<compile_context>
chip_gen: v7x
topology: tpu7x:2x2x1
jax: 0.10.0
libtpu: 0.0.40
codegen_flags: <defaults>
</compile_context>

<pallas_src>
import functools
import math

import jax
import jax.numpy as jnp
from jax.experimental import pallas as pl
from jax.experimental.pallas import tpu as pltpu


# -----------------------------------------------------------------------------
# Chip / tiling helpers
# -----------------------------------------------------------------------------
def _tc_count():
    """TensorCores per chip (2 on v7x, 1 on v5e/v6e); decides whether single
    grid axes should be split so both cores get work."""
    try:
        info = pltpu.get_tpu_info()
        for name in ("num_tensorcores", "tensorcore_count", "num_cores",
                     "cores_per_chip"):
            v = getattr(info, name, None)
            if isinstance(v, int) and 1 <= v <= 8:
                return v
    except Exception:
        pass
    return 1


_NUM_TC = _tc_count()


def _choose_tile(m, target=512):
    """Row tile that divides m exactly (no pad/slice round-trips).  On >=2-TC
    chips aim for >=2 grid steps; single-TC chips get one big block."""
    if _NUM_TC >= 2 and m >= 16:
        target = min(target, max(8, ((m // 2) // 8) * 8))
    if m <= target:
        return m
    t = (min(target, m) // 8) * 8
    while t >= 8:
        if m % t == 0:
            return t
        t -= 8
    return m


def _pack_factor(m, n, cap=128):
    """Pixels packed per matmul row so the output approaches 128 lanes; must
    divide the row count m exactly."""
    p = max(1, cap // max(1, n))
    while p > 1 and m % p:
        p -= 1
    return p


def _blockdiag(w, p):
    """kron(I_p, w): (K,N) -> (p*K, p*N) block-diagonal weight for pixel packing."""
    k, n = w.shape
    if p == 1:
        return w
    eye = jnp.eye(p, dtype=w.dtype)
    return jnp.einsum("ij,kn->ikjn", eye, w).reshape(p * k, p * n)


def _cparams(dims, *block_specs):
    """dimension_semantics + vmem_limit derived from double-buffered block
    footprints; floor raises v5e's 16 MiB default, cap stays under v7x's 64 MiB."""
    need = 0
    for shape, dtype in block_specs:
        n = 1
        for d in shape:
            n *= int(d)
        need += 2 * n * jnp.dtype(dtype).itemsize
    return pltpu.CompilerParams(
        dimension_semantics=dims,
        vmem_limit_bytes=int(min(max(need + (8 << 20), 32 << 20), 60 << 20)))


# -----------------------------------------------------------------------------
# Pallas kernels (refs are 2-D / 3-D after BlockSpec squeezing)
# -----------------------------------------------------------------------------
def _mm_kernel(a_ref, w_ref, b_ref, o_ref, *, act):
    """Pixel-packed matmul (bf16 MXU operands, f32 accumulate) + bias + act."""
    a = a_ref[...]
    if a_ref.dtype != jnp.bfloat16:
        a = a.astype(jnp.bfloat16)
    acc = jnp.dot(a, w_ref[...], preferred_element_type=jnp.float32) + b_ref[...]
    if act == "relu":
        acc = jnp.maximum(acc, 0.0)
    elif act == "sigmoid":
        acc = jax.nn.sigmoid(acc)
    o_ref[...] = acc.astype(o_ref.dtype)


def _mm_ln_kernel(a_ref, w_ref, bgb_ref, seg_ref, o_ref):
    """Pixel-packed matmul + bias + per-pixel (segmented) LayerNorm.
    bgb = [bias; gamma; beta] tiled per pixel; seg = block-diag ones/N matrix so
    x @ seg broadcasts each pixel's channel mean back to its own lanes."""
    a = a_ref[...]
    if a_ref.dtype != jnp.bfloat16:
        a = a.astype(jnp.bfloat16)
    x = jnp.dot(a, w_ref[...], preferred_element_type=jnp.float32) + bgb_ref[0:1, :]
    mu = jnp.dot(x, seg_ref[...], preferred_element_type=jnp.float32)
    xc = x - mu
    var = jnp.dot(xc * xc, seg_ref[...], preferred_element_type=jnp.float32)
    o_ref[...] = (xc * jax.lax.rsqrt(var + 1e-5) * bgb_ref[1:2, :]
                  + bgb_ref[2:3, :]).astype(o_ref.dtype)


def _conv3x3_kernel(x_ref, w_ref, b_ref, o_ref, *rest, H, W, C, act):
    """Direct stride-1 3x3 conv: 9 shifted in-VMEM windows matmul'd against the
    per-tap weights and accumulated in f32 (no im2col).  Optionally also emits
    the global-average-pool of the (unpadded) input as a (1, C) output."""
    acc = None
    for t in range(9):
        dh, dw = divmod(t, 3)
        xt = x_ref[dh:dh + H, dw:dw + W, :].astype(jnp.bfloat16).reshape(H * W, C)
        pt = jnp.dot(xt, w_ref[t], preferred_element_type=jnp.float32)
        acc = pt if acc is None else acc + pt
    acc = acc + b_ref[...]
    if act == "relu":
        acc = jnp.maximum(acc, 0.0)
    o_ref[...] = acc.astype(o_ref.dtype)
    if rest:
        (gap_ref,) = rest
        centre = x_ref[1:1 + H, 1:1 + W, :].astype(jnp.float32).reshape(H * W, C)
        gap_ref[...] = jnp.mean(centre, axis=0, keepdims=True)


def _glam_mlp_kernel(gap_ref, w1_ref, b1_ref, w2_ref, b2_ref, o_ref):
    """(B, C) GAP vector -> fc1 -> relu -> fc2 -> sigmoid channel weights."""
    g = gap_ref[...]
    h = jnp.dot(g.astype(jnp.bfloat16), w1_ref[...],
                preferred_element_type=jnp.float32) + b1_ref[...]
    h = jnp.maximum(h, 0.0)
    s = jnp.dot(h.astype(jnp.bfloat16), w2_ref[...],
                preferred_element_type=jnp.float32) + b2_ref[...]
    o_ref[...] = jax.nn.sigmoid(s)


def _scale_mm_kernel(y_ref, g_ref, w_ref, b_ref, o_ref, *, act):
    """Per-batch channel scale (VPU) folded into the shared 1x1 projection."""
    a = (y_ref[...].astype(jnp.float32) * g_ref[...]).astype(jnp.bfloat16)
    acc = jnp.dot(a, w_ref[...], preferred_element_type=jnp.float32) + b_ref[...]
    if act == "relu":
        acc = jnp.maximum(acc, 0.0)
    o_ref[...] = acc.astype(o_ref.dtype)


def _sba_fuse_kernel(fb_ref, fs_ref, w_ref, b_ref, o_ref):
    """Both SBA sigmoid gate convs merged into one block-anti-diagonal matmul:
    a = [fb | fs], pre = a @ Wq + bq = [pre_gs | pre_gb]; then
    out = fb * sigmoid(pre_gs) + fs * sigmoid(pre_gb)  (lane-aligned halves)."""
    a = jnp.concatenate([fb_ref[...], fs_ref[...]], axis=-1)
    pre = jnp.dot(a.astype(jnp.bfloat16), w_ref[...],
                  preferred_element_type=jnp.float32) + b_ref[...]
    gated = a.astype(jnp.float32) * jax.nn.sigmoid(pre)
    half = gated.shape[-1] // 2
    o_ref[...] = (gated[:, :half] + gated[:, half:]).astype(o_ref.dtype)


# -----------------------------------------------------------------------------
# pallas_call wrappers
# -----------------------------------------------------------------------------
def matmul_bias_act(a, w, bias, act="none", out_dtype=jnp.bfloat16):
    """a:(M,K) @ w:(K,N) + bias (+act), with p = 128/N pixels packed per row."""
    m, k = a.shape
    n = w.shape[1]
    p = _pack_factor(m, n)
    mp, kp, np_ = m // p, p * k, p * n
    a_p = a.reshape(mp, kp)                       # contiguous: free reshape
    wp = _blockdiag(w, p).astype(jnp.bfloat16)
    bp = jnp.tile(bias, p).reshape(1, np_).astype(jnp.float32)
    tile = _choose_tile(mp)
    out = pl.pallas_call(
        functools.partial(_mm_kernel, act=act),
        out_shape=jax.ShapeDtypeStruct((mp, np_), out_dtype),
        grid=(mp // tile,),
        in_specs=[pl.BlockSpec((tile, kp), lambda i: (i, 0)),
                  pl.BlockSpec((kp, np_), lambda i: (0, 0)),
                  pl.BlockSpec((1, np_), lambda i: (0, 0))],
        out_specs=pl.BlockSpec((tile, np_), lambda i: (i, 0)),
        compiler_params=_cparams(("parallel",),
                                 ((tile, kp), a_p.dtype),
                                 ((kp, np_), jnp.bfloat16),
                                 ((1, np_), jnp.float32),
                                 ((tile, np_), out_dtype)),
    )(a_p, wp, bp)
    return out.reshape(m, n)


def matmul_bias_ln(a, w, bias, gamma, beta, out_dtype=jnp.bfloat16):
    """Fused conv-matmul + bias + LayerNorm (encoder patch embeds), packed."""
    m, k = a.shape
    n = w.shape[1]
    p = _pack_factor(m, n)
    mp, kp, np_ = m // p, p * k, p * n
    a_p = a.reshape(mp, kp)
    wp = _blockdiag(w, p).astype(jnp.bfloat16)
    bgb = jnp.stack([jnp.tile(bias, p), jnp.tile(gamma, p),
                     jnp.tile(beta, p)]).astype(jnp.float32)          # (3, pN)
    seg = jnp.kron(jnp.eye(p, dtype=jnp.float32),
                   jnp.ones((n, n), jnp.float32) / n)                 # (pN, pN)
    tile = _choose_tile(mp)
    out = pl.pallas_call(
        _mm_ln_kernel,
        out_shape=jax.ShapeDtypeStruct((mp, np_), out_dtype),
        grid=(mp // tile,),
        in_specs=[pl.BlockSpec((tile, kp), lambda i: (i, 0)),
                  pl.BlockSpec((kp, np_), lambda i: (0, 0)),
                  pl.BlockSpec((3, np_), lambda i: (0, 0)),
                  pl.BlockSpec((np_, np_), lambda i: (0, 0))],
        out_specs=pl.BlockSpec((tile, np_), lambda i: (i, 0)),
        compiler_params=_cparams(("parallel",),
                                 ((tile, kp), a_p.dtype),
                                 ((kp, np_), jnp.bfloat16),
                                 ((3, np_), jnp.float32),
                                 ((np_, np_), jnp.float32),
                                 ((tile, np_), out_dtype)),
    )(a_p, wp, bgb, seg)
    return out.reshape(m, n)


def conv3x3_direct(x, w, bias, act="relu", with_gap=False,
                   out_dtype=jnp.bfloat16):
    """Stride-1 3x3 conv (padding 1) as a direct 9-tap in-VMEM reduction."""
    b, h, wdt, c = x.shape
    n = w.shape[1]
    w9 = w.reshape(9, c, n).astype(jnp.bfloat16)
    bias2 = bias.reshape(1, n).astype(jnp.float32)
    xp = jnp.pad(x, ((0, 0), (1, 1), (1, 1), (0, 0)))   # 1-pixel halo only
    rows = h * wdt
    out_shape = [jax.ShapeDtypeStruct((b, rows, n), out_dtype)]
    out_specs = [pl.BlockSpec((None, rows, n), lambda bi: (bi, 0, 0))]
    if with_gap:
        out_shape.append(jax.ShapeDtypeStruct((b, 1, c), jnp.float32))
        out_specs.append(pl.BlockSpec((None, 1, c), lambda bi: (bi, 0, 0)))
    res = pl.pallas_call(
        functools.partial(_conv3x3_kernel, H=h, W=wdt, C=c, act=act),
        out_shape=out_shape if with_gap else out_shape[0],
        grid=(b,),
        in_specs=[pl.BlockSpec((None, h + 2, wdt + 2, c),
                               lambda bi: (bi, 0, 0, 0)),
                  pl.BlockSpec((9, c, n), lambda bi: (0, 0, 0)),
                  pl.BlockSpec((1, n), lambda bi: (0, 0))],
        out_specs=out_specs if with_gap else out_specs[0],
        compiler_params=_cparams(("parallel",),
                                 (((h + 2) * (wdt + 2), c), xp.dtype),
                                 ((9 * c, n), jnp.bfloat16),
                                 ((1, n), jnp.float32),
                                 ((rows, n), out_dtype),
                                 ((1, c), jnp.float32)),
    )(xp, w9, bias2)
    if with_gap:
        y, gap = res
        return y.reshape(b, h, wdt, n), gap.reshape(b, c)
    return res.reshape(b, h, wdt, n)


def glam_mlp(gap, w1, b1, w2, b2):
    """(B, C) GAP -> sigmoid channel weights (B, inter)."""
    b, c = gap.shape
    inter = w1.shape[1]
    return pl.pallas_call(
        _glam_mlp_kernel,
        out_shape=jax.ShapeDtypeStruct((b, inter), jnp.float32),
        grid=(1,),
        in_specs=[pl.BlockSpec((b, c), lambda i: (0, 0)),
                  pl.BlockSpec((c, inter), lambda i: (0, 0)),
                  pl.BlockSpec((1, inter), lambda i: (0, 0)),
                  pl.BlockSpec((inter, inter), lambda i: (0, 0)),
                  pl.BlockSpec((1, inter), lambda i: (0, 0))],
        out_specs=pl.BlockSpec((b, inter), lambda i: (0, 0)),
        compiler_params=_cparams(("arbitrary",),
                                 ((b, c), jnp.float32),
                                 ((c, inter), jnp.bfloat16),
                                 ((1, inter), jnp.float32),
                                 ((inter, inter), jnp.bfloat16),
                                 ((1, inter), jnp.float32),
                                 ((b, inter), jnp.float32)),
    )(gap, w1.astype(jnp.bfloat16), b1.reshape(1, inter).astype(jnp.float32),
      w2.astype(jnp.bfloat16), b2.reshape(1, inter).astype(jnp.float32))


def glam_channel_proj(y, g, w, bias):
    """(y * g[b]) @ proj + bias, relu.  g stays a per-batch (1,C) operand and the
    shared packed weight is fetched once (constant index map)."""
    b, h, wd, c = y.shape
    n = w.shape[1]
    pk = _pack_factor(h * wd, n)
    rows = (h * wd) // pk
    y_p = y.reshape(b, rows, pk * c)
    g_p = jnp.tile(g, (1, pk)).reshape(b, 1, pk * c).astype(jnp.float32)
    wp = _blockdiag(w, pk).astype(jnp.bfloat16)
    bp = jnp.tile(bias, pk).reshape(1, pk * n).astype(jnp.float32)
    tile = _choose_tile(rows)
    out = pl.pallas_call(
        functools.partial(_scale_mm_kernel, act="relu"),
        out_shape=jax.ShapeDtypeStruct((b, rows, pk * n), jnp.bfloat16),
        grid=(b, rows // tile),
        in_specs=[pl.BlockSpec((None, tile, pk * c), lambda bi, i: (bi, i, 0)),
                  pl.BlockSpec((None, 1, pk * c), lambda bi, i: (bi, 0, 0)),
                  pl.BlockSpec((pk * c, pk * n), lambda bi, i: (0, 0)),
                  pl.BlockSpec((1, pk * n), lambda bi, i: (0, 0))],
        out_specs=pl.BlockSpec((None, tile, pk * n), lambda bi, i: (bi, i, 0)),
        compiler_params=_cparams(("parallel", "parallel"),
                                 ((tile, pk * c), y.dtype),
                                 ((1, pk * c), jnp.float32),
                                 ((pk * c, pk * n), jnp.bfloat16),
                                 ((1, pk * n), jnp.float32),
                                 ((tile, pk * n), jnp.bfloat16)),
    )(y_p, g_p, wp, bp)
    return out.reshape(b, h, wd, n)


def sba_gate_fuse(fb, fs, wb, bb, ws, bs):
    """fb*sigmoid(fs@ws+bs) + fs*sigmoid(fb@wb+bb) in one kernel, 128-lane out."""
    b, h, w, c = fb.shape
    m = b * h * w
    p = _pack_factor(m, c)
    rows, pc = m // p, p * c
    fbp = fb.reshape(rows, pc)
    fsp = fs.reshape(rows, pc)
    kb = _blockdiag(wb, p)
    ks = _blockdiag(ws, p)
    z = jnp.zeros((pc, pc), jnp.float32)
    wq = jnp.block([[z, kb], [ks, z]]).astype(jnp.bfloat16)       # (2pc, 2pc)
    bq = jnp.concatenate([jnp.tile(bs, p), jnp.tile(bb, p)]
                         ).reshape(1, 2 * pc).astype(jnp.float32)
    tile = _choose_tile(rows)
    out = pl.pallas_call(
        _sba_fuse_kernel,
        out_shape=jax.ShapeDtypeStruct((rows, pc), jnp.bfloat16),
        grid=(rows // tile,),
        in_specs=[pl.BlockSpec((tile, pc), lambda i: (i, 0)),
                  pl.BlockSpec((tile, pc), lambda i: (i, 0)),
                  pl.BlockSpec((2 * pc, 2 * pc), lambda i: (0, 0)),
                  pl.BlockSpec((1, 2 * pc), lambda i: (0, 0))],
        out_specs=pl.BlockSpec((tile, pc), lambda i: (i, 0)),
        compiler_params=_cparams(("parallel",),
                                 ((tile, pc), jnp.bfloat16),
                                 ((tile, pc), jnp.bfloat16),
                                 ((2 * pc, 2 * pc), jnp.bfloat16),
                                 ((1, 2 * pc), jnp.float32),
                                 ((tile, pc), jnp.bfloat16)),
    )(fbp, fsp, wq, bq)
    return out.reshape(b, h, w, c)


# -----------------------------------------------------------------------------
# Glue: im2col (strided convs only), conv wrapper, gather-free bilinear upsample
# -----------------------------------------------------------------------------
def _im2col(x, k, stride, pad):
    b, h, w, c = x.shape
    if pad > 0:
        x = jnp.pad(x, ((0, 0), (pad, pad), (pad, pad), (0, 0)))
    ho = (h + 2 * pad - k) // stride + 1
    wo = (w + 2 * pad - k) // stride + 1
    cols = []
    for di in range(k):
        for dj in range(k):
            cols.append(x[:, di:di + stride * ho:stride,
                          dj:dj + stride * wo:stride, :])
    return jnp.concatenate(cols, axis=-1), ho, wo


def conv2d_mm(x, w, bias, k, stride, pad, act="none", ln=None,
              out_dtype=jnp.bfloat16):
    """1x1 / strided conv via (im2col +) pixel-packed fused matmul kernel."""
    b = x.shape[0]
    n = w.shape[1]
    if k == 1 and stride == 1 and pad == 0:
        cols, ho, wo = x, x.shape[1], x.shape[2]
    else:
        # TODO(synk): fold the strided k>1 tap gather into the matmul kernel
        # (per-tap reduction grid axis); stride-1 3x3 convs already bypass im2col.
        cols, ho, wo = _im2col(x, k, stride, pad)
    a = cols.reshape(b * ho * wo, -1)
    if ln is not None:
        out = matmul_bias_ln(a, w, bias, ln[0], ln[1], out_dtype=out_dtype)
    else:
        out = matmul_bias_act(a, w, bias, act=act, out_dtype=out_dtype)
    return out.reshape(b, ho, wo, n)


def _interp_matrix(out_n, in_n):
    """Dense 1-D bilinear (align_corners=False) interpolation matrix."""
    if out_n == in_n:
        return jnp.eye(in_n, dtype=jnp.float32)
    o = jnp.arange(out_n, dtype=jnp.float32)
    src = jnp.clip((o + 0.5) * (in_n / out_n) - 0.5, 0.0, in_n - 1.0)
    lo = jnp.floor(src).astype(jnp.int32)
    hi = jnp.minimum(lo + 1, in_n - 1)
    f = src - lo.astype(jnp.float32)
    return (jax.nn.one_hot(lo, in_n) * (1.0 - f)[:, None]
            + jax.nn.one_hot(hi, in_n) * f[:, None])


def bilinear_upsample(x, out_h, out_w):
    """F.upsample(mode='bilinear', align_corners=False) equivalent (NHWC),
    gather-free: one dense interp matmul per spatial axis.
    TODO(synk): fold into the consuming 1x1-conv kernels via index maps."""
    b, h, w, c = x.shape
    if (out_h, out_w) == (h, w):
        return x
    mh = _interp_matrix(out_h, h)
    mw = _interp_matrix(out_w, w)
    y = jnp.einsum("oi,bihc->bohc", mh, x.astype(jnp.float32))
    y = jnp.einsum("pj,bojc->bopc", mw, y)
    return y.astype(x.dtype)


# -----------------------------------------------------------------------------
# Sub-modules
# -----------------------------------------------------------------------------
def encoder_forward(p, x):
    # TODO(synk): PVT-v2 transformer stages (SR-attention + MLP blocks) omitted --
    # `create_model` source is external; only the overlap patch-embeds with their
    # fused LayerNorm (strides 4/8/16/32) are reproduced.
    f1 = conv2d_mm(x,  p["pe1_w"], p["pe1_b"], 7, 4, 3, ln=(p["ln1_g"], p["ln1_b"]))
    f2 = conv2d_mm(f1, p["pe2_w"], p["pe2_b"], 3, 2, 1, ln=(p["ln2_g"], p["ln2_b"]))
    f3 = conv2d_mm(f2, p["pe3_w"], p["pe3_b"], 3, 2, 1, ln=(p["ln3_g"], p["ln3_b"]))
    f4 = conv2d_mm(f3, p["pe4_w"], p["pe4_b"], 3, 2, 1, ln=(p["ln4_g"], p["ln4_b"]))
    return f1, f2, f3, f4


def glam_forward(p, x):
    # TODO(synk): exact GLAM internals not in the provided snippet; implemented as
    # local 3x3 conv branch + global channel attention (GAP -> MLP -> sigmoid)
    # folded into the 1x1 projection to 32 channels.
    y, gap = conv3x3_direct(x, p["local_w"], p["local_b"], act="relu",
                            with_gap=True)
    g = glam_mlp(gap, p["fc1_w"], p["fc1_b"], p["fc2_w"], p["fc2_b"])
    return glam_channel_proj(y, g, p["proj_w"], p["proj_b"])


def sba_forward(p, fb, fs):
    # TODO(synk): exact SBABlock internals not in the provided snippet; implemented
    # as cross sigmoid-gated fusion of boundary/semantic streams + 3x3 conv.
    fs = bilinear_upsample(fs, fb.shape[1], fb.shape[2])
    fused = sba_gate_fuse(fb, fs, p["gate_b_w"], p["gate_b_b"],
                          p["gate_s_w"], p["gate_s_b"])
    return conv3x3_direct(fused, p["out_w"], p["out_b"], act="relu")


# -----------------------------------------------------------------------------
# DuAT forward
# -----------------------------------------------------------------------------
def duat_forward(params, x_nchw):
    x = jnp.transpose(x_nchw, (0, 2, 3, 1)).astype(jnp.bfloat16)   # NHWC, bf16
    b, h, w, _ = x.shape
    f1, f2, f3, f4 = encoder_forward(params["enc"], x)

    f2_out = glam_forward(params["glam2"], f2)
    f3_out = bilinear_upsample(glam_forward(params["glam3"], f3),
                               f2_out.shape[1], f2_out.shape[2])
    f4_out = bilinear_upsample(glam_forward(params["glam4"], f4),
                               f2_out.shape[1], f2_out.shape[2])

    feature_glam = jnp.concatenate((f2_out, f3_out, f4_out), axis=-1)   # 96 ch
    feature_glam = conv2d_mm(feature_glam, params["glam_conv2_w"],
                             params["glam_conv2_b"], 1, 1, 0, act="relu",
                             out_dtype=jnp.float32)
    feature_glam = bilinear_upsample(feature_glam, h, w)

    feature_b = conv3x3_direct(f1, params["f1_conv_w"], params["f1_conv_b"],
                               act="relu")
    feature_s = jnp.concatenate((f3_out, f4_out), axis=-1)              # 64 ch
    feature_s = conv2d_mm(feature_s, params["glam_conv1_w"],
                          params["glam_conv1_b"], 1, 1, 0, act="relu")
    feature_sba = sba_forward(params["sba"], feature_b, feature_s)
    feature_sba = conv2d_mm(feature_sba, params["sba_conv_w"],
                            params["sba_conv_b"], 1, 1, 0, act="relu",
                            out_dtype=jnp.float32)
    feature_sba = bilinear_upsample(feature_sba, h, w)

    # back to NCHW, matching the PyTorch module outputs
    return (jnp.transpose(feature_glam, (0, 3, 1, 2)),
            jnp.transpose(feature_sba, (0, 3, 1, 2)))


# -----------------------------------------------------------------------------
# Deterministic synthetic parameters
# -----------------------------------------------------------------------------
def init_params(key, in_channels=3, num_classes=1, embed_dims=(16, 32, 64, 128)):
    keys = iter(jax.random.split(key, 64))

    def conv(k, cin, cout):
        w = jax.random.normal(next(keys), (k * k * cin, cout),
                              jnp.float32) / math.sqrt(k * k * cin)
        bias = jax.random.normal(next(keys), (cout,), jnp.float32) * 0.01
        return w, bias

    def ln(c):
        return jnp.ones((c,), jnp.float32), jnp.zeros((c,), jnp.float32)

    e1, e2, e3, e4 = embed_dims
    enc = {}
    enc["pe1_w"], enc["pe1_b"] = conv(7, in_channels, e1)
    enc["ln1_g"], enc["ln1_b"] = ln(e1)
    enc["pe2_w"], enc["pe2_b"] = conv(3, e1, e2)
    enc["ln2_g"], enc["ln2_b"] = ln(e2)
    enc["pe3_w"], enc["pe3_b"] = conv(3, e2, e3)
    enc["ln3_g"], enc["ln3_b"] = ln(e3)
    enc["pe4_w"], enc["pe4_b"] = conv(3, e3, e4)
    enc["ln4_g"], enc["ln4_b"] = ln(e4)

    def glam(cin, cout=32):
        inter = cin // 2
        g = {}
        g["local_w"], g["local_b"] = conv(3, cin, inter)
        g["fc1_w"], g["fc1_b"] = conv(1, cin, inter)
        g["fc2_w"], g["fc2_b"] = conv(1, inter, inter)
        g["proj_w"], g["proj_b"] = conv(1, inter, cout)
        return g

    params = {"enc": enc,
              "glam2": glam(e2), "glam3": glam(e3), "glam4": glam(e4)}
    params["f1_conv_w"], params["f1_conv_b"] = conv(3, e1, 32)
    params["glam_conv1_w"], params["glam_conv1_b"] = conv(1, 64, 32)
    params["glam_conv2_w"], params["glam_conv2_b"] = conv(1, 96, num_classes)
    params["sba_conv_w"], params["sba_conv_b"] = conv(1, 32, num_classes)

    sba = {}
    sba["gate_b_w"], sba["gate_b_b"] = conv(1, 32, 32)
    sba["gate_s_w"], sba["gate_s_b"] = conv(1, 32, 32)
    sba["out_w"], sba["out_b"] = conv(3, 32, 32)
    params["sba"] = sba
    return params


# -----------------------------------------------------------------------------
if __name__ == "__main__":
    B, C, H, W = 2, 3, 32, 32  # four stride-{4,2,2,2} stages need spatial >= 32
    kx, kp = jax.random.split(jax.random.PRNGKey(0))
    x = jax.random.normal(kx, (B, C, H, W), jnp.float32)
    params = init_params(kp, in_channels=C, num_classes=1)

    fwd = jax.jit(duat_forward)
    feature_glam, feature_sba = fwd(params, x)
    jax.block_until_ready((feature_glam, feature_sba))

    assert feature_glam.shape == (B, 1, H, W), feature_glam.shape
    assert feature_sba.shape == (B, 1, H, W), feature_sba.shape
    assert bool(jnp.all(jnp.isfinite(feature_glam)))
    assert bool(jnp.all(jnp.isfinite(feature_sba)))
    print("KERNEL_OK")
</pallas_src>

<mosaic_0001>
module attributes {stable_mosaic.version = 11 : i64} {
  func.func @_mm_ln_kernel(%arg0: i32, %arg1: memref<16x1176xbf16, #tpu.memory_space<vmem>>, %arg2: memref<1176x128xbf16, #tpu.memory_space<vmem>>, %arg3: memref<3x128xf32, #tpu.memory_space<vmem>>, %arg4: memref<128x128xf32, #tpu.memory_space<vmem>>, %arg5: memref<16x128xbf16, #tpu.memory_space<vmem>>) attributes {dimension_semantics = [#tpu.dimension_semantics<parallel>], iteration_bounds = array<i64: 1>, scalar_prefetch = 0 : i64, scratch_operands = 0 : i64, tpu.core_type = #tpu.core_type<tc>, window_params = [{transform_indices = @transform_0, window_bounds = array<i64: 16, 1176>}, {pipeline_mode = #tpu.pipeline_mode<synchronous>, transform_indices = @transform_1, window_bounds = array<i64: 1176, 128>}, {pipeline_mode = #tpu.pipeline_mode<synchronous>, transform_indices = @transform_2, window_bounds = array<i64: 3, 128>}, {pipeline_mode = #tpu.pipeline_mode<synchronous>, transform_indices = @transform_3, window_bounds = array<i64: 128, 128>}, {transform_indices = @transform_4, window_bounds = array<i64: 16, 128>}]} {
    %c0 = arith.constant 0 : index
    %c0_0 = arith.constant 0 : index
    %0 = vector.load %arg1[%c0, %c0_0] : memref<16x1176xbf16, #tpu.memory_space<vmem>>, vector<16x1176xbf16>
    %c0_1 = arith.constant 0 : index
    %c0_2 = arith.constant 0 : index
    %1 = vector.load %arg2[%c0_1, %c0_2] : memref<1176x128xbf16, #tpu.memory_space<vmem>>, vector<1176x128xbf16>
    %cst = arith.constant dense<0.000000e+00> : vector<16x128xf32>
    %2 = tpu.matmul %0, %1, %cst {dimension_numbers = #tpu.dot_dimension_numbers<[1], [0], [0], [1], [0, 0, 1, 1], [], []>} : vector<16x1176xbf16>, vector<1176x128xbf16>, vector<16x128xf32> -> vector<16x128xf32>
    %c0_3 = arith.constant 0 : index
    %c0_4 = arith.constant 0 : index
    %3 = vector.load %arg3[%c0_3, %c0_4] : memref<3x128xf32, #tpu.memory_space<vmem>>, vector<1x128xf32>
    %4 = vector.broadcast %3 : vector<1x128xf32> to vector<16x128xf32>
    %5 = arith.addf %2, %4 : vector<16x128xf32>
    %c0_5 = arith.constant 0 : index
    %c0_6 = arith.constant 0 : index
    %6 = vector.load %arg4[%c0_5, %c0_6] : memref<128x128xf32, #tpu.memory_space<vmem>>, vector<128x128xf32>
    %cst_7 = arith.constant dense<0.000000e+00> : vector<16x128xf32>
    %7 = tpu.matmul %5, %6, %cst_7 {dimension_numbers = #tpu.dot_dimension_numbers<[1], [0], [0], [1], [0, 0, 1, 1], [], []>} : vector<16x128xf32>, vector<128x128xf32>, vector<16x128xf32> -> vector<16x128xf32>
    %8 = arith.subf %5, %7 : vector<16x128xf32>
    %9 = arith.mulf %8, %8 : vector<16x128xf32>
    %c0_8 = arith.constant 0 : index
    %c0_9 = arith.constant 0 : index
    %10 = vector.load %arg4[%c0_8, %c0_9] : memref<128x128xf32, #tpu.memory_space<vmem>>, vector<128x128xf32>
    %cst_10 = arith.constant dense<0.000000e+00> : vector<16x128xf32>
    %11 = tpu.matmul %9, %10, %cst_10 {dimension_numbers = #tpu.dot_dimension_numbers<[1], [0], [0], [1], [0, 0, 1, 1], [], []>} : vector<16x128xf32>, vector<128x128xf32>, vector<16x128xf32> -> vector<16x128xf32>
    %cst_11 = arith.constant 9.99999974E-6 : f32
    %12 = vector.broadcast %cst_11 : f32 to vector<16x128xf32>
    %13 = arith.addf %11, %12 : vector<16x128xf32>
    %14 = math.rsqrt %13 : vector<16x128xf32>
    %15 = arith.mulf %8, %14 : vector<16x128xf32>
    %c1 = arith.constant 1 : index
    %c0_12 = arith.constant 0 : index
    %16 = vector.load %arg3[%c1, %c0_12] : memref<3x128xf32, #tpu.memory_space<vmem>>, vector<1x128xf32>
    %17 = vector.broadcast %16 : vector<1x128xf32> to vector<16x128xf32>
    %18 = arith.mulf %15, %17 : vector<16x128xf32>
    %c2 = arith.constant 2 : index
    %c0_13 = arith.constant 0 : index
    %19 = vector.load %arg3[%c2, %c0_13] : memref<3x128xf32, #tpu.memory_space<vmem>>, vector<1x128xf32>
    %20 = vector.broadcast %19 : vector<1x128xf32> to vector<16x128xf32>
    %21 = arith.addf %18, %20 : vector<16x128xf32>
    %22 = arith.truncf %21 : vector<16x128xf32> to vector<16x128xbf16>
    %c0_14 = arith.constant 0 : index
    %c0_15 = arith.constant 0 : index
    %23 = vector.load %arg5[%c0_14, %c0_15] : memref<16x128xbf16, #tpu.memory_space<vmem>>, vector<16x128xbf16>
    tpu.vector_store %arg5[%c0_14, %c0_15], %22 {strides = array<i32>} : memref<16x128xbf16, #tpu.memory_space<vmem>>, vector<16x128xbf16>,
    return
  }
  func.func @transform_0(%arg0: i32) -> (i32, i32) {
    %c0_i32 = arith.constant 0 : i32
    %c0_i32_0 = arith.constant 0 : i32
    return %arg0, %c0_i32 : i32, i32
  }
  func.func @transform_1(%arg0: i32) -> (i32, i32) {
    %c0_i32 = arith.constant 0 : i32
    %c0_i32_0 = arith.constant 0 : i32
    %c0_i32_1 = arith.constant 0 : i32
    return %c0_i32, %c0_i32_0 : i32, i32
  }
  func.func @transform_2(%arg0: i32) -> (i32, i32) {
    %c0_i32 = arith.constant 0 : i32
    %c0_i32_0 = arith.constant 0 : i32
    %c0_i32_1 = arith.constant 0 : i32
    return %c0_i32, %c0_i32_0 : i32, i32
  }
  func.func @transform_3(%arg0: i32) -> (i32, i32) {
    %c0_i32 = arith.constant 0 : i32
    %c0_i32_0 = arith.constant 0 : i32
    %c0_i32_1 = arith.constant 0 : i32
    return %c0_i32, %c0_i32_0 : i32, i32
  }
  func.func @transform_4(%arg0: i32) -> (i32, i32) {
    %c0_i32 = arith.constant 0 : i32
    %c0_i32_0 = arith.constant 0 : i32
    return %arg0, %c0_i32 : i32, i32
  }
}

module attributes {stable_mosaic.version = 11 : i64} {
  func.func @_mm_ln_kernel(%arg0: i32, %arg1: memref<8x576xbf16, #tpu.memory_space<vmem>>, %arg2: memref<576x128xbf16, #tpu.memory_space<vmem>>, %arg3: memref<3x128xf32, #tpu.memory_space<vmem>>, %arg4: memref<128x128xf32, #tpu.memory_space<vmem>>, %arg5: memref<8x128xbf16, #tpu.memory_space<vmem>>) attributes {dimension_semantics = [#tpu.dimension_semantics<parallel>], iteration_bounds = array<i64: 1>, scalar_prefetch = 0 : i64, scratch_operands = 0 : i64, tpu.core_type = #tpu.core_type<tc>, window_params = [{transform_indices = @transform_0, window_bounds = array<i64: 8, 576>}, {pipeline_mode = #tpu.pipeline_mode<synchronous>, transform_indices = @transform_1, window_bounds = array<i64: 576, 128>}, {pipeline_mode = #tpu.pipeline_mode<synchronous>, transform_indices = @transform_2, window_bounds = array<i64: 3, 128>}, {pipeline_mode = #tpu.pipeline_mode<synchronous>, transform_indices = @transform_3, window_bounds = array<i64: 128, 128>}, {transform_indices = @transform_4, window_bounds = array<i64: 8, 128>}]} {
    %c0 = arith.constant 0 : index
    %c0_0 = arith.constant 0 : index
    %0 = vector.load %arg1[%c0, %c0_0] : memref<8x576xbf16, #tpu.memory_space<vmem>>, vector<8x576xbf16>
    %c0_1 = arith.constant 0 : index
    %c0_2 = arith.constant 0 : index
    %1 = vector.load %arg2[%c0_1, %c0_2] : memref<576x128xbf16, #tpu.memory_space<vmem>>, vector<576x128xbf16>
    %cst = arith.constant dense<0.000000e+00> : vector<8x128xf32>
    %2 = tpu.matmul %0, %1, %cst {dimension_numbers = #tpu.dot_dimension_numbers<[1], [0], [0], [1], [0, 0, 1, 1], [], []>} : vector<8x576xbf16>, vector<576x128xbf16>, vector<8x128xf32> -> vector<8x128xf32>
    %c0_3 = arith.constant 0 : index
    %c0_4 = arith.constant 0 : index
    %3 = vector.load %arg3[%c0_3, %c0_4] : memref<3x128xf32, #tpu.memory_space<vmem>>, vector<1x128xf32>
    %4 = vector.broadcast %3 : vector<1x128xf32> to vector<8x128xf32>
    %5 = arith.addf %2, %4 : vector<8x128xf32>
    %c0_5 = arith.constant 0 : index
    %c0_6 = arith.constant 0 : index
    %6 = vector.load %arg4[%c0_5, %c0_6] : memref<128x128xf32, #tpu.memory_space<vmem>>, vector<128x128xf32>
    %cst_7 = arith.constant dense<0.000000e+00> : vector<8x128xf32>
    %7 = tpu.matmul %5, %6, %cst_7 {dimension_numbers = #tpu.dot_dimension_numbers<[1], [0], [0], [1], [0, 0, 1, 1], [], []>} : vector<8x128xf32>, vector<128x128xf32>, vector<8x128xf32> -> vector<8x128xf32>
    %8 = arith.subf %5, %7 : vector<8x128xf32>
    %9 = arith.mulf %8, %8 : vector<8x128xf32>
    %c0_8 = arith.constant 0 : index
    %c0_9 = arith.constant 0 : index
    %10 = vector.load %arg4[%c0_8, %c0_9] : memref<128x128xf32, #tpu.memory_space<vmem>>, vector<128x128xf32>
    %cst_10 = arith.constant dense<0.000000e+00> : vector<8x128xf32>
    %11 = tpu.matmul %9, %10, %cst_10 {dimension_numbers = #tpu.dot_dimension_numbers<[1], [0], [0], [1], [0, 0, 1, 1], [], []>} : vector<8x128xf32>, vector<128x128xf32>, vector<8x128xf32> -> vector<8x128xf32>
    %cst_11 = arith.constant 9.99999974E-6 : f32
    %12 = vector.broadcast %cst_11 : f32 to vector<8x128xf32>
    %13 = arith.addf %11, %12 : vector<8x128xf32>
    %14 = math.rsqrt %13 : vector<8x128xf32>
    %15 = arith.mulf %8, %14 : vector<8x128xf32>
    %c1 = arith.constant 1 : index
    %c0_12 = arith.constant 0 : index
    %16 = vector.load %arg3[%c1, %c0_12] : memref<3x128xf32, #tpu.memory_space<vmem>>, vector<1x128xf32>
    %17 = vector.broadcast %16 : vector<1x128xf32> to vector<8x128xf32>
    %18 = arith.mulf %15, %17 : vector<8x128xf32>
    %c2 = arith.constant 2 : index
    %c0_13 = arith.constant 0 : index
    %19 = vector.load %arg3[%c2, %c0_13] : memref<3x128xf32, #tpu.memory_space<vmem>>, vector<1x128xf32>
    %20 = vector.broadcast %19 : vector<1x128xf32> to vector<8x128xf32>
    %21 = arith.addf %18, %20 : vector<8x128xf32>
    %22 = arith.truncf %21 : vector<8x128xf32> to vector<8x128xbf16>
    %c0_14 = arith.constant 0 : index
    %c0_15 = arith.constant 0 : index
    %23 = vector.load %arg5[%c0_14, %c0_15] : memref<8x128xbf16, #tpu.memory_space<vmem>>, vector<8x128xbf16>
    tpu.vector_store %arg5[%c0_14, %c0_15], %22 {strides = array<i32>} : memref<8x128xbf16, #tpu.memory_space<vmem>>, vector<8x128xbf16>,
    return
  }
  func.func @transform_0(%arg0: i32) -> (i32, i32) {
    %c0_i32 = arith.constant 0 : i32
    %c0_i32_0 = arith.constant 0 : i32
    return %arg0, %c0_i32 : i32, i32
  }
  func.func @transform_1(%arg0: i32) -> (i32, i32) {
    %c0_i32 = arith.constant 0 : i32
    %c0_i32_0 = arith.constant 0 : i32
    %c0_i32_1 = arith.constant 0 : i32
    return %c0_i32, %c0_i32_0 : i32, i32
  }
  func.func @transform_2(%arg0: i32) -> (i32, i32) {
    %c0_i32 = arith.constant 0 : i32
    %c0_i32_0 = arith.constant 0 : i32
    %c0_i32_1 = arith.constant 0 : i32
    return %c0_i32, %c0_i32_0 : i32, i32
  }
  func.func @transform_3(%arg0: i32) -> (i32, i32) {
    %c0_i32 = arith.constant 0 : i32
    %c0_i32_0 = arith.constant 0 : i32
    %c0_i32_1 = arith.constant 0 : i32
    return %c0_i32, %c0_i32_0 : i32, i32
  }
  func.func @transform_4(%arg0: i32) -> (i32, i32) {
    %c0_i32 = arith.constant 0 : i32
    %c0_i32_0 = arith.constant 0 : i32
    return %arg0, %c0_i32 : i32, i32
  }
}

module attributes {stable_mosaic.version = 11 : i64} {
  func.func @_mm_ln_kernel(%arg0: i32, %arg1: memref<4x576xbf16, #tpu.memory_space<vmem>>, %arg2: memref<576x128xbf16, #tpu.memory_space<vmem>>, %arg3: memref<3x128xf32, #tpu.memory_space<vmem>>, %arg4: memref<128x128xf32, #tpu.memory_space<vmem>>, %arg5: memref<4x128xbf16, #tpu.memory_space<vmem>>) attributes {dimension_semantics = [#tpu.dimension_semantics<parallel>], iteration_bounds = array<i64: 1>, scalar_prefetch = 0 : i64, scratch_operands = 0 : i64, tpu.core_type = #tpu.core_type<tc>, window_params = [{transform_indices = @transform_0, window_bounds = array<i64: 4, 576>}, {pipeline_mode = #tpu.pipeline_mode<synchronous>, transform_indices = @transform_1, window_bounds = array<i64: 576, 128>}, {pipeline_mode = #tpu.pipeline_mode<synchronous>, transform_indices = @transform_2, window_bounds = array<i64: 3, 128>}, {pipeline_mode = #tpu.pipeline_mode<synchronous>, transform_indices = @transform_3, window_bounds = array<i64: 128, 128>}, {transform_indices = @transform_4, window_bounds = array<i64: 4, 128>}]} {
    %c0 = arith.constant 0 : index
    %c0_0 = arith.constant 0 : index
    %0 = vector.load %arg1[%c0, %c0_0] : memref<4x576xbf16, #tpu.memory_space<vmem>>, vector<4x576xbf16>
    %c0_1 = arith.constant 0 : index
    %c0_2 = arith.constant 0 : index
    %1 = vector.load %arg2[%c0_1, %c0_2] : memref<576x128xbf16, #tpu.memory_space<vmem>>, vector<576x128xbf16>
    %cst = arith.constant dense<0.000000e+00> : vector<4x128xf32>
    %2 = tpu.matmul %0, %1, %cst {dimension_numbers = #tpu.dot_dimension_numbers<[1], [0], [0], [1], [0, 0, 1, 1], [], []>} : vector<4x576xbf16>, vector<576x128xbf16>, vector<4x128xf32> -> vector<4x128xf32>
    %c0_3 = arith.constant 0 : index
    %c0_4 = arith.constant 0 : index
    %3 = vector.load %arg3[%c0_3, %c0_4] : memref<3x128xf32, #tpu.memory_space<vmem>>, vector<1x128xf32>
    %4 = vector.broadcast %3 : vector<1x128xf32> to vector<4x128xf32>
    %5 = arith.addf %2, %4 : vector<4x128xf32>
    %c0_5 = arith.constant 0 : index
    %c0_6 = arith.constant 0 : index
    %6 = vector.load %arg4[%c0_5, %c0_6] : memref<128x128xf32, #tpu.memory_space<vmem>>, vector<128x128xf32>
    %cst_7 = arith.constant dense<0.000000e+00> : vector<4x128xf32>
    %7 = tpu.matmul %5, %6, %cst_7 {dimension_numbers = #tpu.dot_dimension_numbers<[1], [0], [0], [1], [0, 0, 1, 1], [], []>} : vector<4x128xf32>, vector<128x128xf32>, vector<4x128xf32> -> vector<4x128xf32>
    %8 = arith.subf %5, %7 : vector<4x128xf32>
    %9 = arith.mulf %8, %8 : vector<4x128xf32>
    %c0_8 = arith.constant 0 : index
    %c0_9 = arith.constant 0 : index
    %10 = vector.load %arg4[%c0_8, %c0_9] : memref<128x128xf32, #tpu.memory_space<vmem>>, vector<128x128xf32>
    %cst_10 = arith.constant dense<0.000000e+00> : vector<4x128xf32>
    %11 = tpu.matmul %9, %10, %cst_10 {dimension_numbers = #tpu.dot_dimension_numbers<[1], [0], [0], [1], [0, 0, 1, 1], [], []>} : vector<4x128xf32>, vector<128x128xf32>, vector<4x128xf32> -> vector<4x128xf32>
    %cst_11 = arith.constant 9.99999974E-6 : f32
    %12 = vector.broadcast %cst_11 : f32 to vector<4x128xf32>
    %13 = arith.addf %11, %12 : vector<4x128xf32>
    %14 = math.rsqrt %13 : vector<4x128xf32>
    %15 = arith.mulf %8, %14 : vector<4x128xf32>
    %c1 = arith.constant 1 : index
    %c0_12 = arith.constant 0 : index
    %16 = vector.load %arg3[%c1, %c0_12] : memref<3x128xf32, #tpu.memory_space<vmem>>, vector<1x128xf32>
    %17 = vector.broadcast %16 : vector<1x128xf32> to vector<4x128xf32>
    %18 = arith.mulf %15, %17 : vector<4x128xf32>
    %c2 = arith.constant 2 : index
    %c0_13 = arith.constant 0 : index
    %19 = vector.load %arg3[%c2, %c0_13] : memref<3x128xf32, #tpu.memory_space<vmem>>, vector<1x128xf32>
    %20 = vector.broadcast %19 : vector<1x128xf32> to vector<4x128xf32>
    %21 = arith.addf %18, %20 : vector<4x128xf32>
    %22 = arith.truncf %21 : vector<4x128xf32> to vector<4x128xbf16>
    %c0_14 = arith.constant 0 : index
    %c0_15 = arith.constant 0 : index
    %23 = vector.load %arg5[%c0_14, %c0_15] : memref<4x128xbf16, #tpu.memory_space<vmem>>, vector<4x128xbf16>
    tpu.vector_store %arg5[%c0_14, %c0_15], %22 {strides = array<i32>} : memref<4x128xbf16, #tpu.memory_space<vmem>>, vector<4x128xbf16>,
    return
  }
  func.func @transform_0(%arg0: i32) -> (i32, i32) {
    %c0_i32 = arith.constant 0 : i32
    %c0_i32_0 = arith.constant 0 : i32
    return %arg0, %c0_i32 : i32, i32
  }
  func.func @transform_1(%arg0: i32) -> (i32, i32) {
    %c0_i32 = arith.constant 0 : i32
    %c0_i32_0 = arith.constant 0 : i32
    %c0_i32_1 = arith.constant 0 : i32
    return %c0_i32, %c0_i32_0 : i32, i32
  }
  func.func @transform_2(%arg0: i32) -> (i32, i32) {
    %c0_i32 = arith.constant 0 : i32
    %c0_i32_0 = arith.constant 0 : i32
    %c0_i32_1 = arith.constant 0 : i32
    return %c0_i32, %c0_i32_0 : i32, i32
  }
  func.func @transform_3(%arg0: i32) -> (i32, i32) {
    %c0_i32 = arith.constant 0 : i32
    %c0_i32_0 = arith.constant 0 : i32
    %c0_i32_1 = arith.constant 0 : i32
    return %c0_i32, %c0_i32_0 : i32, i32
  }
  func.func @transform_4(%arg0: i32) -> (i32, i32) {
    %c0_i32 = arith.constant 0 : i32
    %c0_i32_0 = arith.constant 0 : i32
    return %arg0, %c0_i32 : i32, i32
  }
}

module attributes {stable_mosaic.version = 11 : i64} {
  func.func @_conv3x3_kernel(%arg0: i32, %arg1: memref<1x4x4x64xbf16, #tpu.memory_space<vmem>>, %arg2: memref<9x64x32xbf16, #tpu.memory_space<vmem>>, %arg3: memref<1x32xf32, #tpu.memory_space<vmem>>, %arg4: memref<1x4x32xbf16, #tpu.memory_space<vmem>>, %arg5: memref<1x1x64xf32, #tpu.memory_space<vmem>>) attributes {dimension_semantics = [#tpu.dimension_semantics<parallel>], iteration_bounds = array<i64: 2>, scalar_prefetch = 0 : i64, scratch_operands = 0 : i64, tpu.core_type = #tpu.core_type<tc>, window_params = [{transform_indices = @transform_0, window_bounds = array<i64: 1, 4, 4, 64>}, {pipeline_mode = #tpu.pipeline_mode<synchronous>, transform_indices = @transform_1, window_bounds = array<i64: 9, 64, 32>}, {pipeline_mode = #tpu.pipeline_mode<synchronous>, transform_indices = @transform_2, window_bounds = array<i64: 1, 32>}, {transform_indices = @transform_3, window_bounds = array<i64: 1, 4, 32>}, {transform_indices = @transform_4, window_bounds = array<i64: 1, 1, 64>}]} {
    %c0 = arith.constant 0 : index
    %c0_0 = arith.constant 0 : index
    %c0_1 = arith.constant 0 : index
    %c0_2 = arith.constant 0 : index
    %0 = vector.load %arg1[%c0, %c0_0, %c0_1, %c0_2] : memref<1x4x4x64xbf16, #tpu.memory_space<vmem>>, vector<1x2x2x64xbf16>
    %1 = vector.shape_cast %0 : vector<1x2x2x64xbf16> to vector<2x2x64xbf16>
    %2 = vector.shape_cast %1 : vector<2x2x64xbf16> to vector<4x64xbf16>
    %c0_3 = arith.constant 0 : index
    %c0_4 = arith.constant 0 : index
    %c0_5 = arith.constant 0 : index
    %3 = vector.load %arg2[%c0_3, %c0_4, %c0_5] : memref<9x64x32xbf16, #tpu.memory_space<vmem>>, vector<1x64x32xbf16>
    %4 = vector.shape_cast %3 : vector<1x64x32xbf16> to vector<64x32xbf16>
    %cst = arith.constant dense<0.000000e+00> : vector<4x32xf32>
    %5 = tpu.matmul %2, %4, %cst {dimension_numbers = #tpu.dot_dimension_numbers<[1], [0], [0], [1], [0, 0, 1, 1], [], []>} : vector<4x64xbf16>, vector<64x32xbf16>, vector<4x32xf32> -> vector<4x32xf32>
    %c0_6 = arith.constant 0 : index
    %c0_7 = arith.constant 0 : index
    %c1 = arith.constant 1 : index
    %c0_8 = arith.constant 0 : index
    %6 = vector.load %arg1[%c0_6, %c0_7, %c1, %c0_8] : memref<1x4x4x64xbf16, #tpu.memory_space<vmem>>, vector<1x2x2x64xbf16>
    %7 = vector.shape_cast %6 : vector<1x2x2x64xbf16> to vector<2x2x64xbf16>
    %8 = vector.shape_cast %7 : vector<2x2x64xbf16> to vector<4x64xbf16>
    %c1_9 = arith.constant 1 : index
    %c0_10 = arith.constant 0 : index
    %c0_11 = arith.constant 0 : index
    %9 = vector.load %arg2[%c1_9, %c0_10, %c0_11] : memref<9x64x32xbf16, #tpu.memory_space<vmem>>, vector<1x64x32xbf16>
    %10 = vector.shape_cast %9 : vector<1x64x32xbf16> to vector<64x32xbf16>
    %cst_12 = arith.constant dense<0.000000e+00> : vector<4x32xf32>
    %11 = tpu.matmul %8, %10, %cst_12 {dimension_numbers = #tpu.dot_dimension_numbers<[1], [0], [0], [1], [0, 0, 1, 1], [], []>} : vector<4x64xbf16>, vector<64x32xbf16>, vector<4x32xf32> -> vector<4x32xf32>
    %12 = arith.addf %5, %11 : vector<4x32xf32>
    %c0_13 = arith.constant 0 : index
    %c0_14 = arith.constant 0 : index
    %c2 = arith.constant 2 : index
    %c0_15 = arith.constant 0 : index
    %13 = vector.load %arg1[%c0_13, %c0_14, %c2, %c0_15] : memref<1x4x4x64xbf16, #tpu.memory_space<vmem>>, vector<1x2x2x64xbf16>
    %14 = vector.shape_cast %13 : vector<1x2x2x64xbf16> to vector<2x2x64xbf16>
    %15 = vector.shape_cast %14 : vector<2x2x64xbf16> to vector<4x64xbf16>
    %c2_16 = arith.constant 2 : index
    %c0_17 = arith.constant 0 : index
    %c0_18 = arith.constant 0 : index
    %16 = vector.load %arg2[%c2_16, %c0_17, %c0_18] : memref<9x64x32xbf16, #tpu.memory_space<vmem>>, vector<1x64x32xbf16>
    %17 = vector.shape_cast %16 : vector<1x64x32xbf16> to vector<64x32xbf16>
    %cst_19 = arith.constant dense<0.000000e+00> : vector<4x32xf32>
    %18 = tpu.matmul %15, %17, %cst_19 {dimension_numbers = #tpu.dot_dimension_numbers<[1], [0], [0], [1], [0, 0, 1, 1], [], []>} : vector<4x64xbf16>, vector<64x32xbf16>, vector<4x32xf32> -> vector<4x32xf32>
    %19 = arith.addf %12, %18 : vector<4x32xf32>
    %c0_20 = arith.constant 0 : index
    %c1_21 = arith.constant 1 : index
    %c0_22 = arith.constant 0 : index
    %c0_23 = arith.constant 0 : index
    %20 = vector.load %arg1[%c0_20, %c1_21, %c0_22, %c0_23] : memref<1x4x4x64xbf16, #tpu.memory_space<vmem>>, vector<1x2x2x64xbf16>
    %21 = vector.shape_cast %20 : vector<1x2x2x64xbf16> to vector<2x2x64xbf16>
    %22 = vector.shape_cast %21 : vector<2x2x64xbf16> to vector<4x64xbf16>
    %c3 = arith.constant 3 : index
    %c0_24 = arith.constant 0 : index
    %c0_25 = arith.constant 0 : index
    %23 = vector.load %arg2[%c3, %c0_24, %c0_25] : memref<9x64x32xbf16, #tpu.memory_space<vmem>>, vector<1x64x32xbf16>
    %24 = vector.shape_cast %23 : vector<1x64x32xbf16> to vector<64x32xbf16>
    %cst_26 = arith.constant dense<0.000000e+00> : vector<4x32xf32>
    %25 = tpu.matmul %22, %24, %cst_26 {dimension_numbers = #tpu.dot_dimension_numbers<[1], [0], [0], [1], [0, 0, 1, 1], [], []>} : vector<4x64xbf16>, vector<64x32xbf16>, vector<4x32xf32> -> vector<4x32xf32>
    %26 = arith.addf %19, %25 : vector<4x32xf32>
    %c0_27 = arith.constant 0 : index
    %c1_28 = arith.constant 1 : index
    %c1_29 = arith.constant 1 : index
    %c0_30 = arith.constant 0 : index
    %27 = vector.load %arg1[%c0_27, %c1_28, %c1_29, %c0_30] : memref<1x4x4x64xbf16, #tpu.memory_space<vmem>>, vector<1x2x2x64xbf16>
    %28 = vector.shape_cast %27 : vector<1x2x2x64xbf16> to vector<2x2x64xbf16>
    %29 = vector.shape_cast %28 : vector<2x2x64xbf16> to vector<4x64xbf16>
    %c4 = arith.constant 4 : index
    %c0_31 = arith.constant 0 : index
    %c0_32 = arith.constant 0 : index
    %30 = vector.load %arg2[%c4, %c0_31, %c0_32] : memref<9x64x32xbf16, #tpu.memory_space<vmem>>, vector<1x64x32xbf16>
    %31 = vector.shape_cast %30 : vector<1x64x32xbf16> to vector<64x32xbf16>
    %cst_33 = arith.constant dense<0.000000e+00> : vector<4x32xf32>
    %32 = tpu.matmul %29, %31, %cst_33 {dimension_numbers = #tpu.dot_dimension_numbers<[1], [0], [0], [1], [0, 0, 1, 1], [], []>} : vector<4x64xbf16>, vector<64x32xbf16>, vector<4x32xf32> -> vector<4x32xf32>
    %33 = arith.addf %26, %32 : vector<4x32xf32>
    %c0_34 = arith.constant 0 : index
    %c1_35 = arith.constant 1 : index
    %c2_36 = arith.constant 2 : index
    %c0_37 = arith.constant 0 : index
    %34 = vector.load %arg1[%c0_34, %c1_35, %c2_36, %c0_37] : memref<1x4x4x64xbf16, #tpu.memory_space<vmem>>, vector<1x2x2x64xbf16>
    %35 = vector.shape_cast %34 : vector<1x2x2x64xbf16> to vector<2x2x64xbf16>
    %36 = vector.shape_cast %35 : vector<2x2x64xbf16> to vector<4x64xbf16>
    %c5 = arith.constant 5 : index
    %c0_38 = arith.constant 0 : index
    %c0_39 = arith.constant 0 : index
    %37 = vector.load %arg2[%c5, %c0_38, %c0_39] : memref<9x64x32xbf16, #tpu.memory_space<vmem>>, vector<1x64x32xbf16>
    %38 = vector.shape_cast %37 : vector<1x64x32xbf16> to vector<64x32xbf16>
    %cst_40 = arith.constant dense<0.000000e+00> : vector<4x32xf32>
    %39 = tpu.matmul %36, %38, %cst_40 {dimension_numbers = #tpu.dot_dimension_numbers<[1], [0], [0], [1], [0, 0, 1, 1], [], []>} : vector<4x64xbf16>, vector<64x32xbf16>, vector<4x32xf32> -> vector<4x32xf32>
    %40 = arith.addf %33, %39 : vector<4x32xf32>
    %c0_41 = arith.constant 0 : index
    %c2_42 = arith.constant 2 : index
    %c0_43 = arith.constant 0 : index
    %c0_44 = arith.constant 0 : index
    %41 = vector.load %arg1[%c0_41, %c2_42, %c0_43, %c0_44] : memref<1x4x4x64xbf16, #tpu.memory_space<vmem>>, vector<1x2x2x64xbf16>
    %42 = vector.shape_cast %41 : vector<1x2x2x64xbf16> to vector<2x2x64xbf16>
    %43 = vector.shape_cast %42 : vector<2x2x64xbf16> to vector<4x64xbf16>
    %c6 = arith.constant 6 : index
    %c0_45 = arith.constant 0 : index
    %c0_46 = arith.constant 0 : index
    %44 = vector.load %arg2[%c6, %c0_45, %c0_46] : memref<9x64x32xbf16, #tpu.memory_space<vmem>>, vector<1x64x32xbf16>
    %45 = vector.shape_cast %44 : vector<1x64x32xbf16> to vector<64x32xbf16>
    %cst_47 = arith.constant dense<0.000000e+00> : vector<4x32xf32>
    %46 = tpu.matmul %43, %45, %cst_47 {dimension_numbers = #tpu.dot_dimension_numbers<[1], [0], [0], [1], [0, 0, 1, 1], [], []>} : vector<4x64xbf16>, vector<64x32xbf16>, vector<4x32xf32> -> vector<4x32xf32>
    %47 = arith.addf %40, %46 : vector<4x32xf32>
    %c0_48 = arith.constant 0 : index
    %c2_49 = arith.constant 2 : index
    %c1_50 = arith.constant 1 : index
    %c0_51 = arith.constant 0 : index
    %48 = vector.load %arg1[%c0_48, %c2_49, %c1_50, %c0_51] : memref<1x4x4x64xbf16, #tpu.memory_space<vmem>>, vector<1x2x2x64xbf16>
    %49 = vector.shape_cast %48 : vector<1x2x2x64xbf16> to vector<2x2x64xbf16>
    %50 = vector.shape_cast %49 : vector<2x2x64xbf16> to vector<4x64xbf16>
    %c7 = arith.constant 7 : index
    %c0_52 = arith.constant 0 : index
    %c0_53 = arith.constant 0 : index
    %51 = vector.load %arg2[%c7, %c0_52, %c0_53] : memref<9x64x32xbf16, #tpu.memory_space<vmem>>, vector<1x64x32xbf16>
    %52 = vector.shape_cast %51 : vector<1x64x32xbf16> to vector<64x32xbf16>
    %cst_54 = arith.constant dense<0.000000e+00> : vector<4x32xf32>
    %53 = tpu.matmul %50, %52, %cst_54 {dimension_numbers = #tpu.dot_dimension_numbers<[1], [0], [0], [1], [0, 0, 1, 1], [], []>} : vector<4x64xbf16>, vector<64x32xbf16>, vector<4x32xf32> -> vector<4x32xf32>
    %54 = arith.addf %47, %53 : vector<4x32xf32>
    %c0_55 = arith.constant 0 : index
    %c2_56 = arith.constant 2 : index
    %c2_57 = arith.constant 2 : index
    %c0_58 = arith.constant 0 : index
    %55 = vector.load %arg1[%c0_55, %c2_56, %c2_57, %c0_58] : memref<1x4x4x64xbf16, #tpu.memory_space<vmem>>, vector<1x2x2x64xbf16>
    %56 = vector.shape_cast %55 : vector<1x2x2x64xbf16> to vector<2x2x64xbf16>
    %57 = vector.shape_cast %56 : vector<2x2x64xbf16> to vector<4x64xbf16>
    %c8 = arith.constant 8 : index
    %c0_59 = arith.constant 0 : index
    %c0_60 = arith.constant 0 : index
    %58 = vector.load %arg2[%c8, %c0_59, %c0_60] : memref<9x64x32xbf16, #tpu.memory_space<vmem>>, vector<1x64x32xbf16>
    %59 = vector.shape_cast %58 : vector<1x64x32xbf16> to vector<64x32xbf16>
    %cst_61 = arith.constant dense<0.000000e+00> : vector<4x32xf32>
    %60 = tpu.matmul %57, %59, %cst_61 {dimension_numbers = #tpu.dot_dimension_numbers<[1], [0], [0], [1], [0, 0, 1, 1], [], []>} : vector<4x64xbf16>, vector<64x32xbf16>, vector<4x32xf32> -> vector<4x32xf32>
    %61 = arith.addf %54, %60 : vector<4x32xf32>
    %c0_62 = arith.constant 0 : index
    %c0_63 = arith.constant 0 : index
    %62 = vector.load %arg3[%c0_62, %c0_63] : memref<1x32xf32, #tpu.memory_space<vmem>>, vector<1x32xf32>
    %63 = vector.broadcast %62 : vector<1x32xf32> to vector<4x32xf32>
    %64 = arith.addf %61, %63 : vector<4x32xf32>
    %cst_64 = arith.constant 0.000000e+00 : f32
    %65 = vector.broadcast %cst_64 : f32 to vector<4x32xf32>
    %66 = arith.maximumf %64, %65 : vector<4x32xf32>
    %67 = arith.truncf %66 : vector<4x32xf32> to vector<4x32xbf16>
    %c0_65 = arith.constant 0 : index
    %c0_66 = arith.constant 0 : index
    %c0_67 = arith.constant 0 : index
    %68 = vector.load %arg4[%c0_65, %c0_66, %c0_67] : memref<1x4x32xbf16, #tpu.memory_space<vmem>>, vector<1x4x32xbf16>
    %69 = vector.shape_cast %68 : vector<1x4x32xbf16> to vector<4x32xbf16>
    %70 = vector.shape_cast %67 : vector<4x32xbf16> to vector<1x4x32xbf16>
    tpu.vector_store %arg4[%c0_65, %c0_66, %c0_67], %70 {strides = array<i32>} : memref<1x4x32xbf16, #tpu.memory_space<vmem>>, vector<1x4x32xbf16>,
    %c0_68 = arith.constant 0 : index
    %c1_69 = arith.constant 1 : index
    %c1_70 = arith.constant 1 : index
    %c0_71 = arith.constant 0 : index
    %71 = vector.load %arg1[%c0_68, %c1_69, %c1_70, %c0_71] : memref<1x4x4x64xbf16, #tpu.memory_space<vmem>>, vector<1x2x2x64xbf16>
    %72 = vector.shape_cast %71 : vector<1x2x2x64xbf16> to vector<2x2x64xbf16>
    %73 = arith.extf %72 : vector<2x2x64xbf16> to vector<2x2x64xf32>
    %74 = vector.shape_cast %73 : vector<2x2x64xf32> to vector<4x64xf32>
    %cst_72 = arith.constant dense<0.000000e+00> : vector<64xf32>
    %75 = vector.multi_reduction <add>, %74, %cst_72 [0] : vector<4x64xf32> to vector<64xf32>
    %76 = vector.shape_cast %75 : vector<64xf32> to vector<1x64xf32>
    %cst_73 = arith.constant 4.000000e+00 : f32
    %77 = vector.broadcast %cst_73 : f32 to vector<1x64xf32>
    %78 = arith.divf %76, %77 : vector<1x64xf32>
    %c0_74 = arith.constant 0 : index
    %c0_75 = arith.constant 0 : index
    %c0_76 = arith.constant 0 : index
    %79 = vector.load %arg5[%c0_74, %c0_75, %c0_76] : memref<1x1x64xf32, #tpu.memory_space<vmem>>, vector<1x1x64xf32>
    %80 = vector.shape_cast %79 : vector<1x1x64xf32> to vector<1x64xf32>
    %81 = vector.shape_cast %78 : vector<1x64xf32> to vector<1x1x64xf32>
    tpu.vector_store %arg5[%c0_74, %c0_75, %c0_76], %81 {strides = array<i32>} : memref<1x1x64xf32, #tpu.memory_space<vmem>>, vector<1x1x64xf32>,
    return
  }
  func.func @transform_0(%arg0: i32) -> (i32, i32, i32, i32) {
    %c0_i32 = arith.constant 0 : i32
    %c0_i32_0 = arith.constant 0 : i32
    %c0_i32_1 = arith.constant 0 : i32
    %c0_i32_2 = arith.constant 0 : i32
    return %arg0, %c0_i32, %c0_i32_0, %c0_i32_1 : i32, i32, i32, i32
  }
  func.func @transform_1(%arg0: i32) -> (i32, i32, i32) {
    %c0_i32 = arith.constant 0 : i32
    %c0_i32_0 = arith.constant 0 : i32
    %c0_i32_1 = arith.constant 0 : i32
    %c0_i32_2 = arith.constant 0 : i32
    return %c0_i32, %c0_i32_0, %c0_i32_1 : i32, i32, i32
  }
  func.func @transform_2(%arg0: i32) -> (i32, i32) {
    %c0_i32 = arith.constant 0 : i32
    %c0_i32_0 = arith.constant 0 : i32
    %c0_i32_1 = arith.constant 0 : i32
    return %c0_i32, %c0_i32_0 : i32, i32
  }
  func.func @transform_3(%arg0: i32) -> (i32, i32, i32) {
    %c0_i32 = arith.constant 0 : i32
    %c0_i32_0 = arith.constant 0 : i32
    %c0_i32_1 = arith.constant 0 : i32
    return %arg0, %c0_i32, %c0_i32_0 : i32, i32, i32
  }
  func.func @transform_4(%arg0: i32) -> (i32, i32, i32) {
    %c0_i32 = arith.constant 0 : i32
    %c0_i32_0 = arith.constant 0 : i32
    %c0_i32_1 = arith.constant 0 : i32
    return %arg0, %c0_i32, %c0_i32_0 : i32, i32, i32
  }
}

module attributes {stable_mosaic.version = 11 : i64} {
  func.func @_glam_mlp_kernel(%arg0: i32, %arg1: memref<2x64xf32, #tpu.memory_space<vmem>>, %arg2: memref<64x32xbf16, #tpu.memory_space<vmem>>, %arg3: memref<1x32xf32, #tpu.memory_space<vmem>>, %arg4: memref<32x32xbf16, #tpu.memory_space<vmem>>, %arg5: memref<1x32xf32, #tpu.memory_space<vmem>>, %arg6: memref<2x32xf32, #tpu.memory_space<vmem>>) attributes {dimension_semantics = [#tpu.dimension_semantics<arbitrary>], iteration_bounds = array<i64: 1>, scalar_prefetch = 0 : i64, scratch_operands = 0 : i64, tpu.core_type = #tpu.core_type<tc>, window_params = [{pipeline_mode = #tpu.pipeline_mode<synchronous>, transform_indices = @transform_0, window_bounds = array<i64: 2, 64>}, {pipeline_mode = #tpu.pipeline_mode<synchronous>, transform_indices = @transform_1, window_bounds = array<i64: 64, 32>}, {pipeline_mode = #tpu.pipeline_mode<synchronous>, transform_indices = @transform_2, window_bounds = array<i64: 1, 32>}, {pipeline_mode = #tpu.pipeline_mode<synchronous>, transform_indices = @transform_3, window_bounds = array<i64: 32, 32>}, {pipeline_mode = #tpu.pipeline_mode<synchronous>, transform_indices = @transform_4, window_bounds = array<i64: 1, 32>}, {pipeline_mode = #tpu.pipeline_mode<synchronous>, transform_indices = @transform_5, window_bounds = array<i64: 2, 32>}]} {
    %c0 = arith.constant 0 : index
    %c0_0 = arith.constant 0 : index
    %0 = vector.load %arg1[%c0, %c0_0] : memref<2x64xf32, #tpu.memory_space<vmem>>, vector<2x64xf32>
    %1 = arith.truncf %0 : vector<2x64xf32> to vector<2x64xbf16>
    %c0_1 = arith.constant 0 : index
    %c0_2 = arith.constant 0 : index
    %2 = vector.load %arg2[%c0_1, %c0_2] : memref<64x32xbf16, #tpu.memory_space<vmem>>, vector<64x32xbf16>
    %cst = arith.constant dense<0.000000e+00> : vector<2x32xf32>
    %3 = tpu.matmul %1, %2, %cst {dimension_numbers = #tpu.dot_dimension_numbers<[1], [0], [0], [1], [0, 0, 1, 1], [], []>} : vector<2x64xbf16>, vector<64x32xbf16>, vector<2x32xf32> -> vector<2x32xf32>
    %c0_3 = arith.constant 0 : index
    %c0_4 = arith.constant 0 : index
    %4 = vector.load %arg3[%c0_3, %c0_4] : memref<1x32xf32, #tpu.memory_space<vmem>>, vector<1x32xf32>
    %5 = vector.broadcast %4 : vector<1x32xf32> to vector<2x32xf32>
    %6 = arith.addf %3, %5 : vector<2x32xf32>
    %cst_5 = arith.constant 0.000000e+00 : f32
    %7 = vector.broadcast %cst_5 : f32 to vector<2x32xf32>
    %8 = arith.maximumf %6, %7 : vector<2x32xf32>
    %9 = arith.truncf %8 : vector<2x32xf32> to vector<2x32xbf16>
    %c0_6 = arith.constant 0 : index
    %c0_7 = arith.constant 0 : index
    %10 = vector.load %arg4[%c0_6, %c0_7] : memref<32x32xbf16, #tpu.memory_space<vmem>>, vector<32x32xbf16>
    %cst_8 = arith.constant dense<0.000000e+00> : vector<2x32xf32>
    %11 = tpu.matmul %9, %10, %cst_8 {dimension_numbers = #tpu.dot_dimension_numbers<[1], [0], [0], [1], [0, 0, 1, 1], [], []>} : vector<2x32xbf16>, vector<32x32xbf16>, vector<2x32xf32> -> vector<2x32xf32>
    %c0_9 = arith.constant 0 : index
    %c0_10 = arith.constant 0 : index
    %12 = vector.load %arg5[%c0_9, %c0_10] : memref<1x32xf32, #tpu.memory_space<vmem>>, vector<1x32xf32>
    %13 = vector.broadcast %12 : vector<1x32xf32> to vector<2x32xf32>
    %14 = arith.addf %11, %13 : vector<2x32xf32>
    %15 = arith.negf %14 : vector<2x32xf32>
    %16 = math.exp %15 : vector<2x32xf32>
    %cst_11 = arith.constant 1.000000e+00 : f32
    %17 = vector.broadcast %cst_11 : f32 to vector<2x32xf32>
    %18 = arith.addf %17, %16 : vector<2x32xf32>
    %19 = arith.divf %17, %18 : vector<2x32xf32>
    %c0_12 = arith.constant 0 : index
    %c0_13 = arith.constant 0 : index
    %20 = vector.load %arg6[%c0_12, %c0_13] : memref<2x32xf32, #tpu.memory_space<vmem>>, vector<2x32xf32>
    tpu.vector_store %arg6[%c0_12, %c0_13], %19 {strides = array<i32>} : memref<2x32xf32, #tpu.memory_space<vmem>>, vector<2x32xf32>,
    return
  }
  func.func @transform_0(%arg0: i32) -> (i32, i32) {
    %c0_i32 = arith.constant 0 : i32
    %c0_i32_0 = arith.constant 0 : i32
    %c0_i32_1 = arith.constant 0 : i32
    return %c0_i32, %c0_i32_0 : i32, i32
  }
  func.func @transform_1(%arg0: i32) -> (i32, i32) {
    %c0_i32 = arith.constant 0 : i32
    %c0_i32_0 = arith.constant 0 : i32
    %c0_i32_1 = arith.constant 0 : i32
    return %c0_i32, %c0_i32_0 : i32, i32
  }
  func.func @transform_2(%arg0: i32) -> (i32, i32) {
    %c0_i32 = arith.constant 0 : i32
    %c0_i32_0 = arith.constant 0 : i32
    %c0_i32_1 = arith.constant 0 : i32
    return %c0_i32, %c0_i32_0 : i32, i32
  }
  func.func @transform_3(%arg0: i32) -> (i32, i32) {
    %c0_i32 = arith.constant 0 : i32
    %c0_i32_0 = arith.constant 0 : i32
    %c0_i32_1 = arith.constant 0 : i32
    return %c0_i32, %c0_i32_0 : i32, i32
  }
  func.func @transform_4(%arg0: i32) -> (i32, i32) {
    %c0_i32 = arith.constant 0 : i32
    %c0_i32_0 = arith.constant 0 : i32
    %c0_i32_1 = arith.constant 0 : i32
    return %c0_i32, %c0_i32_0 : i32, i32
  }
  func.func @transform_5(%arg0: i32) -> (i32, i32) {
    %c0_i32 = arith.constant 0 : i32
    %c0_i32_0 = arith.constant 0 : i32
    %c0_i32_1 = arith.constant 0 : i32
    return %c0_i32, %c0_i32_0 : i32, i32
  }
}

module attributes {stable_mosaic.version = 11 : i64} {
  func.func @_scale_mm_kernel(%arg0: i32, %arg1: i32, %arg2: memref<1x1x128xbf16, #tpu.memory_space<vmem>>, %arg3: memref<1x1x128xf32, #tpu.memory_space<vmem>>, %arg4: memref<128x128xbf16, #tpu.memory_space<vmem>>, %arg5: memref<1x128xf32, #tpu.memory_space<vmem>>, %arg6: memref<1x1x128xbf16, #tpu.memory_space<vmem>>) attributes {dimension_semantics = [#tpu.dimension_semantics<parallel>, #tpu.dimension_semantics<parallel>], iteration_bounds = array<i64: 2, 1>, scalar_prefetch = 0 : i64, scratch_operands = 0 : i64, tpu.core_type = #tpu.core_type<tc>, window_params = [{transform_indices = @transform_0, window_bounds = array<i64: 1, 1, 128>}, {transform_indices = @transform_1, window_bounds = array<i64: 1, 1, 128>}, {pipeline_mode = #tpu.pipeline_mode<synchronous>, transform_indices = @transform_2, window_bounds = array<i64: 128, 128>}, {pipeline_mode = #tpu.pipeline_mode<synchronous>, transform_indices = @transform_3, window_bounds = array<i64: 1, 128>}, {transform_indices = @transform_4, window_bounds = array<i64: 1, 1, 128>}]} {
    %c0 = arith.constant 0 : index
    %c0_0 = arith.constant 0 : index
    %c0_1 = arith.constant 0 : index
    %0 = vector.load %arg2[%c0, %c0_0, %c0_1] : memref<1x1x128xbf16, #tpu.memory_space<vmem>>, vector<1x1x128xbf16>
    %1 = vector.shape_cast %0 : vector<1x1x128xbf16> to vector<1x128xbf16>
    %2 = arith.extf %1 : vector<1x128xbf16> to vector<1x128xf32>
    %c0_2 = arith.constant 0 : index
    %c0_3 = arith.constant 0 : index
    %c0_4 = arith.constant 0 : index
    %3 = vector.load %arg3[%c0_2, %c0_3, %c0_4] : memref<1x1x128xf32, #tpu.memory_space<vmem>>, vector<1x1x128xf32>
    %4 = vector.shape_cast %3 : vector<1x1x128xf32> to vector<1x128xf32>
    %5 = arith.mulf %2, %4 : vector<1x128xf32>
    %6 = arith.truncf %5 : vector<1x128xf32> to vector<1x128xbf16>
    %c0_5 = arith.constant 0 : index
    %c0_6 = arith.constant 0 : index
    %7 = vector.load %arg4[%c0_5, %c0_6] : memref<128x128xbf16, #tpu.memory_space<vmem>>, vector<128x128xbf16>
    %cst = arith.constant dense<0.000000e+00> : vector<1x128xf32>
    %8 = tpu.matmul %6, %7, %cst {dimension_numbers = #tpu.dot_dimension_numbers<[1], [0], [0], [1], [0, 0, 1, 1], [], []>} : vector<1x128xbf16>, vector<128x128xbf16>, vector<1x128xf32> -> vector<1x128xf32>
    %c0_7 = arith.constant 0 : index
    %c0_8 = arith.constant 0 : index
    %9 = vector.load %arg5[%c0_7, %c0_8] : memref<1x128xf32, #tpu.memory_space<vmem>>, vector<1x128xf32>
    %10 = arith.addf %8, %9 : vector<1x128xf32>
    %cst_9 = arith.constant 0.000000e+00 : f32
    %11 = vector.broadcast %cst_9 : f32 to vector<1x128xf32>
    %12 = arith.maximumf %10, %11 : vector<1x128xf32>
    %13 = arith.truncf %12 : vector<1x128xf32> to vector<1x128xbf16>
    %c0_10 = arith.constant 0 : index
    %c0_11 = arith.constant 0 : index
    %c0_12 = arith.constant 0 : index
    %14 = vector.load %arg6[%c0_10, %c0_11, %c0_12] : memref<1x1x128xbf16, #tpu.memory_space<vmem>>, vector<1x1x128xbf16>
    %15 = vector.shape_cast %14 : vector<1x1x128xbf16> to vector<1x128xbf16>
    %16 = vector.shape_cast %13 : vector<1x128xbf16> to vector<1x1x128xbf16>
    tpu.vector_store %arg6[%c0_10, %c0_11, %c0_12], %16 {strides = array<i32>} : memref<1x1x128xbf16, #tpu.memory_space<vmem>>, vector<1x1x128xbf16>,
    return
  }
  func.func @transform_0(%arg0: i32, %arg1: i32) -> (i32, i32, i32) {
    %c0_i32 = arith.constant 0 : i32
    %c0_i32_0 = arith.constant 0 : i32
    return %arg0, %arg1, %c0_i32 : i32, i32, i32
  }
  func.func @transform_1(%arg0: i32, %arg1: i32) -> (i32, i32, i32) {
    %c0_i32 = arith.constant 0 : i32
    %c0_i32_0 = arith.constant 0 : i32
    %c0_i32_1 = arith.constant 0 : i32
    return %arg0, %c0_i32, %c0_i32_0 : i32, i32, i32
  }
  func.func @transform_2(%arg0: i32, %arg1: i32) -> (i32, i32) {
    %c0_i32 = arith.constant 0 : i32
    %c0_i32_0 = arith.constant 0 : i32
    %c0_i32_1 = arith.constant 0 : i32
    return %c0_i32, %c0_i32_0 : i32, i32
  }
  func.func @transform_3(%arg0: i32, %arg1: i32) -> (i32, i32) {
    %c0_i32 = arith.constant 0 : i32
    %c0_i32_0 = arith.constant 0 : i32
    %c0_i32_1 = arith.constant 0 : i32
    return %c0_i32, %c0_i32_0 : i32, i32
  }
  func.func @transform_4(%arg0: i32, %arg1: i32) -> (i32, i32, i32) {
    %c0_i32 = arith.constant 0 : i32
    %c0_i32_0 = arith.constant 0 : i32
    return %arg0, %arg1, %c0_i32 : i32, i32, i32
  }
}

module attributes {stable_mosaic.version = 11 : i64} {
  func.func @_mm_ln_kernel(%arg0: i32, %arg1: memref<2x576xbf16, #tpu.memory_space<vmem>>, %arg2: memref<576x128xbf16, #tpu.memory_space<vmem>>, %arg3: memref<3x128xf32, #tpu.memory_space<vmem>>, %arg4: memref<128x128xf32, #tpu.memory_space<vmem>>, %arg5: memref<2x128xbf16, #tpu.memory_space<vmem>>) attributes {dimension_semantics = [#tpu.dimension_semantics<parallel>], iteration_bounds = array<i64: 1>, scalar_prefetch = 0 : i64, scratch_operands = 0 : i64, tpu.core_type = #tpu.core_type<tc>, window_params = [{transform_indices = @transform_0, window_bounds = array<i64: 2, 576>}, {pipeline_mode = #tpu.pipeline_mode<synchronous>, transform_indices = @transform_1, window_bounds = array<i64: 576, 128>}, {pipeline_mode = #tpu.pipeline_mode<synchronous>, transform_indices = @transform_2, window_bounds = array<i64: 3, 128>}, {pipeline_mode = #tpu.pipeline_mode<synchronous>, transform_indices = @transform_3, window_bounds = array<i64: 128, 128>}, {transform_indices = @transform_4, window_bounds = array<i64: 2, 128>}]} {
    %c0 = arith.constant 0 : index
    %c0_0 = arith.constant 0 : index
    %0 = vector.load %arg1[%c0, %c0_0] : memref<2x576xbf16, #tpu.memory_space<vmem>>, vector<2x576xbf16>
    %c0_1 = arith.constant 0 : index
    %c0_2 = arith.constant 0 : index
    %1 = vector.load %arg2[%c0_1, %c0_2] : memref<576x128xbf16, #tpu.memory_space<vmem>>, vector<576x128xbf16>
    %cst = arith.constant dense<0.000000e+00> : vector<2x128xf32>
    %2 = tpu.matmul %0, %1, %cst {dimension_numbers = #tpu.dot_dimension_numbers<[1], [0], [0], [1], [0, 0, 1, 1], [], []>} : vector<2x576xbf16>, vector<576x128xbf16>, vector<2x128xf32> -> vector<2x128xf32>
    %c0_3 = arith.constant 0 : index
    %c0_4 = arith.constant 0 : index
    %3 = vector.load %arg3[%c0_3, %c0_4] : memref<3x128xf32, #tpu.memory_space<vmem>>, vector<1x128xf32>
    %4 = vector.broadcast %3 : vector<1x128xf32> to vector<2x128xf32>
    %5 = arith.addf %2, %4 : vector<2x128xf32>
    %c0_5 = arith.constant 0 : index
    %c0_6 = arith.constant 0 : index
    %6 = vector.load %arg4[%c0_5, %c0_6] : memref<128x128xf32, #tpu.memory_space<vmem>>, vector<128x128xf32>
    %cst_7 = arith.constant dense<0.000000e+00> : vector<2x128xf32>
    %7 = tpu.matmul %5, %6, %cst_7 {dimension_numbers = #tpu.dot_dimension_numbers<[1], [0], [0], [1], [0, 0, 1, 1], [], []>} : vector<2x128xf32>, vector<128x128xf32>, vector<2x128xf32> -> vector<2x128xf32>
    %8 = arith.subf %5, %7 : vector<2x128xf32>
    %9 = arith.mulf %8, %8 : vector<2x128xf32>
    %c0_8 = arith.constant 0 : index
    %c0_9 = arith.constant 0 : index
    %10 = vector.load %arg4[%c0_8, %c0_9] : memref<128x128xf32, #tpu.memory_space<vmem>>, vector<128x128xf32>
    %cst_10 = arith.constant dense<0.000000e+00> : vector<2x128xf32>
    %11 = tpu.matmul %9, %10, %cst_10 {dimension_numbers = #tpu.dot_dimension_numbers<[1], [0], [0], [1], [0, 0, 1, 1], [], []>} : vector<2x128xf32>, vector<128x128xf32>, vector<2x128xf32> -> vector<2x128xf32>
    %cst_11 = arith.constant 9.99999974E-6 : f32
    %12 = vector.broadcast %cst_11 : f32 to vector<2x128xf32>
    %13 = arith.addf %11, %12 : vector<2x128xf32>
    %14 = math.rsqrt %13 : vector<2x128xf32>
    %15 = arith.mulf %8, %14 : vector<2x128xf32>
    %c1 = arith.constant 1 : index
    %c0_12 = arith.constant 0 : index
    %16 = vector.load %arg3[%c1, %c0_12] : memref<3x128xf32, #tpu.memory_space<vmem>>, vector<1x128xf32>
    %17 = vector.broadcast %16 : vector<1x128xf32> to vector<2x128xf32>
    %18 = arith.mulf %15, %17 : vector<2x128xf32>
    %c2 = arith.constant 2 : index
    %c0_13 = arith.constant 0 : index
    %19 = vector.load %arg3[%c2, %c0_13] : memref<3x128xf32, #tpu.memory_space<vmem>>, vector<1x128xf32>
    %20 = vector.broadcast %19 : vector<1x128xf32> to vector<2x128xf32>
    %21 = arith.addf %18, %20 : vector<2x128xf32>
    %22 = arith.truncf %21 : vector<2x128xf32> to vector<2x128xbf16>
    %c0_14 = arith.constant 0 : index
    %c0_15 = arith.constant 0 : index
    %23 = vector.load %arg5[%c0_14, %c0_15] : memref<2x128xbf16, #tpu.memory_space<vmem>>, vector<2x128xbf16>
    tpu.vector_store %arg5[%c0_14, %c0_15], %22 {strides = array<i32>} : memref<2x128xbf16, #tpu.memory_space<vmem>>, vector<2x128xbf16>,
    return
  }
  func.func @transform_0(%arg0: i32) -> (i32, i32) {
    %c0_i32 = arith.constant 0 : i32
    %c0_i32_0 = arith.constant 0 : i32
    return %arg0, %c0_i32 : i32, i32
  }
  func.func @transform_1(%arg0: i32) -> (i32, i32) {
    %c0_i32 = arith.constant 0 : i32
    %c0_i32_0 = arith.constant 0 : i32
    %c0_i32_1 = arith.constant 0 : i32
    return %c0_i32, %c0_i32_0 : i32, i32
  }
  func.func @transform_2(%arg0: i32) -> (i32, i32) {
    %c0_i32 = arith.constant 0 : i32
    %c0_i32_0 = arith.constant 0 : i32
    %c0_i32_1 = arith.constant 0 : i32
    return %c0_i32, %c0_i32_0 : i32, i32
  }
  func.func @transform_3(%arg0: i32) -> (i32, i32) {
    %c0_i32 = arith.constant 0 : i32
    %c0_i32_0 = arith.constant 0 : i32
    %c0_i32_1 = arith.constant 0 : i32
    return %c0_i32, %c0_i32_0 : i32, i32
  }
  func.func @transform_4(%arg0: i32) -> (i32, i32) {
    %c0_i32 = arith.constant 0 : i32
    %c0_i32_0 = arith.constant 0 : i32
    return %arg0, %c0_i32 : i32, i32
  }
}

module attributes {stable_mosaic.version = 11 : i64} {
  func.func @_conv3x3_kernel(%arg0: i32, %arg1: memref<1x3x3x128xbf16, #tpu.memory_space<vmem>>, %arg2: memref<9x128x64xbf16, #tpu.memory_space<vmem>>, %arg3: memref<1x64xf32, #tpu.memory_space<vmem>>, %arg4: memref<1x1x64xbf16, #tpu.memory_space<vmem>>, %arg5: memref<1x1x128xf32, #tpu.memory_space<vmem>>) attributes {dimension_semantics = [#tpu.dimension_semantics<parallel>], iteration_bounds = array<i64: 2>, scalar_prefetch = 0 : i64, scratch_operands = 0 : i64, tpu.core_type = #tpu.core_type<tc>, window_params = [{transform_indices = @transform_0, window_bounds = array<i64: 1, 3, 3, 128>}, {pipeline_mode = #tpu.pipeline_mode<synchronous>, transform_indices = @transform_1, window_bounds = array<i64: 9, 128, 64>}, {pipeline_mode = #tpu.pipeline_mode<synchronous>, transform_indices = @transform_2, window_bounds = array<i64: 1, 64>}, {transform_indices = @transform_3, window_bounds = array<i64: 1, 1, 64>}, {transform_indices = @transform_4, window_bounds = array<i64: 1, 1, 128>}]} {
    %c0 = arith.constant 0 : index
    %c0_0 = arith.constant 0 : index
    %c0_1 = arith.constant 0 : index
    %c0_2 = arith.constant 0 : index
    %0 = vector.load %arg1[%c0, %c0_0, %c0_1, %c0_2] : memref<1x3x3x128xbf16, #tpu.memory_space<vmem>>, vector<1x1x1x128xbf16>
    %1 = vector.shape_cast %0 : vector<1x1x1x128xbf16> to vector<1x1x128xbf16>
    %2 = vector.shape_cast %1 : vector<1x1x128xbf16> to vector<1x128xbf16>
    %c0_3 = arith.constant 0 : index
    %c0_4 = arith.constant 0 : index
    %c0_5 = arith.constant 0 : index
    %3 = vector.load %arg2[%c0_3, %c0_4, %c0_5] : memref<9x128x64xbf16, #tpu.memory_space<vmem>>, vector<1x128x64xbf16>
    %4 = vector.shape_cast %3 : vector<1x128x64xbf16> to vector<128x64xbf16>
    %cst = arith.constant dense<0.000000e+00> : vector<1x64xf32>
    %5 = tpu.matmul %2, %4, %cst {dimension_numbers = #tpu.dot_dimension_numbers<[1], [0], [0], [1], [0, 0, 1, 1], [], []>} : vector<1x128xbf16>, vector<128x64xbf16>, vector<1x64xf32> -> vector<1x64xf32>
    %c0_6 = arith.constant 0 : index
    %c0_7 = arith.constant 0 : index
    %c1 = arith.constant 1 : index
    %c0_8 = arith.constant 0 : index
    %6 = vector.load %arg1[%c0_6, %c0_7, %c1, %c0_8] : memref<1x3x3x128xbf16, #tpu.memory_space<vmem>>, vector<1x1x1x128xbf16>
    %7 = vector.shape_cast %6 : vector<1x1x1x128xbf16> to vector<1x1x128xbf16>
    %8 = vector.shape_cast %7 : vector<1x1x128xbf16> to vector<1x128xbf16>
    %c1_9 = arith.constant 1 : index
    %c0_10 = arith.constant 0 : index
    %c0_11 = arith.constant 0 : index
    %9 = vector.load %arg2[%c1_9, %c0_10, %c0_11] : memref<9x128x64xbf16, #tpu.memory_space<vmem>>, vector<1x128x64xbf16>
    %10 = vector.shape_cast %9 : vector<1x128x64xbf16> to vector<128x64xbf16>
    %cst_12 = arith.constant dense<0.000000e+00> : vector<1x64xf32>
    %11 = tpu.matmul %8, %10, %cst_12 {dimension_numbers = #tpu.dot_dimension_numbers<[1], [0], [0], [1], [0, 0, 1, 1], [], []>} : vector<1x128xbf16>, vector<128x64xbf16>, vector<1x64xf32> -> vector<1x64xf32>
    %12 = arith.addf %5, %11 : vector<1x64xf32>
    %c0_13 = arith.constant 0 : index
    %c0_14 = arith.constant 0 : index
    %c2 = arith.constant 2 : index
    %c0_15 = arith.constant 0 : index
    %13 = vector.load %arg1[%c0_13, %c0_14, %c2, %c0_15] : memref<1x3x3x128xbf16, #tpu.memory_space<vmem>>, vector<1x1x1x128xbf16>
    %14 = vector.shape_cast %13 : vector<1x1x1x128xbf16> to vector<1x1x128xbf16>
    %15 = vector.shape_cast %14 : vector<1x1x128xbf16> to vector<1x128xbf16>
    %c2_16 = arith.constant 2 : index
    %c0_17 = arith.constant 0 : index
    %c0_18 = arith.constant 0 : index
    %16 = vector.load %arg2[%c2_16, %c0_17, %c0_18] : memref<9x128x64xbf16, #tpu.memory_space<vmem>>, vector<1x128x64xbf16>
    %17 = vector.shape_cast %16 : vector<1x128x64xbf16> to vector<128x64xbf16>
    %cst_19 = arith.constant dense<0.000000e+00> : vector<1x64xf32>
    %18 = tpu.matmul %15, %17, %cst_19 {dimension_numbers = #tpu.dot_dimension_numbers<[1], [0], [0], [1], [0, 0, 1, 1], [], []>} : vector<1x128xbf16>, vector<128x64xbf16>, vector<1x64xf32> -> vector<1x64xf32>
    %19 = arith.addf %12, %18 : vector<1x64xf32>
    %c0_20 = arith.constant 0 : index
    %c1_21 = arith.constant 1 : index
    %c0_22 = arith.constant 0 : index
    %c0_23 = arith.constant 0 : index
    %20 = vector.load %arg1[%c0_20, %c1_21, %c0_22, %c0_23] : memref<1x3x3x128xbf16, #tpu.memory_space<vmem>>, vector<1x1x1x128xbf16>
    %21 = vector.shape_cast %20 : vector<1x1x1x128xbf16> to vector<1x1x128xbf16>
    %22 = vector.shape_cast %21 : vector<1x1x128xbf16> to vector<1x128xbf16>
    %c3 = arith.constant 3 : index
    %c0_24 = arith.constant 0 : index
    %c0_25 = arith.constant 0 : index
    %23 = vector.load %arg2[%c3, %c0_24, %c0_25] : memref<9x128x64xbf16, #tpu.memory_space<vmem>>, vector<1x128x64xbf16>
    %24 = vector.shape_cast %23 : vector<1x128x64xbf16> to vector<128x64xbf16>
    %cst_26 = arith.constant dense<0.000000e+00> : vector<1x64xf32>
    %25 = tpu.matmul %22, %24, %cst_26 {dimension_numbers = #tpu.dot_dimension_numbers<[1], [0], [0], [1], [0, 0, 1, 1], [], []>} : vector<1x128xbf16>, vector<128x64xbf16>, vector<1x64xf32> -> vector<1x64xf32>
    %26 = arith.addf %19, %25 : vector<1x64xf32>
    %c0_27 = arith.constant 0 : index
    %c1_28 = arith.constant 1 : index
    %c1_29 = arith.constant 1 : index
    %c0_30 = arith.constant 0 : index
    %27 = vector.load %arg1[%c0_27, %c1_28, %c1_29, %c0_30] : memref<1x3x3x128xbf16, #tpu.memory_space<vmem>>, vector<1x1x1x128xbf16>
    %28 = vector.shape_cast %27 : vector<1x1x1x128xbf16> to vector<1x1x128xbf16>
    %29 = vector.shape_cast %28 : vector<1x1x128xbf16> to vector<1x128xbf16>
    %c4 = arith.constant 4 : index
    %c0_31 = arith.constant 0 : index
    %c0_32 = arith.constant 0 : index
    %30 = vector.load %arg2[%c4, %c0_31, %c0_32] : memref<9x128x64xbf16, #tpu.memory_space<vmem>>, vector<1x128x64xbf16>
    %31 = vector.shape_cast %30 : vector<1x128x64xbf16> to vector<128x64xbf16>
    %cst_33 = arith.constant dense<0.000000e+00> : vector<1x64xf32>
    %32 = tpu.matmul %29, %31, %cst_33 {dimension_numbers = #tpu.dot_dimension_numbers<[1], [0], [0], [1], [0, 0, 1, 1], [], []>} : vector<1x128xbf16>, vector<128x64xbf16>, vector<1x64xf32> -> vector<1x64xf32>
    %33 = arith.addf %26, %32 : vector<1x64xf32>
    %c0_34 = arith.constant 0 : index
    %c1_35 = arith.constant 1 : index
    %c2_36 = arith.constant 2 : index
    %c0_37 = arith.constant 0 : index
    %34 = vector.load %arg1[%c0_34, %c1_35, %c2_36, %c0_37] : memref<1x3x3x128xbf16, #tpu.memory_space<vmem>>, vector<1x1x1x128xbf16>
    %35 = vector.shape_cast %34 : vector<1x1x1x128xbf16> to vector<1x1x128xbf16>
    %36 = vector.shape_cast %35 : vector<1x1x128xbf16> to vector<1x128xbf16>
    %c5 = arith.constant 5 : index
    %c0_38 = arith.constant 0 : index
    %c0_39 = arith.constant 0 : index
    %37 = vector.load %arg2[%c5, %c0_38, %c0_39] : memref<9x128x64xbf16, #tpu.memory_space<vmem>>, vector<1x128x64xbf16>
    %38 = vector.shape_cast %37 : vector<1x128x64xbf16> to vector<128x64xbf16>
    %cst_40 = arith.constant dense<0.000000e+00> : vector<1x64xf32>
    %39 = tpu.matmul %36, %38, %cst_40 {dimension_numbers = #tpu.dot_dimension_numbers<[1], [0], [0], [1], [0, 0, 1, 1], [], []>} : vector<1x128xbf16>, vector<128x64xbf16>, vector<1x64xf32> -> vector<1x64xf32>
    %40 = arith.addf %33, %39 : vector<1x64xf32>
    %c0_41 = arith.constant 0 : index
    %c2_42 = arith.constant 2 : index
    %c0_43 = arith.constant 0 : index
    %c0_44 = arith.constant 0 : index
    %41 = vector.load %arg1[%c0_41, %c2_42, %c0_43, %c0_44] : memref<1x3x3x128xbf16, #tpu.memory_space<vmem>>, vector<1x1x1x128xbf16>
    %42 = vector.shape_cast %41 : vector<1x1x1x128xbf16> to vector<1x1x128xbf16>
    %43 = vector.shape_cast %42 : vector<1x1x128xbf16> to vector<1x128xbf16>
    %c6 = arith.constant 6 : index
    %c0_45 = arith.constant 0 : index
    %c0_46 = arith.constant 0 : index
    %44 = vector.load %arg2[%c6, %c0_45, %c0_46] : memref<9x128x64xbf16, #tpu.memory_space<vmem>>, vector<1x128x64xbf16>
    %45 = vector.shape_cast %44 : vector<1x128x64xbf16> to vector<128x64xbf16>
    %cst_47 = arith.constant dense<0.000000e+00> : vector<1x64xf32>
    %46 = tpu.matmul %43, %45, %cst_47 {dimension_numbers = #tpu.dot_dimension_numbers<[1], [0], [0], [1], [0, 0, 1, 1], [], []>} : vector<1x128xbf16>, vector<128x64xbf16>, vector<1x64xf32> -> vector<1x64xf32>
    %47 = arith.addf %40, %46 : vector<1x64xf32>
    %c0_48 = arith.constant 0 : index
    %c2_49 = arith.constant 2 : index
    %c1_50 = arith.constant 1 : index
    %c0_51 = arith.constant 0 : index
    %48 = vector.load %arg1[%c0_48, %c2_49, %c1_50, %c0_51] : memref<1x3x3x128xbf16, #tpu.memory_space<vmem>>, vector<1x1x1x128xbf16>
    %49 = vector.shape_cast %48 : vector<1x1x1x128xbf16> to vector<1x1x128xbf16>
    %50 = vector.shape_cast %49 : vector<1x1x128xbf16> to vector<1x128xbf16>
    %c7 = arith.constant 7 : index
    %c0_52 = arith.constant 0 : index
    %c0_53 = arith.constant 0 : index
    %51 = vector.load %arg2[%c7, %c0_52, %c0_53] : memref<9x128x64xbf16, #tpu.memory_space<vmem>>, vector<1x128x64xbf16>
    %52 = vector.shape_cast %51 : vector<1x128x64xbf16> to vector<128x64xbf16>
    %cst_54 = arith.constant dense<0.000000e+00> : vector<1x64xf32>
    %53 = tpu.matmul %50, %52, %cst_54 {dimension_numbers = #tpu.dot_dimension_numbers<[1], [0], [0], [1], [0, 0, 1, 1], [], []>} : vector<1x128xbf16>, vector<128x64xbf16>, vector<1x64xf32> -> vector<1x64xf32>
    %54 = arith.addf %47, %53 : vector<1x64xf32>
    %c0_55 = arith.constant 0 : index
    %c2_56 = arith.constant 2 : index
    %c2_57 = arith.constant 2 : index
    %c0_58 = arith.constant 0 : index
    %55 = vector.load %arg1[%c0_55, %c2_56, %c2_57, %c0_58] : memref<1x3x3x128xbf16, #tpu.memory_space<vmem>>, vector<1x1x1x128xbf16>
    %56 = vector.shape_cast %55 : vector<1x1x1x128xbf16> to vector<1x1x128xbf16>
    %57 = vector.shape_cast %56 : vector<1x1x128xbf16> to vector<1x128xbf16>
    %c8 = arith.constant 8 : index
    %c0_59 = arith.constant 0 : index
    %c0_60 = arith.constant 0 : index
    %58 = vector.load %arg2[%c8, %c0_59, %c0_60] : memref<9x128x64xbf16, #tpu.memory_space<vmem>>, vector<1x128x64xbf16>
    %59 = vector.shape_cast %58 : vector<1x128x64xbf16> to vector<128x64xbf16>
    %cst_61 = arith.constant dense<0.000000e+00> : vector<1x64xf32>
    %60 = tpu.matmul %57, %59, %cst_61 {dimension_numbers = #tpu.dot_dimension_numbers<[1], [0], [0], [1], [0, 0, 1, 1], [], []>} : vector<1x128xbf16>, vector<128x64xbf16>, vector<1x64xf32> -> vector<1x64xf32>
    %61 = arith.addf %54, %60 : vector<1x64xf32>
    %c0_62 = arith.constant 0 : index
    %c0_63 = arith.constant 0 : index
    %62 = vector.load %arg3[%c0_62, %c0_63] : memref<1x64xf32, #tpu.memory_space<vmem>>, vector<1x64xf32>
    %63 = arith.addf %61, %62 : vector<1x64xf32>
    %cst_64 = arith.constant 0.000000e+00 : f32
    %64 = vector.broadcast %cst_64 : f32 to vector<1x64xf32>
    %65 = arith.maximumf %63, %64 : vector<1x64xf32>
    %66 = arith.truncf %65 : vector<1x64xf32> to vector<1x64xbf16>
    %c0_65 = arith.constant 0 : index
    %c0_66 = arith.constant 0 : index
    %c0_67 = arith.constant 0 : index
    %67 = vector.load %arg4[%c0_65, %c0_66, %c0_67] : memref<1x1x64xbf16, #tpu.memory_space<vmem>>, vector<1x1x64xbf16>
    %68 = vector.shape_cast %67 : vector<1x1x64xbf16> to vector<1x64xbf16>
    %69 = vector.shape_cast %66 : vector<1x64xbf16> to vector<1x1x64xbf16>
    tpu.vector_store %arg4[%c0_65, %c0_66, %c0_67], %69 {strides = array<i32>} : memref<1x1x64xbf16, #tpu.memory_space<vmem>>, vector<1x1x64xbf16>,
    %c0_68 = arith.constant 0 : index
    %c1_69 = arith.constant 1 : index
    %c1_70 = arith.constant 1 : index
    %c0_71 = arith.constant 0 : index
    %70 = vector.load %arg1[%c0_68, %c1_69, %c1_70, %c0_71] : memref<1x3x3x128xbf16, #tpu.memory_space<vmem>>, vector<1x1x1x128xbf16>
    %71 = vector.shape_cast %70 : vector<1x1x1x128xbf16> to vector<1x1x128xbf16>
    %72 = arith.extf %71 : vector<1x1x128xbf16> to vector<1x1x128xf32>
    %73 = vector.shape_cast %72 : vector<1x1x128xf32> to vector<1x128xf32>
    %cst_72 = arith.constant dense<0.000000e+00> : vector<128xf32>
    %74 = vector.multi_reduction <add>, %73, %cst_72 [0] : vector<1x128xf32> to vector<128xf32>
    %75 = vector.shape_cast %74 : vector<128xf32> to vector<1x128xf32>
    %cst_73 = arith.constant 1.000000e+00 : f32
    %76 = vector.broadcast %cst_73 : f32 to vector<1x128xf32>
    %77 = arith.divf %75, %76 : vector<1x128xf32>
    %c0_74 = arith.constant 0 : index
    %c0_75 = arith.constant 0 : index
    %c0_76 = arith.constant 0 : index
    %78 = vector.load %arg5[%c0_74, %c0_75, %c0_76] : memref<1x1x128xf32, #tpu.memory_space<vmem>>, vector<1x1x128xf32>
    %79 = vector.shape_cast %78 : vector<1x1x128xf32> to vector<1x128xf32>
    %80 = vector.shape_cast %77 : vector<1x128xf32> to vector<1x1x128xf32>
    tpu.vector_store %arg5[%c0_74, %c0_75, %c0_76], %80 {strides = array<i32>} : memref<1x1x128xf32, #tpu.memory_space<vmem>>, vector<1x1x128xf32>,
    return
  }
  func.func @transform_0(%arg0: i32) -> (i32, i32, i32, i32) {
    %c0_i32 = arith.constant 0 : i32
    %c0_i32_0 = arith.constant 0 : i32
    %c0_i32_1 = arith.constant 0 : i32
    %c0_i32_2 = arith.constant 0 : i32
    return %arg0, %c0_i32, %c0_i32_0, %c0_i32_1 : i32, i32, i32, i32
  }
  func.func @transform_1(%arg0: i32) -> (i32, i32, i32) {
    %c0_i32 = arith.constant 0 : i32
    %c0_i32_0 = arith.constant 0 : i32
    %c0_i32_1 = arith.constant 0 : i32
    %c0_i32_2 = arith.constant 0 : i32
    return %c0_i32, %c0_i32_0, %c0_i32_1 : i32, i32, i32
  }
  func.func @transform_2(%arg0: i32) -> (i32, i32) {
    %c0_i32 = arith.constant 0 : i32
    %c0_i32_0 = arith.constant 0 : i32
    %c0_i32_1 = arith.constant 0 : i32
    return %c0_i32, %c0_i32_0 : i32, i32
  }
  func.func @transform_3(%arg0: i32) -> (i32, i32, i32) {
    %c0_i32 = arith.constant 0 : i32
    %c0_i32_0 = arith.constant 0 : i32
    %c0_i32_1 = arith.constant 0 : i32
    return %arg0, %c0_i32, %c0_i32_0 : i32, i32, i32
  }
  func.func @transform_4(%arg0: i32) -> (i32, i32, i32) {
    %c0_i32 = arith.constant 0 : i32
    %c0_i32_0 = arith.constant 0 : i32
    %c0_i32_1 = arith.constant 0 : i32
    return %arg0, %c0_i32, %c0_i32_0 : i32, i32, i32
  }
}

module attributes {stable_mosaic.version = 11 : i64} {
  func.func @_glam_mlp_kernel(%arg0: i32, %arg1: memref<2x128xf32, #tpu.memory_space<vmem>>, %arg2: memref<128x64xbf16, #tpu.memory_space<vmem>>, %arg3: memref<1x64xf32, #tpu.memory_space<vmem>>, %arg4: memref<64x64xbf16, #tpu.memory_space<vmem>>, %arg5: memref<1x64xf32, #tpu.memory_space<vmem>>, %arg6: memref<2x64xf32, #tpu.memory_space<vmem>>) attributes {dimension_semantics = [#tpu.dimension_semantics<arbitrary>], iteration_bounds = array<i64: 1>, scalar_prefetch = 0 : i64, scratch_operands = 0 : i64, tpu.core_type = #tpu.core_type<tc>, window_params = [{pipeline_mode = #tpu.pipeline_mode<synchronous>, transform_indices = @transform_0, window_bounds = array<i64: 2, 128>}, {pipeline_mode = #tpu.pipeline_mode<synchronous>, transform_indices = @transform_1, window_bounds = array<i64: 128, 64>}, {pipeline_mode = #tpu.pipeline_mode<synchronous>, transform_indices = @transform_2, window_bounds = array<i64: 1, 64>}, {pipeline_mode = #tpu.pipeline_mode<synchronous>, transform_indices = @transform_3, window_bounds = array<i64: 64, 64>}, {pipeline_mode = #tpu.pipeline_mode<synchronous>, transform_indices = @transform_4, window_bounds = array<i64: 1, 64>}, {pipeline_mode = #tpu.pipeline_mode<synchronous>, transform_indices = @transform_5, window_bounds = array<i64: 2, 64>}]} {
    %c0 = arith.constant 0 : index
    %c0_0 = arith.constant 0 : index
    %0 = vector.load %arg1[%c0, %c0_0] : memref<2x128xf32, #tpu.memory_space<vmem>>, vector<2x128xf32>
    %1 = arith.truncf %0 : vector<2x128xf32> to vector<2x128xbf16>
    %c0_1 = arith.constant 0 : index
    %c0_2 = arith.constant 0 : index
    %2 = vector.load %arg2[%c0_1, %c0_2] : memref<128x64xbf16, #tpu.memory_space<vmem>>, vector<128x64xbf16>
    %cst = arith.constant dense<0.000000e+00> : vector<2x64xf32>
    %3 = tpu.matmul %1, %2, %cst {dimension_numbers = #tpu.dot_dimension_numbers<[1], [0], [0], [1], [0, 0, 1, 1], [], []>} : vector<2x128xbf16>, vector<128x64xbf16>, vector<2x64xf32> -> vector<2x64xf32>
    %c0_3 = arith.constant 0 : index
    %c0_4 = arith.constant 0 : index
    %4 = vector.load %arg3[%c0_3, %c0_4] : memref<1x64xf32, #tpu.memory_space<vmem>>, vector<1x64xf32>
    %5 = vector.broadcast %4 : vector<1x64xf32> to vector<2x64xf32>
    %6 = arith.addf %3, %5 : vector<2x64xf32>
    %cst_5 = arith.constant 0.000000e+00 : f32
    %7 = vector.broadcast %cst_5 : f32 to vector<2x64xf32>
    %8 = arith.maximumf %6, %7 : vector<2x64xf32>
    %9 = arith.truncf %8 : vector<2x64xf32> to vector<2x64xbf16>
    %c0_6 = arith.constant 0 : index
    %c0_7 = arith.constant 0 : index
    %10 = vector.load %arg4[%c0_6, %c0_7] : memref<64x64xbf16, #tpu.memory_space<vmem>>, vector<64x64xbf16>
    %cst_8 = arith.constant dense<0.000000e+00> : vector<2x64xf32>
    %11 = tpu.matmul %9, %10, %cst_8 {dimension_numbers = #tpu.dot_dimension_numbers<[1], [0], [0], [1], [0, 0, 1, 1], [], []>} : vector<2x64xbf16>, vector<64x64xbf16>, vector<2x64xf32> -> vector<2x64xf32>
    %c0_9 = arith.constant 0 : index
    %c0_10 = arith.constant 0 : index
    %12 = vector.load %arg5[%c0_9, %c0_10] : memref<1x64xf32, #tpu.memory_space<vmem>>, vector<1x64xf32>
    %13 = vector.broadcast %12 : vector<1x64xf32> to vector<2x64xf32>
    %14 = arith.addf %11, %13 : vector<2x64xf32>
    %15 = arith.negf %14 : vector<2x64xf32>
    %16 = math.exp %15 : vector<2x64xf32>
    %cst_11 = arith.constant 1.000000e+00 : f32
    %17 = vector.broadcast %cst_11 : f32 to vector<2x64xf32>
    %18 = arith.addf %17, %16 : vector<2x64xf32>
    %19 = arith.divf %17, %18 : vector<2x64xf32>
    %c0_12 = arith.constant 0 : index
    %c0_13 = arith.constant 0 : index
    %20 = vector.load %arg6[%c0_12, %c0_13] : memref<2x64xf32, #tpu.memory_space<vmem>>, vector<2x64xf32>
    tpu.vector_store %arg6[%c0_12, %c0_13], %19 {strides = array<i32>} : memref<2x64xf32, #tpu.memory_space<vmem>>, vector<2x64xf32>,
    return
  }
  func.func @transform_0(%arg0: i32) -> (i32, i32) {
    %c0_i32 = arith.constant 0 : i32
    %c0_i32_0 = arith.constant 0 : i32
    %c0_i32_1 = arith.constant 0 : i32
    return %c0_i32, %c0_i32_0 : i32, i32
  }
  func.func @transform_1(%arg0: i32) -> (i32, i32) {
    %c0_i32 = arith.constant 0 : i32
    %c0_i32_0 = arith.constant 0 : i32
    %c0_i32_1 = arith.constant 0 : i32
    return %c0_i32, %c0_i32_0 : i32, i32
  }
  func.func @transform_2(%arg0: i32) -> (i32, i32) {
    %c0_i32 = arith.constant 0 : i32
    %c0_i32_0 = arith.constant 0 : i32
    %c0_i32_1 = arith.constant 0 : i32
    return %c0_i32, %c0_i32_0 : i32, i32
  }
  func.func @transform_3(%arg0: i32) -> (i32, i32) {
    %c0_i32 = arith.constant 0 : i32
    %c0_i32_0 = arith.constant 0 : i32
    %c0_i32_1 = arith.constant 0 : i32
    return %c0_i32, %c0_i32_0 : i32, i32
  }
  func.func @transform_4(%arg0: i32) -> (i32, i32) {
    %c0_i32 = arith.constant 0 : i32
    %c0_i32_0 = arith.constant 0 : i32
    %c0_i32_1 = arith.constant 0 : i32
    return %c0_i32, %c0_i32_0 : i32, i32
  }
  func.func @transform_5(%arg0: i32) -> (i32, i32) {
    %c0_i32 = arith.constant 0 : i32
    %c0_i32_0 = arith.constant 0 : i32
    %c0_i32_1 = arith.constant 0 : i32
    return %c0_i32, %c0_i32_0 : i32, i32
  }
}

module attributes {stable_mosaic.version = 11 : i64} {
  func.func @_scale_mm_kernel(%arg0: i32, %arg1: i32, %arg2: memref<1x1x64xbf16, #tpu.memory_space<vmem>>, %arg3: memref<1x1x64xf32, #tpu.memory_space<vmem>>, %arg4: memref<64x32xbf16, #tpu.memory_space<vmem>>, %arg5: memref<1x32xf32, #tpu.memory_space<vmem>>, %arg6: memref<1x1x32xbf16, #tpu.memory_space<vmem>>) attributes {dimension_semantics = [#tpu.dimension_semantics<parallel>, #tpu.dimension_semantics<parallel>], iteration_bounds = array<i64: 2, 1>, scalar_prefetch = 0 : i64, scratch_operands = 0 : i64, tpu.core_type = #tpu.core_type<tc>, window_params = [{transform_indices = @transform_0, window_bounds = array<i64: 1, 1, 64>}, {transform_indices = @transform_1, window_bounds = array<i64: 1, 1, 64>}, {pipeline_mode = #tpu.pipeline_mode<synchronous>, transform_indices = @transform_2, window_bounds = array<i64: 64, 32>}, {pipeline_mode = #tpu.pipeline_mode<synchronous>, transform_indices = @transform_3, window_bounds = array<i64: 1, 32>}, {transform_indices = @transform_4, window_bounds = array<i64: 1, 1, 32>}]} {
    %c0 = arith.constant 0 : index
    %c0_0 = arith.constant 0 : index
    %c0_1 = arith.constant 0 : index
    %0 = vector.load %arg2[%c0, %c0_0, %c0_1] : memref<1x1x64xbf16, #tpu.memory_space<vmem>>, vector<1x1x64xbf16>
    %1 = vector.shape_cast %0 : vector<1x1x64xbf16> to vector<1x64xbf16>
    %2 = arith.extf %1 : vector<1x64xbf16> to vector<1x64xf32>
    %c0_2 = arith.constant 0 : index
    %c0_3 = arith.constant 0 : index
    %c0_4 = arith.constant 0 : index
    %3 = vector.load %arg3[%c0_2, %c0_3, %c0_4] : memref<1x1x64xf32, #tpu.memory_space<vmem>>, vector<1x1x64xf32>
    %4 = vector.shape_cast %3 : vector<1x1x64xf32> to vector<1x64xf32>
    %5 = arith.mulf %2, %4 : vector<1x64xf32>
    %6 = arith.truncf %5 : vector<1x64xf32> to vector<1x64xbf16>
    %c0_5 = arith.constant 0 : index
    %c0_6 = arith.constant 0 : index
    %7 = vector.load %arg4[%c0_5, %c0_6] : memref<64x32xbf16, #tpu.memory_space<vmem>>, vector<64x32xbf16>
    %cst = arith.constant dense<0.000000e+00> : vector<1x32xf32>
    %8 = tpu.matmul %6, %7, %cst {dimension_numbers = #tpu.dot_dimension_numbers<[1], [0], [0], [1], [0, 0, 1, 1], [], []>} : vector<1x64xbf16>, vector<64x32xbf16>, vector<1x32xf32> -> vector<1x32xf32>
    %c0_7 = arith.constant 0 : index
    %c0_8 = arith.constant 0 : index
    %9 = vector.load %arg5[%c0_7, %c0_8] : memref<1x32xf32, #tpu.memory_space<vmem>>, vector<1x32xf32>
    %10 = arith.addf %8, %9 : vector<1x32xf32>
    %cst_9 = arith.constant 0.000000e+00 : f32
    %11 = vector.broadcast %cst_9 : f32 to vector<1x32xf32>
    %12 = arith.maximumf %10, %11 : vector<1x32xf32>
    %13 = arith.truncf %12 : vector<1x32xf32> to vector<1x32xbf16>
    %c0_10 = arith.constant 0 : index
    %c0_11 = arith.constant 0 : index
    %c0_12 = arith.constant 0 : index
    %14 = vector.load %arg6[%c0_10, %c0_11, %c0_12] : memref<1x1x32xbf16, #tpu.memory_space<vmem>>, vector<1x1x32xbf16>
    %15 = vector.shape_cast %14 : vector<1x1x32xbf16> to vector<1x32xbf16>
    %16 = vector.shape_cast %13 : vector<1x32xbf16> to vector<1x1x32xbf16>
    tpu.vector_store %arg6[%c0_10, %c0_11, %c0_12], %16 {strides = array<i32>} : memref<1x1x32xbf16, #tpu.memory_space<vmem>>, vector<1x1x32xbf16>,
    return
  }
  func.func @transform_0(%arg0: i32, %arg1: i32) -> (i32, i32, i32) {
    %c0_i32 = arith.constant 0 : i32
    %c0_i32_0 = arith.constant 0 : i32
    return %arg0, %arg1, %c0_i32 : i32, i32, i32
  }
  func.func @transform_1(%arg0: i32, %arg1: i32) -> (i32, i32, i32) {
    %c0_i32 = arith.constant 0 : i32
    %c0_i32_0 = arith.constant 0 : i32
    %c0_i32_1 = arith.constant 0 : i32
    return %arg0, %c0_i32, %c0_i32_0 : i32, i32, i32
  }
  func.func @transform_2(%arg0: i32, %arg1: i32) -> (i32, i32) {
    %c0_i32 = arith.constant 0 : i32
    %c0_i32_0 = arith.constant 0 : i32
    %c0_i32_1 = arith.constant 0 : i32
    return %c0_i32, %c0_i32_0 : i32, i32
  }
  func.func @transform_3(%arg0: i32, %arg1: i32) -> (i32, i32) {
    %c0_i32 = arith.constant 0 : i32
    %c0_i32_0 = arith.constant 0 : i32
    %c0_i32_1 = arith.constant 0 : i32
    return %c0_i32, %c0_i32_0 : i32, i32
  }
  func.func @transform_4(%arg0: i32, %arg1: i32) -> (i32, i32, i32) {
    %c0_i32 = arith.constant 0 : i32
    %c0_i32_0 = arith.constant 0 : i32
    return %arg0, %arg1, %c0_i32 : i32, i32, i32
  }
}

module attributes {stable_mosaic.version = 11 : i64} {
  func.func @_mm_kernel(%arg0: i32, %arg1: memref<8x256xbf16, #tpu.memory_space<vmem>>, %arg2: memref<256x128xbf16, #tpu.memory_space<vmem>>, %arg3: memref<1x128xf32, #tpu.memory_space<vmem>>, %arg4: memref<8x128xbf16, #tpu.memory_space<vmem>>) attributes {dimension_semantics = [#tpu.dimension_semantics<parallel>], iteration_bounds = array<i64: 1>, scalar_prefetch = 0 : i64, scratch_operands = 0 : i64, tpu.core_type = #tpu.core_type<tc>, window_params = [{transform_indices = @transform_0, window_bounds = array<i64: 8, 256>}, {pipeline_mode = #tpu.pipeline_mode<synchronous>, transform_indices = @transform_1, window_bounds = array<i64: 256, 128>}, {pipeline_mode = #tpu.pipeline_mode<synchronous>, transform_indices = @transform_2, window_bounds = array<i64: 1, 128>}, {transform_indices = @transform_3, window_bounds = array<i64: 8, 128>}]} {
    %c0 = arith.constant 0 : index
    %c0_0 = arith.constant 0 : index
    %0 = vector.load %arg1[%c0, %c0_0] : memref<8x256xbf16, #tpu.memory_space<vmem>>, vector<8x256xbf16>
    %c0_1 = arith.constant 0 : index
    %c0_2 = arith.constant 0 : index
    %1 = vector.load %arg2[%c0_1, %c0_2] : memref<256x128xbf16, #tpu.memory_space<vmem>>, vector<256x128xbf16>
    %cst = arith.constant dense<0.000000e+00> : vector<8x128xf32>
    %2 = tpu.matmul %0, %1, %cst {dimension_numbers = #tpu.dot_dimension_numbers<[1], [0], [0], [1], [0, 0, 1, 1], [], []>} : vector<8x256xbf16>, vector<256x128xbf16>, vector<8x128xf32> -> vector<8x128xf32>
    %c0_3 = arith.constant 0 : index
    %c0_4 = arith.constant 0 : index
    %3 = vector.load %arg3[%c0_3, %c0_4] : memref<1x128xf32, #tpu.memory_space<vmem>>, vector<1x128xf32>
    %4 = vector.broadcast %3 : vector<1x128xf32> to vector<8x128xf32>
    %5 = arith.addf %2, %4 : vector<8x128xf32>
    %cst_5 = arith.constant 0.000000e+00 : f32
    %6 = vector.broadcast %cst_5 : f32 to vector<8x128xf32>
    %7 = arith.maximumf %5, %6 : vector<8x128xf32>
    %8 = arith.truncf %7 : vector<8x128xf32> to vector<8x128xbf16>
    %c0_6 = arith.constant 0 : index
    %c0_7 = arith.constant 0 : index
    %9 = vector.load %arg4[%c0_6, %c0_7] : memref<8x128xbf16, #tpu.memory_space<vmem>>, vector<8x128xbf16>
    tpu.vector_store %arg4[%c0_6, %c0_7], %8 {strides = array<i32>} : memref<8x128xbf16, #tpu.memory_space<vmem>>, vector<8x128xbf16>,
    return
  }
  func.func @transform_0(%arg0: i32) -> (i32, i32) {
    %c0_i32 = arith.constant 0 : i32
    %c0_i32_0 = arith.constant 0 : i32
    return %arg0, %c0_i32 : i32, i32
  }
  func.func @transform_1(%arg0: i32) -> (i32, i32) {
    %c0_i32 = arith.constant 0 : i32
    %c0_i32_0 = arith.constant 0 : i32
    %c0_i32_1 = arith.constant 0 : i32
    return %c0_i32, %c0_i32_0 : i32, i32
  }
  func.func @transform_2(%arg0: i32) -> (i32, i32) {
    %c0_i32 = arith.constant 0 : i32
    %c0_i32_0 = arith.constant 0 : i32
    %c0_i32_1 = arith.constant 0 : i32
    return %c0_i32, %c0_i32_0 : i32, i32
  }
  func.func @transform_3(%arg0: i32) -> (i32, i32) {
    %c0_i32 = arith.constant 0 : i32
    %c0_i32_0 = arith.constant 0 : i32
    return %arg0, %c0_i32 : i32, i32
  }
}

module attributes {stable_mosaic.version = 11 : i64} {
  func.func @_conv3x3_kernel(%arg0: i32, %arg1: memref<1x10x10x16xbf16, #tpu.memory_space<vmem>>, %arg2: memref<9x16x32xbf16, #tpu.memory_space<vmem>>, %arg3: memref<1x32xf32, #tpu.memory_space<vmem>>, %arg4: memref<1x64x32xbf16, #tpu.memory_space<vmem>>) attributes {dimension_semantics = [#tpu.dimension_semantics<parallel>], iteration_bounds = array<i64: 2>, scalar_prefetch = 0 : i64, scratch_operands = 0 : i64, tpu.core_type = #tpu.core_type<tc>, window_params = [{transform_indices = @transform_0, window_bounds = array<i64: 1, 10, 10, 16>}, {pipeline_mode = #tpu.pipeline_mode<synchronous>, transform_indices = @transform_1, window_bounds = array<i64: 9, 16, 32>}, {pipeline_mode = #tpu.pipeline_mode<synchronous>, transform_indices = @transform_2, window_bounds = array<i64: 1, 32>}, {transform_indices = @transform_3, window_bounds = array<i64: 1, 64, 32>}]} {
    %c0 = arith.constant 0 : index
    %c0_0 = arith.constant 0 : index
    %c0_1 = arith.constant 0 : index
    %c0_2 = arith.constant 0 : index
    %0 = vector.load %arg1[%c0, %c0_0, %c0_1, %c0_2] : memref<1x10x10x16xbf16, #tpu.memory_space<vmem>>, vector<1x8x8x16xbf16>
    %1 = vector.shape_cast %0 : vector<1x8x8x16xbf16> to vector<8x8x16xbf16>
    %2 = vector.shape_cast %1 : vector<8x8x16xbf16> to vector<64x16xbf16>
    %c0_3 = arith.constant 0 : index
    %c0_4 = arith.constant 0 : index
    %c0_5 = arith.constant 0 : index
    %3 = vector.load %arg2[%c0_3, %c0_4, %c0_5] : memref<9x16x32xbf16, #tpu.memory_space<vmem>>, vector<1x16x32xbf16>
    %4 = vector.shape_cast %3 : vector<1x16x32xbf16> to vector<16x32xbf16>
    %cst = arith.constant dense<0.000000e+00> : vector<64x32xf32>
    %5 = tpu.matmul %2, %4, %cst {dimension_numbers = #tpu.dot_dimension_numbers<[1], [0], [0], [1], [0, 0, 1, 1], [], []>} : vector<64x16xbf16>, vector<16x32xbf16>, vector<64x32xf32> -> vector<64x32xf32>
    %c0_6 = arith.constant 0 : index
    %c0_7 = arith.constant 0 : index
    %c1 = arith.constant 1 : index
    %c0_8 = arith.constant 0 : index
    %6 = vector.load %arg1[%c0_6, %c0_7, %c1, %c0_8] : memref<1x10x10x16xbf16, #tpu.memory_space<vmem>>, vector<1x8x8x16xbf16>
    %7 = vector.shape_cast %6 : vector<1x8x8x16xbf16> to vector<8x8x16xbf16>
    %8 = vector.shape_cast %7 : vector<8x8x16xbf16> to vector<64x16xbf16>
    %c1_9 = arith.constant 1 : index
    %c0_10 = arith.constant 0 : index
    %c0_11 = arith.constant 0 : index
    %9 = vector.load %arg2[%c1_9, %c0_10, %c0_11] : memref<9x16x32xbf16, #tpu.memory_space<vmem>>, vector<1x16x32xbf16>
    %10 = vector.shape_cast %9 : vector<1x16x32xbf16> to vector<16x32xbf16>
    %cst_12 = arith.constant dense<0.000000e+00> : vector<64x32xf32>
    %11 = tpu.matmul %8, %10, %cst_12 {dimension_numbers = #tpu.dot_dimension_numbers<[1], [0], [0], [1], [0, 0, 1, 1], [], []>} : vector<64x16xbf16>, vector<16x32xbf16>, vector<64x32xf32> -> vector<64x32xf32>
    %12 = arith.addf %5, %11 : vector<64x32xf32>
    %c0_13 = arith.constant 0 : index
    %c0_14 = arith.constant 0 : index
    %c2 = arith.constant 2 : index
    %c0_15 = arith.constant 0 : index
    %13 = vector.load %arg1[%c0_13, %c0_14, %c2, %c0_15] : memref<1x10x10x16xbf16, #tpu.memory_space<vmem>>, vector<1x8x8x16xbf16>
    %14 = vector.shape_cast %13 : vector<1x8x8x16xbf16> to vector<8x8x16xbf16>
    %15 = vector.shape_cast %14 : vector<8x8x16xbf16> to vector<64x16xbf16>
    %c2_16 = arith.constant 2 : index
    %c0_17 = arith.constant 0 : index
    %c0_18 = arith.constant 0 : index
    %16 = vector.load %arg2[%c2_16, %c0_17, %c0_18] : memref<9x16x32xbf16, #tpu.memory_space<vmem>>, vector<1x16x32xbf16>
    %17 = vector.shape_cast %16 : vector<1x16x32xbf16> to vector<16x32xbf16>
    %cst_19 = arith.constant dense<0.000000e+00> : vector<64x32xf32>
    %18 = tpu.matmul %15, %17, %cst_19 {dimension_numbers = #tpu.dot_dimension_numbers<[1], [0], [0], [1], [0, 0, 1, 1], [], []>} : vector<64x16xbf16>, vector<16x32xbf16>, vector<64x32xf32> -> vector<64x32xf32>
    %19 = arith.addf %12, %18 : vector<64x32xf32>
    %c0_20 = arith.constant 0 : index
    %c1_21 = arith.constant 1 : index
    %c0_22 = arith.constant 0 : index
    %c0_23 = arith.constant 0 : index
    %20 = vector.load %arg1[%c0_20, %c1_21, %c0_22, %c0_23] : memref<1x10x10x16xbf16, #tpu.memory_space<vmem>>, vector<1x8x8x16xbf16>
    %21 = vector.shape_cast %20 : vector<1x8x8x16xbf16> to vector<8x8x16xbf16>
    %22 = vector.shape_cast %21 : vector<8x8x16xbf16> to vector<64x16xbf16>
    %c3 = arith.constant 3 : index
    %c0_24 = arith.constant 0 : index
    %c0_25 = arith.constant 0 : index
    %23 = vector.load %arg2[%c3, %c0_24, %c0_25] : memref<9x16x32xbf16, #tpu.memory_space<vmem>>, vector<1x16x32xbf16>
    %24 = vector.shape_cast %23 : vector<1x16x32xbf16> to vector<16x32xbf16>
    %cst_26 = arith.constant dense<0.000000e+00> : vector<64x32xf32>
    %25 = tpu.matmul %22, %24, %cst_26 {dimension_numbers = #tpu.dot_dimension_numbers<[1], [0], [0], [1], [0, 0, 1, 1], [], []>} : vector<64x16xbf16>, vector<16x32xbf16>, vector<64x32xf32> -> vector<64x32xf32>
    %26 = arith.addf %19, %25 : vector<64x32xf32>
    %c0_27 = arith.constant 0 : index
    %c1_28 = arith.constant 1 : index
    %c1_29 = arith.constant 1 : index
    %c0_30 = arith.constant 0 : index
    %27 = vector.load %arg1[%c0_27, %c1_28, %c1_29, %c0_30] : memref<1x10x10x16xbf16, #tpu.memory_space<vmem>>, vector<1x8x8x16xbf16>
    %28 = vector.shape_cast %27 : vector<1x8x8x16xbf16> to vector<8x8x16xbf16>
    %29 = vector.shape_cast %28 : vector<8x8x16xbf16> to vector<64x16xbf16>
    %c4 = arith.constant 4 : index
    %c0_31 = arith.constant 0 : index
    %c0_32 = arith.constant 0 : index
    %30 = vector.load %arg2[%c4, %c0_31, %c0_32] : memref<9x16x32xbf16, #tpu.memory_space<vmem>>, vector<1x16x32xbf16>
    %31 = vector.shape_cast %30 : vector<1x16x32xbf16> to vector<16x32xbf16>
    %cst_33 = arith.constant dense<0.000000e+00> : vector<64x32xf32>
    %32 = tpu.matmul %29, %31, %cst_33 {dimension_numbers = #tpu.dot_dimension_numbers<[1], [0], [0], [1], [0, 0, 1, 1], [], []>} : vector<64x16xbf16>, vector<16x32xbf16>, vector<64x32xf32> -> vector<64x32xf32>
    %33 = arith.addf %26, %32 : vector<64x32xf32>
    %c0_34 = arith.constant 0 : index
    %c1_35 = arith.constant 1 : index
    %c2_36 = arith.constant 2 : index
    %c0_37 = arith.constant 0 : index
    %34 = vector.load %arg1[%c0_34, %c1_35, %c2_36, %c0_37] : memref<1x10x10x16xbf16, #tpu.memory_space<vmem>>, vector<1x8x8x16xbf16>
    %35 = vector.shape_cast %34 : vector<1x8x8x16xbf16> to vector<8x8x16xbf16>
    %36 = vector.shape_cast %35 : vector<8x8x16xbf16> to vector<64x16xbf16>
    %c5 = arith.constant 5 : index
    %c0_38 = arith.constant 0 : index
    %c0_39 = arith.constant 0 : index
    %37 = vector.load %arg2[%c5, %c0_38, %c0_39] : memref<9x16x32xbf16, #tpu.memory_space<vmem>>, vector<1x16x32xbf16>
    %38 = vector.shape_cast %37 : vector<1x16x32xbf16> to vector<16x32xbf16>
    %cst_40 = arith.constant dense<0.000000e+00> : vector<64x32xf32>
    %39 = tpu.matmul %36, %38, %cst_40 {dimension_numbers = #tpu.dot_dimension_numbers<[1], [0], [0], [1], [0, 0, 1, 1], [], []>} : vector<64x16xbf16>, vector<16x32xbf16>, vector<64x32xf32> -> vector<64x32xf32>
    %40 = arith.addf %33, %39 : vector<64x32xf32>
    %c0_41 = arith.constant 0 : index
    %c2_42 = arith.constant 2 : index
    %c0_43 = arith.constant 0 : index
    %c0_44 = arith.constant 0 : index
    %41 = vector.load %arg1[%c0_41, %c2_42, %c0_43, %c0_44] : memref<1x10x10x16xbf16, #tpu.memory_space<vmem>>, vector<1x8x8x16xbf16>
    %42 = vector.shape_cast %41 : vector<1x8x8x16xbf16> to vector<8x8x16xbf16>
    %43 = vector.shape_cast %42 : vector<8x8x16xbf16> to vector<64x16xbf16>
    %c6 = arith.constant 6 : index
    %c0_45 = arith.constant 0 : index
    %c0_46 = arith.constant 0 : index
    %44 = vector.load %arg2[%c6, %c0_45, %c0_46] : memref<9x16x32xbf16, #tpu.memory_space<vmem>>, vector<1x16x32xbf16>
    %45 = vector.shape_cast %44 : vector<1x16x32xbf16> to vector<16x32xbf16>
    %cst_47 = arith.constant dense<0.000000e+00> : vector<64x32xf32>
    %46 = tpu.matmul %43, %45, %cst_47 {dimension_numbers = #tpu.dot_dimension_numbers<[1], [0], [0], [1], [0, 0, 1, 1], [], []>} : vector<64x16xbf16>, vector<16x32xbf16>, vector<64x32xf32> -> vector<64x32xf32>
    %47 = arith.addf %40, %46 : vector<64x32xf32>
    %c0_48 = arith.constant 0 : index
    %c2_49 = arith.constant 2 : index
    %c1_50 = arith.constant 1 : index
    %c0_51 = arith.constant 0 : index
    %48 = vector.load %arg1[%c0_48, %c2_49, %c1_50, %c0_51] : memref<1x10x10x16xbf16, #tpu.memory_space<vmem>>, vector<1x8x8x16xbf16>
    %49 = vector.shape_cast %48 : vector<1x8x8x16xbf16> to vector<8x8x16xbf16>
    %50 = vector.shape_cast %49 : vector<8x8x16xbf16> to vector<64x16xbf16>
    %c7 = arith.constant 7 : index
    %c0_52 = arith.constant 0 : index
    %c0_53 = arith.constant 0 : index
    %51 = vector.load %arg2[%c7, %c0_52, %c0_53] : memref<9x16x32xbf16, #tpu.memory_space<vmem>>, vector<1x16x32xbf16>
    %52 = vector.shape_cast %51 : vector<1x16x32xbf16> to vector<16x32xbf16>
    %cst_54 = arith.constant dense<0.000000e+00> : vector<64x32xf32>
    %53 = tpu.matmul %50, %52, %cst_54 {dimension_numbers = #tpu.dot_dimension_numbers<[1], [0], [0], [1], [0, 0, 1, 1], [], []>} : vector<64x16xbf16>, vector<16x32xbf16>, vector<64x32xf32> -> vector<64x32xf32>
    %54 = arith.addf %47, %53 : vector<64x32xf32>
    %c0_55 = arith.constant 0 : index
    %c2_56 = arith.constant 2 : index
    %c2_57 = arith.constant 2 : index
    %c0_58 = arith.constant 0 : index
    %55 = vector.load %arg1[%c0_55, %c2_56, %c2_57, %c0_58] : memref<1x10x10x16xbf16, #tpu.memory_space<vmem>>, vector<1x8x8x16xbf16>
    %56 = vector.shape_cast %55 : vector<1x8x8x16xbf16> to vector<8x8x16xbf16>
    %57 = vector.shape_cast %56 : vector<8x8x16xbf16> to vector<64x16xbf16>
    %c8 = arith.constant 8 : index
    %c0_59 = arith.constant 0 : index
    %c0_60 = arith.constant 0 : index
    %58 = vector.load %arg2[%c8, %c0_59, %c0_60] : memref<9x16x32xbf16, #tpu.memory_space<vmem>>, vector<1x16x32xbf16>
    %59 = vector.shape_cast %58 : vector<1x16x32xbf16> to vector<16x32xbf16>
    %cst_61 = arith.constant dense<0.000000e+00> : vector<64x32xf32>
    %60 = tpu.matmul %57, %59, %cst_61 {dimension_numbers = #tpu.dot_dimension_numbers<[1], [0], [0], [1], [0, 0, 1, 1], [], []>} : vector<64x16xbf16>, vector<16x32xbf16>, vector<64x32xf32> -> vector<64x32xf32>
    %61 = arith.addf %54, %60 : vector<64x32xf32>
    %c0_62 = arith.constant 0 : index
    %c0_63 = arith.constant 0 : index
    %62 = vector.load %arg3[%c0_62, %c0_63] : memref<1x32xf32, #tpu.memory_space<vmem>>, vector<1x32xf32>
    %63 = vector.broadcast %62 : vector<1x32xf32> to vector<64x32xf32>
    %64 = arith.addf %61, %63 : vector<64x32xf32>
    %cst_64 = arith.constant 0.000000e+00 : f32
    %65 = vector.broadcast %cst_64 : f32 to vector<64x32xf32>
    %66 = arith.maximumf %64, %65 : vector<64x32xf32>
    %67 = arith.truncf %66 : vector<64x32xf32> to vector<64x32xbf16>
    %c0_65 = arith.constant 0 : index
    %c0_66 = arith.constant 0 : index
    %c0_67 = arith.constant 0 : index
    %68 = vector.load %arg4[%c0_65, %c0_66, %c0_67] : memref<1x64x32xbf16, #tpu.memory_space<vmem>>, vector<1x64x32xbf16>
    %69 = vector.shape_cast %68 : vector<1x64x32xbf16> to vector<64x32xbf16>
    %70 = vector.shape_cast %67 : vector<64x32xbf16> to vector<1x64x32xbf16>
    tpu.vector_store %arg4[%c0_65, %c0_66, %c0_67], %70 {strides = array<i32>} : memref<1x64x32xbf16, #tpu.memory_space<vmem>>, vector<1x64x32xbf16>,
    return
  }
  func.func @transform_0(%arg0: i32) -> (i32, i32, i32, i32) {
    %c0_i32 = arith.constant 0 : i32
    %c0_i32_0 = arith.constant 0 : i32
    %c0_i32_1 = arith.constant 0 : i32
    %c0_i32_2 = arith.constant 0 : i32
    return %arg0, %c0_i32, %c0_i32_0, %c0_i32_1 : i32, i32, i32, i32
  }
  func.func @transform_1(%arg0: i32) -> (i32, i32, i32) {
    %c0_i32 = arith.constant 0 : i32
    %c0_i32_0 = arith.constant 0 : i32
    %c0_i32_1 = arith.constant 0 : i32
    %c0_i32_2 = arith.constant 0 : i32
    return %c0_i32, %c0_i32_0, %c0_i32_1 : i32, i32, i32
  }
  func.func @transform_2(%arg0: i32) -> (i32, i32) {
    %c0_i32 = arith.constant 0 : i32
    %c0_i32_0 = arith.constant 0 : i32
    %c0_i32_1 = arith.constant 0 : i32
    return %c0_i32, %c0_i32_0 : i32, i32
  }
  func.func @transform_3(%arg0: i32) -> (i32, i32, i32) {
    %c0_i32 = arith.constant 0 : i32
    %c0_i32_0 = arith.constant 0 : i32
    %c0_i32_1 = arith.constant 0 : i32
    return %arg0, %c0_i32, %c0_i32_0 : i32, i32, i32
  }
}

module attributes {stable_mosaic.version = 11 : i64} {
  func.func @_sba_fuse_kernel(%arg0: i32, %arg1: memref<32x128xbf16, #tpu.memory_space<vmem>>, %arg2: memref<32x128xbf16, #tpu.memory_space<vmem>>, %arg3: memref<256x256xbf16, #tpu.memory_space<vmem>>, %arg4: memref<1x256xf32, #tpu.memory_space<vmem>>, %arg5: memref<32x128xbf16, #tpu.memory_space<vmem>>) attributes {dimension_semantics = [#tpu.dimension_semantics<parallel>], iteration_bounds = array<i64: 1>, scalar_prefetch = 0 : i64, scratch_operands = 0 : i64, tpu.core_type = #tpu.core_type<tc>, window_params = [{transform_indices = @transform_0, window_bounds = array<i64: 32, 128>}, {transform_indices = @transform_1, window_bounds = array<i64: 32, 128>}, {pipeline_mode = #tpu.pipeline_mode<synchronous>, transform_indices = @transform_2, window_bounds = array<i64: 256, 256>}, {pipeline_mode = #tpu.pipeline_mode<synchronous>, transform_indices = @transform_3, window_bounds = array<i64: 1, 256>}, {transform_indices = @transform_4, window_bounds = array<i64: 32, 128>}]} {
    %c0 = arith.constant 0 : index
    %c0_0 = arith.constant 0 : index
    %0 = vector.load %arg1[%c0, %c0_0] : memref<32x128xbf16, #tpu.memory_space<vmem>>, vector<32x128xbf16>
    %c0_1 = arith.constant 0 : index
    %c0_2 = arith.constant 0 : index
    %1 = vector.load %arg2[%c0_1, %c0_2] : memref<32x128xbf16, #tpu.memory_space<vmem>>, vector<32x128xbf16>
    %2 = tpu.concatenate %0, %1 in 1 : vector<32x128xbf16>, vector<32x128xbf16> -> vector<32x256xbf16>
    %c0_3 = arith.constant 0 : index
    %c0_4 = arith.constant 0 : index
    %3 = vector.load %arg3[%c0_3, %c0_4] : memref<256x256xbf16, #tpu.memory_space<vmem>>, vector<256x256xbf16>
    %cst = arith.constant dense<0.000000e+00> : vector<32x256xf32>
    %4 = tpu.matmul %2, %3, %cst {dimension_numbers = #tpu.dot_dimension_numbers<[1], [0], [0], [1], [0, 0, 1, 1], [], []>} : vector<32x256xbf16>, vector<256x256xbf16>, vector<32x256xf32> -> vector<32x256xf32>
    %c0_5 = arith.constant 0 : index
    %c0_6 = arith.constant 0 : index
    %5 = vector.load %arg4[%c0_5, %c0_6] : memref<1x256xf32, #tpu.memory_space<vmem>>, vector<1x256xf32>
    %6 = vector.broadcast %5 : vector<1x256xf32> to vector<32x256xf32>
    %7 = arith.addf %4, %6 : vector<32x256xf32>
    %8 = arith.extf %2 : vector<32x256xbf16> to vector<32x256xf32>
    %9 = arith.negf %7 : vector<32x256xf32>
    %10 = math.exp %9 : vector<32x256xf32>
    %cst_7 = arith.constant 1.000000e+00 : f32
    %11 = vector.broadcast %cst_7 : f32 to vector<32x256xf32>
    %12 = arith.addf %11, %10 : vector<32x256xf32>
    %13 = arith.divf %11, %12 : vector<32x256xf32>
    %14 = arith.mulf %8, %13 : vector<32x256xf32>
    %15 = vector.extract_strided_slice %14 {offsets = [0, 0], sizes = [32, 128], strides = [1, 1]} : vector<32x256xf32> to vector<32x128xf32>
    %16 = vector.extract_strided_slice %14 {offsets = [0, 128], sizes = [32, 128], strides = [1, 1]} : vector<32x256xf32> to vector<32x128xf32>
    %17 = arith.addf %15, %16 : vector<32x128xf32>
    %18 = arith.truncf %17 : vector<32x128xf32> to vector<32x128xbf16>
    %c0_8 = arith.constant 0 : index
    %c0_9 = arith.constant 0 : index
    %19 = vector.load %arg5[%c0_8, %c0_9] : memref<32x128xbf16, #tpu.memory_space<vmem>>, vector<32x128xbf16>
    tpu.vector_store %arg5[%c0_8, %c0_9], %18 {strides = array<i32>} : memref<32x128xbf16, #tpu.memory_space<vmem>>, vector<32x128xbf16>,
    return
  }
  func.func @transform_0(%arg0: i32) -> (i32, i32) {
    %c0_i32 = arith.constant 0 : i32
    %c0_i32_0 = arith.constant 0 : i32
    return %arg0, %c0_i32 : i32, i32
  }
  func.func @transform_1(%arg0: i32) -> (i32, i32) {
    %c0_i32 = arith.constant 0 : i32
    %c0_i32_0 = arith.constant 0 : i32
    return %arg0, %c0_i32 : i32, i32
  }
  func.func @transform_2(%arg0: i32) -> (i32, i32) {
    %c0_i32 = arith.constant 0 : i32
    %c0_i32_0 = arith.constant 0 : i32
    %c0_i32_1 = arith.constant 0 : i32
    return %c0_i32, %c0_i32_0 : i32, i32
  }
  func.func @transform_3(%arg0: i32) -> (i32, i32) {
    %c0_i32 = arith.constant 0 : i32
    %c0_i32_0 = arith.constant 0 : i32
    %c0_i32_1 = arith.constant 0 : i32
    return %c0_i32, %c0_i32_0 : i32, i32
  }
  func.func @transform_4(%arg0: i32) -> (i32, i32) {
    %c0_i32 = arith.constant 0 : i32
    %c0_i32_0 = arith.constant 0 : i32
    return %arg0, %c0_i32 : i32, i32
  }
}

module attributes {stable_mosaic.version = 11 : i64} {
  func.func @_conv3x3_kernel(%arg0: i32, %arg1: memref<1x10x10x32xbf16, #tpu.memory_space<vmem>>, %arg2: memref<9x32x32xbf16, #tpu.memory_space<vmem>>, %arg3: memref<1x32xf32, #tpu.memory_space<vmem>>, %arg4: memref<1x64x32xbf16, #tpu.memory_space<vmem>>) attributes {dimension_semantics = [#tpu.dimension_semantics<parallel>], iteration_bounds = array<i64: 2>, scalar_prefetch = 0 : i64, scratch_operands = 0 : i64, tpu.core_type = #tpu.core_type<tc>, window_params = [{transform_indices = @transform_0, window_bounds = array<i64: 1, 10, 10, 32>}, {pipeline_mode = #tpu.pipeline_mode<synchronous>, transform_indices = @transform_1, window_bounds = array<i64: 9, 32, 32>}, {pipeline_mode = #tpu.pipeline_mode<synchronous>, transform_indices = @transform_2, window_bounds = array<i64: 1, 32>}, {transform_indices = @transform_3, window_bounds = array<i64: 1, 64, 32>}]} {
    %c0 = arith.constant 0 : index
    %c0_0 = arith.constant 0 : index
    %c0_1 = arith.constant 0 : index
    %c0_2 = arith.constant 0 : index
    %0 = vector.load %arg1[%c0, %c0_0, %c0_1, %c0_2] : memref<1x10x10x32xbf16, #tpu.memory_space<vmem>>, vector<1x8x8x32xbf16>
    %1 = vector.shape_cast %0 : vector<1x8x8x32xbf16> to vector<8x8x32xbf16>
    %2 = vector.shape_cast %1 : vector<8x8x32xbf16> to vector<64x32xbf16>
    %c0_3 = arith.constant 0 : index
    %c0_4 = arith.constant 0 : index
    %c0_5 = arith.constant 0 : index
    %3 = vector.load %arg2[%c0_3, %c0_4, %c0_5] : memref<9x32x32xbf16, #tpu.memory_space<vmem>>, vector<1x32x32xbf16>
    %4 = vector.shape_cast %3 : vector<1x32x32xbf16> to vector<32x32xbf16>
    %cst = arith.constant dense<0.000000e+00> : vector<64x32xf32>
    %5 = tpu.matmul %2, %4, %cst {dimension_numbers = #tpu.dot_dimension_numbers<[1], [0], [0], [1], [0, 0, 1, 1], [], []>} : vector<64x32xbf16>, vector<32x32xbf16>, vector<64x32xf32> -> vector<64x32xf32>
    %c0_6 = arith.constant 0 : index
    %c0_7 = arith.constant 0 : index
    %c1 = arith.constant 1 : index
    %c0_8 = arith.constant 0 : index
    %6 = vector.load %arg1[%c0_6, %c0_7, %c1, %c0_8] : memref<1x10x10x32xbf16, #tpu.memory_space<vmem>>, vector<1x8x8x32xbf16>
    %7 = vector.shape_cast %6 : vector<1x8x8x32xbf16> to vector<8x8x32xbf16>
    %8 = vector.shape_cast %7 : vector<8x8x32xbf16> to vector<64x32xbf16>
    %c1_9 = arith.constant 1 : index
    %c0_10 = arith.constant 0 : index
    %c0_11 = arith.constant 0 : index
    %9 = vector.load %arg2[%c1_9, %c0_10, %c0_11] : memref<9x32x32xbf16, #tpu.memory_space<vmem>>, vector<1x32x32xbf16>
    %10 = vector.shape_cast %9 : vector<1x32x32xbf16> to vector<32x32xbf16>
    %cst_12 = arith.constant dense<0.000000e+00> : vector<64x32xf32>
    %11 = tpu.matmul %8, %10, %cst_12 {dimension_numbers = #tpu.dot_dimension_numbers<[1], [0], [0], [1], [0, 0, 1, 1], [], []>} : vector<64x32xbf16>, vector<32x32xbf16>, vector<64x32xf32> -> vector<64x32xf32>
    %12 = arith.addf %5, %11 : vector<64x32xf32>
    %c0_13 = arith.constant 0 : index
    %c0_14 = arith.constant 0 : index
    %c2 = arith.constant 2 : index
    %c0_15 = arith.constant 0 : index
    %13 = vector.load %arg1[%c0_13, %c0_14, %c2, %c0_15] : memref<1x10x10x32xbf16, #tpu.memory_space<vmem>>, vector<1x8x8x32xbf16>
    %14 = vector.shape_cast %13 : vector<1x8x8x32xbf16> to vector<8x8x32xbf16>
    %15 = vector.shape_cast %14 : vector<8x8x32xbf16> to vector<64x32xbf16>
    %c2_16 = arith.constant 2 : index
    %c0_17 = arith.constant 0 : index
    %c0_18 = arith.constant 0 : index
    %16 = vector.load %arg2[%c2_16, %c0_17, %c0_18] : memref<9x32x32xbf16, #tpu.memory_space<vmem>>, vector<1x32x32xbf16>
    %17 = vector.shape_cast %16 : vector<1x32x32xbf16> to vector<32x32xbf16>
    %cst_19 = arith.constant dense<0.000000e+00> : vector<64x32xf32>
    %18 = tpu.matmul %15, %17, %cst_19 {dimension_numbers = #tpu.dot_dimension_numbers<[1], [0], [0], [1], [0, 0, 1, 1], [], []>} : vector<64x32xbf16>, vector<32x32xbf16>, vector<64x32xf32> -> vector<64x32xf32>
    %19 = arith.addf %12, %18 : vector<64x32xf32>
    %c0_20 = arith.constant 0 : index
    %c1_21 = arith.constant 1 : index
    %c0_22 = arith.constant 0 : index
    %c0_23 = arith.constant 0 : index
    %20 = vector.load %arg1[%c0_20, %c1_21, %c0_22, %c0_23] : memref<1x10x10x32xbf16, #tpu.memory_space<vmem>>, vector<1x8x8x32xbf16>
    %21 = vector.shape_cast %20 : vector<1x8x8x32xbf16> to vector<8x8x32xbf16>
    %22 = vector.shape_cast %21 : vector<8x8x32xbf16> to vector<64x32xbf16>
    %c3 = arith.constant 3 : index
    %c0_24 = arith.constant 0 : index
    %c0_25 = arith.constant 0 : index
    %23 = vector.load %arg2[%c3, %c0_24, %c0_25] : memref<9x32x32xbf16, #tpu.memory_space<vmem>>, vector<1x32x32xbf16>
    %24 = vector.shape_cast %23 : vector<1x32x32xbf16> to vector<32x32xbf16>
    %cst_26 = arith.constant dense<0.000000e+00> : vector<64x32xf32>
    %25 = tpu.matmul %22, %24, %cst_26 {dimension_numbers = #tpu.dot_dimension_numbers<[1], [0], [0], [1], [0, 0, 1, 1], [], []>} : vector<64x32xbf16>, vector<32x32xbf16>, vector<64x32xf32> -> vector<64x32xf32>
    %26 = arith.addf %19, %25 : vector<64x32xf32>
    %c0_27 = arith.constant 0 : index
    %c1_28 = arith.constant 1 : index
    %c1_29 = arith.constant 1 : index
    %c0_30 = arith.constant 0 : index
    %27 = vector.load %arg1[%c0_27, %c1_28, %c1_29, %c0_30] : memref<1x10x10x32xbf16, #tpu.memory_space<vmem>>, vector<1x8x8x32xbf16>
    %28 = vector.shape_cast %27 : vector<1x8x8x32xbf16> to vector<8x8x32xbf16>
    %29 = vector.shape_cast %28 : vector<8x8x32xbf16> to vector<64x32xbf16>
    %c4 = arith.constant 4 : index
    %c0_31 = arith.constant 0 : index
    %c0_32 = arith.constant 0 : index
    %30 = vector.load %arg2[%c4, %c0_31, %c0_32] : memref<9x32x32xbf16, #tpu.memory_space<vmem>>, vector<1x32x32xbf16>
    %31 = vector.shape_cast %30 : vector<1x32x32xbf16> to vector<32x32xbf16>
    %cst_33 = arith.constant dense<0.000000e+00> : vector<64x32xf32>
    %32 = tpu.matmul %29, %31, %cst_33 {dimension_numbers = #tpu.dot_dimension_numbers<[1], [0], [0], [1], [0, 0, 1, 1], [], []>} : vector<64x32xbf16>, vector<32x32xbf16>, vector<64x32xf32> -> vector<64x32xf32>
    %33 = arith.addf %26, %32 : vector<64x32xf32>
    %c0_34 = arith.constant 0 : index
    %c1_35 = arith.constant 1 : index
    %c2_36 = arith.constant 2 : index
    %c0_37 = arith.constant 0 : index
    %34 = vector.load %arg1[%c0_34, %c1_35, %c2_36, %c0_37] : memref<1x10x10x32xbf16, #tpu.memory_space<vmem>>, vector<1x8x8x32xbf16>
    %35 = vector.shape_cast %34 : vector<1x8x8x32xbf16> to vector<8x8x32xbf16>
    %36 = vector.shape_cast %35 : vector<8x8x32xbf16> to vector<64x32xbf16>
    %c5 = arith.constant 5 : index
    %c0_38 = arith.constant 0 : index
    %c0_39 = arith.constant 0 : index
    %37 = vector.load %arg2[%c5, %c0_38, %c0_39] : memref<9x32x32xbf16, #tpu.memory_space<vmem>>, vector<1x32x32xbf16>
    %38 = vector.shape_cast %37 : vector<1x32x32xbf16> to vector<32x32xbf16>
    %cst_40 = arith.constant dense<0.000000e+00> : vector<64x32xf32>
    %39 = tpu.matmul %36, %38, %cst_40 {dimension_numbers = #tpu.dot_dimension_numbers<[1], [0], [0], [1], [0, 0, 1, 1], [], []>} : vector<64x32xbf16>, vector<32x32xbf16>, vector<64x32xf32> -> vector<64x32xf32>
    %40 = arith.addf %33, %39 : vector<64x32xf32>
    %c0_41 = arith.constant 0 : index
    %c2_42 = arith.constant 2 : index
    %c0_43 = arith.constant 0 : index
    %c0_44 = arith.constant 0 : index
    %41 = vector.load %arg1[%c0_41, %c2_42, %c0_43, %c0_44] : memref<1x10x10x32xbf16, #tpu.memory_space<vmem>>, vector<1x8x8x32xbf16>
    %42 = vector.shape_cast %41 : vector<1x8x8x32xbf16> to vector<8x8x32xbf16>
    %43 = vector.shape_cast %42 : vector<8x8x32xbf16> to vector<64x32xbf16>
    %c6 = arith.constant 6 : index
    %c0_45 = arith.constant 0 : index
    %c0_46 = arith.constant 0 : index
    %44 = vector.load %arg2[%c6, %c0_45, %c0_46] : memref<9x32x32xbf16, #tpu.memory_space<vmem>>, vector<1x32x32xbf16>
    %45 = vector.shape_cast %44 : vector<1x32x32xbf16> to vector<32x32xbf16>
    %cst_47 = arith.constant dense<0.000000e+00> : vector<64x32xf32>
    %46 = tpu.matmul %43, %45, %cst_47 {dimension_numbers = #tpu.dot_dimension_numbers<[1], [0], [0], [1], [0, 0, 1, 1], [], []>} : vector<64x32xbf16>, vector<32x32xbf16>, vector<64x32xf32> -> vector<64x32xf32>
    %47 = arith.addf %40, %46 : vector<64x32xf32>
    %c0_48 = arith.constant 0 : index
    %c2_49 = arith.constant 2 : index
    %c1_50 = arith.constant 1 : index
    %c0_51 = arith.constant 0 : index
    %48 = vector.load %arg1[%c0_48, %c2_49, %c1_50, %c0_51] : memref<1x10x10x32xbf16, #tpu.memory_space<vmem>>, vector<1x8x8x32xbf16>
    %49 = vector.shape_cast %48 : vector<1x8x8x32xbf16> to vector<8x8x32xbf16>
    %50 = vector.shape_cast %49 : vector<8x8x32xbf16> to vector<64x32xbf16>
    %c7 = arith.constant 7 : index
    %c0_52 = arith.constant 0 : index
    %c0_53 = arith.constant 0 : index
    %51 = vector.load %arg2[%c7, %c0_52, %c0_53] : memref<9x32x32xbf16, #tpu.memory_space<vmem>>, vector<1x32x32xbf16>
    %52 = vector.shape_cast %51 : vector<1x32x32xbf16> to vector<32x32xbf16>
    %cst_54 = arith.constant dense<0.000000e+00> : vector<64x32xf32>
    %53 = tpu.matmul %50, %52, %cst_54 {dimension_numbers = #tpu.dot_dimension_numbers<[1], [0], [0], [1], [0, 0, 1, 1], [], []>} : vector<64x32xbf16>, vector<32x32xbf16>, vector<64x32xf32> -> vector<64x32xf32>
    %54 = arith.addf %47, %53 : vector<64x32xf32>
    %c0_55 = arith.constant 0 : index
    %c2_56 = arith.constant 2 : index
    %c2_57 = arith.constant 2 : index
    %c0_58 = arith.constant 0 : index
    %55 = vector.load %arg1[%c0_55, %c2_56, %c2_57, %c0_58] : memref<1x10x10x32xbf16, #tpu.memory_space<vmem>>, vector<1x8x8x32xbf16>
    %56 = vector.shape_cast %55 : vector<1x8x8x32xbf16> to vector<8x8x32xbf16>
    %57 = vector.shape_cast %56 : vector<8x8x32xbf16> to vector<64x32xbf16>
    %c8 = arith.constant 8 : index
    %c0_59 = arith.constant 0 : index
    %c0_60 = arith.constant 0 : index
    %58 = vector.load %arg2[%c8, %c0_59, %c0_60] : memref<9x32x32xbf16, #tpu.memory_space<vmem>>, vector<1x32x32xbf16>
    %59 = vector.shape_cast %58 : vector<1x32x32xbf16> to vector<32x32xbf16>
    %cst_61 = arith.constant dense<0.000000e+00> : vector<64x32xf32>
    %60 = tpu.matmul %57, %59, %cst_61 {dimension_numbers = #tpu.dot_dimension_numbers<[1], [0], [0], [1], [0, 0, 1, 1], [], []>} : vector<64x32xbf16>, vector<32x32xbf16>, vector<64x32xf32> -> vector<64x32xf32>
    %61 = arith.addf %54, %60 : vector<64x32xf32>
    %c0_62 = arith.constant 0 : index
    %c0_63 = arith.constant 0 : index
    %62 = vector.load %arg3[%c0_62, %c0_63] : memref<1x32xf32, #tpu.memory_space<vmem>>, vector<1x32xf32>
    %63 = vector.broadcast %62 : vector<1x32xf32> to vector<64x32xf32>
    %64 = arith.addf %61, %63 : vector<64x32xf32>
    %cst_64 = arith.constant 0.000000e+00 : f32
    %65 = vector.broadcast %cst_64 : f32 to vector<64x32xf32>
    %66 = arith.maximumf %64, %65 : vector<64x32xf32>
    %67 = arith.truncf %66 : vector<64x32xf32> to vector<64x32xbf16>
    %c0_65 = arith.constant 0 : index
    %c0_66 = arith.constant 0 : index
    %c0_67 = arith.constant 0 : index
    %68 = vector.load %arg4[%c0_65, %c0_66, %c0_67] : memref<1x64x32xbf16, #tpu.memory_space<vmem>>, vector<1x64x32xbf16>
    %69 = vector.shape_cast %68 : vector<1x64x32xbf16> to vector<64x32xbf16>
    %70 = vector.shape_cast %67 : vector<64x32xbf16> to vector<1x64x32xbf16>
    tpu.vector_store %arg4[%c0_65, %c0_66, %c0_67], %70 {strides = array<i32>} : memref<1x64x32xbf16, #tpu.memory_space<vmem>>, vector<1x64x32xbf16>,
    return
  }
  func.func @transform_0(%arg0: i32) -> (i32, i32, i32, i32) {
    %c0_i32 = arith.constant 0 : i32
    %c0_i32_0 = arith.constant 0 : i32
    %c0_i32_1 = arith.constant 0 : i32
    %c0_i32_2 = arith.constant 0 : i32
    return %arg0, %c0_i32, %c0_i32_0, %c0_i32_1 : i32, i32, i32, i32
  }
  func.func @transform_1(%arg0: i32) -> (i32, i32, i32) {
    %c0_i32 = arith.constant 0 : i32
    %c0_i32_0 = arith.constant 0 : i32
    %c0_i32_1 = arith.constant 0 : i32
    %c0_i32_2 = arith.constant 0 : i32
    return %c0_i32, %c0_i32_0, %c0_i32_1 : i32, i32, i32
  }
  func.func @transform_2(%arg0: i32) -> (i32, i32) {
    %c0_i32 = arith.constant 0 : i32
    %c0_i32_0 = arith.constant 0 : i32
    %c0_i32_1 = arith.constant 0 : i32
    return %c0_i32, %c0_i32_0 : i32, i32
  }
  func.func @transform_3(%arg0: i32) -> (i32, i32, i32) {
    %c0_i32 = arith.constant 0 : i32
    %c0_i32_0 = arith.constant 0 : i32
    %c0_i32_1 = arith.constant 0 : i32
    return %arg0, %c0_i32, %c0_i32_0 : i32, i32, i32
  }
}

module attributes {stable_mosaic.version = 11 : i64} {
  func.func @_mm_kernel(%arg0: i32, %arg1: memref<1x4096xbf16, #tpu.memory_space<vmem>>, %arg2: memref<4096x128xbf16, #tpu.memory_space<vmem>>, %arg3: memref<1x128xf32, #tpu.memory_space<vmem>>, %arg4: memref<1x128xf32, #tpu.memory_space<vmem>>) attributes {dimension_semantics = [#tpu.dimension_semantics<parallel>], iteration_bounds = array<i64: 1>, scalar_prefetch = 0 : i64, scratch_operands = 0 : i64, tpu.core_type = #tpu.core_type<tc>, window_params = [{transform_indices = @transform_0, window_bounds = array<i64: 1, 4096>}, {pipeline_mode = #tpu.pipeline_mode<synchronous>, transform_indices = @transform_1, window_bounds = array<i64: 4096, 128>}, {pipeline_mode = #tpu.pipeline_mode<synchronous>, transform_indices = @transform_2, window_bounds = array<i64: 1, 128>}, {transform_indices = @transform_3, window_bounds = array<i64: 1, 128>}]} {
    %c0 = arith.constant 0 : index
    %c0_0 = arith.constant 0 : index
    %0 = vector.load %arg1[%c0, %c0_0] : memref<1x4096xbf16, #tpu.memory_space<vmem>>, vector<1x4096xbf16>
    %c0_1 = arith.constant 0 : index
    %c0_2 = arith.constant 0 : index
    %1 = vector.load %arg2[%c0_1, %c0_2] : memref<4096x128xbf16, #tpu.memory_space<vmem>>, vector<4096x128xbf16>
    %cst = arith.constant dense<0.000000e+00> : vector<1x128xf32>
    %2 = tpu.matmul %0, %1, %cst {dimension_numbers = #tpu.dot_dimension_numbers<[1], [0], [0], [1], [0, 0, 1, 1], [], []>} : vector<1x4096xbf16>, vector<4096x128xbf16>, vector<1x128xf32> -> vector<1x128xf32>
    %c0_3 = arith.constant 0 : index
    %c0_4 = arith.constant 0 : index
    %3 = vector.load %arg3[%c0_3, %c0_4] : memref<1x128xf32, #tpu.memory_space<vmem>>, vector<1x128xf32>
    %4 = arith.addf %2, %3 : vector<1x128xf32>
    %cst_5 = arith.constant 0.000000e+00 : f32
    %5 = vector.broadcast %cst_5 : f32 to vector<1x128xf32>
    %6 = arith.maximumf %4, %5 : vector<1x128xf32>
    %c0_6 = arith.constant 0 : index
    %c0_7 = arith.constant 0 : index
    %7 = vector.load %arg4[%c0_6, %c0_7] : memref<1x128xf32, #tpu.memory_space<vmem>>, vector<1x128xf32>
    tpu.vector_store %arg4[%c0_6, %c0_7], %6 {strides = array<i32>} : memref<1x128xf32, #tpu.memory_space<vmem>>, vector<1x128xf32>,
    return
  }
  func.func @transform_0(%arg0: i32) -> (i32, i32) {
    %c0_i32 = arith.constant 0 : i32
    %c0_i32_0 = arith.constant 0 : i32
    return %arg0, %c0_i32 : i32, i32
  }
  func.func @transform_1(%arg0: i32) -> (i32, i32) {
    %c0_i32 = arith.constant 0 : i32
    %c0_i32_0 = arith.constant 0 : i32
    %c0_i32_1 = arith.constant 0 : i32
    return %c0_i32, %c0_i32_0 : i32, i32
  }
  func.func @transform_2(%arg0: i32) -> (i32, i32) {
    %c0_i32 = arith.constant 0 : i32
    %c0_i32_0 = arith.constant 0 : i32
    %c0_i32_1 = arith.constant 0 : i32
    return %c0_i32, %c0_i32_0 : i32, i32
  }
  func.func @transform_3(%arg0: i32) -> (i32, i32) {
    %c0_i32 = arith.constant 0 : i32
    %c0_i32_0 = arith.constant 0 : i32
    return %arg0, %c0_i32 : i32, i32
  }
}

module attributes {stable_mosaic.version = 11 : i64} {
  func.func @_conv3x3_kernel(%arg0: i32, %arg1: memref<1x6x6x32xbf16, #tpu.memory_space<vmem>>, %arg2: memref<9x32x16xbf16, #tpu.memory_space<vmem>>, %arg3: memref<1x16xf32, #tpu.memory_space<vmem>>, %arg4: memref<1x16x16xbf16, #tpu.memory_space<vmem>>, %arg5: memref<1x1x32xf32, #tpu.memory_space<vmem>>) attributes {dimension_semantics = [#tpu.dimension_semantics<parallel>], iteration_bounds = array<i64: 2>, scalar_prefetch = 0 : i64, scratch_operands = 0 : i64, tpu.core_type = #tpu.core_type<tc>, window_params = [{transform_indices = @transform_0, window_bounds = array<i64: 1, 6, 6, 32>}, {pipeline_mode = #tpu.pipeline_mode<synchronous>, transform_indices = @transform_1, window_bounds = array<i64: 9, 32, 16>}, {pipeline_mode = #tpu.pipeline_mode<synchronous>, transform_indices = @transform_2, window_bounds = array<i64: 1, 16>}, {transform_indices = @transform_3, window_bounds = array<i64: 1, 16, 16>}, {transform_indices = @transform_4, window_bounds = array<i64: 1, 1, 32>}]} {
    %c0 = arith.constant 0 : index
    %c0_0 = arith.constant 0 : index
    %c0_1 = arith.constant 0 : index
    %c0_2 = arith.constant 0 : index
    %0 = vector.load %arg1[%c0, %c0_0, %c0_1, %c0_2] : memref<1x6x6x32xbf16, #tpu.memory_space<vmem>>, vector<1x4x4x32xbf16>
    %1 = vector.shape_cast %0 : vector<1x4x4x32xbf16> to vector<4x4x32xbf16>
    %2 = vector.shape_cast %1 : vector<4x4x32xbf16> to vector<16x32xbf16>
    %c0_3 = arith.constant 0 : index
    %c0_4 = arith.constant 0 : index
    %c0_5 = arith.constant 0 : index
    %3 = vector.load %arg2[%c0_3, %c0_4, %c0_5] : memref<9x32x16xbf16, #tpu.memory_space<vmem>>, vector<1x32x16xbf16>
    %4 = vector.shape_cast %3 : vector<1x32x16xbf16> to vector<32x16xbf16>
    %cst = arith.constant dense<0.000000e+00> : vector<16x16xf32>
    %5 = tpu.matmul %2, %4, %cst {dimension_numbers = #tpu.dot_dimension_numbers<[1], [0], [0], [1], [0, 0, 1, 1], [], []>} : vector<16x32xbf16>, vector<32x16xbf16>, vector<16x16xf32> -> vector<16x16xf32>
    %c0_6 = arith.constant 0 : index
    %c0_7 = arith.constant 0 : index
    %c1 = arith.constant 1 : index
    %c0_8 = arith.constant 0 : index
    %6 = vector.load %arg1[%c0_6, %c0_7, %c1, %c0_8] : memref<1x6x6x32xbf16, #tpu.memory_space<vmem>>, vector<1x4x4x32xbf16>
    %7 = vector.shape_cast %6 : vector<1x4x4x32xbf16> to vector<4x4x32xbf16>
    %8 = vector.shape_cast %7 : vector<4x4x32xbf16> to vector<16x32xbf16>
    %c1_9 = arith.constant 1 : index
    %c0_10 = arith.constant 0 : index
    %c0_11 = arith.constant 0 : index
    %9 = vector.load %arg2[%c1_9, %c0_10, %c0_11] : memref<9x32x16xbf16, #tpu.memory_space<vmem>>, vector<1x32x16xbf16>
    %10 = vector.shape_cast %9 : vector<1x32x16xbf16> to vector<32x16xbf16>
    %cst_12 = arith.constant dense<0.000000e+00> : vector<16x16xf32>
    %11 = tpu.matmul %8, %10, %cst_12 {dimension_numbers = #tpu.dot_dimension_numbers<[1], [0], [0], [1], [0, 0, 1, 1], [], []>} : vector<16x32xbf16>, vector<32x16xbf16>, vector<16x16xf32> -> vector<16x16xf32>
    %12 = arith.addf %5, %11 : vector<16x16xf32>
    %c0_13 = arith.constant 0 : index
    %c0_14 = arith.constant 0 : index
    %c2 = arith.constant 2 : index
    %c0_15 = arith.constant 0 : index
    %13 = vector.load %arg1[%c0_13, %c0_14, %c2, %c0_15] : memref<1x6x6x32xbf16, #tpu.memory_space<vmem>>, vector<1x4x4x32xbf16>
    %14 = vector.shape_cast %13 : vector<1x4x4x32xbf16> to vector<4x4x32xbf16>
    %15 = vector.shape_cast %14 : vector<4x4x32xbf16> to vector<16x32xbf16>
    %c2_16 = arith.constant 2 : index
    %c0_17 = arith.constant 0 : index
    %c0_18 = arith.constant 0 : index
    %16 = vector.load %arg2[%c2_16, %c0_17, %c0_18] : memref<9x32x16xbf16, #tpu.memory_space<vmem>>, vector<1x32x16xbf16>
    %17 = vector.shape_cast %16 : vector<1x32x16xbf16> to vector<32x16xbf16>
    %cst_19 = arith.constant dense<0.000000e+00> : vector<16x16xf32>
    %18 = tpu.matmul %15, %17, %cst_19 {dimension_numbers = #tpu.dot_dimension_numbers<[1], [0], [0], [1], [0, 0, 1, 1], [], []>} : vector<16x32xbf16>, vector<32x16xbf16>, vector<16x16xf32> -> vector<16x16xf32>
    %19 = arith.addf %12, %18 : vector<16x16xf32>
    %c0_20 = arith.constant 0 : index
    %c1_21 = arith.constant 1 : index
    %c0_22 = arith.constant 0 : index
    %c0_23 = arith.constant 0 : index
    %20 = vector.load %arg1[%c0_20, %c1_21, %c0_22, %c0_23] : memref<1x6x6x32xbf16, #tpu.memory_space<vmem>>, vector<1x4x4x32xbf16>
    %21 = vector.shape_cast %20 : vector<1x4x4x32xbf16> to vector<4x4x32xbf16>
    %22 = vector.shape_cast %21 : vector<4x4x32xbf16> to vector<16x32xbf16>
    %c3 = arith.constant 3 : index
    %c0_24 = arith.constant 0 : index
    %c0_25 = arith.constant 0 : index
    %23 = vector.load %arg2[%c3, %c0_24, %c0_25] : memref<9x32x16xbf16, #tpu.memory_space<vmem>>, vector<1x32x16xbf16>
    %24 = vector.shape_cast %23 : vector<1x32x16xbf16> to vector<32x16xbf16>
    %cst_26 = arith.constant dense<0.000000e+00> : vector<16x16xf32>
    %25 = tpu.matmul %22, %24, %cst_26 {dimension_numbers = #tpu.dot_dimension_numbers<[1], [0], [0], [1], [0, 0, 1, 1], [], []>} : vector<16x32xbf16>, vector<32x16xbf16>, vector<16x16xf32> -> vector<16x16xf32>
    %26 = arith.addf %19, %25 : vector<16x16xf32>
    %c0_27 = arith.constant 0 : index
    %c1_28 = arith.constant 1 : index
    %c1_29 = arith.constant 1 : index
    %c0_30 = arith.constant 0 : index
    %27 = vector.load %arg1[%c0_27, %c1_28, %c1_29, %c0_30] : memref<1x6x6x32xbf16, #tpu.memory_space<vmem>>, vector<1x4x4x32xbf16>
    %28 = vector.shape_cast %27 : vector<1x4x4x32xbf16> to vector<4x4x32xbf16>
    %29 = vector.shape_cast %28 : vector<4x4x32xbf16> to vector<16x32xbf16>
    %c4 = arith.constant 4 : index
    %c0_31 = arith.constant 0 : index
    %c0_32 = arith.constant 0 : index
    %30 = vector.load %arg2[%c4, %c0_31, %c0_32] : memref<9x32x16xbf16, #tpu.memory_space<vmem>>, vector<1x32x16xbf16>
    %31 = vector.shape_cast %30 : vector<1x32x16xbf16> to vector<32x16xbf16>
    %cst_33 = arith.constant dense<0.000000e+00> : vector<16x16xf32>
    %32 = tpu.matmul %29, %31, %cst_33 {dimension_numbers = #tpu.dot_dimension_numbers<[1], [0], [0], [1], [0, 0, 1, 1], [], []>} : vector<16x32xbf16>, vector<32x16xbf16>, vector<16x16xf32> -> vector<16x16xf32>
    %33 = arith.addf %26, %32 : vector<16x16xf32>
    %c0_34 = arith.constant 0 : index
    %c1_35 = arith.constant 1 : index
    %c2_36 = arith.constant 2 : index
    %c0_37 = arith.constant 0 : index
    %34 = vector.load %arg1[%c0_34, %c1_35, %c2_36, %c0_37] : memref<1x6x6x32xbf16, #tpu.memory_space<vmem>>, vector<1x4x4x32xbf16>
    %35 = vector.shape_cast %34 : vector<1x4x4x32xbf16> to vector<4x4x32xbf16>
    %36 = vector.shape_cast %35 : vector<4x4x32xbf16> to vector<16x32xbf16>
    %c5 = arith.constant 5 : index
    %c0_38 = arith.constant 0 : index
    %c0_39 = arith.constant 0 : index
    %37 = vector.load %arg2[%c5, %c0_38, %c0_39] : memref<9x32x16xbf16, #tpu.memory_space<vmem>>, vector<1x32x16xbf16>
    %38 = vector.shape_cast %37 : vector<1x32x16xbf16> to vector<32x16xbf16>
    %cst_40 = arith.constant dense<0.000000e+00> : vector<16x16xf32>
    %39 = tpu.matmul %36, %38, %cst_40 {dimension_numbers = #tpu.dot_dimension_numbers<[1], [0], [0], [1], [0, 0, 1, 1], [], []>} : vector<16x32xbf16>, vector<32x16xbf16>, vector<16x16xf32> -> vector<16x16xf32>
    %40 = arith.addf %33, %39 : vector<16x16xf32>
    %c0_41 = arith.constant 0 : index
    %c2_42 = arith.constant 2 : index
    %c0_43 = arith.constant 0 : index
    %c0_44 = arith.constant 0 : index
    %41 = vector.load %arg1[%c0_41, %c2_42, %c0_43, %c0_44] : memref<1x6x6x32xbf16, #tpu.memory_space<vmem>>, vector<1x4x4x32xbf16>
    %42 = vector.shape_cast %41 : vector<1x4x4x32xbf16> to vector<4x4x32xbf16>
    %43 = vector.shape_cast %42 : vector<4x4x32xbf16> to vector<16x32xbf16>
    %c6 = arith.constant 6 : index
    %c0_45 = arith.constant 0 : index
    %c0_46 = arith.constant 0 : index
    %44 = vector.load %arg2[%c6, %c0_45, %c0_46] : memref<9x32x16xbf16, #tpu.memory_space<vmem>>, vector<1x32x16xbf16>
    %45 = vector.shape_cast %44 : vector<1x32x16xbf16> to vector<32x16xbf16>
    %cst_47 = arith.constant dense<0.000000e+00> : vector<16x16xf32>
    %46 = tpu.matmul %43, %45, %cst_47 {dimension_numbers = #tpu.dot_dimension_numbers<[1], [0], [0], [1], [0, 0, 1, 1], [], []>} : vector<16x32xbf16>, vector<32x16xbf16>, vector<16x16xf32> -> vector<16x16xf32>
    %47 = arith.addf %40, %46 : vector<16x16xf32>
    %c0_48 = arith.constant 0 : index
    %c2_49 = arith.constant 2 : index
    %c1_50 = arith.constant 1 : index
    %c0_51 = arith.constant 0 : index
    %48 = vector.load %arg1[%c0_48, %c2_49, %c1_50, %c0_51] : memref<1x6x6x32xbf16, #tpu.memory_space<vmem>>, vector<1x4x4x32xbf16>
    %49 = vector.shape_cast %48 : vector<1x4x4x32xbf16> to vector<4x4x32xbf16>
    %50 = vector.shape_cast %49 : vector<4x4x32xbf16> to vector<16x32xbf16>
    %c7 = arith.constant 7 : index
    %c0_52 = arith.constant 0 : index
    %c0_53 = arith.constant 0 : index
    %51 = vector.load %arg2[%c7, %c0_52, %c0_53] : memref<9x32x16xbf16, #tpu.memory_space<vmem>>, vector<1x32x16xbf16>
    %52 = vector.shape_cast %51 : vector<1x32x16xbf16> to vector<32x16xbf16>
    %cst_54 = arith.constant dense<0.000000e+00> : vector<16x16xf32>
    %53 = tpu.matmul %50, %52, %cst_54 {dimension_numbers = #tpu.dot_dimension_numbers<[1], [0], [0], [1], [0, 0, 1, 1], [], []>} : vector<16x32xbf16>, vector<32x16xbf16>, vector<16x16xf32> -> vector<16x16xf32>
    %54 = arith.addf %47, %53 : vector<16x16xf32>
    %c0_55 = arith.constant 0 : index
    %c2_56 = arith.constant 2 : index
    %c2_57 = arith.constant 2 : index
    %c0_58 = arith.constant 0 : index
    %55 = vector.load %arg1[%c0_55, %c2_56, %c2_57, %c0_58] : memref<1x6x6x32xbf16, #tpu.memory_space<vmem>>, vector<1x4x4x32xbf16>
    %56 = vector.shape_cast %55 : vector<1x4x4x32xbf16> to vector<4x4x32xbf16>
    %57 = vector.shape_cast %56 : vector<4x4x32xbf16> to vector<16x32xbf16>
    %c8 = arith.constant 8 : index
    %c0_59 = arith.constant 0 : index
    %c0_60 = arith.constant 0 : index
    %58 = vector.load %arg2[%c8, %c0_59, %c0_60] : memref<9x32x16xbf16, #tpu.memory_space<vmem>>, vector<1x32x16xbf16>
    %59 = vector.shape_cast %58 : vector<1x32x16xbf16> to vector<32x16xbf16>
    %cst_61 = arith.constant dense<0.000000e+00> : vector<16x16xf32>
    %60 = tpu.matmul %57, %59, %cst_61 {dimension_numbers = #tpu.dot_dimension_numbers<[1], [0], [0], [1], [0, 0, 1, 1], [], []>} : vector<16x32xbf16>, vector<32x16xbf16>, vector<16x16xf32> -> vector<16x16xf32>
    %61 = arith.addf %54, %60 : vector<16x16xf32>
    %c0_62 = arith.constant 0 : index
    %c0_63 = arith.constant 0 : index
    %62 = vector.load %arg3[%c0_62, %c0_63] : memref<1x16xf32, #tpu.memory_space<vmem>>, vector<1x16xf32>
    %63 = vector.broadcast %62 : vector<1x16xf32> to vector<16x16xf32>
    %64 = arith.addf %61, %63 : vector<16x16xf32>
    %cst_64 = arith.constant 0.000000e+00 : f32
    %65 = vector.broadcast %cst_64 : f32 to vector<16x16xf32>
    %66 = arith.maximumf %64, %65 : vector<16x16xf32>
    %67 = arith.truncf %66 : vector<16x16xf32> to vector<16x16xbf16>
    %c0_65 = arith.constant 0 : index
    %c0_66 = arith.constant 0 : index
    %c0_67 = arith.constant 0 : index
    %68 = vector.load %arg4[%c0_65, %c0_66, %c0_67] : memref<1x16x16xbf16, #tpu.memory_space<vmem>>, vector<1x16x16xbf16>
    %69 = vector.shape_cast %68 : vector<1x16x16xbf16> to vector<16x16xbf16>
    %70 = vector.shape_cast %67 : vector<16x16xbf16> to vector<1x16x16xbf16>
    tpu.vector_store %arg4[%c0_65, %c0_66, %c0_67], %70 {strides = array<i32>} : memref<1x16x16xbf16, #tpu.memory_space<vmem>>, vector<1x16x16xbf16>,
    %c0_68 = arith.constant 0 : index
    %c1_69 = arith.constant 1 : index
    %c1_70 = arith.constant 1 : index
    %c0_71 = arith.constant 0 : index
    %71 = vector.load %arg1[%c0_68, %c1_69, %c1_70, %c0_71] : memref<1x6x6x32xbf16, #tpu.memory_space<vmem>>, vector<1x4x4x32xbf16>
    %72 = vector.shape_cast %71 : vector<1x4x4x32xbf16> to vector<4x4x32xbf16>
    %73 = arith.extf %72 : vector<4x4x32xbf16> to vector<4x4x32xf32>
    %74 = vector.shape_cast %73 : vector<4x4x32xf32> to vector<16x32xf32>
    %cst_72 = arith.constant dense<0.000000e+00> : vector<32xf32>
    %75 = vector.multi_reduction <add>, %74, %cst_72 [0] : vector<16x32xf32> to vector<32xf32>
    %76 = vector.shape_cast %75 : vector<32xf32> to vector<1x32xf32>
    %cst_73 = arith.constant 1.600000e+01 : f32
    %77 = vector.broadcast %cst_73 : f32 to vector<1x32xf32>
    %78 = arith.divf %76, %77 : vector<1x32xf32>
    %c0_74 = arith.constant 0 : index
    %c0_75 = arith.constant 0 : index
    %c0_76 = arith.constant 0 : index
    %79 = vector.load %arg5[%c0_74, %c0_75, %c0_76] : memref<1x1x32xf32, #tpu.memory_space<vmem>>, vector<1x1x32xf32>
    %80 = vector.shape_cast %79 : vector<1x1x32xf32> to vector<1x32xf32>
    %81 = vector.shape_cast %78 : vector<1x32xf32> to vector<1x1x32xf32>
    tpu.vector_store %arg5[%c0_74, %c0_75, %c0_76], %81 {strides = array<i32>} : memref<1x1x32xf32, #tpu.memory_space<vmem>>, vector<1x1x32xf32>,
    return
  }
  func.func @transform_0(%arg0: i32) -> (i32, i32, i32, i32) {
    %c0_i32 = arith.constant 0 : i32
    %c0_i32_0 = arith.constant 0 : i32
    %c0_i32_1 = arith.constant 0 : i32
    %c0_i32_2 = arith.constant 0 : i32
    return %arg0, %c0_i32, %c0_i32_0, %c0_i32_1 : i32, i32, i32, i32
  }
  func.func @transform_1(%arg0: i32) -> (i32, i32, i32) {
    %c0_i32 = arith.constant 0 : i32
    %c0_i32_0 = arith.constant 0 : i32
    %c0_i32_1 = arith.constant 0 : i32
    %c0_i32_2 = arith.constant 0 : i32
    return %c0_i32, %c0_i32_0, %c0_i32_1 : i32, i32, i32
  }
  func.func @transform_2(%arg0: i32) -> (i32, i32) {
    %c0_i32 = arith.constant 0 : i32
    %c0_i32_0 = arith.constant 0 : i32
    %c0_i32_1 = arith.constant 0 : i32
    return %c0_i32, %c0_i32_0 : i32, i32
  }
  func.func @transform_3(%arg0: i32) -> (i32, i32, i32) {
    %c0_i32 = arith.constant 0 : i32
    %c0_i32_0 = arith.constant 0 : i32
    %c0_i32_1 = arith.constant 0 : i32
    return %arg0, %c0_i32, %c0_i32_0 : i32, i32, i32
  }
  func.func @transform_4(%arg0: i32) -> (i32, i32, i32) {
    %c0_i32 = arith.constant 0 : i32
    %c0_i32_0 = arith.constant 0 : i32
    %c0_i32_1 = arith.constant 0 : i32
    return %arg0, %c0_i32, %c0_i32_0 : i32, i32, i32
  }
}

module attributes {stable_mosaic.version = 11 : i64} {
  func.func @_glam_mlp_kernel(%arg0: i32, %arg1: memref<2x32xf32, #tpu.memory_space<vmem>>, %arg2: memref<32x16xbf16, #tpu.memory_space<vmem>>, %arg3: memref<1x16xf32, #tpu.memory_space<vmem>>, %arg4: memref<16x16xbf16, #tpu.memory_space<vmem>>, %arg5: memref<1x16xf32, #tpu.memory_space<vmem>>, %arg6: memref<2x16xf32, #tpu.memory_space<vmem>>) attributes {dimension_semantics = [#tpu.dimension_semantics<arbitrary>], iteration_bounds = array<i64: 1>, scalar_prefetch = 0 : i64, scratch_operands = 0 : i64, tpu.core_type = #tpu.core_type<tc>, window_params = [{pipeline_mode = #tpu.pipeline_mode<synchronous>, transform_indices = @transform_0, window_bounds = array<i64: 2, 32>}, {pipeline_mode = #tpu.pipeline_mode<synchronous>, transform_indices = @transform_1, window_bounds = array<i64: 32, 16>}, {pipeline_mode = #tpu.pipeline_mode<synchronous>, transform_indices = @transform_2, window_bounds = array<i64: 1, 16>}, {pipeline_mode = #tpu.pipeline_mode<synchronous>, transform_indices = @transform_3, window_bounds = array<i64: 16, 16>}, {pipeline_mode = #tpu.pipeline_mode<synchronous>, transform_indices = @transform_4, window_bounds = array<i64: 1, 16>}, {pipeline_mode = #tpu.pipeline_mode<synchronous>, transform_indices = @transform_5, window_bounds = array<i64: 2, 16>}]} {
    %c0 = arith.constant 0 : index
    %c0_0 = arith.constant 0 : index
    %0 = vector.load %arg1[%c0, %c0_0] : memref<2x32xf32, #tpu.memory_space<vmem>>, vector<2x32xf32>
    %1 = arith.truncf %0 : vector<2x32xf32> to vector<2x32xbf16>
    %c0_1 = arith.constant 0 : index
    %c0_2 = arith.constant 0 : index
    %2 = vector.load %arg2[%c0_1, %c0_2] : memref<32x16xbf16, #tpu.memory_space<vmem>>, vector<32x16xbf16>
    %cst = arith.constant dense<0.000000e+00> : vector<2x16xf32>
    %3 = tpu.matmul %1, %2, %cst {dimension_numbers = #tpu.dot_dimension_numbers<[1], [0], [0], [1], [0, 0, 1, 1], [], []>} : vector<2x32xbf16>, vector<32x16xbf16>, vector<2x16xf32> -> vector<2x16xf32>
    %c0_3 = arith.constant 0 : index
    %c0_4 = arith.constant 0 : index
    %4 = vector.load %arg3[%c0_3, %c0_4] : memref<1x16xf32, #tpu.memory_space<vmem>>, vector<1x16xf32>
    %5 = vector.broadcast %4 : vector<1x16xf32> to vector<2x16xf32>
    %6 = arith.addf %3, %5 : vector<2x16xf32>
    %cst_5 = arith.constant 0.000000e+00 : f32
    %7 = vector.broadcast %cst_5 : f32 to vector<2x16xf32>
    %8 = arith.maximumf %6, %7 : vector<2x16xf32>
    %9 = arith.truncf %8 : vector<2x16xf32> to vector<2x16xbf16>
    %c0_6 = arith.constant 0 : index
    %c0_7 = arith.constant 0 : index
    %10 = vector.load %arg4[%c0_6, %c0_7] : memref<16x16xbf16, #tpu.memory_space<vmem>>, vector<16x16xbf16>
    %cst_8 = arith.constant dense<0.000000e+00> : vector<2x16xf32>
    %11 = tpu.matmul %9, %10, %cst_8 {dimension_numbers = #tpu.dot_dimension_numbers<[1], [0], [0], [1], [0, 0, 1, 1], [], []>} : vector<2x16xbf16>, vector<16x16xbf16>, vector<2x16xf32> -> vector<2x16xf32>
    %c0_9 = arith.constant 0 : index
    %c0_10 = arith.constant 0 : index
    %12 = vector.load %arg5[%c0_9, %c0_10] : memref<1x16xf32, #tpu.memory_space<vmem>>, vector<1x16xf32>
    %13 = vector.broadcast %12 : vector<1x16xf32> to vector<2x16xf32>
    %14 = arith.addf %11, %13 : vector<2x16xf32>
    %15 = arith.negf %14 : vector<2x16xf32>
    %16 = math.exp %15 : vector<2x16xf32>
    %cst_11 = arith.constant 1.000000e+00 : f32
    %17 = vector.broadcast %cst_11 : f32 to vector<2x16xf32>
    %18 = arith.addf %17, %16 : vector<2x16xf32>
    %19 = arith.divf %17, %18 : vector<2x16xf32>
    %c0_12 = arith.constant 0 : index
    %c0_13 = arith.constant 0 : index
    %20 = vector.load %arg6[%c0_12, %c0_13] : memref<2x16xf32, #tpu.memory_space<vmem>>, vector<2x16xf32>
    tpu.vector_store %arg6[%c0_12, %c0_13], %19 {strides = array<i32>} : memref<2x16xf32, #tpu.memory_space<vmem>>, vector<2x16xf32>,
    return
  }
  func.func @transform_0(%arg0: i32) -> (i32, i32) {
    %c0_i32 = arith.constant 0 : i32
    %c0_i32_0 = arith.constant 0 : i32
    %c0_i32_1 = arith.constant 0 : i32
    return %c0_i32, %c0_i32_0 : i32, i32
  }
  func.func @transform_1(%arg0: i32) -> (i32, i32) {
    %c0_i32 = arith.constant 0 : i32
    %c0_i32_0 = arith.constant 0 : i32
    %c0_i32_1 = arith.constant 0 : i32
    return %c0_i32, %c0_i32_0 : i32, i32
  }
  func.func @transform_2(%arg0: i32) -> (i32, i32) {
    %c0_i32 = arith.constant 0 : i32
    %c0_i32_0 = arith.constant 0 : i32
    %c0_i32_1 = arith.constant 0 : i32
    return %c0_i32, %c0_i32_0 : i32, i32
  }
  func.func @transform_3(%arg0: i32) -> (i32, i32) {
    %c0_i32 = arith.constant 0 : i32
    %c0_i32_0 = arith.constant 0 : i32
    %c0_i32_1 = arith.constant 0 : i32
    return %c0_i32, %c0_i32_0 : i32, i32
  }
  func.func @transform_4(%arg0: i32) -> (i32, i32) {
    %c0_i32 = arith.constant 0 : i32
    %c0_i32_0 = arith.constant 0 : i32
    %c0_i32_1 = arith.constant 0 : i32
    return %c0_i32, %c0_i32_0 : i32, i32
  }
  func.func @transform_5(%arg0: i32) -> (i32, i32) {
    %c0_i32 = arith.constant 0 : i32
    %c0_i32_0 = arith.constant 0 : i32
    %c0_i32_1 = arith.constant 0 : i32
    return %c0_i32, %c0_i32_0 : i32, i32
  }
}

module attributes {stable_mosaic.version = 11 : i64} {
  func.func @_scale_mm_kernel(%arg0: i32, %arg1: i32, %arg2: memref<1x4x64xbf16, #tpu.memory_space<vmem>>, %arg3: memref<1x1x64xf32, #tpu.memory_space<vmem>>, %arg4: memref<64x128xbf16, #tpu.memory_space<vmem>>, %arg5: memref<1x128xf32, #tpu.memory_space<vmem>>, %arg6: memref<1x4x128xbf16, #tpu.memory_space<vmem>>) attributes {dimension_semantics = [#tpu.dimension_semantics<parallel>, #tpu.dimension_semantics<parallel>], iteration_bounds = array<i64: 2, 1>, scalar_prefetch = 0 : i64, scratch_operands = 0 : i64, tpu.core_type = #tpu.core_type<tc>, window_params = [{transform_indices = @transform_0, window_bounds = array<i64: 1, 4, 64>}, {transform_indices = @transform_1, window_bounds = array<i64: 1, 1, 64>}, {pipeline_mode = #tpu.pipeline_mode<synchronous>, transform_indices = @transform_2, window_bounds = array<i64: 64, 128>}, {pipeline_mode = #tpu.pipeline_mode<synchronous>, transform_indices = @transform_3, window_bounds = array<i64: 1, 128>}, {transform_indices = @transform_4, window_bounds = array<i64: 1, 4, 128>}]} {
    %c0 = arith.constant 0 : index
    %c0_0 = arith.constant 0 : index
    %c0_1 = arith.constant 0 : index
    %0 = vector.load %arg2[%c0, %c0_0, %c0_1] : memref<1x4x64xbf16, #tpu.memory_space<vmem>>, vector<1x4x64xbf16>
    %1 = vector.shape_cast %0 : vector<1x4x64xbf16> to vector<4x64xbf16>
    %2 = arith.extf %1 : vector<4x64xbf16> to vector<4x64xf32>
    %c0_2 = arith.constant 0 : index
    %c0_3 = arith.constant 0 : index
    %c0_4 = arith.constant 0 : index
    %3 = vector.load %arg3[%c0_2, %c0_3, %c0_4] : memref<1x1x64xf32, #tpu.memory_space<vmem>>, vector<1x1x64xf32>
    %4 = vector.shape_cast %3 : vector<1x1x64xf32> to vector<1x64xf32>
    %5 = vector.broadcast %4 : vector<1x64xf32> to vector<4x64xf32>
    %6 = arith.mulf %2, %5 : vector<4x64xf32>
    %7 = arith.truncf %6 : vector<4x64xf32> to vector<4x64xbf16>
    %c0_5 = arith.constant 0 : index
    %c0_6 = arith.constant 0 : index
    %8 = vector.load %arg4[%c0_5, %c0_6] : memref<64x128xbf16, #tpu.memory_space<vmem>>, vector<64x128xbf16>
    %cst = arith.constant dense<0.000000e+00> : vector<4x128xf32>
    %9 = tpu.matmul %7, %8, %cst {dimension_numbers = #tpu.dot_dimension_numbers<[1], [0], [0], [1], [0, 0, 1, 1], [], []>} : vector<4x64xbf16>, vector<64x128xbf16>, vector<4x128xf32> -> vector<4x128xf32>
    %c0_7 = arith.constant 0 : index
    %c0_8 = arith.constant 0 : index
    %10 = vector.load %arg5[%c0_7, %c0_8] : memref<1x128xf32, #tpu.memory_space<vmem>>, vector<1x128xf32>
    %11 = vector.broadcast %10 : vector<1x128xf32> to vector<4x128xf32>
    %12 = arith.addf %9, %11 : vector<4x128xf32>
    %cst_9 = arith.constant 0.000000e+00 : f32
    %13 = vector.broadcast %cst_9 : f32 to vector<4x128xf32>
    %14 = arith.maximumf %12, %13 : vector<4x128xf32>
    %15 = arith.truncf %14 : vector<4x128xf32> to vector<4x128xbf16>
    %c0_10 = arith.constant 0 : index
    %c0_11 = arith.constant 0 : index
    %c0_12 = arith.constant 0 : index
    %16 = vector.load %arg6[%c0_10, %c0_11, %c0_12] : memref<1x4x128xbf16, #tpu.memory_space<vmem>>, vector<1x4x128xbf16>
    %17 = vector.shape_cast %16 : vector<1x4x128xbf16> to vector<4x128xbf16>
    %18 = vector.shape_cast %15 : vector<4x128xbf16> to vector<1x4x128xbf16>
    tpu.vector_store %arg6[%c0_10, %c0_11, %c0_12], %18 {strides = array<i32>} : memref<1x4x128xbf16, #tpu.memory_space<vmem>>, vector<1x4x128xbf16>,
    return
  }
  func.func @transform_0(%arg0: i32, %arg1: i32) -> (i32, i32, i32) {
    %c0_i32 = arith.constant 0 : i32
    %c0_i32_0 = arith.constant 0 : i32
    return %arg0, %arg1, %c0_i32 : i32, i32, i32
  }
  func.func @transform_1(%arg0: i32, %arg1: i32) -> (i32, i32, i32) {
    %c0_i32 = arith.constant 0 : i32
    %c0_i32_0 = arith.constant 0 : i32
    %c0_i32_1 = arith.constant 0 : i32
    return %arg0, %c0_i32, %c0_i32_0 : i32, i32, i32
  }
  func.func @transform_2(%arg0: i32, %arg1: i32) -> (i32, i32) {
    %c0_i32 = arith.constant 0 : i32
    %c0_i32_0 = arith.constant 0 : i32
    %c0_i32_1 = arith.constant 0 : i32
    return %c0_i32, %c0_i32_0 : i32, i32
  }
  func.func @transform_3(%arg0: i32, %arg1: i32) -> (i32, i32) {
    %c0_i32 = arith.constant 0 : i32
    %c0_i32_0 = arith.constant 0 : i32
    %c0_i32_1 = arith.constant 0 : i32
    return %c0_i32, %c0_i32_0 : i32, i32
  }
  func.func @transform_4(%arg0: i32, %arg1: i32) -> (i32, i32, i32) {
    %c0_i32 = arith.constant 0 : i32
    %c0_i32_0 = arith.constant 0 : i32
    return %arg0, %arg1, %c0_i32 : i32, i32, i32
  }
}

module attributes {stable_mosaic.version = 11 : i64} {
  func.func @_mm_kernel(%arg0: i32, %arg1: memref<1x3072xbf16, #tpu.memory_space<vmem>>, %arg2: memref<3072x32xbf16, #tpu.memory_space<vmem>>, %arg3: memref<1x32xf32, #tpu.memory_space<vmem>>, %arg4: memref<1x32xf32, #tpu.memory_space<vmem>>) attributes {dimension_semantics = [#tpu.dimension_semantics<parallel>], iteration_bounds = array<i64: 1>, scalar_prefetch = 0 : i64, scratch_operands = 0 : i64, tpu.core_type = #tpu.core_type<tc>, window_params = [{transform_indices = @transform_0, window_bounds = array<i64: 1, 3072>}, {pipeline_mode = #tpu.pipeline_mode<synchronous>, transform_indices = @transform_1, window_bounds = array<i64: 3072, 32>}, {pipeline_mode = #tpu.pipeline_mode<synchronous>, transform_indices = @transform_2, window_bounds = array<i64: 1, 32>}, {transform_indices = @transform_3, window_bounds = array<i64: 1, 32>}]} {
    %c0 = arith.constant 0 : index
    %c0_0 = arith.constant 0 : index
    %0 = vector.load %arg1[%c0, %c0_0] : memref<1x3072xbf16, #tpu.memory_space<vmem>>, vector<1x3072xbf16>
    %c0_1 = arith.constant 0 : index
    %c0_2 = arith.constant 0 : index
    %1 = vector.load %arg2[%c0_1, %c0_2] : memref<3072x32xbf16, #tpu.memory_space<vmem>>, vector<3072x32xbf16>
    %cst = arith.constant dense<0.000000e+00> : vector<1x32xf32>
    %2 = tpu.matmul %0, %1, %cst {dimension_numbers = #tpu.dot_dimension_numbers<[1], [0], [0], [1], [0, 0, 1, 1], [], []>} : vector<1x3072xbf16>, vector<3072x32xbf16>, vector<1x32xf32> -> vector<1x32xf32>
    %c0_3 = arith.constant 0 : index
    %c0_4 = arith.constant 0 : index
    %3 = vector.load %arg3[%c0_3, %c0_4] : memref<1x32xf32, #tpu.memory_space<vmem>>, vector<1x32xf32>
    %4 = arith.addf %2, %3 : vector<1x32xf32>
    %cst_5 = arith.constant 0.000000e+00 : f32
    %5 = vector.broadcast %cst_5 : f32 to vector<1x32xf32>
    %6 = arith.maximumf %4, %5 : vector<1x32xf32>
    %c0_6 = arith.constant 0 : index
    %c0_7 = arith.constant 0 : index
    %7 = vector.load %arg4[%c0_6, %c0_7] : memref<1x32xf32, #tpu.memory_space<vmem>>, vector<1x32xf32>
    tpu.vector_store %arg4[%c0_6, %c0_7], %6 {strides = array<i32>} : memref<1x32xf32, #tpu.memory_space<vmem>>, vector<1x32xf32>,
    return
  }
  func.func @transform_0(%arg0: i32) -> (i32, i32) {
    %c0_i32 = arith.constant 0 : i32
    %c0_i32_0 = arith.constant 0 : i32
    return %arg0, %c0_i32 : i32, i32
  }
  func.func @transform_1(%arg0: i32) -> (i32, i32) {
    %c0_i32 = arith.constant 0 : i32
    %c0_i32_0 = arith.constant 0 : i32
    %c0_i32_1 = arith.constant 0 : i32
    return %c0_i32, %c0_i32_0 : i32, i32
  }
  func.func @transform_2(%arg0: i32) -> (i32, i32) {
    %c0_i32 = arith.constant 0 : i32
    %c0_i32_0 = arith.constant 0 : i32
    %c0_i32_1 = arith.constant 0 : i32
    return %c0_i32, %c0_i32_0 : i32, i32
  }
  func.func @transform_3(%arg0: i32) -> (i32, i32) {
    %c0_i32 = arith.constant 0 : i32
    %c0_i32_0 = arith.constant 0 : i32
    return %arg0, %c0_i32 : i32, i32
  }
}

</mosaic_0001>

<bundles_post_ra>
// kernel: tile.98
= control target key start
LH: loop header
LB: loop body
LE: loop exit
PB: predicated region body
PF: predicated region fallthrough
CT: control target
= control target key end

     0   :  { %s22_s0 = inlined_call_operand.vmem [shape: f32[16], index: 0, kind: input, shape index: {}]   ;;  %s23_s1 = inlined_call_operand.vmem [shape: f32[8,16], index: 1, kind: output, shape index: {}]  }
   0x1   :  { %v4_v0 = vld [vmem:[%s22_s0] ss:$0 sm:$0xff] }
   0x2   :  { %5 = vst [vmem:[%s23_s1] sm:$0xff] %v4_v0 }

// kernel: tile.107
= control target key start
LH: loop header
LB: loop body
LE: loop exit
PB: predicated region body
PF: predicated region fallthrough
CT: control target
= control target key end

     0   :  { %s67_s10 = smov 112   ;;  %s68_s11 = smov 80   ;;  %vm3_vm0 = vcmask 130048   ;;  %vm9_vm1 = vcmask 1048448   ;;  %vm15_vm2 = vcmask 917248   ;;  %vm21_vm3 = vcmask 786048   ;;  %s111_s0 = inlined_call_operand.vmem [shape: f32[8,16], index: 0, kind: input, shape index: {}]   ;;  %s112_s1 = inlined_call_operand.vmem [shape: f32[1,128], index: 1, kind: output, shape index: {}]  }
   0x1   :  { %v53_v0 = vld [vmem:[%s111_s0 + $0x7] sm:$0x1]   ;;  %v55_v1 = vld [vmem:[%s111_s0 + $0x5] sm:$0x1]   ;;  %v54_v2 = vld [vmem:[%s111_s0 + $0x6] sm:$0x1]  }
   0x2   :  { %7 = vrot.lane.b32.xlu0 %v53_v0, %s67_s10  ;;  %19 = vrot.lane.b32.xlu1 %v55_v1, %s68_s11  ;;  %v56_v3 = vld [vmem:[%s111_s0 + $0x4] sm:$0x1]   ;;  %v2_v4 = vld [vmem:[%s111_s0] sm:$0x1]   ;;  %s69_s18 = smov 96   ;;  %s70_s19 = smov 64  }
   0x3   :  { %4 = vst.msk [vmem:[#allocation0] sm:$0x1] %vm3_vm0, %v2_v4   ;;  %v57_v5 = vld [vmem:[%s111_s0 + $0x3] sm:$0x1]   ;;  %v58_v6 = vld [vmem:[%s111_s0 + $0x2] sm:$0x1]  }
   0x4   :  { %s71_s24 = smov 48   ;;  %s72_s25 = smov 32   ;;  %v59_v7 = vld [vmem:[%s111_s0 + $0x1] sm:$0x1]   ;;  %vm27_vm4 = vcmask 654848   ;;  %vm33_vm5 = vcmask 523648  }
   0x5   :  { %s73_s0 = smov 16   ;;  %vm39_vm6 = vcmask 392448   ;;  %vm45_vm7 = vcmask 261248  }
   0x6   :  { %13 = vrot.lane.b32.xlu0 %v54_v2, %s69_s18  ;;  %25 = vrot.lane.b32.xlu1 %v56_v3, %s70_s19 }
   0xa   :  { %31 = vrot.lane.b32.xlu0 %v57_v5, %s71_s24  ;;  %37 = vrot.lane.b32.xlu1 %v58_v6, %s72_s25 }
   0xe   :  { %43 = vrot.lane.b32.xlu0 %v59_v7, %s73_s0 }
  0x74   :  { %v8_v8 = vpop.permute.xlu0 %7   ;;  %v20_v9 = vpop.permute.xlu1 %19  }
  0x75   :  { %10 = vst.msk [vmem:[#allocation0] sm:$0x1] %vm9_vm1, %v8_v8  }
  0x78   :  { %v14_v10 = vpop.permute.xlu0 %13   ;;  %v26_v11 = vpop.permute.xlu1 %25  }
  0x79   :  { %16 = vst.msk [vmem:[#allocation0] sm:$0x1] %vm15_vm2, %v14_v10  }
  0x7a   :  { %22 = vst.msk [vmem:[#allocation0] sm:$0x1] %vm21_vm3, %v20_v9  }
  0x7b   :  { %28 = vst.msk [vmem:[#allocation0] sm:$0x1] %vm27_vm4, %v26_v11  }
  0x7c   :  { %v32_v12 = vpop.permute.xlu0 %31   ;;  %v38_v13 = vpop.permute.xlu1 %37  }
  0x7d   :  { %34 = vst.msk [vmem:[#allocation0] sm:$0x1] %vm33_vm5, %v32_v12  }
  0x7e   :  { %40 = vst.msk [vmem:[#allocation0] sm:$0x1] %vm39_vm6, %v38_v13  }
  0x80   :  { %v44_v14 = vpop.permute.xlu0 %43  }
  0x81   :  { %46 = vst.msk [vmem:[#allocation0] sm:$0x1] %vm45_vm7, %v44_v14  }
  0x88   :  { %v50_v15 = vld [vmem:[#allocation0] sm:$0x1] }
  0x89   :  { %52 = vst [vmem:[%s112_s1] sm:$0x1] %v50_v15 }

// kernel: duat_forward.19
= control target key start
LH: loop header
LB: loop body
LE: loop exit
PB: predicated region body
PF: predicated region fallthrough
CT: control target
= control target key end

     0   :  { %vm670_vm0 = vcmask 195584   ;;  %vm674_vm1 = vcmask 1043456   ;;  %s1914_s1 = inlined_call_operand.vmem [shape: bf16[1176,128], index: 1, kind: input, shape index: {}]   ;;  %s1915_s0 = inlined_call_operand.vmem [shape: bf16[16,1176], index: 0, kind: input, shape index: {}]   ;;  %s1916_s3 = inlined_call_operand.vmem [shape: f32[128,128], index: 3, kind: input, shape index: {}]   ;;  %s1917_s2 = inlined_call_operand.vmem [shape: f32[3,128], index: 2, kind: input, shape index: {}]   ;;  %s1918_s4 = inlined_call_operand.vmem [shape: bf16[16,128], index: 4, kind: output, shape index: {}]  }
   0x1   :  { %v1441_v0 = vld [vmem:[%s1914_s1 + $0x40] sm:$0xff]   ;;  %v1445_v4 = vld [vmem:[%s1914_s1 + $0x48] sm:$0xff]   ;;  %v1449_v8 = vld [vmem:[%s1914_s1 + $0x50] sm:$0xff]  }
   0x2   :  { %v1442_v1 = vld [vmem:[%s1914_s1] sm:$0xff]   ;;  %1182 = vmatprep.subr.bf16.mxu0 %v1441_v0  ;;  %v1446_v5 = vld [vmem:[%s1914_s1 + $0x8] sm:$0xff]   ;;  %v1450_v9 = vld [vmem:[%s1914_s1 + $0x10] sm:$0xff]  }
   0x3   :  { %v1443_v2 = vld [vmem:[%s1914_s1 + $0xc0] sm:$0xff]   ;;  %1183 = vmatpush3.bf16.msra.mxu0 %v1442_v1  ;;  %v1447_v6 = vld [vmem:[%s1914_s1 + $0xc8] sm:$0xff]   ;;  %v1451_v10 = vld [vmem:[%s1914_s1 + $0xd0] sm:$0xff]  }
   0x4   :  { %v1444_v3 = vld [vmem:[%s1914_s1 + $0x80] sm:$0xff]   ;;  %1204 = vmatprep.subr.bf16.mxu1 %v1443_v2  ;;  %1184 = vmatprep.subr.bf16.mxu0 %v1445_v4  ;;  %v1448_v7 = vld [vmem:[%s1914_s1 + $0x88] sm:$0xff]   ;;  %v1452_v11 = vld [vmem:[%s1914_s1 + $0x90] sm:$0xff]  }
   0x5   :  { %1205 = vmatpush3.bf16.msra.mxu1 %v1444_v3  ;;  %v1453_v12 = vld [vmem:[%s1914_s1 + $0x58] sm:$0xff]   ;;  %v1457_v16 = vld [vmem:[%s1914_s1 + $0x60] sm:$0xff]   ;;  %v1461_v20 = vld [vmem:[%s1914_s1 + $0x68] sm:$0xff]  }
   0x6   :  { %1206 = vmatprep.subr.bf16.mxu1 %v1447_v6  ;;  %v1454_v13 = vld [vmem:[%s1914_s1 + $0x18] sm:$0xff]   ;;  %v1458_v17 = vld [vmem:[%s1914_s1 + $0x20] sm:$0xff]   ;;  %v1462_v21 = vld [vmem:[%s1914_s1 + $0x28] sm:$0xff]   ;;  %v1534_v6 = vmov 0  }
   0x7   :  { %1185 = vmatpush3.bf16.msra.mxu0 %v1446_v5  ;;  %v1455_v14 = vld [vmem:[%s1914_s1 + $0xd8] sm:$0xff]   ;;  %v1459_v18 = vld [vmem:[%s1914_s1 + $0xe0] sm:$0xff]   ;;  %v1463_v22 = vld [vmem:[%s1914_s1 + $0xe8] sm:$0xff]  }
   0x8   :  { %1186 = vmatprep.subr.bf16.mxu0 %v1449_v8  ;;  %v1456_v15 = vld [vmem:[%s1914_s1 + $0x98] sm:$0xff]   ;;  %v1460_v19 = vld [vmem:[%s1914_s1 + $0xa0] sm:$0xff]   ;;  %v1464_v23 = vld [vmem:[%s1914_s1 + $0xa8] sm:$0xff]  }
   0x9   :  { %1207 = vmatpush3.bf16.msra.mxu1 %v1448_v7  ;;  %v1465_v24 = vld [vmem:[%s1914_s1 + $0x70] sm:$0xff]   ;;  %v1469_v28 = vld [vmem:[%s1914_s1 + $0x78] sm:$0xff]   ;;  %v1472_v31 = vld [vmem:[%s1915_s0] ss:$40 sps:$4 sm:$0xff]  }
   0xa   :  { %1208 = vmatprep.subr.bf16.mxu1 %v1451_v10  ;;  %v1466_v25 = vld [vmem:[%s1914_s1 + $0x30] sm:$0xff]   ;;  %v1470_v29 = vld [vmem:[%s1914_s1 + $0x38] sm:$0xff]   ;;  %v1474_v32 = vld [vmem:[%s1915_s0 + $0x4] ss:$40 sps:$4 sm:$0xff]  }
   0xb   :  { %1187 = vmatpush3.bf16.msra.mxu0 %v1450_v9  ;;  %v1467_v26 = vld [vmem:[%s1914_s1 + $0xf0] sm:$0xff]   ;;  %v1471_v30 = vld [vmem:[%s1914_s1 + $0xf8] sm:$0xff]   ;;  %710 = vmatprep.mubr.bf16.mxu0 %v1474_v32  ;;  %v1476_v34 = vld [vmem:[%s1914_s1 + $0x140] sm:$0xff]  }
   0xc   :  { %1188 = vmatprep.subr.bf16.mxu0 %v1453_v12  ;;  %v1468_v27 = vld [vmem:[%s1914_s1 + $0xb0] sm:$0xff]   ;;  %v1475_v33 = vld [vmem:[%s1914_s1 + $0xb8] sm:$0xff]   ;;  %v1480_v37 = vld [vmem:[%s1914_s1 + $0x100] sm:$0xff]  }
   0xd   :  { %1209 = vmatpush3.bf16.msra.mxu1 %v1452_v11  ;;  %v1477_v35 = vld [vmem:[%s1915_s0 + $0x8] ss:$40 sps:$4 sm:$0xff]   ;;  %v1479_v36 = vld [vmem:[%s1915_s0 + $0xc] ss:$40 sps:$4 sm:$0xff]   ;;  %v1481_v38 = vld [vmem:[%s1914_s1 + $0x1c0] sm:$0xff]  }
   0xe   :  { %1210 = vmatprep.subr.bf16.mxu1 %v1455_v14  ;;  %751 = vmatprep.mubr.bf16.mxu1 %v1479_v36  ;;  %v1482_v39 = vld [vmem:[%s1914_s1 + $0x180] sm:$0xff]   ;;  %v1483_v40 = vld [vmem:[%s1914_s1 + $0x148] sm:$0xff]   ;;  %v1487_v44 = vld [vmem:[%s1914_s1 + $0x150] sm:$0xff]  }
   0xf   :  { %1189 = vmatpush3.bf16.msra.mxu0 %v1454_v13  ;;  %v1484_v41 = vld [vmem:[%s1914_s1 + $0x108] sm:$0xff]   ;;  %v1488_v45 = vld [vmem:[%s1914_s1 + $0x110] sm:$0xff]   ;;  %v1491_v48 = vld [vmem:[%s1914_s1 + $0x158] sm:$0xff]  }
  0x10   :  { %1190 = vmatprep.subr.bf16.mxu0 %v1457_v16  ;;  %v1485_v42 = vld [vmem:[%s1914_s1 + $0x1c8] sm:$0xff]   ;;  %v1489_v46 = vld [vmem:[%s1914_s1 + $0x1d0] sm:$0xff]   ;;  %v1492_v49 = vld [vmem:[%s1914_s1 + $0x118] sm:$0xff]  }
  0x11   :  { %1211 = vmatpush3.bf16.msra.mxu1 %v1456_v15  ;;  %v1486_v43 = vld [vmem:[%s1914_s1 + $0x188] sm:$0xff]   ;;  %v1490_v47 = vld [vmem:[%s1914_s1 + $0x190] sm:$0xff]   ;;  %v1493_v50 = vld [vmem:[%s1914_s1 + $0x1d8] sm:$0xff]  }
  0x12   :  { %1212 = vmatprep.subr.bf16.mxu1 %v1459_v18  ;;  %v1494_v51 = vld [vmem:[%s1914_s1 + $0x198] sm:$0xff]   ;;  %v1495_v52 = vld [vmem:[%s1914_s1 + $0x160] sm:$0xff]   ;;  %v1499_v56 = vld [vmem:[%s1914_s1 + $0x168] sm:$0xff]  }
  0x13   :  { %1191 = vmatpush3.bf16.msra.mxu0 %v1458_v17  ;;  %v1496_v53 = vld [vmem:[%s1914_s1 + $0x120] sm:$0xff]   ;;  %v1500_v57 = vld [vmem:[%s1914_s1 + $0x128] sm:$0xff]   ;;  %v1503_v60 = vld [vmem:[%s1914_s1 + $0x170] sm:$0xff]  }
  0x14   :  { %1192 = vmatprep.subr.bf16.mxu0 %v1461_v20  ;;  %v1497_v54 = vld [vmem:[%s1914_s1 + $0x1e0] sm:$0xff]   ;;  %v1501_v58 = vld [vmem:[%s1914_s1 + $0x1e8] sm:$0xff]   ;;  %v1504_v61 = vld [vmem:[%s1914_s1 + $0x130] sm:$0xff]  }
  0x15   :  { %1213 = vmatpush3.bf16.msra.mxu1 %v1460_v19  ;;  %v1498_v55 = vld [vmem:[%s1914_s1 + $0x1a0] sm:$0xff]   ;;  %v1502_v59 = vld [vmem:[%s1914_s1 + $0x1a8] sm:$0xff]   ;;  %v1505_v62 = vld [vmem:[%s1914_s1 + $0x1f0] sm:$0xff]  }
  0x16   :  { %1214 = vmatprep.subr.bf16.mxu1 %v1463_v22  ;;  %v1506_v63 = vld [vmem:[%s1914_s1 + $0x1b0] sm:$0xff]   ;;  %v1507_v0 = vld [vmem:[%s1914_s1 + $0x178] sm:$0xff]   ;;  %v1517_v9 = vld [vmem:[%s1914_s1 + $0x200] sm:$0xff]  }
  0x17   :  { %1193 = vmatpush3.bf16.msra.mxu0 %v1462_v21  ;;  %v1508_v1 = vld [vmem:[%s1914_s1 + $0x138] sm:$0xff]   ;;  %v1518_v10 = vld [vmem:[%s1914_s1 + $0x208] sm:$0xff]   ;;  %v1519_v11 = vld [vmem:[%s1914_s1 + $0x210] sm:$0xff]  }
  0x18   :  { %1194 = vmatprep.subr.bf16.mxu0 %v1465_v24  ;;  %v1509_v2 = vld [vmem:[%s1914_s1 + $0x1f8] sm:$0xff]   ;;  %v1527_v12 = vld [vmem:[%s1915_s0 + $0x24] ss:$40 sps:$4 sm:$0xff]   ;;  %v1523_v16 = vld [vmem:[%s1914_s1 + $0x230] sm:$0xff]  }
  0x19   :  { %1215 = vmatpush3.bf16.msra.mxu1 %v1464_v23  ;;  %v1510_v3 = vld [vmem:[%s1915_s0 + $0x10] ss:$40 sps:$4 sm:$0xff]   ;;  %v1512_v4 = vld [vmem:[%s1915_s0 + $0x14] ss:$40 sps:$4 sm:$0xff]   ;;  %v1521_v14 = vld [vmem:[%s1914_s1 + $0x220] sm:$0xff]  }
  0x1a   :  { %1216 = vmatprep.subr.bf16.mxu1 %v1467_v26  ;;  %v1513_v5 = vld [vmem:[%s1914_s1 + $0x1b8] sm:$0xff]   ;;  %v1522_v15 = vld [vmem:[%s1914_s1 + $0x228] sm:$0xff]   ;;  %v1525_v18 = vld [vmem:[%s1914_s1 + $0x240] sm:$0xff]  }
  0x1b   :  { %1195 = vmatpush3.bf16.msra.mxu0 %v1466_v25  ;;  %v1514_v7 = vld [vmem:[%s1915_s0 + $0x18] ss:$40 sps:$4 sm:$0xff]   ;;  %v1516_v8 = vld [vmem:[%s1915_s0 + $0x1c] ss:$40 sps:$4 sm:$0xff]   ;;  %v1526_v19 = vld [vmem:[%s1914_s1 + $0x248] ss:$0 sps:$4 sm:$0xff]  }
  0x1c   :  { %1196 = vmatprep.subr.bf16.mxu0 %v1469_v28  ;;  %v1520_v13 = vld [vmem:[%s1914_s1 + $0x218] sm:$0xff]   ;;  %v676_v20 = vsel %vm674_vm1, %v1526_v19, 0  ;;  %v1529_v21 = vld [vmem:[%s1915_s0 + $0x20] ss:$40 sps:$4 sm:$0xff]   ;;  %v885_v24 = vld [vmem:[%s1916_s3 + $0x10] sm:$0xff] }
  0x1d   :  { %1217 = vmatpush3.bf16.msra.mxu1 %v1468_v27  ;;  %v1524_v17 = vld [vmem:[%s1914_s1 + $0x238] sm:$0xff]   ;;  %v883_v22 = vld [vmem:[%s1916_s3] sm:$0xff]  ;;  %v884_v23 = vld [vmem:[%s1916_s3 + $0x8] sm:$0xff] }
  0x1e   :  { %1218 = vmatprep.subr.bf16.mxu1 %v1471_v30  ;;  %v1821_v25 = vpack.c.bf16 %v884_v23, %v883_v22  ;;  %v886_v26 = vld [vmem:[%s1916_s3 + $0x18] sm:$0xff]  ;;  %v887_v28 = vld [vmem:[%s1916_s3 + $0x20] sm:$0xff] }
  0x1f   :  { %1197 = vmatpush3.bf16.msra.mxu0 %v1470_v29  ;;  %v1826_v27 = vpack.c.bf16 %v886_v26, %v885_v24  ;;  %v888_v29 = vld [vmem:[%s1916_s3 + $0x28] sm:$0xff]  ;;  %v890_v32 = vld [vmem:[%s1916_s3 + $0x38] sm:$0xff] }
  0x20   :  { %1226 = vmatprep.subr.bf16.mxu0 %v1476_v34  ;;  %v1837_v30 = vpack.c.bf16 %v888_v29, %v887_v28  ;;  %v891_v34 = vld [vmem:[%s1916_s3 + $0x40] sm:$0xff] }
  0x21   :  { %1219 = vmatpush3.bf16.msra.mxu1 %v1475_v33 }
  0x22   :  { %711 = vmatmul.mubr.bf16.vlgmr.msra.gmra.mrb[0].mxu0 %v1472_v31  ;;  %1248 = vmatprep.subr.bf16.mxu1 %v1481_v38  ;;  %v889_v31 = vld [vmem:[%s1916_s3 + $0x30] sm:$0xff]  ;;  %v894_v38 = vld [vmem:[%s1916_s3 + $0x58] sm:$0xff] }
  0x23   :  { %1227 = vmatpush3.bf16.msra.mxu0 %v1480_v37  ;;  %792 = vmatprep.mubr.bf16.mxu0 %v1512_v4  ;;  %v1847_v33 = vpack.c.bf16 %v890_v32, %v889_v31  ;;  %v893_v37 = vld [vmem:[%s1916_s3 + $0x50] sm:$0xff]  ;;  %v1171_v32 = vld [vmem:[%s1917_s2 + $0x1] ss:$0 sm:$0xff] }
  0x24   :  { %752 = vmatmul.mubr.bf16.vlgmr.msra.gmra.mrb[0].mxu1 %v1477_v35  ;;  %1228 = vmatprep.subr.bf16.mxu0 %v1483_v40  ;;  %v892_v35 = vld [vmem:[%s1916_s3 + $0x48] sm:$0xff]  ;;  %v895_v40 = vld [vmem:[%s1916_s3 + $0x60] sm:$0xff] }
  0x25   :  { %1249 = vmatpush3.bf16.msra.mxu1 %v1482_v39  ;;  %833 = vmatprep.mubr.bf16.mxu1 %v1516_v8  ;;  %v1857_v36 = vpack.c.bf16 %v892_v35, %v891_v34  ;;  %v1867_v39 = vpack.c.bf16 %v894_v38, %v893_v37  ;;  %v1172_v35 = vld [vmem:[%s1917_s2 + $0x2] ss:$0 sm:$0xff] }
  0x26   :  { %1250 = vmatprep.subr.bf16.mxu1 %v1485_v42 }
  0x27   :  { %1229 = vmatpush3.bf16.msra.mxu0 %v1484_v41  ;;  %v896_v41 = vld [vmem:[%s1916_s3 + $0x68] sm:$0xff] }
  0x28   :  { %1230 = vmatprep.subr.bf16.mxu0 %v1487_v44  ;;  %v1877_v42 = vpack.c.bf16 %v896_v41, %v895_v40  ;;  %v898_v44 = vld [vmem:[%s1916_s3 + $0x78] sm:$0xff] }
  0x29   :  { %1251 = vmatpush3.bf16.msra.mxu1 %v1486_v43  ;;  %v897_v43 = vld [vmem:[%s1916_s3 + $0x70] sm:$0xff] }
  0x2a   :  { %1252 = vmatprep.subr.bf16.mxu1 %v1489_v46 }
  0x2b   :  { %1231 = vmatpush3.bf16.msra.mxu0 %v1488_v45  ;;  %v1404_v45 = vpack.c.bf16 %v898_v44, %v897_v43 }
  0x2c   :  { %1232 = vmatprep.subr.bf16.mxu0 %v1491_v48 }
  0x2d   :  { %1253 = vmatpush3.bf16.msra.mxu1 %v1490_v47  ;;  %v1085_v47 = vld [vmem:[%s1917_s2] ss:$0 sm:$0xff] }
  0x2e   :  { %1254 = vmatprep.subr.bf16.mxu1 %v1493_v50 }
  0x2f   :  { %1233 = vmatpush3.bf16.msra.mxu0 %v1492_v49 }
  0x30   :  { %1234 = vmatprep.subr.bf16.mxu0 %v1495_v52 }
  0x31   :  { %1255 = vmatpush3.bf16.msra.mxu1 %v1494_v51 }
  0x32   :  { %1256 = vmatprep.subr.bf16.mxu1 %v1497_v54 }
  0x33   :  { %1235 = vmatpush3.bf16.msra.mxu0 %v1496_v53 }
  0x34   :  { %1236 = vmatprep.subr.bf16.mxu0 %v1499_v56 }
  0x35   :  { %1257 = vmatpush3.bf16.msra.mxu1 %v1498_v55 }
  0x36   :  { %1258 = vmatprep.subr.bf16.mxu1 %v1501_v58 }
  0x37   :  { %1237 = vmatpush3.bf16.msra.mxu0 %v1500_v57 }
  0x38   :  { %1238 = vmatprep.subr.bf16.mxu0 %v1503_v60 }
  0x39   :  { %1259 = vmatpush3.bf16.msra.mxu1 %v1502_v59 }
  0x3a   :  { %1260 = vmatprep.subr.bf16.mxu1 %v1505_v62 }
  0x3b   :  { %1239 = vmatpush3.bf16.msra.mxu0 %v1504_v61 }
  0x3c   :  { %1240 = vmatprep.subr.bf16.mxu0 %v1507_v0 }
  0x3d   :  { %1261 = vmatpush3.bf16.msra.mxu1 %v1506_v63 }
  0x3e   :  { %1262 = vmatprep.subr.bf16.mxu1 %v1509_v2 }
  0x3f   :  { %1241 = vmatpush3.bf16.msra.mxu0 %v1508_v1 }
  0x40   :  { %842 = vmatprep.subr.bf16.mxu0 %v1534_v6 }
  0x41   :  { %1263 = vmatpush3.bf16.msra.mxu1 %v1513_v5 }
  0x42   :  { %793 = vmatmul.mubr.bf16.vlgmr.msra.gmra.mrb[4].mxu0 %v1510_v3  ;;  %1377 = vmatprep.subr.bf16.mxu1 %v1821_v25 }
  0x43   :  { %843 = vmatpush1.bf16.msra.mxu0 %v1517_v9  ;;  %1170 = vmatprep.mubr.msk.bf16.mxu0 %vm670_vm0, %v1527_v12 }
  0x44   :  { %834 = vmatmul.mubr.bf16.vlgmr.msra.gmra.mrb[4].mxu1 %v1514_v7  ;;  %844 = vmatprep.subr.bf16.mxu0 %v1534_v6 }
  0x45   :  { %1379 = vmatpush3.bf16.msra.mxu1 %v1821_v25 }
  0x46   :  { %1381 = vmatprep.subr.bf16.mxu1 %v1826_v27 }
  0x47   :  { %845 = vmatpush1.bf16.msra.mxu0 %v1518_v10 }
  0x48   :  { %846 = vmatprep.subr.bf16.mxu0 %v1534_v6 }
  0x49   :  { %1383 = vmatpush3.bf16.msra.mxu1 %v1826_v27 }
  0x4a   :  { %1385 = vmatprep.subr.bf16.mxu1 %v1837_v30 }
  0x4b   :  { %847 = vmatpush1.bf16.msra.mxu0 %v1519_v11 }
  0x4c   :  { %848 = vmatprep.subr.bf16.mxu0 %v1534_v6 }
  0x4d   :  { %1387 = vmatpush3.bf16.msra.mxu1 %v1837_v30 }
  0x4e   :  { %1389 = vmatprep.subr.bf16.mxu1 %v1847_v33 }
  0x4f   :  { %849 = vmatpush1.bf16.msra.mxu0 %v1520_v13 }
  0x50   :  { %850 = vmatprep.subr.bf16.mxu0 %v1534_v6 }
  0x51   :  { %1391 = vmatpush3.bf16.msra.mxu1 %v1847_v33 }
  0x52   :  { %1393 = vmatprep.subr.bf16.mxu1 %v1857_v36 }
  0x53   :  { %851 = vmatpush1.bf16.msra.mxu0 %v1521_v14 }
  0x54   :  { %852 = vmatprep.subr.bf16.mxu0 %v1534_v6 }
  0x55   :  { %1395 = vmatpush3.bf16.msra.mxu1 %v1857_v36 }
  0x56   :  { %1397 = vmatprep.subr.bf16.mxu1 %v1867_v39 }
  0x57   :  { %853 = vmatpush1.bf16.msra.mxu0 %v1522_v15 }
  0x58   :  { %854 = vmatprep.subr.bf16.mxu0 %v1534_v6 }
  0x59   :  { %1399 = vmatpush3.bf16.msra.mxu1 %v1867_v39 }
  0x5a   :  { %1401 = vmatprep.subr.bf16.mxu1 %v1877_v42 }
  0x5b   :  { %855 = vmatpush1.bf16.msra.mxu0 %v1523_v16 }
  0x5c   :  { %856 = vmatprep.subr.bf16.mxu0 %v1534_v6 }
  0x5d   :  { %1403 = vmatpush3.bf16.msra.mxu1 %v1877_v42 }
  0x5e   :  { %1405 = vmatprep.subr.bf16.mxu1 %v1404_v45 }
  0x5f   :  { %857 = vmatpush1.bf16.msra.mxu0 %v1524_v17 }
  0x60   :  { %858 = vmatprep.subr.bf16.mxu0 %v1534_v6 }
  0x61   :  { %1407 = vmatpush3.bf16.msra.mxu1 %v1404_v45 }
  0x62   :  { %1409 = vmatprep.subr.bf16.mxu1 %v1821_v25 }
  0x63   :  { %859 = vmatpush1.bf16.msra.mxu0 %v1525_v18 }
  0x64   :  { %860 = vmatprep.subr.bf16.mxu0 %v1534_v6 }
  0x67   :  { %861 = vmatpush1.bf16.msra.mxu0 %v676_v20 }
  0x6a   :  { %875 = vmatmul.mubr.bf16.vlgmr.msra.gmra.mrb[8].mxu0 %v1529_v21 }
  0xf5   :  { %v1198_v46 = vpop.f32.mrb[0].mxu0 }
  0xf6   :  { %v1199_v48 = vpop.f32.mrb[1].mxu0 }
  0xf7   :  { %v1200_v49 = vadd.f32 %v1199_v48, %v1198_v46  ;;  %v1201_v50 = vpop.f32.mrb[2].mxu0  ;;  %v1220_v51 = vpop.f32.mrb[0].mxu1 }
  0xf8   :  { %v1202_v52 = vpop.f32.mrb[3].mxu0  ;;  %v1221_v55 = vpop.f32.mrb[1].mxu1 }
  0xf9   :  { %v713_v53 = vadd.f32 %v1200_v49, %v1085_v47  ;;  %v1203_v54 = vadd.f32 %v1202_v52, %v1201_v50  ;;  %v1222_v56 = vadd.f32 %v1221_v55, %v1220_v51  ;;  %v1223_v57 = vpop.f32.mrb[2].mxu1 }
  0xfa   :  { %v1224_v59 = vpop.f32.mrb[3].mxu1 }
  0xfb   :  { %v716_v58 = vadd.f32 %v1203_v54, %v1085_v47  ;;  %v754_v60 = vadd.f32 %v1222_v56, %v713_v53  ;;  %v1225_v61 = vadd.f32 %v1224_v59, %v1223_v57 }
  0xfd   :  { %v757_v62 = vadd.f32 %v1225_v61, %v716_v58 }
 0x115   :  { %v1242_v63 = vpop.f32.mrb[4].mxu0 }
 0x116   :  { %v1243_v0 = vpop.f32.mrb[5].mxu0 }
 0x117   :  { %v1244_v1 = vadd.f32 %v1243_v0, %v1242_v63  ;;  %v1245_v2 = vpop.f32.mrb[6].mxu0  ;;  %v1264_v3 = vpop.f32.mrb[4].mxu1 }
 0x118   :  { %v1246_v4 = vpop.f32.mrb[7].mxu0  ;;  %v1265_v7 = vpop.f32.mrb[5].mxu1 }
 0x119   :  { %v795_v5 = vadd.f32 %v1244_v1, %v754_v60  ;;  %v1247_v6 = vadd.f32 %v1246_v4, %v1245_v2  ;;  %v1266_v8 = vadd.f32 %v1265_v7, %v1264_v3  ;;  %v1267_v9 = vpop.f32.mrb[6].mxu1 }
 0x11a   :  { %v1268_v11 = vpop.f32.mrb[7].mxu1 }
 0x11b   :  { %v798_v10 = vadd.f32 %v1247_v6, %v757_v62  ;;  %v1269_v12 = vadd.f32 %v1268_v11, %v1267_v9  ;;  %v836_v13 = vadd.f32 %v1266_v8, %v795_v5 }
 0x11d   :  { %v839_v14 = vadd.f32 %v1269_v12, %v798_v10 }
 0x13d   :  { %v876_v15 = vpop.f32.mrb[8].mxu0 }
 0x13e   :  { %v877_v16 = vadd.f32 %v876_v15, %v836_v13  ;;  %v878_v17 = vpop.f32.mrb[9].mxu0 }
 0x13f   :  { %v879_v18 = vpop.f32.mrb[10].mxu0 }
 0x140   :  { %v880_v19 = vadd.f32 %v879_v18, %v839_v14  ;;  %v881_v20 = vpop.f32.mrb[11].mxu0  ;;  %1338 = vmatprep.mubr.f32.mxu1 %v877_v16 }
 0x142   :  { %1339 = vmatmul.mubr.f32.vlgmr.msra.gmra.mrb[8].mxu1 %v880_v19 }
 0x143   :  { %1411 = vmatpush3.bf16.msra.mxu1 %v1821_v25 }
 0x144   :  { %1413 = vmatprep.subr.bf16.mxu1 %v1826_v27 }
 0x147   :  { %1415 = vmatpush3.bf16.msra.mxu1 %v1826_v27 }
 0x148   :  { %1417 = vmatprep.subr.bf16.mxu1 %v1837_v30 }
 0x14b   :  { %1419 = vmatpush3.bf16.msra.mxu1 %v1837_v30 }
 0x14c   :  { %1421 = vmatprep.subr.bf16.mxu1 %v1847_v33 }
 0x14f   :  { %1423 = vmatpush3.bf16.msra.mxu1 %v1847_v33 }
 0x150   :  { %1425 = vmatprep.subr.bf16.mxu1 %v1857_v36 }
 0x153   :  { %1427 = vmatpush3.bf16.msra.mxu1 %v1857_v36 }
 0x154   :  { %1429 = vmatprep.subr.bf16.mxu1 %v1867_v39 }
 0x157   :  { %1431 = vmatpush3.bf16.msra.mxu1 %v1867_v39 }
 0x158   :  { %1433 = vmatprep.subr.bf16.mxu1 %v1877_v42 }
 0x15b   :  { %1435 = vmatpush3.bf16.msra.mxu1 %v1877_v42 }
 0x15c   :  { %1437 = vmatprep.subr.bf16.mxu1 %v1404_v45 }
 0x15f   :  { %1439 = vmatpush3.bf16.msra.mxu1 %v1404_v45 }
 0x215   :  { %v1340_v21 = vpop.f32.mrb[8].mxu1 }
 0x216   :  { %v975_v22 = vsub.f32 %v880_v19, %v1340_v21  ;;  %v965_v23 = vpop.f32.mrb[9].mxu1 }
 0x217   :  { %v974_v24 = vsub.f32 %v877_v16, %v965_v23 }
 0x218   :  { %v977_v26 = vmul.f32 %v975_v22, %v975_v22 }
 0x219   :  { %v976_v25 = vmul.f32 %v974_v24, %v974_v24 }
 0x21b   :  { %1373 = vmatprep.mubr.f32.mxu1 %v976_v25 }
 0x21c   :  { %1374 = vmatmul.mubr.f32.vlgmr.msra.gmra.mrb[10].mxu1 %v977_v26 }
 0x2ef   :  { %v1375_v27 = vpop.f32.mrb[10].mxu1 }
 0x2f0   :  { %v1050_v28 = vadd.f32 1e-05, %v1375_v27  ;;  %v1044_v29 = vpop.f32.mrb[11].mxu1 }
 0x2f1   :  { %v1045_v30 = vadd.f32 1e-05, %v1044_v29 }
 0x2f2   :  { %1530 = vrsqrt.f32 %v1050_v28 }
 0x2f3   :  { %1532 = vrsqrt.f32 %v1045_v30 }
 0x2fc   :  { %v1531_v31 = vpop.eup %1530 }
 0x2fd   :  { %v1533_v33 = vpop.eup %1532  ;;  %v1056_v34 = vmul.f32 %v1531_v31, %v975_v22 }
 0x2fe   :  { %v1055_v36 = vmul.f32 %v1533_v33, %v974_v24 }
 0x2ff   :  { %v1063_v37 = vmul.f32 %v1171_v32, %v1056_v34 }
 0x300   :  { %v1062_v38 = vmul.f32 %v1171_v32, %v1055_v36 }
 0x301   :  { %v1070_v39 = vadd.f32 %v1172_v35, %v1063_v37 }
 0x302   :  { %v1069_v40 = vadd.f32 %v1172_v35, %v1062_v38 }
 0x304   :  { %v1180_v41 = vpack.c.bf16 %v1070_v39, %v1069_v40 }
 0x306   :  { %1181 = vst [vmem:[%s1918_s4] sm:$0xff] %v1180_v41  }

// kernel: tile.113
= control target key start
LH: loop header
LB: loop body
LE: loop exit
PB: predicated region body
PF: predicated region fallthrough
CT: control target
= control target key end

     0   :  { %s22_s0 = inlined_call_operand.vmem [shape: f32[32], index: 0, kind: input, shape index: {}]   ;;  %s23_s1 = inlined_call_operand.vmem [shape: f32[4,32], index: 1, kind: output, shape index: {}]  }
   0x1   :  { %v4_v0 = vld [vmem:[%s22_s0] ss:$0 sm:$0xff] }
   0x2   :  { %5 = vst [vmem:[%s23_s1] sm:$0xf] %v4_v0 }

// kernel: tile.122
= control target key start
LH: loop header
LB: loop body
LE: loop exit
PB: predicated region body
PF: predicated region fallthrough
CT: control target
= control target key end

     0   :  { %vm7_vm0 = vcmask 261120   ;;  %s37_s8 = smov 32   ;;  %s38_s9 = smov 64   ;;  %vm13_vm1 = vcmask 1048320   ;;  %vm19_vm2 = vcmask 785920   ;;  %vm25_vm3 = vcmask 523520   ;;  %s55_s0 = inlined_call_operand.vmem [shape: f32[4,32], index: 0, kind: input, shape index: {}]   ;;  %s56_s1 = inlined_call_operand.vmem [shape: f32[1,128], index: 1, kind: output, shape index: {}]  }
   0x1   :  { %v4_v0 = vld [vmem:[%s55_s0] sm:$0xf]  ;;  %s36_s0 = smov 96  }
   0x2   :  { %5 = vst [vmem:[#allocation1] sm:$0xf] %v4_v0 }
   0x9   :  { %v10_v1 = vld [vmem:[#allocation1 + $0x3] sm:$0x1]   ;;  %v22_v2 = vld [vmem:[#allocation1 + $0x1] sm:$0x1]   ;;  %v6_v3 = vld [vmem:[#allocation1] sm:$0x1]  }
   0xa   :  { %11 = vrot.lane.b32.xlu0 %v10_v1, %s36_s0  ;;  %23 = vrot.lane.b32.xlu1 %v22_v2, %s37_s8  ;;  %v16_v4 = vld [vmem:[#allocation1 + $0x2] sm:$0x1]   ;;  %8 = vst.msk [vmem:[#allocation0] sm:$0x1] %vm7_vm0, %v6_v3  }
   0xe   :  { %17 = vrot.lane.b32.xlu0 %v16_v4, %s38_s9 }
  0x7c   :  { %v12_v5 = vpop.permute.xlu0 %11   ;;  %v24_v6 = vpop.permute.xlu1 %23  }
  0x7d   :  { %14 = vst.msk [vmem:[#allocation0] sm:$0x1] %vm13_vm1, %v12_v5  }
  0x80   :  { %v18_v7 = vpop.permute.xlu0 %17  }
  0x81   :  { %20 = vst.msk [vmem:[#allocation0] sm:$0x1] %vm19_vm2, %v18_v7  }
  0x82   :  { %26 = vst.msk [vmem:[#allocation0] sm:$0x1] %vm25_vm3, %v24_v6  }
  0x89   :  { %v30_v8 = vld [vmem:[#allocation0] sm:$0x1] }
  0x8a   :  { %32 = vst [vmem:[%s56_s1] sm:$0x1] %v30_v8 }

// kernel: duat_forward.20
= control target key start
LH: loop header
LB: loop body
LE: loop exit
PB: predicated region body
PF: predicated region fallthrough
CT: control target
= control target key end

     0   :  { %v937_v35 = vmov 0.0   ;;  %v938_v40 = vmov 0.0|0.0   ;;  %vm939_vm0 = vmmov 0   ;;  %vm331_vm1 = vcmask 523264   ;;  %s1161_s1 = inlined_call_operand.vmem [shape: bf16[576,128], index: 1, kind: input, shape index: {}]   ;;  %s1162_s0 = inlined_call_operand.vmem [shape: bf16[8,576], index: 0, kind: input, shape index: {}]   ;;  %s1163_s3 = inlined_call_operand.vmem [shape: f32[128,128], index: 3, kind: input, shape index: {}]   ;;  %s1164_s2 = inlined_call_operand.vmem [shape: f32[3,128], index: 2, kind: input, shape index: {}]   ;;  %s1165_s4 = inlined_call_operand.vmem [shape: bf16[8,128], index: 4, kind: output, shape index: {}]  }
   0x1   :  { %v894_v0 = vld [vmem:[%s1161_s1 + $0x40] sm:$0xff]   ;;  %v898_v4 = vld [vmem:[%s1161_s1 + $0x48] sm:$0xff]   ;;  %v902_v8 = vld [vmem:[%s1161_s1 + $0x50] sm:$0xff]  }
   0x2   :  { %v895_v1 = vld [vmem:[%s1161_s1] sm:$0xff]   ;;  %678 = vmatprep.subr.bf16.mxu0 %v894_v0  ;;  %v899_v5 = vld [vmem:[%s1161_s1 + $0x8] sm:$0xff]   ;;  %v903_v9 = vld [vmem:[%s1161_s1 + $0x10] sm:$0xff]  }
   0x3   :  { %v896_v2 = vld [vmem:[%s1161_s1 + $0xc0] sm:$0xff]   ;;  %679 = vmatpush3.bf16.msra.mxu0 %v895_v1  ;;  %v900_v6 = vld [vmem:[%s1161_s1 + $0xc8] sm:$0xff]   ;;  %v904_v10 = vld [vmem:[%s1161_s1 + $0xd0] sm:$0xff]  }
   0x4   :  { %v897_v3 = vld [vmem:[%s1161_s1 + $0x80] sm:$0xff]   ;;  %700 = vmatprep.subr.bf16.mxu1 %v896_v2  ;;  %680 = vmatprep.subr.bf16.mxu0 %v898_v4  ;;  %v901_v7 = vld [vmem:[%s1161_s1 + $0x88] sm:$0xff]   ;;  %v905_v11 = vld [vmem:[%s1161_s1 + $0x90] sm:$0xff]  }
   0x5   :  { %701 = vmatpush3.bf16.msra.mxu1 %v897_v3  ;;  %v906_v12 = vld [vmem:[%s1161_s1 + $0x58] sm:$0xff]   ;;  %v910_v16 = vld [vmem:[%s1161_s1 + $0x60] sm:$0xff]   ;;  %v914_v20 = vld [vmem:[%s1161_s1 + $0x68] sm:$0xff]  }
   0x6   :  { %702 = vmatprep.subr.bf16.mxu1 %v900_v6  ;;  %v907_v13 = vld [vmem:[%s1161_s1 + $0x18] sm:$0xff]   ;;  %v911_v17 = vld [vmem:[%s1161_s1 + $0x20] sm:$0xff]   ;;  %v915_v21 = vld [vmem:[%s1161_s1 + $0x28] sm:$0xff]  }
   0x7   :  { %681 = vmatpush3.bf16.msra.mxu0 %v899_v5  ;;  %v908_v14 = vld [vmem:[%s1161_s1 + $0xd8] sm:$0xff]   ;;  %v912_v18 = vld [vmem:[%s1161_s1 + $0xe0] sm:$0xff]   ;;  %v916_v22 = vld [vmem:[%s1161_s1 + $0xe8] sm:$0xff]  }
   0x8   :  { %682 = vmatprep.subr.bf16.mxu0 %v902_v8  ;;  %v909_v15 = vld [vmem:[%s1161_s1 + $0x98] sm:$0xff]   ;;  %v913_v19 = vld [vmem:[%s1161_s1 + $0xa0] sm:$0xff]   ;;  %v917_v23 = vld [vmem:[%s1161_s1 + $0xa8] sm:$0xff]  }
   0x9   :  { %703 = vmatpush3.bf16.msra.mxu1 %v901_v7  ;;  %v918_v24 = vld [vmem:[%s1161_s1 + $0x70] sm:$0xff]   ;;  %v922_v28 = vld [vmem:[%s1161_s1 + $0x78] sm:$0xff]   ;;  %v18_v31 = vld [vmem:[%s1162_s0] sm:$0xff] }
   0xa   :  { %704 = vmatprep.subr.bf16.mxu1 %v904_v10  ;;  %v919_v25 = vld [vmem:[%s1161_s1 + $0x30] sm:$0xff]   ;;  %v923_v29 = vld [vmem:[%s1161_s1 + $0x38] sm:$0xff]   ;;  %v634_v32 = vcombine.low %v18_v31, %v18_v31  ;;  %v635_v33 = vcombine.high %v18_v31, %v18_v31  ;;  %v19_v36 = vld [vmem:[%s1162_s0 + $0x8] sm:$0xff] }
   0xb   :  { %683 = vmatpush3.bf16.msra.mxu0 %v903_v9  ;;  %v920_v26 = vld [vmem:[%s1161_s1 + $0xf0] sm:$0xff]   ;;  %v924_v30 = vld [vmem:[%s1161_s1 + $0xf8] sm:$0xff]   ;;  %v636_v37 = vcombine.low %v19_v36, %v19_v36  ;;  %v637_v38 = vcombine.high %v19_v36, %v19_v36  ;;  %v931_v39 = vld [vmem:[%s1161_s1 + $0x100] sm:$0xff]  }
   0xc   :  { %684 = vmatprep.subr.bf16.mxu0 %v906_v12  ;;  %v921_v27 = vld [vmem:[%s1161_s1 + $0xb0] sm:$0xff]   ;;  %v928_v34 = vld [vmem:[%s1161_s1 + $0xb8] sm:$0xff]   ;;  %367 = vmatprep.mubr.bf16.mxu0 %v635_v33  ;;  %v932_v41 = vld [vmem:[%s1161_s1 + $0x108] sm:$0xff]  }
   0xd   :  { %705 = vmatpush3.bf16.msra.mxu1 %v905_v11  ;;  %407 = vmatprep.mubr.bf16.mxu1 %v637_v38  ;;  %v455_v42 = vld [vmem:[%s1163_s3] sm:$0xff]  ;;  %v456_v43 = vld [vmem:[%s1163_s3 + $0x8] sm:$0xff]  ;;  %v457_v45 = vld [vmem:[%s1163_s3 + $0x10] sm:$0xff] }
   0xe   :  { %706 = vmatprep.subr.bf16.mxu1 %v908_v14  ;;  %v844_v44 = vpack.c.bf16 %v456_v43, %v455_v42  ;;  %v458_v46 = vld [vmem:[%s1163_s3 + $0x18] sm:$0xff]  ;;  %v933_v47 = vld [vmem:[%s1161_s1 + $0x110] sm:$0xff]   ;;  %v459_v49 = vld [vmem:[%s1163_s3 + $0x20] sm:$0xff] }
   0xf   :  { %685 = vmatpush3.bf16.msra.mxu0 %v907_v13  ;;  %v847_v48 = vpack.c.bf16 %v458_v46, %v457_v45  ;;  %v460_v50 = vld [vmem:[%s1163_s3 + $0x28] sm:$0xff]  ;;  %v934_v51 = vld [vmem:[%s1161_s1 + $0x118] sm:$0xff]   ;;  %v927_v53 = vld [vmem:[%s1162_s0 + $0x10] ss:$0 sps:$4 sm:$0xff]  }
  0x10   :  { %686 = vmatprep.subr.bf16.mxu0 %v910_v16  ;;  %v850_v52 = vpack.c.bf16 %v460_v50, %v459_v49  ;;  %v461_v54 = vld [vmem:[%s1163_s3 + $0x30] sm:$0xff]  ;;  %v462_v55 = vld [vmem:[%s1163_s3 + $0x38] sm:$0xff]  ;;  %v463_v57 = vld [vmem:[%s1163_s3 + $0x40] sm:$0xff] }
  0x11   :  { %707 = vmatpush3.bf16.msra.mxu1 %v909_v15  ;;  %v853_v56 = vpack.c.bf16 %v462_v55, %v461_v54  ;;  %v464_v58 = vld [vmem:[%s1163_s3 + $0x48] sm:$0xff]  ;;  %v465_v60 = vld [vmem:[%s1163_s3 + $0x50] sm:$0xff]  ;;  %v466_v61 = vld [vmem:[%s1163_s3 + $0x58] sm:$0xff] }
  0x12   :  { %708 = vmatprep.subr.bf16.mxu1 %v912_v18  ;;  %v856_v59 = vpack.c.bf16 %v464_v58, %v463_v57  ;;  %v467_v62 = vld [vmem:[%s1163_s3 + $0x60] sm:$0xff]  ;;  %v468_v63 = vld [vmem:[%s1163_s3 + $0x68] sm:$0xff]  ;;  %v859_v0 = vpack.c.bf16 %v466_v61, %v465_v60  ;;  %v469_v2 = vld [vmem:[%s1163_s3 + $0x70] sm:$0xff] }
  0x13   :  { %687 = vmatpush3.bf16.msra.mxu0 %v911_v17  ;;  %v862_v1 = vpack.c.bf16 %v468_v63, %v467_v62  ;;  %v470_v3 = vld [vmem:[%s1163_s3 + $0x78] sm:$0xff]  ;;  %v633_v6 = vld [vmem:[%s1164_s2] ss:$0 sm:$0xff]  ;;  %v676_v31 = vld [vmem:[%s1164_s2 + $0x1] ss:$0 sm:$0xff] }
  0x14   :  { %688 = vmatprep.subr.bf16.mxu0 %v914_v20  ;;  %v865_v4 = vpack.c.bf16 %v470_v3, %v469_v2  ;;  %v677_v33 = vld [vmem:[%s1164_s2 + $0x2] ss:$0 sm:$0xff] }
  0x15   :  { %709 = vmatpush3.bf16.msra.mxu1 %v913_v19 }
  0x16   :  { %710 = vmatprep.subr.bf16.mxu1 %v916_v22 }
  0x17   :  { %689 = vmatpush3.bf16.msra.mxu0 %v915_v21 }
  0x18   :  { %690 = vmatprep.subr.bf16.mxu0 %v918_v24 }
  0x19   :  { %711 = vmatpush3.bf16.msra.mxu1 %v917_v23 }
  0x1a   :  { %712 = vmatprep.subr.bf16.mxu1 %v920_v26 }
  0x1b   :  { %691 = vmatpush3.bf16.msra.mxu0 %v919_v25 }
  0x1c   :  { %692 = vmatprep.subr.bf16.mxu0 %v922_v28 }
  0x1d   :  { %713 = vmatpush3.bf16.msra.mxu1 %v921_v27 }
  0x1e   :  { %714 = vmatprep.subr.bf16.mxu1 %v924_v30 }
  0x1f   :  { %693 = vmatpush3.bf16.msra.mxu0 %v923_v29 }
  0x20   :  { %761 = vmatprep.subr.bf16.mxu0 %v937_v35 }
  0x21   :  { %715 = vmatpush3.bf16.msra.mxu1 %v928_v34 }
  0x22   :  { %368 = vmatmul.mubr.bf16.vlgmr.msra.gmra.mrb[0].mxu0 %v634_v32  ;;  %843 = vmatprep.subr.bf16.mxu1 %v938_v40 }
  0x23   :  { %762 = vmatpush3.bf16.msra.mxu0 %v931_v39  ;;  %769 = vmatprep.mubr.msk.bf16.mxu0 %vm939_vm0, %v937_v35 }
  0x24   :  { %408 = vmatmul.mubr.bf16.vlgmr.msra.gmra.mrb[0].mxu1 %v636_v37  ;;  %763 = vmatprep.subr.bf16.mxu0 %v937_v35 }
  0x25   :  { %805 = vmatprep.mubr.msk.f32.mxu1 %vm939_vm0, %v937_v35  ;;  %845 = vmatpush3.bf16.msra.mxu1 %v844_v44 }
  0x26   :  { %846 = vmatprep.subr.bf16.mxu1 %v938_v40 }
  0x27   :  { %764 = vmatpush3.bf16.msra.mxu0 %v932_v41 }
  0x28   :  { %765 = vmatprep.subr.bf16.mxu0 %v937_v35 }
  0x29   :  { %848 = vmatpush3.bf16.msra.mxu1 %v847_v48 }
  0x2a   :  { %849 = vmatprep.subr.bf16.mxu1 %v938_v40 }
  0x2b   :  { %766 = vmatpush3.bf16.msra.mxu0 %v933_v47 }
  0x2c   :  { %767 = vmatprep.subr.bf16.mxu0 %v937_v35 }
  0x2d   :  { %851 = vmatpush3.bf16.msra.mxu1 %v850_v52 }
  0x2e   :  { %852 = vmatprep.subr.bf16.mxu1 %v938_v40 }
  0x2f   :  { %768 = vmatpush3.bf16.msra.mxu0 %v934_v51 }
  0x30   :  { %867 = vmatprep.subr.bf16.mxu0 %v938_v40 }
  0x31   :  { %854 = vmatpush3.bf16.msra.mxu1 %v853_v56 }
  0x32   :  { %770 = vmatmul.mubr.msk.bf16.vlgmr.msra.gmra.mrb[4].mxu0 %vm331_vm1, %v927_v53  ;;  %855 = vmatprep.subr.bf16.mxu1 %v938_v40 }
  0x33   :  { %869 = vmatpush3.bf16.msra.mxu0 %v844_v44  ;;  %840 = vmatprep.mubr.msk.f32.mxu0 %vm939_vm0, %v937_v35 }
  0x34   :  { %870 = vmatprep.subr.bf16.mxu0 %v938_v40 }
  0x35   :  { %857 = vmatpush3.bf16.msra.mxu1 %v856_v59 }
  0x36   :  { %858 = vmatprep.subr.bf16.mxu1 %v938_v40 }
  0x37   :  { %872 = vmatpush3.bf16.msra.mxu0 %v847_v48 }
  0x38   :  { %873 = vmatprep.subr.bf16.mxu0 %v938_v40 }
  0x39   :  { %860 = vmatpush3.bf16.msra.mxu1 %v859_v0 }
  0x3a   :  { %861 = vmatprep.subr.bf16.mxu1 %v938_v40 }
  0x3b   :  { %875 = vmatpush3.bf16.msra.mxu0 %v850_v52 }
  0x3c   :  { %876 = vmatprep.subr.bf16.mxu0 %v938_v40 }
  0x3d   :  { %863 = vmatpush3.bf16.msra.mxu1 %v862_v1 }
  0x3e   :  { %864 = vmatprep.subr.bf16.mxu1 %v938_v40 }
  0x3f   :  { %878 = vmatpush3.bf16.msra.mxu0 %v853_v56 }
  0x40   :  { %879 = vmatprep.subr.bf16.mxu0 %v938_v40 }
  0x41   :  { %866 = vmatpush3.bf16.msra.mxu1 %v865_v4 }
  0x43   :  { %881 = vmatpush3.bf16.msra.mxu0 %v856_v59 }
  0x44   :  { %882 = vmatprep.subr.bf16.mxu0 %v938_v40 }
  0x47   :  { %884 = vmatpush3.bf16.msra.mxu0 %v859_v0 }
  0x48   :  { %885 = vmatprep.subr.bf16.mxu0 %v938_v40 }
  0x4b   :  { %887 = vmatpush3.bf16.msra.mxu0 %v862_v1 }
  0x4c   :  { %888 = vmatprep.subr.bf16.mxu0 %v938_v40 }
  0x4f   :  { %890 = vmatpush3.bf16.msra.mxu0 %v865_v4 }
  0xf5   :  { %v694_v5 = vpop.f32.mrb[0].mxu0 }
  0xf6   :  { %v695_v7 = vpop.f32.mrb[1].mxu0 }
  0xf7   :  { %v696_v8 = vadd.f32 %v695_v7, %v694_v5  ;;  %v697_v9 = vpop.f32.mrb[2].mxu0  ;;  %v716_v10 = vpop.f32.mrb[0].mxu1 }
  0xf8   :  { %v698_v11 = vpop.f32.mrb[3].mxu0  ;;  %v717_v12 = vpop.f32.mrb[1].mxu1 }
  0xf9   :  { %v370_v13 = vadd.f32 %v696_v8, %v633_v6  ;;  %v718_v14 = vadd.f32 %v717_v12, %v716_v10  ;;  %v719_v15 = vpop.f32.mrb[2].mxu1 }
  0xfa   :  { %v720_v16 = vpop.f32.mrb[3].mxu1 }
  0xfb   :  { %v410_v17 = vadd.f32 %v718_v14, %v370_v13 }
 0x105   :  { %v449_v18 = vpop.f32.mrb[4].mxu0 }
 0x106   :  { %v450_v19 = vadd.f32 %v449_v18, %v410_v17  ;;  %v771_v20 = vpop.f32.mrb[5].mxu0 }
 0x107   :  { %v452_v21 = vpop.f32.mrb[6].mxu0 }
 0x108   :  { %v772_v22 = vpop.f32.mrb[7].mxu0  ;;  %806 = vmatmul.mubr.f32.vlgmr.msra.gmra.mrb[4].mxu1 %v450_v19 }
 0x1db   :  { %v537_v23 = vpop.f32.mrb[4].mxu1 }
 0x1dc   :  { %v541_v24 = vsub.f32 %v450_v19, %v537_v23  ;;  %v807_v25 = vpop.f32.mrb[5].mxu1 }
 0x1de   :  { %v542_v26 = vmul.f32 %v541_v24, %v541_v24 }
 0x1e0   :  { %841 = vmatmul.mubr.f32.vlgmr.msra.gmra.mrb[8].mxu0 %v542_v26 }
 0x2b3   :  { %v609_v27 = vpop.f32.mrb[8].mxu0 }
 0x2b4   :  { %v610_v28 = vadd.f32 1e-05, %v609_v27  ;;  %v842_v29 = vpop.f32.mrb[9].mxu0 }
 0x2b6   :  { %935 = vrsqrt.f32 %v610_v28 }
 0x2c0   :  { %v936_v30 = vpop.eup %935 }
 0x2c1   :  { %v614_v32 = vmul.f32 %v936_v30, %v541_v24 }
 0x2c3   :  { %v620_v34 = vmul.f32 %v676_v31, %v614_v32 }
 0x2c5   :  { %v626_v35 = vadd.f32 %v677_v33, %v620_v34 }
 0x2c7   :  { %v627_v36 = vpack.c.bf16 %v626_v35, %v626_v35 }
 0x2c9   :  { %628 = vst [vmem:[%s1165_s4] sm:$0xf] %v627_v36 }

// kernel: tile.128
= control target key start
LH: loop header
LB: loop body
LE: loop exit
PB: predicated region body
PF: predicated region fallthrough
CT: control target
= control target key end

     0   :  { %s22_s0 = inlined_call_operand.vmem [shape: f32[64], index: 0, kind: input, shape index: {}]   ;;  %s23_s1 = inlined_call_operand.vmem [shape: f32[2,64], index: 1, kind: output, shape index: {}]  }
   0x1   :  { %v4_v0 = vld [vmem:[%s22_s0] ss:$0 sm:$0xff] }
   0x2   :  { %5 = vst [vmem:[%s23_s1] sm:$0x3] %v4_v0 }

// kernel: tile.137
= control target key start
LH: loop header
LB: loop body
LE: loop exit
PB: predicated region body
PF: predicated region fallthrough
CT: control target
= control target key end

     0   :  { %vm7_vm0 = vcmask 523264   ;;  %vm13_vm1 = vcmask 1048064   ;;  %s39_s0 = inlined_call_operand.vmem [shape: f32[2,64], index: 0, kind: input, shape index: {}]   ;;  %s40_s1 = inlined_call_operand.vmem [shape: f32[1,128], index: 1, kind: output, shape index: {}]  }
   0x1   :  { %v4_v0 = vld [vmem:[%s39_s0] sm:$0x3]  ;;  %s22_s0 = smov 64  }
   0x2   :  { %5 = vst [vmem:[#allocation1] sm:$0x3] %v4_v0 }
   0x9   :  { %v10_v1 = vld [vmem:[#allocation1 + $0x1] sm:$0x1]   ;;  %v6_v2 = vld [vmem:[#allocation1] sm:$0x1]  }
   0xa   :  { %11 = vrot.lane.b32.xlu0 %v10_v1, %s22_s0  ;;  %8 = vst.msk [vmem:[#allocation0] sm:$0x1] %vm7_vm0, %v6_v2  }
  0x7c   :  { %v12_v3 = vpop.permute.xlu0 %11  }
  0x7d   :  { %14 = vst.msk [vmem:[#allocation0] sm:$0x1] %vm13_vm1, %v12_v3  }
  0x84   :  { %v18_v4 = vld [vmem:[#allocation0] sm:$0x1] }
  0x85   :  { %20 = vst [vmem:[%s40_s1] sm:$0x1] %v18_v4 }

// kernel: duat_forward.21
= control target key start
LH: loop header
LB: loop body
LE: loop exit
PB: predicated region body
PF: predicated region fallthrough
CT: control target
= control target key end

     0   :  { %v942_v21 = vmov 1983009808   ;;  %v103_v23 = vlaneseq  ;;  %v943_v40 = vmov 0.0   ;;  %v944_v45 = vmov 0.0|0.0   ;;  %s1164_s1 = inlined_call_operand.vmem [shape: bf16[576,128], index: 1, kind: input, shape index: {}]   ;;  %s1165_s0 = inlined_call_operand.vmem [shape: bf16[4,576], index: 0, kind: input, shape index: {}]   ;;  %s1166_s3 = inlined_call_operand.vmem [shape: f32[128,128], index: 3, kind: input, shape index: {}]   ;;  %s1167_s2 = inlined_call_operand.vmem [shape: f32[3,128], index: 2, kind: input, shape index: {}]   ;;  %s1168_s4 = inlined_call_operand.vmem [shape: bf16[4,128], index: 4, kind: output, shape index: {}]  }
   0x1   :  { %v903_v0 = vld [vmem:[%s1164_s1 + $0x40] sm:$0xff]   ;;  %v907_v4 = vld [vmem:[%s1164_s1 + $0x48] sm:$0xff]   ;;  %v911_v8 = vld [vmem:[%s1164_s1 + $0x50] sm:$0xff]   ;;  %v101_v22 = vunpack.c.l.s4 %v942_v21  ;;  %vm945_vm0 = vmmov 0   ;;  %vm343_vm1 = vcmask 523264  }
   0x2   :  { %v904_v1 = vld [vmem:[%s1164_s1] sm:$0xff]   ;;  %686 = vmatprep.subr.bf16.mxu0 %v903_v0  ;;  %v908_v5 = vld [vmem:[%s1164_s1 + $0x8] sm:$0xff]   ;;  %v912_v9 = vld [vmem:[%s1164_s1 + $0x10] sm:$0xff]   ;;  %v104_v29 = vshrl.u32 %v103_v23, 7 }
   0x3   :  { %v905_v2 = vld [vmem:[%s1164_s1 + $0xc0] sm:$0xff]   ;;  %687 = vmatpush3.bf16.msra.mxu0 %v904_v1  ;;  %v909_v6 = vld [vmem:[%s1164_s1 + $0xc8] sm:$0xff]   ;;  %v913_v10 = vld [vmem:[%s1164_s1 + $0xd0] sm:$0xff]   ;;  %v102_v28 = vunpack.c.0.s8 %v101_v22 }
   0x4   :  { %v906_v3 = vld [vmem:[%s1164_s1 + $0x80] sm:$0xff]   ;;  %708 = vmatprep.subr.bf16.mxu1 %v905_v2  ;;  %688 = vmatprep.subr.bf16.mxu0 %v907_v4  ;;  %v910_v7 = vld [vmem:[%s1164_s1 + $0x88] sm:$0xff]   ;;  %v914_v11 = vld [vmem:[%s1164_s1 + $0x90] sm:$0xff]  }
   0x5   :  { %709 = vmatpush3.bf16.msra.mxu1 %v906_v3  ;;  %v915_v12 = vld [vmem:[%s1164_s1 + $0x58] sm:$0xff]   ;;  %v919_v16 = vld [vmem:[%s1164_s1 + $0x60] sm:$0xff]   ;;  %v923_v20 = vld [vmem:[%s1164_s1 + $0x68] sm:$0xff]   ;;  %v105_v34 = vsub.s32 %v102_v28, %v104_v29 }
   0x6   :  { %710 = vmatprep.subr.bf16.mxu1 %v909_v6  ;;  %v916_v13 = vld [vmem:[%s1164_s1 + $0x18] sm:$0xff]   ;;  %v920_v17 = vld [vmem:[%s1164_s1 + $0x20] sm:$0xff]   ;;  %v924_v24 = vld [vmem:[%s1164_s1 + $0x28] sm:$0xff]  }
   0x7   :  { %689 = vmatpush3.bf16.msra.mxu0 %v908_v5  ;;  %v917_v14 = vld [vmem:[%s1164_s1 + $0xd8] sm:$0xff]   ;;  %v921_v18 = vld [vmem:[%s1164_s1 + $0xe0] sm:$0xff]   ;;  %v925_v25 = vld [vmem:[%s1164_s1 + $0xe8] sm:$0xff]  }
   0x8   :  { %690 = vmatprep.subr.bf16.mxu0 %v911_v8  ;;  %v918_v15 = vld [vmem:[%s1164_s1 + $0x98] sm:$0xff]   ;;  %v922_v19 = vld [vmem:[%s1164_s1 + $0xa0] sm:$0xff]   ;;  %v926_v26 = vld [vmem:[%s1164_s1 + $0xa8] sm:$0xff]  }
   0x9   :  { %711 = vmatpush3.bf16.msra.mxu1 %v910_v7  ;;  %v927_v27 = vld [vmem:[%s1164_s1 + $0x70] sm:$0xff]   ;;  %v931_v33 = vld [vmem:[%s1164_s1 + $0x78] sm:$0xff]   ;;  %v18_v37 = vld [vmem:[%s1165_s0] sm:$0xff] }
   0xa   :  { %712 = vmatprep.subr.bf16.mxu1 %v913_v10  ;;  %v928_v30 = vld [vmem:[%s1164_s1 + $0x30] sm:$0xff]   ;;  %v932_v35 = vld [vmem:[%s1164_s1 + $0x38] sm:$0xff]   ;;  %v106_v39 = vrot.slane %v18_v37, %v105_v34  ;;  %v99_v41 = vcombine.high %v18_v37, %v18_v37  ;;  %v936_v44 = vld [vmem:[%s1164_s1 + $0x100] sm:$0xff]  }
   0xb   :  { %691 = vmatpush3.bf16.msra.mxu0 %v912_v9  ;;  %v929_v31 = vld [vmem:[%s1164_s1 + $0xf0] sm:$0xff]   ;;  %v933_v36 = vld [vmem:[%s1164_s1 + $0xf8] sm:$0xff]   ;;  %v467_v47 = vld [vmem:[%s1166_s3] sm:$0xff] }
   0xc   :  { %692 = vmatprep.subr.bf16.mxu0 %v915_v12  ;;  %v930_v32 = vld [vmem:[%s1164_s1 + $0xb0] sm:$0xff]   ;;  %v934_v38 = vld [vmem:[%s1164_s1 + $0xb8] sm:$0xff]   ;;  %v114_v42 = vcombine.high %v106_v39, %v106_v39  ;;  %v113_v43 = vrot.slane %v99_v41, %v105_v34  ;;  %v468_v48 = vld [vmem:[%s1166_s3 + $0x8] sm:$0xff] }
   0xd   :  { %713 = vmatpush3.bf16.msra.mxu1 %v914_v11  ;;  %v469_v49 = vld [vmem:[%s1166_s3 + $0x10] sm:$0xff]  ;;  %v470_v50 = vld [vmem:[%s1166_s3 + $0x18] sm:$0xff]  ;;  %v937_v51 = vld [vmem:[%s1164_s1 + $0x108] sm:$0xff]   ;;  %v852_v52 = vpack.c.bf16 %v468_v48, %v467_v47 }
   0xe   :  { %714 = vmatprep.subr.bf16.mxu1 %v917_v14  ;;  %379 = vmatprep.mubr.bf16.mxu0 %v114_v42  ;;  %v115_v46 = vcombine.high %v113_v43, %v113_v43  ;;  %v855_v53 = vpack.c.bf16 %v470_v50, %v469_v49  ;;  %v471_v54 = vld [vmem:[%s1166_s3 + $0x20] sm:$0xff]  ;;  %v472_v55 = vld [vmem:[%s1166_s3 + $0x28] sm:$0xff]  ;;  %v938_v56 = vld [vmem:[%s1164_s1 + $0x110] sm:$0xff]  }
   0xf   :  { %693 = vmatpush3.bf16.msra.mxu0 %v916_v13  ;;  %v858_v57 = vpack.c.bf16 %v472_v55, %v471_v54  ;;  %v939_v58 = vld [vmem:[%s1164_s1 + $0x118] sm:$0xff]   ;;  %v646_v59 = vld.sshfl [vmem:[%s1165_s0 + $0x8] sm:$0x3 pattern:$0x76325410]  ;;  %v473_v60 = vld [vmem:[%s1166_s3 + $0x30] sm:$0xff] }
  0x10   :  { %694 = vmatprep.subr.bf16.mxu0 %v919_v16  ;;  %419 = vmatprep.mubr.bf16.mxu1 %v115_v46  ;;  %v474_v61 = vld [vmem:[%s1166_s3 + $0x38] sm:$0xff]  ;;  %v475_v63 = vld [vmem:[%s1166_s3 + $0x40] sm:$0xff]  ;;  %v476_v0 = vld [vmem:[%s1166_s3 + $0x48] sm:$0xff] }
  0x11   :  { %715 = vmatpush3.bf16.msra.mxu1 %v918_v15  ;;  %v861_v62 = vpack.c.bf16 %v474_v61, %v473_v60  ;;  %v864_v1 = vpack.c.bf16 %v476_v0, %v475_v63  ;;  %v477_v2 = vld [vmem:[%s1166_s3 + $0x50] sm:$0xff]  ;;  %v478_v3 = vld [vmem:[%s1166_s3 + $0x58] sm:$0xff]  ;;  %v479_v4 = vld [vmem:[%s1166_s3 + $0x60] sm:$0xff] }
  0x12   :  { %716 = vmatprep.subr.bf16.mxu1 %v921_v18  ;;  %v480_v5 = vld [vmem:[%s1166_s3 + $0x68] sm:$0xff]  ;;  %v867_v6 = vpack.c.bf16 %v478_v3, %v477_v2  ;;  %v481_v8 = vld [vmem:[%s1166_s3 + $0x70] sm:$0xff]  ;;  %v482_v9 = vld [vmem:[%s1166_s3 + $0x78] sm:$0xff] }
  0x13   :  { %695 = vmatpush3.bf16.msra.mxu0 %v920_v17  ;;  %v870_v7 = vpack.c.bf16 %v480_v5, %v479_v4  ;;  %v873_v10 = vpack.c.bf16 %v482_v9, %v481_v8  ;;  %v645_v12 = vld [vmem:[%s1167_s2] ss:$0 sm:$0xff]  ;;  %v684_v37 = vld [vmem:[%s1167_s2 + $0x1] ss:$0 sm:$0xff] }
  0x14   :  { %696 = vmatprep.subr.bf16.mxu0 %v923_v20 }
  0x15   :  { %717 = vmatpush3.bf16.msra.mxu1 %v922_v19 }
  0x16   :  { %718 = vmatprep.subr.bf16.mxu1 %v925_v25 }
  0x17   :  { %697 = vmatpush3.bf16.msra.mxu0 %v924_v24 }
  0x18   :  { %698 = vmatprep.subr.bf16.mxu0 %v927_v27 }
  0x19   :  { %719 = vmatpush3.bf16.msra.mxu1 %v926_v26 }
  0x1a   :  { %720 = vmatprep.subr.bf16.mxu1 %v929_v31 }
  0x1b   :  { %699 = vmatpush3.bf16.msra.mxu0 %v928_v30 }
  0x1c   :  { %700 = vmatprep.subr.bf16.mxu0 %v931_v33 }
  0x1d   :  { %721 = vmatpush3.bf16.msra.mxu1 %v930_v32 }
  0x1e   :  { %722 = vmatprep.subr.bf16.mxu1 %v933_v36 }
  0x1f   :  { %701 = vmatpush3.bf16.msra.mxu0 %v932_v35 }
  0x20   :  { %769 = vmatprep.subr.bf16.mxu0 %v943_v40 }
  0x21   :  { %723 = vmatpush3.bf16.msra.mxu1 %v934_v38 }
  0x22   :  { %851 = vmatprep.subr.bf16.mxu1 %v944_v45  ;;  %380 = vmatmul.mubr.bf16.vlgmr.msra.gmra.mrb[0].mxu0 %v106_v39  ;;  %v685_v39 = vld [vmem:[%s1167_s2 + $0x2] ss:$0 sm:$0xff] }
  0x23   :  { %770 = vmatpush3.bf16.msra.mxu0 %v936_v44  ;;  %777 = vmatprep.mubr.msk.bf16.mxu0 %vm945_vm0, %v943_v40 }
  0x24   :  { %420 = vmatmul.mubr.bf16.vlgmr.msra.gmra.mrb[0].mxu1 %v113_v43  ;;  %771 = vmatprep.subr.bf16.mxu0 %v943_v40 }
  0x25   :  { %853 = vmatpush3.bf16.msra.mxu1 %v852_v52  ;;  %813 = vmatprep.mubr.msk.f32.mxu1 %vm945_vm0, %v943_v40 }
  0x26   :  { %854 = vmatprep.subr.bf16.mxu1 %v944_v45 }
  0x27   :  { %772 = vmatpush3.bf16.msra.mxu0 %v937_v51 }
  0x28   :  { %773 = vmatprep.subr.bf16.mxu0 %v943_v40 }
  0x29   :  { %856 = vmatpush3.bf16.msra.mxu1 %v855_v53 }
  0x2a   :  { %857 = vmatprep.subr.bf16.mxu1 %v944_v45 }
  0x2b   :  { %774 = vmatpush3.bf16.msra.mxu0 %v938_v56 }
  0x2c   :  { %775 = vmatprep.subr.bf16.mxu0 %v943_v40 }
  0x2d   :  { %859 = vmatpush3.bf16.msra.mxu1 %v858_v57 }
  0x2e   :  { %860 = vmatprep.subr.bf16.mxu1 %v944_v45 }
  0x2f   :  { %776 = vmatpush3.bf16.msra.mxu0 %v939_v58 }
  0x30   :  { %875 = vmatprep.subr.bf16.mxu0 %v944_v45 }
  0x31   :  { %862 = vmatpush3.bf16.msra.mxu1 %v861_v62 }
  0x32   :  { %778 = vmatmul.mubr.msk.bf16.vlgmr.msra.gmra.mrb[4].mxu0 %vm343_vm1, %v646_v59  ;;  %863 = vmatprep.subr.bf16.mxu1 %v944_v45 }
  0x33   :  { %877 = vmatpush3.bf16.msra.mxu0 %v852_v52  ;;  %848 = vmatprep.mubr.msk.f32.mxu0 %vm945_vm0, %v943_v40 }
  0x34   :  { %878 = vmatprep.subr.bf16.mxu0 %v944_v45 }
  0x35   :  { %865 = vmatpush3.bf16.msra.mxu1 %v864_v1 }
  0x36   :  { %866 = vmatprep.subr.bf16.mxu1 %v944_v45 }
  0x37   :  { %880 = vmatpush3.bf16.msra.mxu0 %v855_v53 }
  0x38   :  { %881 = vmatprep.subr.bf16.mxu0 %v944_v45 }
  0x39   :  { %868 = vmatpush3.bf16.msra.mxu1 %v867_v6 }
  0x3a   :  { %869 = vmatprep.subr.bf16.mxu1 %v944_v45 }
  0x3b   :  { %883 = vmatpush3.bf16.msra.mxu0 %v858_v57 }
  0x3c   :  { %884 = vmatprep.subr.bf16.mxu0 %v944_v45 }
  0x3d   :  { %871 = vmatpush3.bf16.msra.mxu1 %v870_v7 }
  0x3e   :  { %872 = vmatprep.subr.bf16.mxu1 %v944_v45 }
  0x3f   :  { %886 = vmatpush3.bf16.msra.mxu0 %v861_v62 }
  0x40   :  { %887 = vmatprep.subr.bf16.mxu0 %v944_v45 }
  0x41   :  { %874 = vmatpush3.bf16.msra.mxu1 %v873_v10 }
  0x43   :  { %889 = vmatpush3.bf16.msra.mxu0 %v864_v1 }
  0x44   :  { %890 = vmatprep.subr.bf16.mxu0 %v944_v45 }
  0x47   :  { %892 = vmatpush3.bf16.msra.mxu0 %v867_v6 }
  0x48   :  { %893 = vmatprep.subr.bf16.mxu0 %v944_v45 }
  0x4b   :  { %895 = vmatpush3.bf16.msra.mxu0 %v870_v7 }
  0x4c   :  { %896 = vmatprep.subr.bf16.mxu0 %v944_v45 }
  0x4f   :  { %898 = vmatpush3.bf16.msra.mxu0 %v873_v10 }
  0xf5   :  { %v702_v11 = vpop.f32.mrb[0].mxu0 }
  0xf6   :  { %v703_v13 = vpop.f32.mrb[1].mxu0 }
  0xf7   :  { %v704_v14 = vadd.f32 %v703_v13, %v702_v11  ;;  %v705_v15 = vpop.f32.mrb[2].mxu0  ;;  %v724_v16 = vpop.f32.mrb[0].mxu1 }
  0xf8   :  { %v706_v17 = vpop.f32.mrb[3].mxu0  ;;  %v725_v18 = vpop.f32.mrb[1].mxu1 }
  0xf9   :  { %v382_v19 = vadd.f32 %v704_v14, %v645_v12  ;;  %v726_v20 = vadd.f32 %v725_v18, %v724_v16  ;;  %v727_v21 = vpop.f32.mrb[2].mxu1 }
  0xfa   :  { %v728_v22 = vpop.f32.mrb[3].mxu1 }
  0xfb   :  { %v422_v23 = vadd.f32 %v726_v20, %v382_v19 }
 0x105   :  { %v461_v24 = vpop.f32.mrb[4].mxu0 }
 0x106   :  { %v462_v25 = vadd.f32 %v461_v24, %v422_v23  ;;  %v779_v26 = vpop.f32.mrb[5].mxu0 }
 0x107   :  { %v464_v27 = vpop.f32.mrb[6].mxu0 }
 0x108   :  { %v780_v28 = vpop.f32.mrb[7].mxu0  ;;  %814 = vmatmul.mubr.f32.vlgmr.msra.gmra.mrb[4].mxu1 %v462_v25 }
 0x1db   :  { %v549_v29 = vpop.f32.mrb[4].mxu1 }
 0x1dc   :  { %v553_v30 = vsub.f32 %v462_v25, %v549_v29  ;;  %v815_v31 = vpop.f32.mrb[5].mxu1 }
 0x1de   :  { %v554_v32 = vmul.f32 %v553_v30, %v553_v30 }
 0x1e0   :  { %849 = vmatmul.mubr.f32.vlgmr.msra.gmra.mrb[8].mxu0 %v554_v32 }
 0x2b3   :  { %v621_v33 = vpop.f32.mrb[8].mxu0 }
 0x2b4   :  { %v622_v34 = vadd.f32 1e-05, %v621_v33  ;;  %v850_v35 = vpop.f32.mrb[9].mxu0 }
 0x2b6   :  { %940 = vrsqrt.f32 %v622_v34 }
 0x2c0   :  { %v941_v36 = vpop.eup %940 }
 0x2c1   :  { %v626_v38 = vmul.f32 %v941_v36, %v553_v30 }
 0x2c3   :  { %v632_v40 = vmul.f32 %v684_v37, %v626_v38 }
 0x2c5   :  { %v638_v41 = vadd.f32 %v685_v39, %v632_v40 }
 0x2c7   :  { %v639_v42 = vpack.c.bf16 %v638_v41, %v638_v41 }
 0x2c9   :  { %640 = vst [vmem:[%s1168_s4] sm:$0x3] %v639_v42 }

// kernel: duat_forward.27
= control target key start
LH: loop header
LB: loop body
LE: loop exit
PB: predicated region body
PF: predicated region fallthrough
CT: control target
= control target key end

     0   :  { %v238_v0 = vmov 0.0   ;;  %vm239_vm0 = vmmov 0   ;;  %vm62_vm1 = vcmask 523264   ;;  %vm131_vm2 = vcmask 261120   ;;  %s300_s1 = inlined_call_operand.vmem [shape: bf16[64,32], index: 1, kind: input, shape index: {}]   ;;  %s301_s0 = inlined_call_operand.vmem [shape: f32[2,64], index: 0, kind: input, shape index: {}]   ;;  %s302_s3 = inlined_call_operand.vmem [shape: bf16[32,32], index: 3, kind: input, shape index: {}]   ;;  %s303_s2 = inlined_call_operand.vmem [shape: f32[1,32], index: 2, kind: input, shape index: {}]   ;;  %s304_s4 = inlined_call_operand.vmem [shape: f32[1,32], index: 4, kind: input, shape index: {}]   ;;  %s305_s5 = inlined_call_operand.vmem [shape: f32[2,32], index: 5, kind: output, shape index: {}]  }
   0x1   :  { %206 = vmatprep.subr.bf16.mxu0 %v238_v0  ;;  %v228_v1 = vld [vmem:[%s300_s1] sm:$0xff]   ;;  %214 = vmatprep.mubr.msk.bf16.mxu0 %vm239_vm0, %v238_v0  ;;  %v229_v2 = vld [vmem:[%s300_s1 + $0x8] sm:$0xff]   ;;  %v230_v3 = vld [vmem:[%s300_s1 + $0x10] sm:$0xff]   ;;  %vm181_vm3 = vcmask 254976  }
   0x2   :  { %218 = vmatprep.subr.bf16.mxu1 %v238_v0  ;;  %222 = vmatprep.mubr.msk.bf16.mxu1 %vm239_vm0, %v238_v0  ;;  %v231_v4 = vld [vmem:[%s300_s1 + $0x18] sm:$0xff]   ;;  %v21_v5 = vld [vmem:[%s301_s0] sm:$0x3]  ;;  %v233_v8 = vld [vmem:[%s302_s3 + $0x8] sm:$0xff]  }
   0x3   :  { %207 = vmatpush3.bf16.msra.mxu0 %v228_v1  ;;  %v22_v6 = vpack.c.bf16 %v21_v5, %v21_v5  ;;  %v232_v7 = vld [vmem:[%s302_s3] sm:$0xff]  }
   0x4   :  { %208 = vmatprep.subr.bf16.mxu0 %v238_v0  ;;  %219 = vmatpush3.bf16.msra.mxu1 %v232_v7  ;;  %v187_v9 = vld [vmem:[%s303_s2] ss:$0 sm:$0xff] }
   0x5   :  { %220 = vmatprep.subr.bf16.mxu1 %v238_v0  ;;  %v193_v17 = vld [vmem:[%s304_s4] ss:$0 sm:$0xff] }
   0x7   :  { %209 = vmatpush3.bf16.msra.mxu0 %v229_v2 }
   0x8   :  { %210 = vmatprep.subr.bf16.mxu0 %v238_v0  ;;  %221 = vmatpush3.bf16.msra.mxu1 %v233_v8 }
   0xb   :  { %211 = vmatpush3.bf16.msra.mxu0 %v230_v3 }
   0xc   :  { %212 = vmatprep.subr.bf16.mxu0 %v238_v0 }
   0xf   :  { %213 = vmatpush3.bf16.msra.mxu0 %v231_v4 }
  0x12   :  { %215 = vmatmul.mubr.msk.bf16.vlgmr.msra.gmra.mrb[0].mxu0 %vm62_vm1, %v22_v6 }
  0xe5   :  { %v100_v10 = vpop.f32.mrb[0].mxu0 }
  0xe6   :  { %v101_v11 = vadd.f32 %v187_v9, %v100_v10  ;;  %v216_v12 = vpop.f32.mrb[1].mxu0 }
  0xe7   :  { %v103_v13 = vpop.f32.mrb[2].mxu0 }
  0xe8   :  { %v106_v14 = vmax.f32 %v101_v11, 0.0  ;;  %v217_v15 = vpop.f32.mrb[3].mxu0 }
  0xea   :  { %v107_v16 = vpack.c.bf16 %v106_v14, %v106_v14 }
  0xec   :  { %223 = vmatmul.mubr.msk.bf16.vlgmr.msra.gmra.mrb[0].mxu1 %vm131_vm2, %v107_v16 }
 0x1bf   :  { %v169_v18 = vpop.f32.mrb[0].mxu1 }
 0x1c0   :  { %v170_v19 = vadd.f32 %v193_v17, %v169_v18  ;;  %v224_v20 = vpop.f32.mrb[1].mxu1 }
 0x1c1   :  { %v172_v21 = vpop.f32.mrb[2].mxu1 }
 0x1c2   :  { %v197_v22 = vmul.f32 -1.442695, %v170_v19  ;;  %v225_v23 = vpop.f32.mrb[3].mxu1 }
 0x1c4   :  { %234 = vpow2.f32 %v197_v22 }
 0x1ce   :  { %v235_v24 = vpop.eup %234 }
 0x1cf   :  { %v178_v25 = vadd.f32 1.0, %v235_v24 }
 0x1d1   :  { %236 = vrcp.f32 %v178_v25 }
 0x1db   :  { %v237_v26 = vpop.eup %236 }
 0x1dc   :  { %182 = vst.msk [vmem:[%s305_s5] sm:$0x3] %vm181_vm3, %v237_v26 }

// kernel: duat_forward.26
= control target key start
LH: loop header
LB: loop body
LE: loop exit
PB: predicated region body
PF: predicated region fallthrough
CT: control target
= control target key end

     0   :  { %s1779_s15 = smov 0   ;;  %s2044_s0 = inlined_call_operand.vmem [shape: bf16[2,4,4,64], index: 0, kind: input, shape index: {}]   ;;  %s2045_s1 = inlined_call_operand.vmem [shape: bf16[9,64,32], index: 1, kind: input, shape index: {}]   ;;  %s2046_s2 = inlined_call_operand.vmem [shape: f32[1,32], index: 2, kind: input, shape index: {}]   ;;  %s2047_s3 = inlined_call_operand.vmem [shape: bf16[2,4,32], index: 3, kind: output, shape index: {0}]   ;;  %s2048_s4 = inlined_call_operand.vmem [shape: f32[2,1,64], index: 4, kind: output, shape index: {1}]  }
   0x1 LB: > { %s1383_s16 = sadd.s32 4294967295, %s1748_s15   ;;  %p1387_p0 = scmp.ge.s32.totalorder %s1748_s15, 1  ;;  %s1748_s15 = sphi %s1779_s15, %s15_s15  }
   0x2   : > { %p165_p1 = scmp.lt.s32.totalorder %s1748_s15, 3 }
   0x4   : > { %p166_p2 = pnand %p1387_p0, %p165_p1 }
   0x5   : > { %v1706_v0 = vld [vmem:[%s2045_s1 + $0x20] sm:$0xff] (!%p166_p2)   ;;  %v1750_v1 = vmov (!%p166_p2), 0.0   ;;  %v1708_v3 = vld [vmem:[%s2045_s1 + $0x28] sm:$0xff] (!%p166_p2)   ;;  %vm1751_vm0 = vmmov (!%p166_p2), 0   ;;  %p193_p3 = scmp.lt.s32.totalorder (!%p166_p2), %s1383_s16, 1  ;;  %v282_v5 = vlaneseq (!%p166_p2)  ;;  %v1710_v6 = vld [vmem:[%s2045_s1 + $0x30] sm:$0xff] (!%p166_p2)  }
   0x6   : > { %169 = sbr.rel (%p166_p2) target bundleno = 314 (0x13a), region = 32  ;;  %1586 = vmatprep.subr.bf16.mxu0 (!%p166_p2), %v1750_v1  ;;  %1598 = vmatprep.subr.bf16.mxu1 (!%p166_p2), %v1750_v1  ;;  %v1707_v2 = vld [vmem:[%s2045_s1] sm:$0xff] (!%p166_p2)   ;;  %v1709_v4 = vld [vmem:[%s2045_s1 + $0x8] sm:$0xff] (!%p166_p2)   ;;  %v1711_v7 = vld [vmem:[%s2045_s1 + $0x10] sm:$0xff] (!%p166_p2)   ;;  %vm236_vm1 = vsmask.f32 (!%p166_p2), 256 }
   0x7   : > { %1587 = vmatpush3.bf16.msra.mxu0 (!%p166_p2), %v1706_v0  ;;  %1594 = vmatprep.mubr.msk.bf16.mxu0 (!%p166_p2), %vm1751_vm0, %v1750_v1  ;;  %v283_v8 = vshrl.u32 (!%p166_p2), %v282_v5, 7  ;;  %v1712_v9 = vld [vmem:[%s2045_s1 + $0x38] sm:$0xff] (!%p166_p2)   ;;  %vm237_vm2 = vsmask.f32 (!%p166_p2), 1284  ;;  %vm239_vm4 = vsmask.f32 (!%p166_p2), 2312 }
   0x8   : > { %1599 = vmatpush3.bf16.msra.mxu1 (!%p166_p2), %v1707_v2  ;;  %1588 = vmatprep.subr.bf16.mxu0 (!%p166_p2), %v1750_v1  ;;  %v1713_v11 = vld [vmem:[%s2045_s1 + $0x18] sm:$0xff] (!%p166_p2)   ;;  %vm238_vm3 = vmor (!%p166_p2), %vm236_vm1, %vm237_vm2  ;;  %vm241_vm5 = vsmask.f32 (!%p166_p2), 3340  ;;  %vm243_vm6 = vsmask.f32 (!%p166_p2), 4368  ;;  %vm1269_vm14 = vcmask (!%p166_p2), 1040384  }
   0x9   : > { %1600 = vmatprep.subr.bf16.mxu1 (!%p166_p2), %v1750_v1  ;;  %1606 = vmatprep.mubr.msk.bf16.mxu1 (!%p166_p2), %vm1751_vm0, %v1750_v1  ;;  %vm240_vm7 = vmor (!%p166_p2), %vm238_vm3, %vm239_vm4  ;;  %vm245_vm8 = vsmask.f32 (!%p166_p2), 5396  ;;  %vm247_vm9 = vsmask.f32 (!%p166_p2), 6424  ;;  %vm249_vm10 = vsmask.f32 (!%p166_p2), 7452 }
   0xa   : > { %vm242_vm11 = vmor (!%p166_p2), %vm240_vm7, %vm241_vm5  ;;  %v1752_v21 = vmov (!%p166_p2), 1966171168   ;;  %v1753_v23 = vmov (!%p166_p2), 1983009808   ;;  %vm1270_vm15 = vcmask (!%p166_p2), 1042434   ;;  %vm1272_vm4 = vcmask (!%p166_p2), 1044484  }
   0xb   : > { %1589 = vmatpush3.bf16.msra.mxu0 (!%p166_p2), %v1708_v3  ;;  %vm244_vm12 = vmor (!%p166_p2), %vm242_vm11, %vm243_vm6  ;;  %v280_v22 = vunpack.c.l.s4 (!%p166_p2), %v1752_v21  ;;  %v1254_v24 = vunpack.c.l.s4 (!%p166_p2), %v1753_v23  ;;  %vm1274_vm5 = vcmask (!%p166_p2), 1046534   ;;  %vm317_vm7 = vcmask (!%p166_p2), 523264   ;;  %v1714_v42 = vld [vmem:[%s2045_s1 + $0x40] sm:$0xff] (!%p166_p2)   ;;  %v1716_v52 = vld [vmem:[%s2045_s1 + $0x48] sm:$0xff] (!%p166_p2)  }
   0xc   : > { %1601 = vmatpush3.bf16.msra.mxu1 (!%p166_p2), %v1709_v4  ;;  %1590 = vmatprep.subr.bf16.mxu0 (!%p166_p2), %v1750_v1  ;;  %vm246_vm13 = vmor (!%p166_p2), %vm244_vm12, %vm245_vm8  ;;  %v1715_v47 = vld [vmem:[%s2045_s1 + $0x60] sm:$0xff] (!%p166_p2)   ;;  %v1717_v53 = vld [vmem:[%s2045_s1 + $0x68] sm:$0xff] (!%p166_p2)  }
   0xd   : > { %s2052_s16 = smov (!%p193_p3, %s1383_s16), 1  ;;  %1602 = vmatprep.subr.bf16.mxu1 %v1750_v1  ;;  %vm248_vm1 = vmor %vm246_vm13, %vm247_vm9  ;;  %v281_v29 = vunpack.c.0.s8 %v280_v22  ;;  %v1255_v31 = vunpack.c.0.s8 %v1254_v24  ;;  %vm1293_vm9 = vcmask 519168   ;;  %v1718_v63 = vld [vmem:[%s2045_s1 + $0x50] sm:$0xff]   ;;  %v1724_v22 = vld [vmem:[%s2045_s1 + $0x88] sm:$0xff]  }
   0xe   : > { %s1540_s27 = sshll.u32 %s2052_s16, 3  ;;  %vm1840_vm2 = vmor %vm248_vm1, %vm249_vm10  ;;  %v1719_v2 = vld [vmem:[%s2045_s1 + $0x70] sm:$0xff]   ;;  %s204_s14 = scalar_lea.vmem %s2048_s4, %s2052_s16  ;;  %vm1303_vm10 = vcmask 516096  }
   0xf   : > { %s1820_s6 = scalar_lea.vmem %s2044_s0, %s1540_s27  ;;  %1591 = vmatpush3.bf16.msra.mxu0 %v1710_v6  ;;  %vm1271_vm3 = vmor %vm1269_vm14, %vm1270_vm15  ;;  %v1854_v36 = vsub.s32 %v281_v29, %v283_v8  ;;  %v1258_v37 = vsub.s32 %v1255_v31, %v283_v8  ;;  %v1720_v6 = vld [vmem:[%s2045_s1 + $0x58] sm:$0xff]   ;;  %v1735_v28 = vld [vmem:[%s2045_s1 + $0xf0] sm:$0xff]   ;;  %s1390_s27 = sshll.u32 %s2052_s16, 1 }
  0x10   : > { %v1391_v10 = vld.sshfl [vmem:[%s1820_s6] sm:$0x11 pattern:$0x75316420]  ;;  %1603 = vmatpush3.bf16.msra.mxu1 %v1711_v7  ;;  %1592 = vmatprep.subr.bf16.mxu0 %v1750_v1  ;;  %v1534_v19 = vld [vmem:[%s1820_s6 + $0x2] sm:$0x3]  ;;  %vm1273_vm6 = vmor %vm1271_vm3, %vm1272_vm4  ;;  %s201_s30 = scalar_lea.vmem %s2047_s3, %s1390_s27 }
  0x11   : > { %v1392_v12 = vld.sshfl [vmem:[%s1820_s6 + $0x2] sm:$0x11 pattern:$0x75316420]  ;;  %v227_v13 = vcombine.high %v1391_v10, %v1391_v10  ;;  %1604 = vmatprep.subr.bf16.mxu1 %v1750_v1  ;;  %v252_v15 = vshrl.u32 %v1391_v10, 16  ;;  %v1249_v27 = vunpack.c.l.bf16 %v1534_v19  ;;  %vm1275_vm8 = vmor %vm1273_vm6, %vm1274_vm5 }
  0x12   : > { %v235_v14 = vcombine.high %v1392_v12, %v1392_v12  ;;  %v261_v17 = vshrl.u32 %v1392_v12, 16  ;;  %v1535_v20 = vld [vmem:[%s1820_s6 + $0x4] sm:$0x3]  ;;  %v206_v25 = vld [vmem:[%s1820_s6] sm:$0x1] }
  0x13   : > { %v257_v16 = vshll.u32 %v227_v13, 16  ;;  %1593 = vmatpush3.bf16.msra.mxu0 %v1712_v9  ;;  %v207_v26 = vld [vmem:[%s1820_s6 + $0x2] sm:$0x1]  ;;  %v1250_v30 = vunpack.c.l.bf16 %v1535_v20  ;;  %v1259_v39 = vrot.slane %v1249_v27, %v1258_v37  ;;  %v1430_v60 = vld [vmem:[%s1820_s6 + $0x4] sm:$0x1]  ;;  %v1721_v9 = vld [vmem:[%s2045_s1 + $0x78] sm:$0xff]  }
  0x14   : > { %v266_v18 = vshll.u32 %v235_v14, 16  ;;  %1605 = vmatpush3.bf16.msra.mxu1 %v1713_v11  ;;  %1610 = vmatprep.subr.bf16.mxu0 %v1750_v1  ;;  %v363_v32 = vcombine.low %v206_v25, %v207_v26  ;;  %v1413_v54 = vld.sshfl [vmem:[%s1820_s6] sm:$0x10 pattern:$0x75316420]  ;;  %v1725_v25 = vld [vmem:[%s2045_s1 + $0xa8] sm:$0xff]  }
  0x15   : > { %1622 = vmatprep.subr.bf16.mxu1 %v1750_v1  ;;  %v259_v33 = vsel %vm1840_vm2, %v252_v15, %v257_v16  ;;  %v1267_v40 = vrot.slane %v1250_v30, %v1258_v37  ;;  %v1260_v44 = vcombine.high %v1259_v39, %v1259_v39  ;;  %v1536_v46 = vrot.slane %v1259_v39, 9  ;;  %v1877_v57 = vld.sshfl [vmem:[%s1820_s6 + $0x2] sm:$0x10 pattern:$0x75316420]  ;;  %v1726_v27 = vld [vmem:[%s2045_s1 + $0x90] sm:$0xff]  }
  0x16   : > { %v1849_v34 = vsel %vm1840_vm2, %v261_v17, %v266_v18  ;;  %v370_v41 = vrot.slane %v363_v32, %v1854_v36  ;;  %v1429_v59 = vld [vmem:[%s1820_s6 + $0x2] sm:$0x1]  ;;  %v1423_v61 = vcombine.high %v1413_v54, %v1877_v57  ;;  %v1447_v10 = vld.sshfl [vmem:[%s1820_s6 + $0x4] sm:$0x11 pattern:$0x75316420] }
  0x17   : > { %v278_v35 = vcombine.low %v259_v33, %v1849_v34  ;;  %v1268_v45 = vcombine.high %v1267_v40, %v1267_v40  ;;  %v1537_v48 = vrot.slane %v1267_v40, 9  ;;  %v1278_v50 = vrot.slane %v1260_v44, 7  ;;  %v1722_v14 = vld [vmem:[%s2045_s1 + $0x80] sm:$0xff]   ;;  %v1727_v30 = vld [vmem:[%s2045_s1 + $0xb0] sm:$0xff]  }
  0x18   : > { %v377_v49 = vrot.slane %v370_v41, %v1854_v36  ;;  %v571_v0 = vcombine.low %v1429_v59, %v1430_v60  ;;  %v481_v5 = vrot.slane %v1423_v61, %v1854_v36  ;;  %v673_v13 = vcombine.high %v1447_v10, %v1447_v10  ;;  %v1723_v18 = vld [vmem:[%s2045_s1 + $0xa0] sm:$0xff]   ;;  %v1737_v60 = vld [vmem:[%s2045_s1 + $0xf8] sm:$0xff]  }
  0x19   : > { %v285_v38 = vrot.slane %v278_v35, %v1854_v36  ;;  %v1282_v51 = vrot.slane %v1268_v45, 7  ;;  %v1279_v55 = vsel %vm1275_vm8, %v1536_v46, %v1278_v50  ;;  %v684_v16 = vshrl.u32 %v1447_v10, 16  ;;  %v1466_v21 = vld.sshfl [vmem:[%s1820_s6 + $0x4] sm:$0x10 pattern:$0x75316420] }
  0x1a   : > { %1607 = vmatmul.mubr.msk.bf16.vlgmr.msra.gmra.mrb[0].mxu1 %vm317_vm7, %v377_v49  ;;  %v578_v7 = vrot.slane %v571_v0, %v1854_v36  ;;  %v488_v12 = vrot.slane %v481_v5, %v1854_v36  ;;  %v689_v19 = vshll.u32 %v673_v13, 16  ;;  %v1475_v31 = vcombine.high %v1877_v57, %v1466_v21  ;;  %v1499_v32 = vld.sshfl [vmem:[%s1820_s6 + $0x6] sm:$0x11 pattern:$0x75316420]  ;;  %v1732_v49 = vld [vmem:[%s2045_s1 + $0xc8] sm:$0xff]  }
  0x1b   : > { %v292_v43 = vrot.slane %v285_v38, %v1854_v36  ;;  %v1283_v56 = vsel %vm1275_vm8, %v1537_v48, %v1282_v51  ;;  %1623 = vmatpush3.bf16.msra.mxu1 %v1715_v47  ;;  %1630 = vmatprep.mubr.msk.bf16.mxu1 %vm1751_vm0, %v1750_v1  ;;  %v1012_v38 = vcombine.high %v1499_v32, %v1499_v32  ;;  %v1518_v39 = vld.sshfl [vmem:[%s1820_s6 + $0x6] sm:$0x10 pattern:$0x75316420]  ;;  %v1023_v46 = vshrl.u32 %v1499_v32, 16  ;;  %v1739_v0 = vld [vmem:[%s2045_s1 + $0x108] sm:$0xff]  }
  0x1c   : > { %v1284_v58 = vcombine.low %v1279_v55, %v1283_v56  ;;  %1624 = vmatprep.subr.bf16.mxu1 %v1750_v1  ;;  %v585_v15 = vrot.slane %v578_v7, %v1854_v36  ;;  %v1924_v23 = vsel %vm1840_vm2, %v684_v16, %v689_v19  ;;  %v820_v35 = vrot.slane %v1475_v31, %v1854_v36  ;;  %v1731_v45 = vld [vmem:[%s2045_s1 + $0xe0] sm:$0xff]   ;;  %v1734_v55 = vld [vmem:[%s2045_s1 + $0xd0] sm:$0xff]  }
  0x1d   : > { %1595 = vmatmul.mubr.msk.bf16.vlgmr.msra.gmra.mrb[0].mxu0 %vm317_vm7, %v292_v43  ;;  %v701_v29 = vcombine.low %v1849_v34, %v1924_v23  ;;  %v1728_v34 = vld [vmem:[%s2045_s1 + $0x98] sm:$0xff]   ;;  %v1527_v40 = vcombine.high %v1466_v21, %v1518_v39  ;;  %v1028_v47 = vshll.u32 %v1012_v38, 16  ;;  %v1481_v50 = vld [vmem:[%s1820_s6 + $0x4] sm:$0x1]  ;;  %v1482_v51 = vld [vmem:[%s1820_s6 + $0x6] sm:$0x1] }
  0x1e   : > { %1611 = vmatpush3.bf16.msra.mxu0 %v1714_v42  ;;  %1618 = vmatprep.mubr.msk.bf16.mxu0 %vm1751_vm0, %v1750_v1  ;;  %v1291_v62 = vrot.slane %v1284_v58, %v1258_v37  ;;  %v1729_v37 = vld [vmem:[%s2045_s1 + $0xb8] sm:$0xff]   ;;  %v1730_v42 = vld [vmem:[%s2045_s1 + $0xc0] sm:$0xff]   ;;  %v827_v43 = vrot.slane %v820_v35, %v1854_v36  ;;  %v910_v54 = vcombine.low %v1481_v50, %v1482_v51 }
  0x1f   : > { %1612 = vmatprep.subr.bf16.mxu0 %v1750_v1  ;;  %1625 = vmatpush3.bf16.msra.mxu1 %v1717_v53  ;;  %v708_v33 = vrot.slane %v701_v29, %v1854_v36  ;;  %v1159_v44 = vrot.slane %v1527_v40, %v1854_v36  ;;  %v1030_v53 = vsel %vm1840_vm2, %v1023_v46, %v1028_v47  ;;  %v1736_v58 = vld [vmem:[%s2045_s1 + $0xd8] sm:$0xff]  }
  0x20   : > { %v1294_v3 = vsel %vm1293_vm9, %v1291_v62, 0.0  ;;  %1626 = vmatprep.subr.bf16.mxu1 %v1750_v1  ;;  %v1040_v56 = vcombine.low %v1924_v23, %v1030_v53  ;;  %v917_v57 = vrot.slane %v910_v54, %v1854_v36  ;;  %v1738_v62 = vld [vmem:[%s2045_s1 + $0x100] sm:$0xff]  }
  0x21   : > { %v1295_v4 = vrot.slane %v1294_v3, 4  ;;  %v715_v41 = vrot.slane %v708_v33, %v1854_v36  ;;  %v1166_v48 = vrot.slane %v1159_v44, %v1854_v36  ;;  %v1533_v44 = vld [vmem:[%s2046_s2] ss:$0 sm:$0xff] }
  0x22   : > { %1613 = vmatpush3.bf16.msra.mxu0 %v1716_v52  ;;  %v1733_v52 = vld [vmem:[%s2045_s1 + $0xe8] sm:$0xff]   ;;  %v1047_v59 = vrot.slane %v1040_v56, %v1854_v36  ;;  %v924_v61 = vrot.slane %v917_v57, %v1854_v36 }
  0x23   : > { %1614 = vmatprep.subr.bf16.mxu0 %v1750_v1  ;;  %v1296_v8 = vadd.f32 %v1295_v4, %v1294_v3  ;;  %1627 = vmatpush3.bf16.msra.mxu1 %v1719_v2  ;;  %v1741_v2 = vld [vmem:[%s2045_s1 + $0x118] sm:$0xff]  }
  0x24   : > { %1628 = vmatprep.subr.bf16.mxu1 %v1750_v1 }
  0x25   : > { %v1297_v11 = vrot.slane %v1296_v8, 2 }
  0x26   : > { %1615 = vmatpush3.bf16.msra.mxu0 %v1718_v63  ;;  %v1054_v63 = vrot.slane %v1047_v59, %v1854_v36  ;;  %v1740_v36 = vld [vmem:[%s2045_s1 + $0x110] sm:$0xff]  }
  0x27   : > { %1616 = vmatprep.subr.bf16.mxu0 %v1750_v1  ;;  %v1298_v17 = vadd.f32 %v1297_v11, %v1296_v8  ;;  %1629 = vmatpush3.bf16.msra.mxu1 %v1721_v9 }
  0x28   : > { %1646 = vmatprep.subr.bf16.mxu1 %v1750_v1 }
  0x29   : > { %v1299_v20 = vrot.slane %v1298_v17, 1 }
  0x2a   : > { %1617 = vmatpush3.bf16.msra.mxu0 %v1720_v6  ;;  %1631 = vmatmul.mubr.msk.bf16.vlgmr.msra.gmra.mrb[4].mxu1 %vm317_vm7, %v585_v15 }
  0x2b   : > { %1634 = vmatprep.subr.bf16.mxu0 %v1750_v1  ;;  %v1300_v24 = vadd.f32 %v1299_v20, %v1298_v17  ;;  %1647 = vmatpush3.bf16.msra.mxu1 %v1723_v18 }
  0x2c   : > { %1648 = vmatprep.subr.bf16.mxu1 %v1750_v1  ;;  %1654 = vmatprep.mubr.msk.bf16.mxu1 %vm1751_vm0, %v1750_v1 }
  0x2d   : > { %1619 = vmatmul.mubr.msk.bf16.vlgmr.msra.gmra.mrb[4].mxu0 %vm317_vm7, %v488_v12  ;;  %v1302_v26 = vmul.f32 0.25, %v1300_v24 }
  0x2e   : > { %1635 = vmatpush3.bf16.msra.mxu0 %v1722_v14  ;;  %1642 = vmatprep.mubr.msk.bf16.mxu0 %vm1751_vm0, %v1750_v1 }
  0x2f   : > { %1636 = vmatprep.subr.bf16.mxu0 %v1750_v1  ;;  %1304 = vst.msk [vmem:[%s204_s14] sm:$0x1] %vm1303_vm10, %v1302_v26  ;;  %1649 = vmatpush3.bf16.msra.mxu1 %v1725_v25 }
  0x30   : > { %1650 = vmatprep.subr.bf16.mxu1 %v1750_v1 }
  0x32   : > { %1637 = vmatpush3.bf16.msra.mxu0 %v1724_v22 }
  0x33   : > { %1638 = vmatprep.subr.bf16.mxu0 %v1750_v1  ;;  %1651 = vmatpush3.bf16.msra.mxu1 %v1727_v30 }
  0x34   : > { %1652 = vmatprep.subr.bf16.mxu1 %v1750_v1 }
  0x36   : > { %1639 = vmatpush3.bf16.msra.mxu0 %v1726_v27 }
  0x37   : > { %1640 = vmatprep.subr.bf16.mxu0 %v1750_v1  ;;  %1653 = vmatpush3.bf16.msra.mxu1 %v1729_v37 }
  0x38   : > { %1670 = vmatprep.subr.bf16.mxu1 %v1750_v1 }
  0x3a   : > { %1641 = vmatpush3.bf16.msra.mxu0 %v1728_v34  ;;  %1655 = vmatmul.mubr.msk.bf16.vlgmr.msra.gmra.mrb[8].mxu1 %vm317_vm7, %v827_v43 }
  0x3b   : > { %1658 = vmatprep.subr.bf16.mxu0 %v1750_v1  ;;  %1671 = vmatpush3.bf16.msra.mxu1 %v1731_v45 }
  0x3c   : > { %1672 = vmatprep.subr.bf16.mxu1 %v1750_v1  ;;  %1678 = vmatprep.mubr.msk.bf16.mxu1 %vm1751_vm0, %v1750_v1 }
  0x3d   : > { %1643 = vmatmul.mubr.msk.bf16.vlgmr.msra.gmra.mrb[8].mxu0 %vm317_vm7, %v715_v41 }
  0x3e   : > { %1659 = vmatpush3.bf16.msra.mxu0 %v1730_v42  ;;  %1666 = vmatprep.mubr.msk.bf16.mxu0 %vm1751_vm0, %v1750_v1 }
  0x3f   : > { %1660 = vmatprep.subr.bf16.mxu0 %v1750_v1  ;;  %1673 = vmatpush3.bf16.msra.mxu1 %v1733_v52 }
  0x40   : > { %1674 = vmatprep.subr.bf16.mxu1 %v1750_v1 }
  0x42   : > { %1661 = vmatpush3.bf16.msra.mxu0 %v1732_v49 }
  0x43   : > { %1662 = vmatprep.subr.bf16.mxu0 %v1750_v1  ;;  %1675 = vmatpush3.bf16.msra.mxu1 %v1735_v28 }
  0x44   : > { %1676 = vmatprep.subr.bf16.mxu1 %v1750_v1 }
  0x46   : > { %1663 = vmatpush3.bf16.msra.mxu0 %v1734_v55 }
  0x47   : > { %1664 = vmatprep.subr.bf16.mxu0 %v1750_v1  ;;  %1677 = vmatpush3.bf16.msra.mxu1 %v1737_v60 }
  0x4a   : > { %1665 = vmatpush3.bf16.msra.mxu0 %v1736_v58  ;;  %1679 = vmatmul.mubr.msk.bf16.vlgmr.msra.gmra.mrb[12].mxu1 %vm317_vm7, %v1054_v63 }
  0x4b   : > { %1682 = vmatprep.subr.bf16.mxu0 %v1750_v1 }
  0x4d   : > { %1667 = vmatmul.mubr.msk.bf16.vlgmr.msra.gmra.mrb[12].mxu0 %vm317_vm7, %v924_v61 }
  0x4e   : > { %1683 = vmatpush3.bf16.msra.mxu0 %v1738_v62  ;;  %1690 = vmatprep.mubr.msk.bf16.mxu0 %vm1751_vm0, %v1750_v1  ;;  %vm1245_vm0 = vcmask 254976  }
  0x4f   : > { %1684 = vmatprep.subr.bf16.mxu0 %v1750_v1 }
  0x52   : > { %1685 = vmatpush3.bf16.msra.mxu0 %v1739_v0 }
  0x53   : > { %1686 = vmatprep.subr.bf16.mxu0 %v1750_v1 }
  0x56   : > { %1687 = vmatpush3.bf16.msra.mxu0 %v1740_v36 }
  0x57   : > { %1688 = vmatprep.subr.bf16.mxu0 %v1750_v1 }
  0x5a   : > { %1689 = vmatpush3.bf16.msra.mxu0 %v1741_v2 }
  0x5d   : > { %1691 = vmatmul.mubr.msk.bf16.vlgmr.msra.gmra.mrb[16].mxu0 %vm317_vm7, %v1166_v48 }
  0xed   : > { %v439_v5 = vpop.f32.mrb[0].mxu1 }
  0xee   : > { %v1608_v8 = vpop.f32.mrb[1].mxu1 }
  0xef   : > { %v442_v10 = vpop.f32.mrb[2].mxu1 }
  0xf0   : > { %v355_v3 = vpop.f32.mrb[0].mxu0  ;;  %v1609_v11 = vpop.f32.mrb[3].mxu1 }
  0xf1   : > { %v1596_v4 = vpop.f32.mrb[1].mxu0  ;;  %v440_v6 = vadd.f32 %v439_v5, %v355_v3 }
  0xf2   : > { %v358_v7 = vpop.f32.mrb[2].mxu0 }
  0xf3   : > { %v1597_v9 = vpop.f32.mrb[3].mxu0 }
  0xfd   : > { %v647_v15 = vpop.f32.mrb[4].mxu1 }
  0xfe   : > { %v1632_v17 = vpop.f32.mrb[5].mxu1 }
  0xff   : > { %v650_v19 = vpop.f32.mrb[6].mxu1 }
 0x100   : > { %v550_v12 = vpop.f32.mrb[4].mxu0  ;;  %v1633_v20 = vpop.f32.mrb[7].mxu1 }
 0x101   : > { %v556_v13 = vadd.f32 %v550_v12, %v440_v6  ;;  %v1620_v14 = vpop.f32.mrb[5].mxu0 }
 0x102   : > { %v553_v16 = vpop.f32.mrb[6].mxu0 }
 0x103   : > { %v653_v18 = vadd.f32 %v647_v15, %v556_v13  ;;  %v1621_v1 = vpop.f32.mrb[7].mxu0 }
 0x10d   : > { %v889_v24 = vpop.f32.mrb[8].mxu1 }
 0x10e   : > { %v1656_v26 = vpop.f32.mrb[9].mxu1 }
 0x10f   : > { %v892_v30 = vpop.f32.mrb[10].mxu1 }
 0x110   : > { %v777_v21 = vpop.f32.mrb[8].mxu0  ;;  %v1657_v31 = vpop.f32.mrb[11].mxu1 }
 0x111   : > { %v783_v22 = vadd.f32 %v777_v21, %v653_v18  ;;  %v1644_v23 = vpop.f32.mrb[9].mxu0 }
 0x112   : > { %v780_v25 = vpop.f32.mrb[10].mxu0 }
 0x113   : > { %v895_v27 = vadd.f32 %v889_v24, %v783_v22  ;;  %v1645_v29 = vpop.f32.mrb[11].mxu0 }
 0x11d   : > { %v1116_v35 = vpop.f32.mrb[12].mxu1 }
 0x11e   : > { %v1680_v38 = vpop.f32.mrb[13].mxu1 }
 0x11f   : > { %v1119_v41 = vpop.f32.mrb[14].mxu1 }
 0x120   : > { %v986_v32 = vpop.f32.mrb[12].mxu0  ;;  %v1681_v42 = vpop.f32.mrb[15].mxu1 }
 0x121   : > { %v992_v33 = vadd.f32 %v986_v32, %v895_v27  ;;  %v1668_v34 = vpop.f32.mrb[13].mxu0 }
 0x122   : > { %v989_v37 = vpop.f32.mrb[14].mxu0 }
 0x123   : > { %v1122_v39 = vadd.f32 %v1116_v35, %v992_v33  ;;  %v1669_v40 = vpop.f32.mrb[15].mxu0 }
 0x130   : > { %v1228_v43 = vpop.f32.mrb[16].mxu0 }
 0x131   : > { %v1234_v45 = vadd.f32 %v1228_v43, %v1122_v39  ;;  %v1692_v46 = vpop.f32.mrb[17].mxu0 }
 0x132   : > { %v1231_v47 = vpop.f32.mrb[18].mxu0 }
 0x133   : > { %v1242_v48 = vadd.f32 %v1533_v44, %v1234_v45  ;;  %v1693_v49 = vpop.f32.mrb[19].mxu0 }
 0x135   : > { %v1243_v50 = vmax.f32 %v1242_v48, 0.0 }
 0x137   : > { %v1244_v51 = vpack.c.bf16 %v1243_v50, %v1243_v50 }
 0x139   : > { %1246 = vst.msk [vmem:[%s201_s30] sm:$0x3] %vm1245_vm0, %v1244_v51 }
 0x13a PF: > { %s15_s15 = sadd.s32 1, %s1748_s15  }
 0x13b   : > { %p12_p4 = scmp.ge.s32.totalorder %s15_s15, 4  }
 0x13d   :  { %14 = sbr.rel (!%p12_p4) target bundleno = 1 (0x1), region = 84 }

// kernel: duat_forward.28
= control target key start
LH: loop header
LB: loop body
LE: loop exit
PB: predicated region body
PF: predicated region fallthrough
CT: control target
= control target key end

     0   :  { %s555_s15 = smov 0   ;;  %s557_s16 = smov 0   ;;  %s618_s0 = inlined_call_operand.vmem [shape: bf16[2,1,128], index: 0, kind: input, shape index: {}]   ;;  %s619_s1 = inlined_call_operand.vmem [shape: f32[2,1,128], index: 1, kind: input, shape index: {}]   ;;  %s620_s2 = inlined_call_operand.vmem [shape: bf16[128,128], index: 2, kind: input, shape index: {}]   ;;  %s621_s3 = inlined_call_operand.vmem [shape: f32[1,128], index: 3, kind: input, shape index: {}]   ;;  %s622_s4 = inlined_call_operand.vmem [shape: bf16[2,1,128], index: 4, kind: output, shape index: {}]  }
   0x1   :  { %s559_s17 = smov 0  }
   0x2 LB: > { %s26_s18 = sadd.s32 1, %s522_s16  ;;  %p430_p0 = scmp.ge.s32.totalorder %s526_s17, 1  ;;  %s526_s17 = sphi %s559_s17, %s14_s17   ;;  %s522_s16 = sphi %s557_s16, %s624_s16   ;;  %s518_s15 = sphi %s555_s15, %s623_s15  }
   0x3   : > { %p28_p1 = scmp.ge.s32.totalorder %s26_s18, 2  ;;  %p187_p2 = scmp.lt.s32.totalorder %s526_s17, 3 }
   0x5   : > { %s626_s18 = smov (%p28_p1, %s26_s18), 0  ;;  %p188_p3 = pnand %p430_p0, %p187_p2 }
   0x6   : > { %v496_v0 = vld [vmem:[%s620_s2] sm:$0xff] (!%p188_p3)   ;;  %v528_v1 = vmov (!%p188_p3), 0.0   ;;  %v497_v2 = vld [vmem:[%s620_s2 + $0x8] sm:$0xff] (!%p188_p3)   ;;  %vm529_vm0 = vmmov (!%p188_p3), 0   ;;  %v498_v3 = vld [vmem:[%s620_s2 + $0x10] sm:$0xff] (!%p188_p3)   ;;  %p218_p4 = scmp.lt.s32.totalorder (!%p188_p3), %s518_s15, 1 }
   0x7   : > { %191 = sbr.rel (%p188_p3) target bundleno = 259 (0x103), region = 36  ;;  %450 = vmatprep.subr.bf16.mxu0 (!%p188_p3), %v528_v1  ;;  %466 = vmatprep.mubr.msk.bf16.mxu0 (!%p188_p3), %vm529_vm0, %v528_v1  ;;  %v499_v4 = vld [vmem:[%s620_s2 + $0x18] sm:$0xff] (!%p188_p3)   ;;  %v500_v5 = vld [vmem:[%s620_s2 + $0x20] sm:$0xff] (!%p188_p3)   ;;  %v501_v6 = vld [vmem:[%s620_s2 + $0x28] sm:$0xff] (!%p188_p3)   ;;  %vm346_vm1 = vcmask (!%p188_p3), 1040384  }
   0x8   : > { %451 = vmatpush3.bf16.msra.mxu0 (!%p188_p3), %v496_v0  ;;  %v502_v9 = vld [vmem:[%s620_s2 + $0x30] sm:$0xff] (!%p188_p3)   ;;  %v503_v12 = vld [vmem:[%s620_s2 + $0x38] sm:$0xff] (!%p188_p3)   ;;  %v255_v14 = vld [vmem:[%s621_s3] sm:$0x1] (!%p188_p3)  ;;  %vm347_vm2 = vsmask.f32 (!%p188_p3), 256 }
   0x9   : > { %452 = vmatprep.subr.bf16.mxu0 (!%p188_p3), %v528_v1  ;;  %vm348_vm3 = vmand (!%p188_p3), %vm346_vm1, %vm347_vm2 }
   0xc   : > { %453 = vmatpush3.bf16.msra.mxu0 (!%p188_p3), %v497_v2 }
   0xd   : > { %454 = vmatprep.subr.bf16.mxu0 (!%p188_p3), %v528_v1 }
   0xe   : > { %s628_s15 = smov (!%p218_p4, %s518_s15), 1 }
   0xf   : > { %s223_s5 = scalar_lea.vmem %s618_s0, %s628_s15  ;;  %s226_s10 = scalar_lea.vmem %s619_s1, %s628_s15 }
  0x10   : > { %455 = vmatpush3.bf16.msra.mxu0 %v498_v3  ;;  %v234_v7 = vld [vmem:[%s223_s5] sm:$0x1]  ;;  %s232_s23 = scalar_lea.vmem %s622_s4, %s628_s15 }
  0x11   : > { %456 = vmatprep.subr.bf16.mxu0 %v528_v1  ;;  %v235_v8 = vunpack.c.l.bf16 %v234_v7  ;;  %v236_v10 = vld [vmem:[%s226_s10] sm:$0x1] }
  0x12   : > { %v349_v21 = vld [vmem:[%s232_s23] sm:$0x1] }
  0x13   : > { %v237_v11 = vmul.f32 %v236_v10, %v235_v8 }
  0x14   : > { %457 = vmatpush3.bf16.msra.mxu0 %v499_v4 }
  0x15   : > { %458 = vmatprep.subr.bf16.mxu0 %v528_v1  ;;  %v238_v13 = vpack.c.bf16 %v237_v11, %v237_v11 }
  0x18   : > { %459 = vmatpush3.bf16.msra.mxu0 %v500_v5 }
  0x19   : > { %460 = vmatprep.subr.bf16.mxu0 %v528_v1 }
  0x1c   : > { %461 = vmatpush3.bf16.msra.mxu0 %v501_v6 }
  0x1d   : > { %462 = vmatprep.subr.bf16.mxu0 %v528_v1 }
  0x20   : > { %463 = vmatpush3.bf16.msra.mxu0 %v502_v9 }
  0x21   : > { %464 = vmatprep.subr.bf16.mxu0 %v528_v1 }
  0x24   : > { %465 = vmatpush3.bf16.msra.mxu0 %v503_v12 }
  0x27   : > { %467 = vmatmul.mubr.bf16.vlgmr.msra.gmra.mrb[0].mxu0 %v238_v13 }
  0xfa   : > { %v338_v15 = vpop.f32.mrb[0].mxu0 }
  0xfb   : > { %v339_v16 = vadd.f32 %v338_v15, %v255_v14  ;;  %v468_v17 = vpop.f32.mrb[1].mxu0 }
  0xfc   : > { %v341_v18 = vpop.f32.mrb[2].mxu0 }
  0xfd   : > { %v344_v19 = vmax.f32 %v339_v16, 0.0  ;;  %v469_v20 = vpop.f32.mrb[3].mxu0 }
  0xff   : > { %v345_v22 = vpack.c.bf16 %v344_v19, %v344_v19 }
 0x101   : > { %v350_v23 = vsel %vm348_vm3, %v345_v22, %v349_v21 }
 0x102   : > { %351 = vst [vmem:[%s232_s23] sm:$0x1] %v350_v23 }
 0x103 PF: > { %s14_s17 = sadd.s32 1, %s526_s17   ;;  %s623_s15 = smov %s522_s16 }
 0x104   : > { %p11_p5 = scmp.ge.s32.totalorder %s14_s17, 4   ;;  %s624_s16 = smov %s626_s18 }
 0x106   :  { %13 = sbr.rel (!%p11_p5) target bundleno = 2 (0x2), region = 69 }

// kernel: duat_forward.22
= control target key start
LH: loop header
LB: loop body
LE: loop exit
PB: predicated region body
PF: predicated region fallthrough
CT: control target
= control target key end

     0   :  { %v954_v21 = vmov 1966171168   ;;  %v101_v23 = vlaneseq  ;;  %v955_v40 = vmov 0.0   ;;  %v956_v43 = vmov 0.0|0.0   ;;  %s1173_s1 = inlined_call_operand.vmem [shape: bf16[576,128], index: 1, kind: input, shape index: {}]   ;;  %s1174_s0 = inlined_call_operand.vmem [shape: bf16[2,576], index: 0, kind: input, shape index: {}]   ;;  %s1175_s3 = inlined_call_operand.vmem [shape: f32[128,128], index: 3, kind: input, shape index: {}]   ;;  %s1176_s2 = inlined_call_operand.vmem [shape: f32[3,128], index: 2, kind: input, shape index: {}]   ;;  %s1177_s4 = inlined_call_operand.vmem [shape: bf16[2,128], index: 4, kind: output, shape index: {}]  }
   0x1   :  { %v915_v0 = vld [vmem:[%s1173_s1 + $0x40] sm:$0xff]   ;;  %v919_v4 = vld [vmem:[%s1173_s1 + $0x48] sm:$0xff]   ;;  %v923_v8 = vld [vmem:[%s1173_s1 + $0x50] sm:$0xff]   ;;  %v99_v22 = vunpack.c.l.s4 %v954_v21  ;;  %vm957_vm0 = vmmov 0   ;;  %vm356_vm1 = vcmask 523264  }
   0x2   :  { %v916_v1 = vld [vmem:[%s1173_s1] sm:$0xff]   ;;  %698 = vmatprep.subr.bf16.mxu0 %v915_v0  ;;  %v920_v5 = vld [vmem:[%s1173_s1 + $0x8] sm:$0xff]   ;;  %v924_v9 = vld [vmem:[%s1173_s1 + $0x10] sm:$0xff]   ;;  %v102_v29 = vshrl.u32 %v101_v23, 7 }
   0x3   :  { %v917_v2 = vld [vmem:[%s1173_s1 + $0xc0] sm:$0xff]   ;;  %699 = vmatpush3.bf16.msra.mxu0 %v916_v1  ;;  %v921_v6 = vld [vmem:[%s1173_s1 + $0xc8] sm:$0xff]   ;;  %v925_v10 = vld [vmem:[%s1173_s1 + $0xd0] sm:$0xff]   ;;  %v100_v28 = vunpack.c.0.s8 %v99_v22 }
   0x4   :  { %v918_v3 = vld [vmem:[%s1173_s1 + $0x80] sm:$0xff]   ;;  %720 = vmatprep.subr.bf16.mxu1 %v917_v2  ;;  %700 = vmatprep.subr.bf16.mxu0 %v919_v4  ;;  %v922_v7 = vld [vmem:[%s1173_s1 + $0x88] sm:$0xff]   ;;  %v926_v11 = vld [vmem:[%s1173_s1 + $0x90] sm:$0xff]  }
   0x5   :  { %721 = vmatpush3.bf16.msra.mxu1 %v918_v3  ;;  %v927_v12 = vld [vmem:[%s1173_s1 + $0x58] sm:$0xff]   ;;  %v931_v16 = vld [vmem:[%s1173_s1 + $0x60] sm:$0xff]   ;;  %v935_v20 = vld [vmem:[%s1173_s1 + $0x68] sm:$0xff]   ;;  %v103_v34 = vsub.s32 %v100_v28, %v102_v29 }
   0x6   :  { %722 = vmatprep.subr.bf16.mxu1 %v921_v6  ;;  %v928_v13 = vld [vmem:[%s1173_s1 + $0x18] sm:$0xff]   ;;  %v932_v17 = vld [vmem:[%s1173_s1 + $0x20] sm:$0xff]   ;;  %v936_v24 = vld [vmem:[%s1173_s1 + $0x28] sm:$0xff]  }
   0x7   :  { %701 = vmatpush3.bf16.msra.mxu0 %v920_v5  ;;  %v929_v14 = vld [vmem:[%s1173_s1 + $0xd8] sm:$0xff]   ;;  %v933_v18 = vld [vmem:[%s1173_s1 + $0xe0] sm:$0xff]   ;;  %v937_v25 = vld [vmem:[%s1173_s1 + $0xe8] sm:$0xff]  }
   0x8   :  { %702 = vmatprep.subr.bf16.mxu0 %v923_v8  ;;  %v930_v15 = vld [vmem:[%s1173_s1 + $0x98] sm:$0xff]   ;;  %v934_v19 = vld [vmem:[%s1173_s1 + $0xa0] sm:$0xff]   ;;  %v938_v26 = vld [vmem:[%s1173_s1 + $0xa8] sm:$0xff]  }
   0x9   :  { %723 = vmatpush3.bf16.msra.mxu1 %v922_v7  ;;  %v939_v27 = vld [vmem:[%s1173_s1 + $0x70] sm:$0xff]   ;;  %v943_v33 = vld [vmem:[%s1173_s1 + $0x78] sm:$0xff]   ;;  %v18_v37 = vld [vmem:[%s1174_s0] sm:$0x1f] }
   0xa   :  { %724 = vmatprep.subr.bf16.mxu1 %v925_v10  ;;  %v940_v30 = vld [vmem:[%s1173_s1 + $0x30] sm:$0xff]   ;;  %v944_v35 = vld [vmem:[%s1173_s1 + $0x38] sm:$0xff]   ;;  %v104_v38 = vrot.slane %v18_v37, %v103_v34  ;;  %v948_v45 = vld [vmem:[%s1173_s1 + $0x100] sm:$0xff]   ;;  %v97_v55 = vcombine.high %v18_v37, %v18_v37 }
   0xb   :  { %703 = vmatpush3.bf16.msra.mxu0 %v924_v9  ;;  %v941_v31 = vld [vmem:[%s1173_s1 + $0xf0] sm:$0xff]   ;;  %v945_v36 = vld [vmem:[%s1173_s1 + $0xf8] sm:$0xff]   ;;  %v480_v46 = vld [vmem:[%s1175_s3] sm:$0xff] }
   0xc   :  { %704 = vmatprep.subr.bf16.mxu0 %v927_v12  ;;  %v942_v32 = vld [vmem:[%s1173_s1 + $0xb0] sm:$0xff]   ;;  %v947_v39 = vld [vmem:[%s1173_s1 + $0xb8] sm:$0xff]   ;;  %v112_v41 = vcombine.high %v104_v38, %v104_v38  ;;  %v119_v42 = vrot.slane %v104_v38, %v103_v34  ;;  %v481_v47 = vld [vmem:[%s1175_s3 + $0x8] sm:$0xff]  ;;  %v111_v60 = vrot.slane %v97_v55, %v103_v34 }
   0xd   :  { %725 = vmatpush3.bf16.msra.mxu1 %v926_v11  ;;  %v864_v50 = vpack.c.bf16 %v481_v47, %v480_v46  ;;  %v482_v51 = vld [vmem:[%s1175_s3 + $0x10] sm:$0xff]  ;;  %v483_v52 = vld [vmem:[%s1175_s3 + $0x18] sm:$0xff]  ;;  %v949_v53 = vld [vmem:[%s1173_s1 + $0x108] sm:$0xff]  }
   0xe   :  { %726 = vmatprep.subr.bf16.mxu1 %v929_v14  ;;  %v133_v44 = vrot.slane %v112_v41, %v103_v34  ;;  %v134_v48 = vcombine.high %v119_v42, %v119_v42  ;;  %v867_v54 = vpack.c.bf16 %v483_v52, %v482_v51  ;;  %v484_v56 = vld [vmem:[%s1175_s3 + $0x20] sm:$0xff]  ;;  %v485_v57 = vld [vmem:[%s1175_s3 + $0x28] sm:$0xff]  ;;  %v950_v58 = vld [vmem:[%s1173_s1 + $0x110] sm:$0xff]   ;;  %v126_v62 = vrot.slane %v111_v60, %v103_v34 }
   0xf   :  { %705 = vmatpush3.bf16.msra.mxu0 %v928_v13  ;;  %v870_v59 = vpack.c.bf16 %v485_v57, %v484_v56  ;;  %v951_v61 = vld [vmem:[%s1173_s1 + $0x118] sm:$0xff]   ;;  %v486_v63 = vld [vmem:[%s1175_s3 + $0x30] sm:$0xff]  ;;  %v488_v2 = vld [vmem:[%s1175_s3 + $0x40] sm:$0xff] }
  0x10   :  { %706 = vmatprep.subr.bf16.mxu0 %v931_v16  ;;  %392 = vmatprep.mubr.bf16.mxu0 %v133_v44  ;;  %v135_v49 = vcombine.high %v133_v44, %v133_v44  ;;  %v487_v0 = vld [vmem:[%s1175_s3 + $0x38] sm:$0xff]  ;;  %v489_v3 = vld [vmem:[%s1175_s3 + $0x48] sm:$0xff]  ;;  %v490_v5 = vld [vmem:[%s1175_s3 + $0x50] sm:$0xff] }
  0x11   :  { %727 = vmatpush3.bf16.msra.mxu1 %v930_v15  ;;  %v873_v1 = vpack.c.bf16 %v487_v0, %v486_v63  ;;  %v876_v4 = vpack.c.bf16 %v489_v3, %v488_v2  ;;  %v491_v6 = vld [vmem:[%s1175_s3 + $0x58] sm:$0xff]  ;;  %v492_v7 = vld [vmem:[%s1175_s3 + $0x60] sm:$0xff]  ;;  %v493_v8 = vld [vmem:[%s1175_s3 + $0x68] sm:$0xff] }
  0x12   :  { %728 = vmatprep.subr.bf16.mxu1 %v933_v18  ;;  %432 = vmatprep.mubr.bf16.mxu1 %v135_v49  ;;  %v879_v9 = vpack.c.bf16 %v491_v6, %v490_v5  ;;  %v882_v10 = vpack.c.bf16 %v493_v8, %v492_v7  ;;  %v494_v11 = vld [vmem:[%s1175_s3 + $0x70] sm:$0xff]  ;;  %v495_v12 = vld [vmem:[%s1175_s3 + $0x78] sm:$0xff]  ;;  %v658_v15 = vld [vmem:[%s1176_s2] ss:$0 sm:$0xff] }
  0x13   :  { %707 = vmatpush3.bf16.msra.mxu0 %v932_v17  ;;  %v885_v13 = vpack.c.bf16 %v495_v12, %v494_v11 }
  0x14   :  { %708 = vmatprep.subr.bf16.mxu0 %v935_v20 }
  0x15   :  { %729 = vmatpush3.bf16.msra.mxu1 %v934_v19 }
  0x16   :  { %730 = vmatprep.subr.bf16.mxu1 %v937_v25 }
  0x17   :  { %709 = vmatpush3.bf16.msra.mxu0 %v936_v24 }
  0x18   :  { %710 = vmatprep.subr.bf16.mxu0 %v939_v27 }
  0x19   :  { %731 = vmatpush3.bf16.msra.mxu1 %v938_v26 }
  0x1a   :  { %732 = vmatprep.subr.bf16.mxu1 %v941_v31 }
  0x1b   :  { %711 = vmatpush3.bf16.msra.mxu0 %v940_v30 }
  0x1c   :  { %712 = vmatprep.subr.bf16.mxu0 %v943_v33 }
  0x1d   :  { %733 = vmatpush3.bf16.msra.mxu1 %v942_v32 }
  0x1e   :  { %734 = vmatprep.subr.bf16.mxu1 %v945_v36 }
  0x1f   :  { %713 = vmatpush3.bf16.msra.mxu0 %v944_v35 }
  0x20   :  { %781 = vmatprep.subr.bf16.mxu0 %v955_v40 }
  0x21   :  { %735 = vmatpush3.bf16.msra.mxu1 %v947_v39 }
  0x22   :  { %863 = vmatprep.subr.bf16.mxu1 %v956_v43  ;;  %393 = vmatmul.mubr.bf16.vlgmr.msra.gmra.mrb[0].mxu0 %v119_v42  ;;  %v697_v42 = vld [vmem:[%s1176_s2 + $0x2] ss:$0 sm:$0xff] }
  0x23   :  { %782 = vmatpush3.bf16.msra.mxu0 %v948_v45  ;;  %789 = vmatprep.mubr.msk.bf16.mxu0 %vm957_vm0, %v955_v40 }
  0x24   :  { %433 = vmatmul.mubr.bf16.vlgmr.msra.gmra.mrb[0].mxu1 %v134_v48  ;;  %783 = vmatprep.subr.bf16.mxu0 %v955_v40 }
  0x25   :  { %865 = vmatpush3.bf16.msra.mxu1 %v864_v50  ;;  %825 = vmatprep.mubr.msk.f32.mxu1 %vm957_vm0, %v955_v40 }
  0x26   :  { %866 = vmatprep.subr.bf16.mxu1 %v956_v43 }
  0x27   :  { %784 = vmatpush3.bf16.msra.mxu0 %v949_v53 }
  0x28   :  { %785 = vmatprep.subr.bf16.mxu0 %v955_v40 }
  0x29   :  { %868 = vmatpush3.bf16.msra.mxu1 %v867_v54 }
  0x2a   :  { %869 = vmatprep.subr.bf16.mxu1 %v956_v43 }
  0x2b   :  { %786 = vmatpush3.bf16.msra.mxu0 %v950_v58 }
  0x2c   :  { %787 = vmatprep.subr.bf16.mxu0 %v955_v40 }
  0x2d   :  { %871 = vmatpush3.bf16.msra.mxu1 %v870_v59 }
  0x2e   :  { %872 = vmatprep.subr.bf16.mxu1 %v956_v43 }
  0x2f   :  { %788 = vmatpush3.bf16.msra.mxu0 %v951_v61 }
  0x30   :  { %887 = vmatprep.subr.bf16.mxu0 %v956_v43 }
  0x31   :  { %874 = vmatpush3.bf16.msra.mxu1 %v873_v1 }
  0x32   :  { %790 = vmatmul.mubr.msk.bf16.vlgmr.msra.gmra.mrb[4].mxu0 %vm356_vm1, %v126_v62  ;;  %875 = vmatprep.subr.bf16.mxu1 %v956_v43 }
  0x33   :  { %889 = vmatpush3.bf16.msra.mxu0 %v864_v50  ;;  %860 = vmatprep.mubr.msk.f32.mxu0 %vm957_vm0, %v955_v40  ;;  %v696_v40 = vld [vmem:[%s1176_s2 + $0x1] ss:$0 sm:$0xff] }
  0x34   :  { %890 = vmatprep.subr.bf16.mxu0 %v956_v43 }
  0x35   :  { %877 = vmatpush3.bf16.msra.mxu1 %v876_v4 }
  0x36   :  { %878 = vmatprep.subr.bf16.mxu1 %v956_v43 }
  0x37   :  { %892 = vmatpush3.bf16.msra.mxu0 %v867_v54 }
  0x38   :  { %893 = vmatprep.subr.bf16.mxu0 %v956_v43 }
  0x39   :  { %880 = vmatpush3.bf16.msra.mxu1 %v879_v9 }
  0x3a   :  { %881 = vmatprep.subr.bf16.mxu1 %v956_v43 }
  0x3b   :  { %895 = vmatpush3.bf16.msra.mxu0 %v870_v59 }
  0x3c   :  { %896 = vmatprep.subr.bf16.mxu0 %v956_v43 }
  0x3d   :  { %883 = vmatpush3.bf16.msra.mxu1 %v882_v10 }
  0x3e   :  { %884 = vmatprep.subr.bf16.mxu1 %v956_v43 }
  0x3f   :  { %898 = vmatpush3.bf16.msra.mxu0 %v873_v1 }
  0x40   :  { %899 = vmatprep.subr.bf16.mxu0 %v956_v43 }
  0x41   :  { %886 = vmatpush3.bf16.msra.mxu1 %v885_v13 }
  0x43   :  { %901 = vmatpush3.bf16.msra.mxu0 %v876_v4 }
  0x44   :  { %902 = vmatprep.subr.bf16.mxu0 %v956_v43 }
  0x47   :  { %904 = vmatpush3.bf16.msra.mxu0 %v879_v9 }
  0x48   :  { %905 = vmatprep.subr.bf16.mxu0 %v956_v43 }
  0x4b   :  { %907 = vmatpush3.bf16.msra.mxu0 %v882_v10 }
  0x4c   :  { %908 = vmatprep.subr.bf16.mxu0 %v956_v43 }
  0x4f   :  { %910 = vmatpush3.bf16.msra.mxu0 %v885_v13 }
  0xf5   :  { %v714_v14 = vpop.f32.mrb[0].mxu0 }
  0xf6   :  { %v715_v16 = vpop.f32.mrb[1].mxu0 }
  0xf7   :  { %v716_v17 = vadd.f32 %v715_v16, %v714_v14  ;;  %v717_v18 = vpop.f32.mrb[2].mxu0  ;;  %v736_v19 = vpop.f32.mrb[0].mxu1 }
  0xf8   :  { %v718_v20 = vpop.f32.mrb[3].mxu0  ;;  %v737_v21 = vpop.f32.mrb[1].mxu1 }
  0xf9   :  { %v395_v22 = vadd.f32 %v716_v17, %v658_v15  ;;  %v738_v23 = vadd.f32 %v737_v21, %v736_v19  ;;  %v739_v24 = vpop.f32.mrb[2].mxu1 }
  0xfa   :  { %v740_v25 = vpop.f32.mrb[3].mxu1 }
  0xfb   :  { %v435_v26 = vadd.f32 %v738_v23, %v395_v22 }
 0x105   :  { %v474_v27 = vpop.f32.mrb[4].mxu0 }
 0x106   :  { %v475_v28 = vadd.f32 %v474_v27, %v435_v26  ;;  %v791_v29 = vpop.f32.mrb[5].mxu0 }
 0x107   :  { %v477_v30 = vpop.f32.mrb[6].mxu0 }
 0x108   :  { %v792_v31 = vpop.f32.mrb[7].mxu0  ;;  %826 = vmatmul.mubr.f32.vlgmr.msra.gmra.mrb[4].mxu1 %v475_v28 }
 0x1db   :  { %v562_v32 = vpop.f32.mrb[4].mxu1 }
 0x1dc   :  { %v566_v33 = vsub.f32 %v475_v28, %v562_v32  ;;  %v827_v34 = vpop.f32.mrb[5].mxu1 }
 0x1de   :  { %v567_v35 = vmul.f32 %v566_v33, %v566_v33 }
 0x1e0   :  { %861 = vmatmul.mubr.f32.vlgmr.msra.gmra.mrb[8].mxu0 %v567_v35 }
 0x2b3   :  { %v634_v36 = vpop.f32.mrb[8].mxu0 }
 0x2b4   :  { %v635_v37 = vadd.f32 1e-05, %v634_v36  ;;  %v862_v38 = vpop.f32.mrb[9].mxu0 }
 0x2b6   :  { %952 = vrsqrt.f32 %v635_v37 }
 0x2c0   :  { %v953_v39 = vpop.eup %952 }
 0x2c1   :  { %v639_v41 = vmul.f32 %v953_v39, %v566_v33 }
 0x2c3   :  { %v645_v43 = vmul.f32 %v696_v40, %v639_v41 }
 0x2c5   :  { %v651_v44 = vadd.f32 %v697_v42, %v645_v43 }
 0x2c7   :  { %v652_v45 = vpack.c.bf16 %v651_v44, %v651_v44 }
 0x2c9   :  { %653 = vst [vmem:[%s1177_s4] sm:$0x1] %v652_v45 }

// kernel: duat_forward.30
= control target key start
LH: loop header
LB: loop body
LE: loop exit
PB: predicated region body
PF: predicated region fallthrough
CT: control target
= control target key end

     0   :  { %v311_v0 = vmov 0.0   ;;  %vm312_vm0 = vmmov 0   ;;  %vm175_vm1 = vcmask 523264   ;;  %vm225_vm2 = vcmask 517120   ;;  %s391_s1 = inlined_call_operand.vmem [shape: bf16[128,64], index: 1, kind: input, shape index: {}]   ;;  %s392_s3 = inlined_call_operand.vmem [shape: bf16[64,64], index: 3, kind: input, shape index: {}]   ;;  %s393_s0 = inlined_call_operand.vmem [shape: f32[2,128], index: 0, kind: input, shape index: {}]   ;;  %s394_s2 = inlined_call_operand.vmem [shape: f32[1,64], index: 2, kind: input, shape index: {}]   ;;  %s395_s4 = inlined_call_operand.vmem [shape: f32[1,64], index: 4, kind: input, shape index: {}]   ;;  %s396_s5 = inlined_call_operand.vmem [shape: f32[2,64], index: 5, kind: output, shape index: {}]  }
   0x1   :  { %261 = vmatprep.subr.bf16.mxu0 %v311_v0  ;;  %v295_v1 = vld [vmem:[%s391_s1] sm:$0xff]   ;;  %277 = vmatprep.mubr.msk.bf16.mxu0 %vm312_vm0, %v311_v0  ;;  %v296_v2 = vld [vmem:[%s391_s1 + $0x8] sm:$0xff]   ;;  %v297_v3 = vld [vmem:[%s391_s1 + $0x10] sm:$0xff]  }
   0x2   :  { %281 = vmatprep.subr.bf16.mxu1 %v311_v0  ;;  %289 = vmatprep.mubr.msk.bf16.mxu1 %vm312_vm0, %v311_v0  ;;  %v303_v4 = vld [vmem:[%s392_s3] sm:$0xff]   ;;  %v298_v5 = vld [vmem:[%s391_s1 + $0x18] sm:$0xff]   ;;  %v304_v6 = vld [vmem:[%s392_s3 + $0x8] sm:$0xff]  }
   0x3   :  { %262 = vmatpush3.bf16.msra.mxu0 %v295_v1  ;;  %282 = vmatpush3.bf16.msra.mxu1 %v303_v4  ;;  %v299_v7 = vld [vmem:[%s391_s1 + $0x20] sm:$0xff]   ;;  %v300_v8 = vld [vmem:[%s391_s1 + $0x28] sm:$0xff]   ;;  %v301_v9 = vld [vmem:[%s391_s1 + $0x30] sm:$0xff]  }
   0x4   :  { %263 = vmatprep.subr.bf16.mxu0 %v311_v0  ;;  %283 = vmatprep.subr.bf16.mxu1 %v311_v0  ;;  %v302_v10 = vld [vmem:[%s391_s1 + $0x38] sm:$0xff]   ;;  %v21_v11 = vld [vmem:[%s393_s0] sm:$0x3]  ;;  %v305_v13 = vld [vmem:[%s392_s3 + $0x10] sm:$0xff]  }
   0x5   :  { %v22_v12 = vpack.c.bf16 %v21_v11, %v21_v11  ;;  %v306_v14 = vld [vmem:[%s392_s3 + $0x18] sm:$0xff]   ;;  %v231_v15 = vld [vmem:[%s394_s2] ss:$0 sm:$0xff] }
   0x6   :  { %v240_v23 = vld [vmem:[%s395_s4] ss:$0 sm:$0xff] }
   0x7   :  { %264 = vmatpush3.bf16.msra.mxu0 %v296_v2  ;;  %284 = vmatpush3.bf16.msra.mxu1 %v304_v6 }
   0x8   :  { %265 = vmatprep.subr.bf16.mxu0 %v311_v0  ;;  %285 = vmatprep.subr.bf16.mxu1 %v311_v0 }
   0xb   :  { %266 = vmatpush3.bf16.msra.mxu0 %v297_v3  ;;  %286 = vmatpush3.bf16.msra.mxu1 %v305_v13 }
   0xc   :  { %267 = vmatprep.subr.bf16.mxu0 %v311_v0  ;;  %287 = vmatprep.subr.bf16.mxu1 %v311_v0 }
   0xf   :  { %268 = vmatpush3.bf16.msra.mxu0 %v298_v5  ;;  %288 = vmatpush3.bf16.msra.mxu1 %v306_v14 }
  0x10   :  { %269 = vmatprep.subr.bf16.mxu0 %v311_v0 }
  0x13   :  { %270 = vmatpush3.bf16.msra.mxu0 %v299_v7 }
  0x14   :  { %271 = vmatprep.subr.bf16.mxu0 %v311_v0 }
  0x17   :  { %272 = vmatpush3.bf16.msra.mxu0 %v300_v8 }
  0x18   :  { %273 = vmatprep.subr.bf16.mxu0 %v311_v0 }
  0x1b   :  { %274 = vmatpush3.bf16.msra.mxu0 %v301_v9 }
  0x1c   :  { %275 = vmatprep.subr.bf16.mxu0 %v311_v0 }
  0x1f   :  { %276 = vmatpush3.bf16.msra.mxu0 %v302_v10 }
  0x22   :  { %278 = vmatmul.mubr.bf16.vlgmr.msra.gmra.mrb[0].mxu0 %v22_v12 }
  0xf5   :  { %v128_v16 = vpop.f32.mrb[0].mxu0 }
  0xf6   :  { %v129_v17 = vadd.f32 %v231_v15, %v128_v16  ;;  %v279_v18 = vpop.f32.mrb[1].mxu0 }
  0xf7   :  { %v131_v19 = vpop.f32.mrb[2].mxu0 }
  0xf8   :  { %v134_v20 = vmax.f32 %v129_v17, 0.0  ;;  %v280_v21 = vpop.f32.mrb[3].mxu0 }
  0xfa   :  { %v135_v22 = vpack.c.bf16 %v134_v20, %v134_v20 }
  0xfc   :  { %290 = vmatmul.mubr.msk.bf16.vlgmr.msra.gmra.mrb[0].mxu1 %vm175_vm1, %v135_v22 }
 0x1cf   :  { %v213_v24 = vpop.f32.mrb[0].mxu1 }
 0x1d0   :  { %v214_v25 = vadd.f32 %v240_v23, %v213_v24  ;;  %v291_v26 = vpop.f32.mrb[1].mxu1 }
 0x1d1   :  { %v216_v27 = vpop.f32.mrb[2].mxu1 }
 0x1d2   :  { %v246_v28 = vmul.f32 -1.442695, %v214_v25  ;;  %v292_v29 = vpop.f32.mrb[3].mxu1 }
 0x1d4   :  { %307 = vpow2.f32 %v246_v28 }
 0x1de   :  { %v308_v30 = vpop.eup %307 }
 0x1df   :  { %v222_v31 = vadd.f32 1.0, %v308_v30 }
 0x1e1   :  { %309 = vrcp.f32 %v222_v31 }
 0x1eb   :  { %v310_v32 = vpop.eup %309 }
 0x1ec   :  { %226 = vst.msk [vmem:[%s396_s5] sm:$0x3] %vm225_vm2, %v310_v32 }

// kernel: duat_forward.29
= control target key start
LH: loop header
LB: loop body
LE: loop exit
PB: predicated region body
PF: predicated region fallthrough
CT: control target
= control target key end

     0   :  { %s1912_s15 = smov 0   ;;  %s2267_s0 = inlined_call_operand.vmem [shape: bf16[2,3,3,128], index: 0, kind: input, shape index: {}]   ;;  %s2268_s1 = inlined_call_operand.vmem [shape: bf16[9,128,64], index: 1, kind: input, shape index: {}]   ;;  %s2269_s2 = inlined_call_operand.vmem [shape: f32[1,64], index: 2, kind: input, shape index: {}]   ;;  %s2270_s3 = inlined_call_operand.vmem [shape: bf16[2,1,64], index: 3, kind: output, shape index: {0}]   ;;  %s2271_s4 = inlined_call_operand.vmem [shape: f32[2,1,128], index: 4, kind: output, shape index: {1}]  }
   0x1 LB: > { %s1315_s16 = sadd.s32 4294967295, %s1882_s15   ;;  %p1319_p0 = scmp.ge.s32.totalorder %s1882_s15, 1  ;;  %s1882_s15 = sphi %s1912_s15, %s15_s15  }
   0x2   : > { %p165_p1 = scmp.lt.s32.totalorder %s1882_s15, 3 }
   0x4   : > { %p166_p2 = pnand %p1319_p0, %p165_p1 }
   0x5   : > { %v1804_v0 = vld [vmem:[%s2268_s1 + $0x40] sm:$0xff] (!%p166_p2)   ;;  %v1884_v1 = vmov (!%p166_p2), 0.0   ;;  %v1806_v3 = vld [vmem:[%s2268_s1 + $0x48] sm:$0xff] (!%p166_p2)   ;;  %vm1885_vm0 = vmmov (!%p166_p2), 0   ;;  %p192_p3 = scmp.lt.s32.totalorder (!%p166_p2), %s1315_s16, 1  ;;  %v1808_v5 = vld [vmem:[%s2268_s1 + $0x50] sm:$0xff] (!%p166_p2)   ;;  %v242_v9 = vlaneseq (!%p166_p2) }
   0x6   : > { %169 = sbr.rel (%p166_p2) target bundleno = 388 (0x184), region = 32  ;;  %1612 = vmatprep.subr.bf16.mxu0 (!%p166_p2), %v1884_v1  ;;  %1632 = vmatprep.subr.bf16.mxu1 (!%p166_p2), %v1884_v1  ;;  %v1805_v2 = vld [vmem:[%s2268_s1] sm:$0xff] (!%p166_p2)   ;;  %v1807_v4 = vld [vmem:[%s2268_s1 + $0x8] sm:$0xff] (!%p166_p2)   ;;  %v1809_v6 = vld [vmem:[%s2268_s1 + $0x10] sm:$0xff] (!%p166_p2)   ;;  %v1886_v13 = vmov (!%p166_p2), 1983009808  }
   0x7   : > { %1613 = vmatpush3.bf16.msra.mxu0 (!%p166_p2), %v1804_v0  ;;  %1628 = vmatprep.mubr.msk.bf16.mxu0 (!%p166_p2), %vm1885_vm0, %v1884_v1  ;;  %v1810_v7 = vld [vmem:[%s2268_s1 + $0x58] sm:$0xff] (!%p166_p2)   ;;  %v1812_v10 = vld [vmem:[%s2268_s1 + $0x60] sm:$0xff] (!%p166_p2)   ;;  %v240_v14 = vunpack.c.l.s4 (!%p166_p2), %v1886_v13  ;;  %v243_v15 = vshrl.u32 (!%p166_p2), %v242_v9, 7  ;;  %v1814_v17 = vld [vmem:[%s2268_s1 + $0x68] sm:$0xff] (!%p166_p2)   ;;  %vm1233_vm1 = vcmask (!%p166_p2), 516096  }
   0x8   : > { %1633 = vmatpush3.bf16.msra.mxu1 (!%p166_p2), %v1805_v2  ;;  %1614 = vmatprep.subr.bf16.mxu0 (!%p166_p2), %v1884_v1  ;;  %v1811_v8 = vld [vmem:[%s2268_s1 + $0x18] sm:$0xff] (!%p166_p2)   ;;  %v1813_v11 = vld [vmem:[%s2268_s1 + $0x20] sm:$0xff] (!%p166_p2)   ;;  %v1815_v18 = vld [vmem:[%s2268_s1 + $0x28] sm:$0xff] (!%p166_p2)   ;;  %vm1234_vm2 = vsmask.f32 (!%p166_p2), 256 }
   0x9   : > { %1634 = vmatprep.subr.bf16.mxu1 (!%p166_p2), %v1884_v1  ;;  %1648 = vmatprep.mubr.msk.bf16.mxu1 (!%p166_p2), %vm1885_vm0, %v1884_v1  ;;  %v241_v19 = vunpack.c.0.s8 (!%p166_p2), %v240_v14  ;;  %v1816_v20 = vld [vmem:[%s2268_s1 + $0x70] sm:$0xff] (!%p166_p2)   ;;  %v1818_v25 = vld [vmem:[%s2268_s1 + $0x78] sm:$0xff] (!%p166_p2)   ;;  %v1820_v28 = vld [vmem:[%s2268_s1 + $0x80] sm:$0xff] (!%p166_p2)  }
   0xa   : > { %v1817_v23 = vld [vmem:[%s2268_s1 + $0x30] sm:$0xff] (!%p166_p2)   ;;  %v1819_v26 = vld [vmem:[%s2268_s1 + $0x38] sm:$0xff] (!%p166_p2)   ;;  %v1821_v29 = vld [vmem:[%s2268_s1 + $0xc0] sm:$0xff] (!%p166_p2)  }
   0xb   : > { %1615 = vmatpush3.bf16.msra.mxu0 (!%p166_p2), %v1806_v3  ;;  %v1988_v21 = vsub.s32 (!%p166_p2), %v241_v19, %v243_v15  ;;  %v1822_v30 = vld [vmem:[%s2268_s1 + $0x88] sm:$0xff] (!%p166_p2)   ;;  %v1824_v32 = vld [vmem:[%s2268_s1 + $0x90] sm:$0xff] (!%p166_p2)   ;;  %v1826_v34 = vld [vmem:[%s2268_s1 + $0x98] sm:$0xff] (!%p166_p2)  }
   0xc   : > { %1635 = vmatpush3.bf16.msra.mxu1 (!%p166_p2), %v1807_v4  ;;  %1616 = vmatprep.subr.bf16.mxu0 (!%p166_p2), %v1884_v1  ;;  %v1823_v31 = vld [vmem:[%s2268_s1 + $0xc8] sm:$0xff] (!%p166_p2)   ;;  %v1825_v33 = vld [vmem:[%s2268_s1 + $0xd0] sm:$0xff] (!%p166_p2)   ;;  %v1827_v35 = vld [vmem:[%s2268_s1 + $0xd8] sm:$0xff] (!%p166_p2)  }
   0xd   : > { %s2273_s16 = smov (!%p192_p3, %s1315_s16), 1  ;;  %1636 = vmatprep.subr.bf16.mxu1 %v1884_v1  ;;  %v1828_v36 = vld [vmem:[%s2268_s1 + $0xa0] sm:$0xff]   ;;  %v1830_v38 = vld [vmem:[%s2268_s1 + $0xa8] sm:$0xff]   ;;  %v1832_v40 = vld [vmem:[%s2268_s1 + $0xb0] sm:$0xff]  }
   0xe   : > { %s1792_s7 = smul.u32 6, %s2273_s16  ;;  %s202_s19 = scalar_lea.vmem %s2271_s4, %s2273_s16  ;;  %v1829_v37 = vld [vmem:[%s2268_s1 + $0xe0] sm:$0xff]   ;;  %v1831_v39 = vld [vmem:[%s2268_s1 + $0xe8] sm:$0xff]   ;;  %v1833_v41 = vld [vmem:[%s2268_s1 + $0xf0] sm:$0xff]  }
   0xf   : > { %1617 = vmatpush3.bf16.msra.mxu0 %v1808_v5  ;;  %v1834_v43 = vld [vmem:[%s2268_s1 + $0xb8] sm:$0xff]   ;;  %v1836_v46 = vld [vmem:[%s2268_s1 + $0x100] sm:$0xff]   ;;  %v1838_v49 = vld [vmem:[%s2268_s1 + $0x108] sm:$0xff]   ;;  %s199_s6 = scalar_lea.vmem %s2270_s3, %s2273_s16 }
  0x10   : > { %1637 = vmatpush3.bf16.msra.mxu1 %v1809_v6  ;;  %1618 = vmatprep.subr.bf16.mxu0 %v1884_v1  ;;  %s1969_s14 = scalar_lea.vmem %s2267_s0, %s1792_s7  ;;  %v1835_v44 = vld [vmem:[%s2268_s1 + $0xf8] sm:$0xff]   ;;  %v1837_v48 = vld [vmem:[%s2268_s1 + $0x140] sm:$0xff]   ;;  %v1839_v51 = vld [vmem:[%s2268_s1 + $0x148] sm:$0xff]  }
  0x11   : > { %1638 = vmatprep.subr.bf16.mxu1 %v1884_v1  ;;  %v1528_v12 = vld [vmem:[%s1969_s14 + $0x2] sm:$0x1]  ;;  %v204_v22 = vld [vmem:[%s1969_s14] sm:$0x1]  ;;  %v2087_v50 = vld [vmem:[%s1969_s14 + $0x4] sm:$0x1] }
  0x12   : > { %v1240_v16 = vunpack.c.l.bf16 %v1528_v12  ;;  %v245_v24 = vrot.slane %v204_v22, %v1988_v21  ;;  %v1369_v42 = vld.sshfl [vmem:[%s1969_s14] sm:$0x2 pattern:$0x76325410]  ;;  %v1378_v47 = vld [vmem:[%s1969_s14 + $0x2] sm:$0x1]  ;;  %v1018_v52 = vrot.slane %v2087_v50, %v1988_v21  ;;  %vm1235_vm3 = vmand %vm1233_vm1, %vm1234_vm2 }
  0x13   : > { %1619 = vmatpush3.bf16.msra.mxu0 %v1810_v7  ;;  %v452_v45 = vrot.slane %v1369_v42, 1  ;;  %v1840_v53 = vld [vmem:[%s2268_s1 + $0x110] sm:$0xff]   ;;  %v1842_v55 = vld [vmem:[%s2268_s1 + $0x118] sm:$0xff]   ;;  %v1844_v57 = vld [vmem:[%s2268_s1 + $0x120] sm:$0xff]   ;;  %v675_v63 = vrot.slane %v1378_v47, %v1988_v21 }
  0x14   : > { %1639 = vmatpush3.bf16.msra.mxu1 %v1811_v8  ;;  %1620 = vmatprep.subr.bf16.mxu0 %v1884_v1  ;;  %1242 = vst [vmem:[%s202_s19 - $0x1] sm:$0x2] %v1240_v16  ;;  %v247_v27 = vshrl.u32 %v245_v24, 16  ;;  %v1841_v54 = vld [vmem:[%s2268_s1 + $0x150] sm:$0xff]   ;;  %v1843_v56 = vld [vmem:[%s2268_s1 + $0x158] sm:$0xff]   ;;  %v1845_v58 = vld [vmem:[%s2268_s1 + $0x160] sm:$0xff]  }
  0x15   : > { %1640 = vmatprep.subr.bf16.mxu1 %v1884_v1  ;;  %v1846_v59 = vld [vmem:[%s2268_s1 + $0x128] sm:$0xff]   ;;  %v1848_v61 = vld [vmem:[%s2268_s1 + $0x130] sm:$0xff]   ;;  %v1850_v0 = vld [vmem:[%s2268_s1 + $0x138] sm:$0xff]   ;;  %v677_v4 = vshrl.u32 %v675_v63, 16 }
  0x16   : > { %v1847_v60 = vld [vmem:[%s2268_s1 + $0x168] sm:$0xff]   ;;  %v1849_v62 = vld [vmem:[%s2268_s1 + $0x170] sm:$0xff]   ;;  %v1851_v2 = vld [vmem:[%s2268_s1 + $0x178] sm:$0xff]  }
  0x17   : > { %1621 = vmatpush3.bf16.msra.mxu0 %v1812_v10  ;;  %v1444_v3 = vld.sshfl [vmem:[%s1969_s14 + $0x2] sm:$0x2 pattern:$0x76325410]  ;;  %v1854_v8 = vld [vmem:[%s2268_s1 + $0x188] sm:$0xff]   ;;  %v1856_v10 = vld [vmem:[%s2268_s1 + $0x190] sm:$0xff]  }
  0x18   : > { %1641 = vmatpush3.bf16.msra.mxu1 %v1813_v11  ;;  %1622 = vmatprep.subr.bf16.mxu0 %v1884_v1  ;;  %v1852_v5 = vld [vmem:[%s2268_s1 + $0x180] sm:$0xff]   ;;  %v795_v6 = vrot.slane %v1444_v3, 1  ;;  %v1855_v9 = vld [vmem:[%s2268_s1 + $0x1c8] sm:$0xff]   ;;  %v1857_v11 = vld [vmem:[%s2268_s1 + $0x1d0] sm:$0xff]  }
  0x19   : > { %1642 = vmatprep.subr.bf16.mxu1 %v1884_v1  ;;  %v1853_v7 = vld [vmem:[%s2268_s1 + $0x1c0] sm:$0xff]   ;;  %v1858_v12 = vld [vmem:[%s2268_s1 + $0x198] sm:$0xff]   ;;  %v1862_v16 = vld [vmem:[%s2268_s1 + $0x1a8] sm:$0xff]  }
  0x1a   : > { %v1859_v13 = vld [vmem:[%s2268_s1 + $0x1d8] sm:$0xff]   ;;  %v1860_v14 = vld [vmem:[%s2268_s1 + $0x1a0] sm:$0xff]   ;;  %v1865_v19 = vld [vmem:[%s2268_s1 + $0x1f0] sm:$0xff]  }
  0x1b   : > { %1623 = vmatpush3.bf16.msra.mxu0 %v1814_v17  ;;  %v1861_v15 = vld [vmem:[%s2268_s1 + $0x1e0] sm:$0xff]   ;;  %v1863_v17 = vld [vmem:[%s2268_s1 + $0x1e8] sm:$0xff]   ;;  %v1870_v21 = vld [vmem:[%s2268_s1 + $0x210] sm:$0xff]  }
  0x1c   : > { %1643 = vmatpush3.bf16.msra.mxu1 %v1815_v18  ;;  %1624 = vmatprep.subr.bf16.mxu0 %v1884_v1  ;;  %v1864_v18 = vld [vmem:[%s2268_s1 + $0x1b0] sm:$0xff]   ;;  %v1868_v24 = vld [vmem:[%s2268_s1 + $0x200] sm:$0xff]  }
  0x1d   : > { %1644 = vmatprep.subr.bf16.mxu1 %v1884_v1 }
  0x1f   : > { %1625 = vmatpush3.bf16.msra.mxu0 %v1816_v20  ;;  %v1866_v20 = vld [vmem:[%s2268_s1 + $0x1b8] sm:$0xff]  }
  0x20   : > { %1645 = vmatpush3.bf16.msra.mxu1 %v1817_v23  ;;  %1626 = vmatprep.subr.bf16.mxu0 %v1884_v1  ;;  %v1020_v23 = vshrl.u32 %v1018_v52, 16 }
  0x21   : > { %1646 = vmatprep.subr.bf16.mxu1 %v1884_v1 }
  0x23   : > { %1627 = vmatpush3.bf16.msra.mxu0 %v1818_v25  ;;  %v1869_v25 = vld [vmem:[%s2268_s1 + $0x208] sm:$0xff]  }
  0x24   : > { %1647 = vmatpush3.bf16.msra.mxu1 %v1819_v26  ;;  %1652 = vmatprep.subr.bf16.mxu0 %v1884_v1  ;;  %v1871_v26 = vld [vmem:[%s2268_s1 + $0x218] sm:$0xff]  }
  0x25   : > { %1672 = vmatprep.subr.bf16.mxu1 %v1884_v1 }
  0x26   : > { %1629 = vmatmul.mubr.bf16.vlgmr.msra.gmra.mrb[0].mxu0 %v247_v27  ;;  %v1872_v27 = vld [vmem:[%s2268_s1 + $0x220] sm:$0xff]  }
  0x27   : > { %1649 = vmatmul.mubr.bf16.vlgmr.msra.gmra.mrb[0].mxu1 %v204_v22  ;;  %1653 = vmatpush3.bf16.msra.mxu0 %v1820_v28  ;;  %v1867_v22 = vld [vmem:[%s2268_s1 + $0x1f8] sm:$0xff]   ;;  %v1873_v28 = vld [vmem:[%s2268_s1 + $0x228] sm:$0xff]  }
  0x28   : > { %1673 = vmatpush3.bf16.msra.mxu1 %v1821_v29  ;;  %1654 = vmatprep.subr.bf16.mxu0 %v1884_v1  ;;  %v1874_v29 = vld [vmem:[%s2268_s1 + $0x230] sm:$0xff]  }
  0x29   : > { %1674 = vmatprep.subr.bf16.mxu1 %v1884_v1  ;;  %1668 = vmatprep.mubr.msk.bf16.mxu0 %vm1885_vm0, %v1884_v1 }
  0x2a   : > { %1688 = vmatprep.mubr.msk.bf16.mxu1 %vm1885_vm0, %v1884_v1 }
  0x2b   : > { %1655 = vmatpush3.bf16.msra.mxu0 %v1822_v30  ;;  %v1875_v30 = vld [vmem:[%s2268_s1 + $0x238] sm:$0xff]  }
  0x2c   : > { %1675 = vmatpush3.bf16.msra.mxu1 %v1823_v31  ;;  %1656 = vmatprep.subr.bf16.mxu0 %v1884_v1  ;;  %v1519_v31 = vld.sshfl [vmem:[%s1969_s14 + $0x4] sm:$0x2 pattern:$0x76325410] }
  0x2d   : > { %1676 = vmatprep.subr.bf16.mxu1 %v1884_v1 }
  0x2f   : > { %1657 = vmatpush3.bf16.msra.mxu0 %v1824_v32  ;;  %v1138_v32 = vrot.slane %v1519_v31, 1 }
  0x30   : > { %1677 = vmatpush3.bf16.msra.mxu1 %v1825_v33  ;;  %1658 = vmatprep.subr.bf16.mxu0 %v1884_v1 }
  0x31   : > { %1678 = vmatprep.subr.bf16.mxu1 %v1884_v1 }
  0x33   : > { %1659 = vmatpush3.bf16.msra.mxu0 %v1826_v34 }
  0x34   : > { %1679 = vmatpush3.bf16.msra.mxu1 %v1827_v35  ;;  %1660 = vmatprep.subr.bf16.mxu0 %v1884_v1 }
  0x35   : > { %1680 = vmatprep.subr.bf16.mxu1 %v1884_v1 }
  0x37   : > { %1661 = vmatpush3.bf16.msra.mxu0 %v1828_v36 }
  0x38   : > { %1681 = vmatpush3.bf16.msra.mxu1 %v1829_v37  ;;  %1662 = vmatprep.subr.bf16.mxu0 %v1884_v1 }
  0x39   : > { %1682 = vmatprep.subr.bf16.mxu1 %v1884_v1 }
  0x3b   : > { %1663 = vmatpush3.bf16.msra.mxu0 %v1830_v38 }
  0x3c   : > { %1683 = vmatpush3.bf16.msra.mxu1 %v1831_v39  ;;  %1664 = vmatprep.subr.bf16.mxu0 %v1884_v1 }
  0x3d   : > { %1684 = vmatprep.subr.bf16.mxu1 %v1884_v1 }
  0x3f   : > { %1665 = vmatpush3.bf16.msra.mxu0 %v1832_v40 }
  0x40   : > { %1685 = vmatpush3.bf16.msra.mxu1 %v1833_v41  ;;  %1666 = vmatprep.subr.bf16.mxu0 %v1884_v1 }
  0x41   : > { %1686 = vmatprep.subr.bf16.mxu1 %v1884_v1 }
  0x43   : > { %1667 = vmatpush3.bf16.msra.mxu0 %v1834_v43 }
  0x44   : > { %1687 = vmatpush3.bf16.msra.mxu1 %v1835_v44  ;;  %1692 = vmatprep.subr.bf16.mxu0 %v1884_v1 }
  0x45   : > { %1712 = vmatprep.subr.bf16.mxu1 %v1884_v1 }
  0x46   : > { %1669 = vmatmul.mubr.bf16.vlgmr.msra.gmra.mrb[4].mxu0 %v452_v45 }
  0x47   : > { %1693 = vmatpush3.bf16.msra.mxu0 %v1836_v46  ;;  %1689 = vmatmul.mubr.bf16.vlgmr.msra.gmra.mrb[4].mxu1 %v1378_v47 }
  0x48   : > { %1713 = vmatpush3.bf16.msra.mxu1 %v1837_v48  ;;  %1694 = vmatprep.subr.bf16.mxu0 %v1884_v1 }
  0x49   : > { %1714 = vmatprep.subr.bf16.mxu1 %v1884_v1  ;;  %1708 = vmatprep.mubr.msk.bf16.mxu0 %vm1885_vm0, %v1884_v1 }
  0x4a   : > { %1728 = vmatprep.mubr.msk.bf16.mxu1 %vm1885_vm0, %v1884_v1 }
  0x4b   : > { %1695 = vmatpush3.bf16.msra.mxu0 %v1838_v49 }
  0x4c   : > { %1715 = vmatpush3.bf16.msra.mxu1 %v1839_v51  ;;  %1696 = vmatprep.subr.bf16.mxu0 %v1884_v1 }
  0x4d   : > { %1716 = vmatprep.subr.bf16.mxu1 %v1884_v1 }
  0x4f   : > { %1697 = vmatpush3.bf16.msra.mxu0 %v1840_v53 }
  0x50   : > { %1717 = vmatpush3.bf16.msra.mxu1 %v1841_v54  ;;  %1698 = vmatprep.subr.bf16.mxu0 %v1884_v1 }
  0x51   : > { %1718 = vmatprep.subr.bf16.mxu1 %v1884_v1 }
  0x53   : > { %1699 = vmatpush3.bf16.msra.mxu0 %v1842_v55 }
  0x54   : > { %1719 = vmatpush3.bf16.msra.mxu1 %v1843_v56  ;;  %1700 = vmatprep.subr.bf16.mxu0 %v1884_v1 }
  0x55   : > { %1720 = vmatprep.subr.bf16.mxu1 %v1884_v1 }
  0x57   : > { %1701 = vmatpush3.bf16.msra.mxu0 %v1844_v57 }
  0x58   : > { %1721 = vmatpush3.bf16.msra.mxu1 %v1845_v58  ;;  %1702 = vmatprep.subr.bf16.mxu0 %v1884_v1 }
  0x59   : > { %1722 = vmatprep.subr.bf16.mxu1 %v1884_v1 }
  0x5b   : > { %1703 = vmatpush3.bf16.msra.mxu0 %v1846_v59 }
  0x5c   : > { %1723 = vmatpush3.bf16.msra.mxu1 %v1847_v60  ;;  %1704 = vmatprep.subr.bf16.mxu0 %v1884_v1 }
  0x5d   : > { %1724 = vmatprep.subr.bf16.mxu1 %v1884_v1 }
  0x5f   : > { %1705 = vmatpush3.bf16.msra.mxu0 %v1848_v61 }
  0x60   : > { %1725 = vmatpush3.bf16.msra.mxu1 %v1849_v62  ;;  %1706 = vmatprep.subr.bf16.mxu0 %v1884_v1 }
  0x61   : > { %1726 = vmatprep.subr.bf16.mxu1 %v1884_v1 }
  0x63   : > { %1707 = vmatpush3.bf16.msra.mxu0 %v1850_v0 }
  0x64   : > { %1727 = vmatpush3.bf16.msra.mxu1 %v1851_v2  ;;  %1732 = vmatprep.subr.bf16.mxu0 %v1884_v1 }
  0x65   : > { %1752 = vmatprep.subr.bf16.mxu1 %v1884_v1 }
  0x66   : > { %1709 = vmatmul.mubr.bf16.vlgmr.msra.gmra.mrb[8].mxu0 %v677_v4 }
  0x67   : > { %1733 = vmatpush3.bf16.msra.mxu0 %v1852_v5  ;;  %1729 = vmatmul.mubr.bf16.vlgmr.msra.gmra.mrb[8].mxu1 %v795_v6 }
  0x68   : > { %1753 = vmatpush3.bf16.msra.mxu1 %v1853_v7  ;;  %1734 = vmatprep.subr.bf16.mxu0 %v1884_v1 }
  0x69   : > { %1754 = vmatprep.subr.bf16.mxu1 %v1884_v1  ;;  %1748 = vmatprep.mubr.msk.bf16.mxu0 %vm1885_vm0, %v1884_v1 }
  0x6a   : > { %1768 = vmatprep.mubr.msk.bf16.mxu1 %vm1885_vm0, %v1884_v1 }
  0x6b   : > { %1735 = vmatpush3.bf16.msra.mxu0 %v1854_v8 }
  0x6c   : > { %1755 = vmatpush3.bf16.msra.mxu1 %v1855_v9  ;;  %1736 = vmatprep.subr.bf16.mxu0 %v1884_v1  ;;  %v1229_v9 = vld [vmem:[%s2269_s2] sm:$0x1] }
  0x6d   : > { %1756 = vmatprep.subr.bf16.mxu1 %v1884_v1 }
  0x6f   : > { %1737 = vmatpush3.bf16.msra.mxu0 %v1856_v10 }
  0x70   : > { %1757 = vmatpush3.bf16.msra.mxu1 %v1857_v11  ;;  %1738 = vmatprep.subr.bf16.mxu0 %v1884_v1 }
  0x71   : > { %1758 = vmatprep.subr.bf16.mxu1 %v1884_v1 }
  0x73   : > { %1739 = vmatpush3.bf16.msra.mxu0 %v1858_v12 }
  0x74   : > { %1759 = vmatpush3.bf16.msra.mxu1 %v1859_v13  ;;  %1740 = vmatprep.subr.bf16.mxu0 %v1884_v1 }
  0x75   : > { %1760 = vmatprep.subr.bf16.mxu1 %v1884_v1 }
  0x77   : > { %1741 = vmatpush3.bf16.msra.mxu0 %v1860_v14 }
  0x78   : > { %1761 = vmatpush3.bf16.msra.mxu1 %v1861_v15  ;;  %1742 = vmatprep.subr.bf16.mxu0 %v1884_v1 }
  0x79   : > { %1762 = vmatprep.subr.bf16.mxu1 %v1884_v1 }
  0x7b   : > { %1743 = vmatpush3.bf16.msra.mxu0 %v1862_v16  ;;  %v1236_v16 = vld [vmem:[%s199_s6] sm:$0x1] }
  0x7c   : > { %1763 = vmatpush3.bf16.msra.mxu1 %v1863_v17  ;;  %1744 = vmatprep.subr.bf16.mxu0 %v1884_v1 }
  0x7d   : > { %1764 = vmatprep.subr.bf16.mxu1 %v1884_v1 }
  0x7f   : > { %1745 = vmatpush3.bf16.msra.mxu0 %v1864_v18 }
  0x80   : > { %1765 = vmatpush3.bf16.msra.mxu1 %v1865_v19  ;;  %1746 = vmatprep.subr.bf16.mxu0 %v1884_v1 }
  0x81   : > { %1766 = vmatprep.subr.bf16.mxu1 %v1884_v1 }
  0x83   : > { %1747 = vmatpush3.bf16.msra.mxu0 %v1866_v20 }
  0x84   : > { %1767 = vmatpush3.bf16.msra.mxu1 %v1867_v22  ;;  %1772 = vmatprep.subr.bf16.mxu0 %v1884_v1 }
  0x86   : > { %1749 = vmatmul.mubr.bf16.vlgmr.msra.gmra.mrb[12].mxu0 %v2087_v50 }
  0x87   : > { %1773 = vmatpush3.bf16.msra.mxu0 %v1868_v24  ;;  %1769 = vmatmul.mubr.bf16.vlgmr.msra.gmra.mrb[12].mxu1 %v1020_v23 }
  0x88   : > { %1774 = vmatprep.subr.bf16.mxu0 %v1884_v1  ;;  %1788 = vmatprep.mubr.msk.bf16.mxu0 %vm1885_vm0, %v1884_v1 }
  0x8b   : > { %1775 = vmatpush3.bf16.msra.mxu0 %v1869_v25 }
  0x8c   : > { %1776 = vmatprep.subr.bf16.mxu0 %v1884_v1 }
  0x8f   : > { %1777 = vmatpush3.bf16.msra.mxu0 %v1870_v21 }
  0x90   : > { %1778 = vmatprep.subr.bf16.mxu0 %v1884_v1 }
  0x93   : > { %1779 = vmatpush3.bf16.msra.mxu0 %v1871_v26 }
  0x94   : > { %1780 = vmatprep.subr.bf16.mxu0 %v1884_v1 }
  0x97   : > { %1781 = vmatpush3.bf16.msra.mxu0 %v1872_v27 }
  0x98   : > { %1782 = vmatprep.subr.bf16.mxu0 %v1884_v1 }
  0x9b   : > { %1783 = vmatpush3.bf16.msra.mxu0 %v1873_v28 }
  0x9c   : > { %1784 = vmatprep.subr.bf16.mxu0 %v1884_v1 }
  0x9f   : > { %1785 = vmatpush3.bf16.msra.mxu0 %v1874_v29 }
  0xa0   : > { %1786 = vmatprep.subr.bf16.mxu0 %v1884_v1 }
  0xa3   : > { %1787 = vmatpush3.bf16.msra.mxu0 %v1875_v30 }
  0xa6   : > { %1789 = vmatmul.mubr.bf16.vlgmr.msra.gmra.mrb[16].mxu0 %v1138_v32 }
  0xf9   : > { %v332_v33 = vpop.f32.mrb[0].mxu0 }
  0xfa   : > { %v1630_v34 = vpop.f32.mrb[1].mxu0  ;;  %v420_v35 = vpop.f32.mrb[0].mxu1 }
  0xfb   : > { %v421_v36 = vadd.f32 %v420_v35, %v332_v33  ;;  %v335_v37 = vpop.f32.mrb[2].mxu0  ;;  %v1650_v38 = vpop.f32.mrb[1].mxu1 }
  0xfc   : > { %v1631_v39 = vpop.f32.mrb[3].mxu0  ;;  %v423_v40 = vpop.f32.mrb[2].mxu1 }
  0xfd   : > { %v1651_v41 = vpop.f32.mrb[3].mxu1 }
 0x119   : > { %v536_v42 = vpop.f32.mrb[4].mxu0 }
 0x11a   : > { %v542_v43 = vadd.f32 %v536_v42, %v421_v36  ;;  %v1670_v44 = vpop.f32.mrb[5].mxu0  ;;  %v644_v45 = vpop.f32.mrb[4].mxu1 }
 0x11b   : > { %v539_v46 = vpop.f32.mrb[6].mxu0  ;;  %v1690_v47 = vpop.f32.mrb[5].mxu1 }
 0x11c   : > { %v650_v48 = vadd.f32 %v644_v45, %v542_v43  ;;  %v1671_v1 = vpop.f32.mrb[7].mxu0  ;;  %v647_v49 = vpop.f32.mrb[6].mxu1 }
 0x11d   : > { %v1691_v50 = vpop.f32.mrb[7].mxu1 }
 0x139   : > { %v762_v51 = vpop.f32.mrb[8].mxu0 }
 0x13a   : > { %v768_v52 = vadd.f32 %v762_v51, %v650_v48  ;;  %v1710_v53 = vpop.f32.mrb[9].mxu0  ;;  %v879_v54 = vpop.f32.mrb[8].mxu1 }
 0x13b   : > { %v765_v55 = vpop.f32.mrb[10].mxu0  ;;  %v1730_v56 = vpop.f32.mrb[9].mxu1 }
 0x13c   : > { %v885_v57 = vadd.f32 %v879_v54, %v768_v52  ;;  %v1711_v58 = vpop.f32.mrb[11].mxu0  ;;  %v882_v59 = vpop.f32.mrb[10].mxu1 }
 0x13d   : > { %v1731_v60 = vpop.f32.mrb[11].mxu1 }
 0x159   : > { %v987_v61 = vpop.f32.mrb[12].mxu0 }
 0x15a   : > { %v993_v62 = vadd.f32 %v987_v61, %v885_v57  ;;  %v1750_v63 = vpop.f32.mrb[13].mxu0  ;;  %v1105_v0 = vpop.f32.mrb[12].mxu1 }
 0x15b   : > { %v990_v2 = vpop.f32.mrb[14].mxu0  ;;  %v1770_v3 = vpop.f32.mrb[13].mxu1 }
 0x15c   : > { %v1111_v4 = vadd.f32 %v1105_v0, %v993_v62  ;;  %v1751_v5 = vpop.f32.mrb[15].mxu0  ;;  %v1108_v6 = vpop.f32.mrb[14].mxu1 }
 0x15d   : > { %v1771_v7 = vpop.f32.mrb[15].mxu1 }
 0x179   : > { %v1222_v8 = vpop.f32.mrb[16].mxu0 }
 0x17a   : > { %v1228_v10 = vadd.f32 %v1222_v8, %v1111_v4  ;;  %v1790_v11 = vpop.f32.mrb[17].mxu0 }
 0x17b   : > { %v1225_v12 = vpop.f32.mrb[18].mxu0 }
 0x17c   : > { %v1230_v13 = vadd.f32 %v1229_v9, %v1228_v10  ;;  %v1791_v14 = vpop.f32.mrb[19].mxu0 }
 0x17e   : > { %v1231_v15 = vmax.f32 %v1230_v13, 0.0 }
 0x180   : > { %v1232_v17 = vpack.c.bf16 %v1231_v15, %v1231_v15 }
 0x182   : > { %v1237_v18 = vsel %vm1235_vm3, %v1232_v17, %v1236_v16 }
 0x183   : > { %1238 = vst [vmem:[%s199_s6] sm:$0x1] %v1237_v18 }
 0x184 PF: > { %s15_s15 = sadd.s32 1, %s1882_s15  }
 0x185   : > { %p12_p4 = scmp.ge.s32.totalorder %s15_s15, 4  }
 0x187   :  { %14 = sbr.rel (!%p12_p4) target bundleno = 1 (0x1), region = 84 }

// kernel: duat_forward.31
= control target key start
LH: loop header
LB: loop body
LE: loop exit
PB: predicated region body
PF: predicated region fallthrough
CT: control target
= control target key end

     0   :  { %s508_s15 = smov 0   ;;  %s510_s16 = smov 0   ;;  %s559_s0 = inlined_call_operand.vmem [shape: bf16[2,1,64], index: 0, kind: input, shape index: {}]   ;;  %s560_s1 = inlined_call_operand.vmem [shape: f32[2,1,64], index: 1, kind: input, shape index: {}]   ;;  %s561_s2 = inlined_call_operand.vmem [shape: bf16[64,32], index: 2, kind: input, shape index: {}]   ;;  %s562_s3 = inlined_call_operand.vmem [shape: f32[1,32], index: 3, kind: input, shape index: {}]   ;;  %s563_s4 = inlined_call_operand.vmem [shape: bf16[2,1,32], index: 4, kind: output, shape index: {}]  }
   0x1   :  { %s512_s17 = smov 0  }
   0x2 LB: > { %s26_s18 = sadd.s32 1, %s475_s16  ;;  %p402_p0 = scmp.ge.s32.totalorder %s479_s17, 1  ;;  %s479_s17 = sphi %s512_s17, %s14_s17   ;;  %s475_s16 = sphi %s510_s16, %s565_s16   ;;  %s471_s15 = sphi %s508_s15, %s564_s15  }
   0x3   : > { %p28_p1 = scmp.ge.s32.totalorder %s26_s18, 2  ;;  %p187_p2 = scmp.lt.s32.totalorder %s479_s17, 3 }
   0x5   : > { %s567_s18 = smov (%p28_p1, %s26_s18), 0  ;;  %p188_p3 = pnand %p402_p0, %p187_p2 }
   0x6   : > { %v453_v0 = vld [vmem:[%s561_s2] sm:$0xff] (!%p188_p3)   ;;  %v481_v1 = vmov (!%p188_p3), 0.0   ;;  %v454_v2 = vld [vmem:[%s561_s2 + $0x8] sm:$0xff] (!%p188_p3)   ;;  %vm482_vm0 = vmmov (!%p188_p3), 0   ;;  %p218_p4 = scmp.lt.s32.totalorder (!%p188_p3), %s471_s15, 1  ;;  %v455_v3 = vld [vmem:[%s561_s2 + $0x10] sm:$0xff] (!%p188_p3)  }
   0x7   : > { %191 = sbr.rel (%p188_p3) target bundleno = 243 (0xf3), region = 36  ;;  %415 = vmatprep.subr.bf16.mxu0 (!%p188_p3), %v481_v1  ;;  %423 = vmatprep.mubr.msk.bf16.mxu0 (!%p188_p3), %vm482_vm0, %v481_v1  ;;  %v456_v7 = vld [vmem:[%s561_s2 + $0x18] sm:$0xff] (!%p188_p3)   ;;  %vm272_vm1 = vcmask (!%p188_p3), 523264   ;;  %v247_v10 = vld [vmem:[%s562_s3] sm:$0x1] (!%p188_p3)  ;;  %vm318_vm2 = vcmask (!%p188_p3), 253952  }
   0x8   : > { %416 = vmatpush3.bf16.msra.mxu0 (!%p188_p3), %v453_v0  ;;  %vm319_vm3 = vsmask.f32 (!%p188_p3), 256 }
   0x9   : > { %417 = vmatprep.subr.bf16.mxu0 (!%p188_p3), %v481_v1  ;;  %vm320_vm4 = vmand (!%p188_p3), %vm318_vm2, %vm319_vm3 }
   0xc   : > { %418 = vmatpush3.bf16.msra.mxu0 (!%p188_p3), %v454_v2 }
   0xd   : > { %419 = vmatprep.subr.bf16.mxu0 (!%p188_p3), %v481_v1 }
   0xe   : > { %s569_s15 = smov (!%p218_p4, %s471_s15), 1 }
   0xf   : > { %s223_s27 = scalar_lea.vmem %s559_s0, %s569_s15  ;;  %s226_s30 = scalar_lea.vmem %s560_s1, %s569_s15 }
  0x10   : > { %v234_v4 = vld [vmem:[%s223_s27] sm:$0x1]  ;;  %420 = vmatpush3.bf16.msra.mxu0 %v455_v3  ;;  %s232_s11 = scalar_lea.vmem %s563_s4, %s569_s15 }
  0x11   : > { %v236_v5 = vld [vmem:[%s226_s30] sm:$0x1]  ;;  %v235_v6 = vunpack.c.l.bf16 %v234_v4  ;;  %421 = vmatprep.subr.bf16.mxu0 %v481_v1 }
  0x12   : > { %v321_v17 = vld [vmem:[%s232_s11] sm:$0x1] }
  0x13   : > { %v237_v8 = vmul.f32 %v236_v5, %v235_v6 }
  0x14   : > { %422 = vmatpush3.bf16.msra.mxu0 %v456_v7 }
  0x15   : > { %v238_v9 = vpack.c.bf16 %v237_v8, %v237_v8 }
  0x17   : > { %424 = vmatmul.mubr.msk.bf16.vlgmr.msra.gmra.mrb[0].mxu0 %vm272_vm1, %v238_v9 }
  0xea   : > { %v310_v11 = vpop.f32.mrb[0].mxu0 }
  0xeb   : > { %v311_v12 = vadd.f32 %v310_v11, %v247_v10  ;;  %v425_v13 = vpop.f32.mrb[1].mxu0 }
  0xec   : > { %v313_v14 = vpop.f32.mrb[2].mxu0 }
  0xed   : > { %v316_v15 = vmax.f32 %v311_v12, 0.0  ;;  %v426_v16 = vpop.f32.mrb[3].mxu0 }
  0xef   : > { %v317_v18 = vpack.c.bf16 %v316_v15, %v316_v15 }
  0xf1   : > { %v322_v19 = vsel %vm320_vm4, %v317_v18, %v321_v17 }
  0xf2   : > { %323 = vst [vmem:[%s232_s11] sm:$0x1] %v322_v19 }
  0xf3 PF: > { %s14_s17 = sadd.s32 1, %s479_s17   ;;  %s564_s15 = smov %s475_s16 }
  0xf4   : > { %p11_p5 = scmp.ge.s32.totalorder %s14_s17, 4   ;;  %s565_s16 = smov %s567_s18 }
  0xf6   :  { %13 = sbr.rel (!%p11_p5) target bundleno = 2 (0x2), region = 69 }

// kernel: duat_forward.34
= control target key start
LH: loop header
LB: loop body
LE: loop exit
PB: predicated region body
PF: predicated region fallthrough
CT: control target
= control target key end

     0   :  { %s341_s1 = inlined_call_operand.vmem [shape: bf16[256,128], index: 1, kind: input, shape index: {}]   ;;  %s342_s0 = inlined_call_operand.vmem [shape: bf16[8,256], index: 0, kind: input, shape index: {}]   ;;  %s343_s2 = inlined_call_operand.vmem [shape: f32[1,128], index: 2, kind: input, shape index: {}]   ;;  %s344_s3 = inlined_call_operand.vmem [shape: bf16[8,128], index: 3, kind: output, shape index: {}]  }
   0x1   :  { %v246_v0 = vld [vmem:[%s341_s1 + $0x40] sm:$0xff]   ;;  %v248_v2 = vld [vmem:[%s341_s1 + $0x48] sm:$0xff]   ;;  %v250_v4 = vld [vmem:[%s341_s1 + $0x50] sm:$0xff]  }
   0x2   :  { %v247_v1 = vld [vmem:[%s341_s1] sm:$0xff]   ;;  %224 = vmatprep.subr.bf16.mxu0 %v246_v0  ;;  %v249_v3 = vld [vmem:[%s341_s1 + $0x8] sm:$0xff]   ;;  %v251_v5 = vld [vmem:[%s341_s1 + $0x10] sm:$0xff]  }
   0x3   :  { %225 = vmatpush3.bf16.msra.mxu0 %v247_v1  ;;  %v252_v6 = vld [vmem:[%s341_s1 + $0x58] sm:$0xff]   ;;  %v254_v8 = vld [vmem:[%s341_s1 + $0x60] sm:$0xff]   ;;  %v256_v10 = vld [vmem:[%s341_s1 + $0x68] sm:$0xff]  }
   0x4   :  { %226 = vmatprep.subr.bf16.mxu0 %v248_v2  ;;  %v253_v7 = vld [vmem:[%s341_s1 + $0x18] sm:$0xff]   ;;  %v255_v9 = vld [vmem:[%s341_s1 + $0x20] sm:$0xff]   ;;  %v257_v13 = vld [vmem:[%s341_s1 + $0x28] sm:$0xff]  }
   0x5   :  { %v15_v11 = vld [vmem:[%s342_s0] sm:$0xff]  ;;  %v258_v14 = vld [vmem:[%s341_s1 + $0x70] sm:$0xff]   ;;  %v260_v16 = vld [vmem:[%s341_s1 + $0x78] sm:$0xff]  }
   0x6   :  { %v207_v12 = vcombine.high %v15_v11, %v15_v11  ;;  %v259_v15 = vld [vmem:[%s341_s1 + $0x30] sm:$0xff]   ;;  %v261_v17 = vld [vmem:[%s341_s1 + $0x38] sm:$0xff]   ;;  %v206_v18 = vcombine.low %v15_v11, %v15_v11  ;;  %v205_v20 = vld [vmem:[%s343_s2] ss:$0 sm:$0xff] }
   0x7   :  { %227 = vmatpush3.bf16.msra.mxu0 %v249_v3 }
   0x8   :  { %228 = vmatprep.subr.bf16.mxu0 %v250_v4  ;;  %190 = vmatprep.mubr.bf16.mxu0 %v207_v12 }
   0xb   :  { %229 = vmatpush3.bf16.msra.mxu0 %v251_v5 }
   0xc   :  { %230 = vmatprep.subr.bf16.mxu0 %v252_v6 }
   0xf   :  { %231 = vmatpush3.bf16.msra.mxu0 %v253_v7 }
  0x10   :  { %232 = vmatprep.subr.bf16.mxu0 %v254_v8 }
  0x13   :  { %233 = vmatpush3.bf16.msra.mxu0 %v255_v9 }
  0x14   :  { %234 = vmatprep.subr.bf16.mxu0 %v256_v10 }
  0x17   :  { %235 = vmatpush3.bf16.msra.mxu0 %v257_v13 }
  0x18   :  { %236 = vmatprep.subr.bf16.mxu0 %v258_v14 }
  0x1b   :  { %237 = vmatpush3.bf16.msra.mxu0 %v259_v15 }
  0x1c   :  { %238 = vmatprep.subr.bf16.mxu0 %v260_v16 }
  0x1f   :  { %239 = vmatpush3.bf16.msra.mxu0 %v261_v17 }
  0x22   :  { %191 = vmatmul.mubr.bf16.vlgmr.msra.gmra.mrb[0].mxu0 %v206_v18 }
  0xf5   :  { %v240_v19 = vpop.f32.mrb[0].mxu0 }
  0xf6   :  { %v241_v21 = vpop.f32.mrb[1].mxu0 }
  0xf7   :  { %v242_v22 = vadd.f32 %v241_v21, %v240_v19  ;;  %v243_v23 = vpop.f32.mrb[2].mxu0 }
  0xf8   :  { %v244_v24 = vpop.f32.mrb[3].mxu0 }
  0xf9   :  { %v193_v25 = vadd.f32 %v242_v22, %v205_v20 }
  0xfb   :  { %v198_v26 = vmax.f32 %v193_v25, 0.0 }
  0xfd   :  { %v199_v27 = vpack.c.bf16 %v198_v26, %v198_v26 }
  0xff   :  { %200 = vst [vmem:[%s344_s3] sm:$0xf] %v199_v27 }

// kernel: tile.179
= control target key start
LH: loop header
LB: loop body
LE: loop exit
PB: predicated region body
PF: predicated region fallthrough
CT: control target
= control target key end

     0   :  { %vm7_vm0 = vcmask 261120   ;;  %s37_s8 = smov 32   ;;  %s38_s9 = smov 64   ;;  %vm13_vm1 = vcmask 1048320   ;;  %vm19_vm2 = vcmask 785920   ;;  %vm25_vm3 = vcmask 523520   ;;  %s55_s0 = inlined_call_operand.vmem [shape: f32[4,32], index: 0, kind: input, shape index: {}]   ;;  %s56_s1 = inlined_call_operand.vmem [shape: f32[128], index: 1, kind: output, shape index: {}]  }
   0x1   :  { %v4_v0 = vld [vmem:[%s55_s0] sm:$0xf]  ;;  %s36_s0 = smov 96  }
   0x2   :  { %5 = vst [vmem:[#allocation1] sm:$0xf] %v4_v0 }
   0x9   :  { %v10_v1 = vld [vmem:[#allocation1 + $0x3] sm:$0x1]   ;;  %v22_v2 = vld [vmem:[#allocation1 + $0x1] sm:$0x1]   ;;  %v6_v3 = vld [vmem:[#allocation1] sm:$0x1]  }
   0xa   :  { %11 = vrot.lane.b32.xlu0 %v10_v1, %s36_s0  ;;  %23 = vrot.lane.b32.xlu1 %v22_v2, %s37_s8  ;;  %v16_v4 = vld [vmem:[#allocation1 + $0x2] sm:$0x1]   ;;  %8 = vst.msk [vmem:[#allocation0] sm:$0x1] %vm7_vm0, %v6_v3  }
   0xe   :  { %17 = vrot.lane.b32.xlu0 %v16_v4, %s38_s9 }
  0x7c   :  { %v12_v5 = vpop.permute.xlu0 %11   ;;  %v24_v6 = vpop.permute.xlu1 %23  }
  0x7d   :  { %14 = vst.msk [vmem:[#allocation0] sm:$0x1] %vm13_vm1, %v12_v5  }
  0x80   :  { %v18_v7 = vpop.permute.xlu0 %17  }
  0x81   :  { %20 = vst.msk [vmem:[#allocation0] sm:$0x1] %vm19_vm2, %v18_v7  }
  0x82   :  { %26 = vst.msk [vmem:[#allocation0] sm:$0x1] %vm25_vm3, %v24_v6  }
  0x89   :  { %v30_v8 = vld [vmem:[#allocation0] sm:$0x1] }
  0x8a   :  { %32 = vst [vmem:[%s56_s1] sm:$0x1] %v30_v8 }

// kernel: duat_forward.35
= control target key start
LH: loop header
LB: loop body
LE: loop exit
PB: predicated region body
PF: predicated region fallthrough
CT: control target
= control target key end

     0   :  { %v83_v36 = vlaneseq  ;;  %s739_s2 = inlined_call_operand.vmem [shape: bf16[256,256], index: 2, kind: input, shape index: {}]   ;;  %s740_s1 = inlined_call_operand.vmem [shape: bf16[32,128], index: 1, kind: input, shape index: {}]   ;;  %s741_s0 = inlined_call_operand.vmem [shape: bf16[32,128], index: 0, kind: input, shape index: {}]   ;;  %s742_s3 = inlined_call_operand.vmem [shape: f32[1,256], index: 3, kind: input, shape index: {}]   ;;  %s743_s4 = inlined_call_operand.vmem [shape: bf16[32,128], index: 4, kind: output, shape index: {}]  }
   0x1   :  { %v493_v0 = vld [vmem:[%s739_s2 + $0x4] ss:$8 sps:$4 sm:$0xff]   ;;  %v495_v1 = vld [vmem:[%s739_s2] ss:$8 sps:$4 sm:$0xff]   ;;  %v496_v2 = vld [vmem:[%s739_s2 + $0x14] ss:$8 sps:$4 sm:$0xff]  }
   0x2   :  { %253 = vmatprep.subr.bf16.mxu0 %v493_v0  ;;  %461 = vmatprep.subr.bf16.mxu1 %v493_v0  ;;  %v498_v3 = vld [vmem:[%s739_s2 + $0x10] ss:$8 sps:$4 sm:$0xff]   ;;  %v499_v4 = vld [vmem:[%s739_s2 + $0x24] ss:$8 sps:$4 sm:$0xff]   ;;  %v501_v5 = vld [vmem:[%s739_s2 + $0x20] ss:$8 sps:$4 sm:$0xff]  }
   0x3   :  { %254 = vmatpush1.bf16.msra.mxu0 %v495_v1  ;;  %477 = vmatpush1.bf16.msra.mxu1 %v495_v1  ;;  %v502_v6 = vld [vmem:[%s739_s2 + $0x34] ss:$8 sps:$4 sm:$0xff]   ;;  %v504_v7 = vld [vmem:[%s739_s2 + $0x30] ss:$8 sps:$4 sm:$0xff]   ;;  %v505_v8 = vld [vmem:[%s739_s2 + $0x44] ss:$8 sps:$4 sm:$0xff]  }
   0x4   :  { %255 = vmatprep.subr.bf16.mxu0 %v496_v2  ;;  %462 = vmatprep.subr.bf16.mxu1 %v496_v2  ;;  %v507_v9 = vld [vmem:[%s739_s2 + $0x40] ss:$8 sps:$4 sm:$0xff]   ;;  %v508_v10 = vld [vmem:[%s739_s2 + $0x54] ss:$8 sps:$4 sm:$0xff]   ;;  %v510_v11 = vld [vmem:[%s739_s2 + $0x50] ss:$8 sps:$4 sm:$0xff]  }
   0x5   :  { %v511_v12 = vld [vmem:[%s739_s2 + $0x64] ss:$8 sps:$4 sm:$0xff]   ;;  %v513_v13 = vld [vmem:[%s739_s2 + $0x60] ss:$8 sps:$4 sm:$0xff]   ;;  %v514_v16 = vld [vmem:[%s739_s2 + $0x74] ss:$8 sps:$4 sm:$0xff]  }
   0x6   :  { %v647_v14 = vld [vmem:[%s740_s1] sm:$0xff]   ;;  %v652_v15 = vld [vmem:[%s740_s1 + $0x8] sm:$0xff]   ;;  %v516_v17 = vld [vmem:[%s739_s2 + $0x70] ss:$8 sps:$4 sm:$0xff]   ;;  %v84_v37 = vshrl.u32 %v83_v36, 7 }
   0x7   :  { %256 = vmatpush1.bf16.msra.mxu0 %v498_v3  ;;  %478 = vmatpush1.bf16.msra.mxu1 %v498_v3  ;;  %v517_v18 = vld [vmem:[%s739_s2 + $0x84] ss:$8 sps:$4 sm:$0xff]   ;;  %v519_v19 = vld [vmem:[%s739_s2 + $0x80] ss:$8 sps:$4 sm:$0xff]   ;;  %v520_v20 = vld [vmem:[%s739_s2 + $0x94] ss:$8 sps:$4 sm:$0xff]  }
   0x8   :  { %257 = vmatprep.subr.bf16.mxu0 %v499_v4  ;;  %463 = vmatprep.subr.bf16.mxu1 %v499_v4  ;;  %v522_v21 = vld [vmem:[%s739_s2 + $0x90] ss:$8 sps:$4 sm:$0xff]   ;;  %v523_v22 = vld [vmem:[%s739_s2 + $0xa4] ss:$8 sps:$4 sm:$0xff]   ;;  %v525_v23 = vld [vmem:[%s739_s2 + $0xa0] ss:$8 sps:$4 sm:$0xff]  }
   0x9   :  { %285 = vmatprep.mubr.bf16.mxu0 %v647_v14  ;;  %295 = vmatprep.mubr.bf16.mxu1 %v652_v15  ;;  %v526_v24 = vld [vmem:[%s739_s2 + $0xb4] ss:$8 sps:$4 sm:$0xff]   ;;  %v528_v25 = vld [vmem:[%s739_s2 + $0xb0] ss:$8 sps:$4 sm:$0xff]   ;;  %v529_v26 = vld [vmem:[%s739_s2 + $0xc4] ss:$8 sps:$4 sm:$0xff]  }
   0xa   :  { %v531_v27 = vld [vmem:[%s739_s2 + $0xc0] ss:$8 sps:$4 sm:$0xff]   ;;  %v532_v28 = vld [vmem:[%s739_s2 + $0xd4] ss:$8 sps:$4 sm:$0xff]   ;;  %v534_v29 = vld [vmem:[%s739_s2 + $0xd0] ss:$8 sps:$4 sm:$0xff]  }
   0xb   :  { %258 = vmatpush1.bf16.msra.mxu0 %v501_v5  ;;  %479 = vmatpush1.bf16.msra.mxu1 %v501_v5  ;;  %v535_v30 = vld [vmem:[%s739_s2 + $0xe4] ss:$8 sps:$4 sm:$0xff]   ;;  %v537_v31 = vld [vmem:[%s739_s2 + $0xe0] ss:$8 sps:$4 sm:$0xff]   ;;  %v538_v32 = vld [vmem:[%s739_s2 + $0xf4] ss:$8 sps:$4 sm:$0xff]  }
   0xc   :  { %259 = vmatprep.subr.bf16.mxu0 %v502_v6  ;;  %464 = vmatprep.subr.bf16.mxu1 %v502_v6  ;;  %v540_v33 = vld [vmem:[%s739_s2 + $0xf0] ss:$8 sps:$4 sm:$0xff]   ;;  %v713_v34 = vld [vmem:[%s741_s0] sm:$0xff]   ;;  %v718_v35 = vld [vmem:[%s741_s0 + $0x8] sm:$0xff]   ;;  %v85_v38 = vsub.s32 0, %v84_v37  ;;  %v89_v40 = vsub.s32 1, %v84_v37 }
   0xd   :  { %v81_v39 = vld [vmem:[%s742_s3] sm:$0x3] }
   0xe   :  { %v86_v41 = vrot.slane %v81_v39, %v85_v38  ;;  %v90_v42 = vrot.slane %v81_v39, %v89_v40  ;;  %v313_v38 = vunpack.c.h.bf16 %v652_v15 }
   0xf   :  { %260 = vmatpush1.bf16.msra.mxu0 %v504_v7  ;;  %480 = vmatpush1.bf16.msra.mxu1 %v504_v7 }
  0x10   :  { %261 = vmatprep.subr.bf16.mxu0 %v505_v8  ;;  %465 = vmatprep.subr.bf16.mxu1 %v505_v8 }
  0x13   :  { %262 = vmatpush1.bf16.msra.mxu0 %v507_v9  ;;  %481 = vmatpush1.bf16.msra.mxu1 %v507_v9 }
  0x14   :  { %263 = vmatprep.subr.bf16.mxu0 %v508_v10  ;;  %466 = vmatprep.subr.bf16.mxu1 %v508_v10 }
  0x17   :  { %264 = vmatpush1.bf16.msra.mxu0 %v510_v11  ;;  %482 = vmatpush1.bf16.msra.mxu1 %v510_v11 }
  0x18   :  { %265 = vmatprep.subr.bf16.mxu0 %v511_v12  ;;  %467 = vmatprep.subr.bf16.mxu1 %v511_v12 }
  0x1b   :  { %266 = vmatpush1.bf16.msra.mxu0 %v513_v13  ;;  %483 = vmatpush1.bf16.msra.mxu1 %v513_v13 }
  0x1c   :  { %267 = vmatprep.subr.bf16.mxu0 %v514_v16  ;;  %468 = vmatprep.subr.bf16.mxu1 %v514_v16 }
  0x1f   :  { %268 = vmatpush1.bf16.msra.mxu0 %v516_v17  ;;  %484 = vmatpush1.bf16.msra.mxu1 %v516_v17 }
  0x20   :  { %269 = vmatprep.subr.bf16.mxu0 %v517_v18  ;;  %469 = vmatprep.subr.bf16.mxu1 %v517_v18 }
  0x23   :  { %270 = vmatpush1.bf16.msra.mxu0 %v519_v19  ;;  %485 = vmatpush1.bf16.msra.mxu1 %v519_v19 }
  0x24   :  { %271 = vmatprep.subr.bf16.mxu0 %v520_v20  ;;  %470 = vmatprep.subr.bf16.mxu1 %v520_v20 }
  0x27   :  { %272 = vmatpush1.bf16.msra.mxu0 %v522_v21  ;;  %486 = vmatpush1.bf16.msra.mxu1 %v522_v21  ;;  %v306_v21 = vunpack.c.l.bf16 %v713_v34 }
  0x28   :  { %273 = vmatprep.subr.bf16.mxu0 %v523_v22  ;;  %471 = vmatprep.subr.bf16.mxu1 %v523_v22  ;;  %v310_v22 = vunpack.c.l.bf16 %v718_v35 }
  0x2b   :  { %274 = vmatpush1.bf16.msra.mxu0 %v525_v23  ;;  %487 = vmatpush1.bf16.msra.mxu1 %v525_v23  ;;  %v307_v23 = vunpack.c.l.bf16 %v647_v14 }
  0x2c   :  { %275 = vmatprep.subr.bf16.mxu0 %v526_v24  ;;  %472 = vmatprep.subr.bf16.mxu1 %v526_v24 }
  0x2f   :  { %276 = vmatpush1.bf16.msra.mxu0 %v528_v25  ;;  %488 = vmatpush1.bf16.msra.mxu1 %v528_v25  ;;  %v311_v25 = vunpack.c.l.bf16 %v652_v15 }
  0x30   :  { %277 = vmatprep.subr.bf16.mxu0 %v529_v26  ;;  %473 = vmatprep.subr.bf16.mxu1 %v529_v26 }
  0x33   :  { %278 = vmatpush1.bf16.msra.mxu0 %v531_v27  ;;  %489 = vmatpush1.bf16.msra.mxu1 %v531_v27  ;;  %v308_v27 = vunpack.c.h.bf16 %v713_v34 }
  0x34   :  { %279 = vmatprep.subr.bf16.mxu0 %v532_v28  ;;  %474 = vmatprep.subr.bf16.mxu1 %v532_v28 }
  0x37   :  { %280 = vmatpush1.bf16.msra.mxu0 %v534_v29  ;;  %490 = vmatpush1.bf16.msra.mxu1 %v534_v29 }
  0x38   :  { %281 = vmatprep.subr.bf16.mxu0 %v535_v30  ;;  %475 = vmatprep.subr.bf16.mxu1 %v535_v30  ;;  %v312_v30 = vunpack.c.h.bf16 %v718_v35 }
  0x3b   :  { %282 = vmatpush1.bf16.msra.mxu0 %v537_v31  ;;  %491 = vmatpush1.bf16.msra.mxu1 %v537_v31 }
  0x3c   :  { %283 = vmatprep.subr.bf16.mxu0 %v538_v32  ;;  %476 = vmatprep.subr.bf16.mxu1 %v538_v32 }
  0x3f   :  { %284 = vmatpush1.bf16.msra.mxu0 %v540_v33  ;;  %492 = vmatpush1.bf16.msra.mxu1 %v540_v33  ;;  %v309_v33 = vunpack.c.h.bf16 %v647_v14 }
  0x42   :  { %286 = vmatmul.mubr.bf16.vlgmr.msra.gmra.mrb[0].mxu0 %v713_v34  ;;  %296 = vmatmul.mubr.bf16.vlgmr.msra.gmra.mrb[0].mxu1 %v718_v35 }
 0x115   :  { %v287_v43 = vpop.f32.mrb[0].mxu0  ;;  %v297_v44 = vpop.f32.mrb[0].mxu1 }
 0x116   :  { %v288_v45 = vadd.f32 %v287_v43, %v86_v41  ;;  %v298_v46 = vadd.f32 %v297_v44, %v86_v41  ;;  %v289_v47 = vpop.f32.mrb[1].mxu0  ;;  %v299_v48 = vpop.f32.mrb[1].mxu1 }
 0x117   :  { %v290_v49 = vadd.f32 %v289_v47, %v90_v42  ;;  %v300_v50 = vadd.f32 %v299_v48, %v90_v42  ;;  %v291_v51 = vpop.f32.mrb[2].mxu0  ;;  %v301_v52 = vpop.f32.mrb[2].mxu1 }
 0x118   :  { %v434_v53 = vmul.f32 -1.442695, %v288_v45  ;;  %v438_v54 = vmul.f32 -1.442695, %v298_v46  ;;  %v292_v55 = vadd.f32 %v291_v51, %v86_v41  ;;  %v302_v56 = vadd.f32 %v301_v52, %v86_v41  ;;  %v293_v57 = vpop.f32.mrb[3].mxu0  ;;  %v303_v58 = vpop.f32.mrb[3].mxu1 }
 0x119   :  { %v435_v59 = vmul.f32 -1.442695, %v290_v49  ;;  %v439_v60 = vmul.f32 -1.442695, %v300_v50  ;;  %v294_v61 = vadd.f32 %v293_v57, %v90_v42  ;;  %v304_v62 = vadd.f32 %v303_v58, %v90_v42 }
 0x11a   :  { %545 = vpow2.f32 %v434_v53  ;;  %v436_v63 = vmul.f32 -1.442695, %v292_v55  ;;  %v440_v0 = vmul.f32 -1.442695, %v302_v56 }
 0x11b   :  { %547 = vpow2.f32 %v438_v54  ;;  %v437_v1 = vmul.f32 -1.442695, %v294_v61  ;;  %v441_v2 = vmul.f32 -1.442695, %v304_v62 }
 0x11c   :  { %549 = vpow2.f32 %v435_v59 }
 0x11d   :  { %551 = vpow2.f32 %v439_v60 }
 0x11e   :  { %553 = vpow2.f32 %v436_v63 }
 0x11f   :  { %555 = vpow2.f32 %v440_v0 }
 0x120   :  { %557 = vpow2.f32 %v437_v1 }
 0x121   :  { %559 = vpow2.f32 %v441_v2 }
 0x124   :  { %v546_v3 = vpop.eup %545 }
 0x125   :  { %v548_v4 = vpop.eup %547  ;;  %v338_v5 = vadd.f32 1.0, %v546_v3 }
 0x126   :  { %v550_v6 = vpop.eup %549  ;;  %v342_v7 = vadd.f32 1.0, %v548_v4 }
 0x127   :  { %v552_v8 = vpop.eup %551  ;;  %561 = vrcp.f32 %v338_v5  ;;  %v339_v9 = vadd.f32 1.0, %v550_v6 }
 0x128   :  { %v554_v10 = vpop.eup %553  ;;  %563 = vrcp.f32 %v342_v7  ;;  %v343_v11 = vadd.f32 1.0, %v552_v8 }
 0x129   :  { %v556_v12 = vpop.eup %555  ;;  %565 = vrcp.f32 %v339_v9  ;;  %v340_v13 = vadd.f32 1.0, %v554_v10 }
 0x12a   :  { %v558_v16 = vpop.eup %557  ;;  %567 = vrcp.f32 %v343_v11  ;;  %v344_v17 = vadd.f32 1.0, %v556_v12 }
 0x12b   :  { %v560_v18 = vpop.eup %559  ;;  %569 = vrcp.f32 %v340_v13  ;;  %v341_v19 = vadd.f32 1.0, %v558_v16 }
 0x12c   :  { %571 = vrcp.f32 %v344_v17  ;;  %v345_v20 = vadd.f32 1.0, %v560_v18 }
 0x12d   :  { %573 = vrcp.f32 %v341_v19 }
 0x12e   :  { %575 = vrcp.f32 %v345_v20 }
 0x131   :  { %v562_v24 = vpop.eup %561 }
 0x132   :  { %v564_v26 = vpop.eup %563  ;;  %v362_v28 = vmul.f32 %v562_v24, %v306_v21 }
 0x133   :  { %v566_v29 = vpop.eup %565  ;;  %v366_v31 = vmul.f32 %v564_v26, %v310_v22 }
 0x134   :  { %v568_v32 = vpop.eup %567  ;;  %v363_v36 = vmul.f32 %v566_v29, %v307_v23 }
 0x135   :  { %v570_v37 = vpop.eup %569  ;;  %v367_v39 = vmul.f32 %v568_v32, %v311_v25 }
 0x136   :  { %v572_v40 = vpop.eup %571  ;;  %v370_v41 = vadd.f32 %v363_v36, %v362_v28  ;;  %v364_v42 = vmul.f32 %v570_v37, %v308_v27 }
 0x137   :  { %v574_v43 = vpop.eup %573  ;;  %v372_v44 = vadd.f32 %v367_v39, %v366_v31  ;;  %v368_v45 = vmul.f32 %v572_v40, %v312_v30 }
 0x138   :  { %v576_v34 = vpop.eup %575  ;;  %v365_v46 = vmul.f32 %v574_v43, %v309_v33 }
 0x139   :  { %v369_v47 = vmul.f32 %v576_v34, %v313_v38 }
 0x13a   :  { %v371_v48 = vadd.f32 %v365_v46, %v364_v42 }
 0x13b   :  { %v373_v35 = vadd.f32 %v369_v47, %v368_v45 }
 0x13c   :  { %v453_v49 = vpack.c.bf16 %v371_v48, %v370_v41 }
 0x13d   :  { %v458_v50 = vpack.c.bf16 %v373_v35, %v372_v44 }
 0x13e   :  { %454 = vst [vmem:[%s743_s4] sm:$0xff] %v453_v49  }
 0x13f   :  { %460 = vst [vmem:[%s743_s4 + $0x8] sm:$0xff] %v458_v50  }

// kernel: duat_forward.33
= control target key start
LH: loop header
LB: loop body
LE: loop exit
PB: predicated region body
PF: predicated region fallthrough
CT: control target
= control target key end

     0   :  { %s2301_s12 = smov 0   ;;  %s2810_s0 = inlined_call_operand.vmem [shape: bf16[2,10,10,16], index: 0, kind: input, shape index: {}]   ;;  %s2811_s1 = inlined_call_operand.vmem [shape: bf16[9,16,32], index: 1, kind: input, shape index: {}]   ;;  %s2812_s2 = inlined_call_operand.vmem [shape: f32[1,32], index: 2, kind: input, shape index: {}]   ;;  %s2813_s3 = inlined_call_operand.vmem [shape: bf16[2,64,32], index: 3, kind: output, shape index: {}]  }
   0x1 LB: > { %s1829_s13 = sadd.s32 4294967295, %s2279_s12   ;;  %p1833_p0 = scmp.ge.s32.totalorder %s2279_s12, 1  ;;  %s2279_s12 = sphi %s2301_s12, %s13_s12  }
   0x2   : > { %p137_p1 = scmp.lt.s32.totalorder %s2279_s12, 3 }
   0x4   : > { %p138_p2 = pnand %p1833_p0, %p137_p1 }
   0x5   : > { %v2252_v0 = vld [vmem:[%s2811_s1 + $0x8] sm:$0xff] (!%p138_p2)   ;;  %p161_p3 = scmp.lt.s32.totalorder (!%p138_p2), %s1829_s13, 1  ;;  %v2315_v1 = vld [vmem:[%s2811_s1 + $0x20] sm:$0xff] (!%p138_p2)   ;;  %vm190_vm0 = vsmask.f32 (!%p138_p2), 3328  ;;  %vm326_vm2 = vcmask (!%p138_p2), 130048  }
   0x6   : > { %141 = sbr.rel (%p138_p2) target bundleno = 339 (0x153), region = 32  ;;  %2087 = vmatprep.subr.bf16.mxu1 (!%p138_p2), %v2252_v0  ;;  %v2322_v2 = vld [vmem:[%s2811_s1] sm:$0xff] (!%p138_p2)   ;;  %2127 = vmatprep.subr.bf16.mxu0 (!%p138_p2), %v2315_v1  ;;  %v2331_v3 = vld [vmem:[%s2811_s1 + $0x28] sm:$0xff] (!%p138_p2)   ;;  %vm191_vm1 = vsmask.f32 (!%p138_p2), 7440  ;;  %vm531_vm4 = vcmask (!%p138_p2), 1042432  }
   0x7   : > { %2088 = vmatpush3.bf16.msra.mxu1 (!%p138_p2), %v2252_v0  ;;  %2128 = vmatpush3.bf16.msra.mxu0 (!%p138_p2), %v2315_v1  ;;  %vm2368_vm3 = vmor (!%p138_p2), %vm190_vm0, %vm191_vm1  ;;  %vm532_vm5 = vcmask (!%p138_p2), 1046532   ;;  %vm1765_vm7 = vcmask (!%p138_p2), 257024  }
   0x8   : > { %2097 = vmatprep.subr.bf16.mxu1 (!%p138_p2), %v2322_v2  ;;  %2137 = vmatprep.subr.bf16.mxu0 (!%p138_p2), %v2331_v3  ;;  %vm2478_vm6 = vmor (!%p138_p2), %vm531_vm4, %vm532_vm5 }
   0xd   : > { %s2819_s13 = smov (!%p161_p3, %s1829_s13), 1 }
   0xe   : > { %s2243_s20 = smul.u32 80, %s2819_s13  ;;  %s2033_s11 = sshll.u32 %s2819_s13, 5 }
   0xf   : > { %s2789_s16 = scalar_lea.vmem %s2813_s3, %s2033_s11 }
  0x10   : > { %s2336_s25 = scalar_lea.vmem %s2810_s0, %s2243_s20 }
  0x11   : > { %v2340_v4 = vld [vmem:[%s2336_s25] sm:$0xf]  ;;  %v2343_v5 = vld [vmem:[%s2336_s25 + $0x8] sm:$0xf]  ;;  %v2346_v6 = vld [vmem:[%s2336_s25 + $0x4] sm:$0x1] }
  0x12   : > { %v2349_v7 = vld [vmem:[%s2336_s25 + $0xc] sm:$0x1]  ;;  %v194_v8 = vshrl.u32 %v2340_v4, 16  ;;  %v197_v9 = vshll.u32 %v2340_v4, 16  ;;  %v203_v10 = vshll.u32 %v2346_v6, 16  ;;  %v208_v11 = vshrl.u32 %v2343_v5, 16 }
  0x13   : > { %v211_v12 = vshll.u32 %v2343_v5, 16  ;;  %v217_v13 = vshll.u32 %v2349_v7, 16  ;;  %v1895_v14 = vld [vmem:[%s2336_s25 + $0x8] sm:$0xf]  ;;  %v2359_v19 = vld [vmem:[%s2336_s25 + $0xc] sm:$0x1] }
  0x14   : > { %v196_v15 = vrot.slane %v194_v8, 4  ;;  %v199_v16 = vrot.slane %v197_v9, 5  ;;  %v205_v17 = vrot.slane %v203_v10, 5  ;;  %v210_v18 = vrot.slane %v208_v11, 4  ;;  %v1897_v22 = vld [vmem:[%s2336_s25 + $0x10] sm:$0xf] }
  0x15   : > { %v213_v20 = vrot.slane %v211_v12, 5  ;;  %v219_v21 = vrot.slane %v217_v13, 5  ;;  %v2363_v23 = vld [vmem:[%s2336_s25 + $0x14] sm:$0x1]  ;;  %v812_v25 = vshrl.u32 %v1895_v14, 16  ;;  %v815_v26 = vshll.u32 %v1895_v14, 16 }
  0x16   : > { %v200_v24 = vor.u32 %v199_v16, %v196_v15  ;;  %v821_v27 = vshll.u32 %v2359_v19, 16  ;;  %v826_v30 = vshrl.u32 %v1897_v22, 16  ;;  %v829_v31 = vshll.u32 %v1897_v22, 16  ;;  %v2374_v33 = vld [vmem:[%s2336_s25 + $0x10] sm:$0xf] }
  0x17   : > { %v214_v29 = vor.u32 %v213_v20, %v210_v18  ;;  %v835_v32 = vshll.u32 %v2363_v23, 16  ;;  %v536_v35 = vrot.slane %v2346_v6, 5  ;;  %v814_v36 = vrot.slane %v812_v25, 4  ;;  %v2378_v38 = vld [vmem:[%s2336_s25 + $0x18] sm:$0xf] }
  0x18   : > { %v201_v34 = vrot.slane %v200_v24, 4  ;;  %v817_v37 = vrot.slane %v815_v26, 5  ;;  %v540_v40 = vrot.slane %v2349_v7, 5  ;;  %v828_v41 = vrot.slane %v826_v30, 4  ;;  %v2382_v43 = vld [vmem:[%s2336_s25 + $0x14] sm:$0x1] }
  0x19   : > { %v215_v39 = vrot.slane %v214_v29, 4  ;;  %v831_v42 = vrot.slane %v829_v31, 5  ;;  %v823_v46 = vrot.slane %v821_v27, 5  ;;  %v837_v47 = vrot.slane %v835_v32, 5  ;;  %v2389_v50 = vld [vmem:[%s2336_s25 + $0x1c] sm:$0x1] }
  0x1a   : > { %v206_v44 = vsel %vm2368_vm3, %v201_v34, %v205_v17  ;;  %v818_v45 = vor.u32 %v817_v37, %v814_v36  ;;  %v222_v51 = vshrl.u32 %v2374_v33, 16  ;;  %v225_v52 = vshll.u32 %v2374_v33, 16  ;;  %v1899_v61 = vld [vmem:[%s2336_s25 + $0x18] sm:$0xf]  ;;  %v2403_v9 = vld [vmem:[%s2336_s25 + $0x1c] sm:$0x1] }
  0x1b   : > { %v220_v48 = vsel %vm2368_vm3, %v215_v39, %v219_v21  ;;  %v832_v49 = vor.u32 %v831_v42, %v828_v41  ;;  %v231_v55 = vshll.u32 %v2382_v43, 16  ;;  %v236_v56 = vshrl.u32 %v2378_v38, 16  ;;  %v1901_v14 = vld [vmem:[%s2336_s25 + $0x20] sm:$0xf]  ;;  %v2409_v15 = vld [vmem:[%s2336_s25 + $0x24] sm:$0x1] }
  0x1c   : > { %v1839_v53 = vcombine.low %v206_v44, %v220_v48  ;;  %v819_v54 = vrot.slane %v818_v45, 4  ;;  %v224_v58 = vrot.slane %v222_v51, 4  ;;  %v227_v59 = vrot.slane %v225_v52, 5  ;;  %v2416_v31 = vld [vmem:[%s2336_s25 + $0x20] sm:$0xf] }
  0x1d   : > { %v833_v57 = vrot.slane %v832_v49, 4  ;;  %v239_v60 = vshll.u32 %v2378_v38, 16  ;;  %v1055_v63 = vrot.slane %v2359_v19, 5  ;;  %v238_v0 = vrot.slane %v236_v56, 4  ;;  %v2421_v39 = vld [vmem:[%s2336_s25 + $0x24] sm:$0x1] }
  0x1e   : > { %2089 = vmatprep.mubr.msk.bf16.mxu1 %vm326_vm2, %v1839_v53  ;;  %v824_v62 = vsel %vm2368_vm3, %v819_v54, %v823_v46  ;;  %v245_v8 = vshll.u32 %v2389_v50, 16  ;;  %v228_v11 = vor.u32 %v227_v59, %v224_v58  ;;  %v233_v12 = vrot.slane %v231_v55, 5  ;;  %v2425_v46 = vld [vmem:[%s2336_s25 + $0x28] sm:$0xf]  ;;  %v2431_v51 = vld [vmem:[%s2336_s25 + $0x2c] sm:$0x1] }
  0x1f   : > { %v838_v10 = vsel %vm2368_vm3, %v833_v57, %v837_v47  ;;  %v241_v13 = vrot.slane %v239_v60, 5  ;;  %v1059_v17 = vrot.slane %v2363_v23, 5  ;;  %v840_v20 = vshrl.u32 %v1899_v61, 16  ;;  %v2437_v57 = vld [vmem:[%s2336_s25 + $0x30] sm:$0xf] }
  0x20   : > { %v1913_v16 = vcombine.low %v824_v62, %v838_v10  ;;  %v247_v18 = vrot.slane %v245_v8, 5  ;;  %v229_v21 = vrot.slane %v228_v11, 4  ;;  %v843_v24 = vshll.u32 %v1899_v61, 16  ;;  %v2442_v58 = vld [vmem:[%s2811_s1 + $0x10] sm:$0xff]  }
  0x21   : > { %v242_v22 = vor.u32 %v241_v13, %v238_v0  ;;  %v849_v25 = vshll.u32 %v2403_v9, 16  ;;  %v842_v26 = vrot.slane %v840_v20, 4  ;;  %v854_v27 = vshrl.u32 %v1901_v14, 16  ;;  %v2447_v0 = vld [vmem:[%s2336_s25 + $0x38] sm:$0xf] }
  0x22   : > { %2129 = vmatprep.mubr.msk.bf16.mxu0 %vm326_vm2, %v1913_v16  ;;  %v857_v29 = vshll.u32 %v1901_v14, 16  ;;  %v863_v30 = vshll.u32 %v2409_v15, 16  ;;  %v234_v32 = vsel %vm2368_vm3, %v229_v21, %v233_v12  ;;  %v845_v36 = vrot.slane %v843_v24, 5  ;;  %v2452_v13 = vld [vmem:[%s2336_s25 + $0x34] sm:$0x1] }
  0x23   : > { %v243_v34 = vrot.slane %v242_v22, 4  ;;  %v851_v37 = vrot.slane %v849_v25, 5  ;;  %v856_v41 = vrot.slane %v854_v27, 4  ;;  %v1063_v45 = vrot.slane %v2403_v9, 5  ;;  %v2458_v20 = vld [vmem:[%s2336_s25 + $0x3c] sm:$0x1] }
  0x24   : > { %v859_v42 = vrot.slane %v857_v29, 5  ;;  %v865_v44 = vrot.slane %v863_v30, 5  ;;  %v846_v48 = vor.u32 %v845_v36, %v842_v26  ;;  %v1067_v49 = vrot.slane %v2409_v15, 5  ;;  %v2464_v22 = vld [vmem:[%s2811_s1 + $0x30] sm:$0xff]   ;;  %v1922_v27 = vld [vmem:[%s2336_s25 + $0x8] sm:$0xe] }
  0x25   : > { %v248_v47 = vsel %vm2368_vm3, %v243_v34, %v247_v18  ;;  %v250_v52 = vshrl.u32 %v2416_v31, 16  ;;  %v253_v55 = vshll.u32 %v2416_v31, 16  ;;  %v259_v56 = vshll.u32 %v2421_v39, 16  ;;  %v1923_v29 = vld [vmem:[%s2336_s25 + $0x10] sm:$0xe] }
  0x26   : > { %v1840_v53 = vcombine.low %v234_v32, %v248_v47  ;;  %v860_v54 = vor.u32 %v859_v42, %v856_v41  ;;  %v847_v59 = vrot.slane %v846_v48, 4  ;;  %v264_v61 = vshrl.u32 %v2425_v46, 16  ;;  %v2022_v48 = vld [vmem:[%s2812_s2] ss:$0 sm:$0xff] }
  0x27   : > { %v252_v60 = vrot.slane %v250_v52, 4  ;;  %v267_v62 = vshll.u32 %v2425_v46, 16  ;;  %v255_v10 = vrot.slane %v253_v55, 5  ;;  %v261_v11 = vrot.slane %v259_v56, 5  ;;  %v1925_v52 = vld [vmem:[%s2336_s25 + $0x20] sm:$0xe] }
  0x28   : > { %2090 = vmatmul.mubr.msk.bf16.vlgmr.msra.gmra.mrb[0].mxu1 %vm326_vm2, %v1840_v53  ;;  %v861_v8 = vrot.slane %v860_v54, 4  ;;  %v273_v12 = vshll.u32 %v2431_v51, 16  ;;  %v852_v14 = vsel %vm2368_vm3, %v847_v59, %v851_v37  ;;  %v266_v16 = vrot.slane %v264_v61, 4  ;;  %v1924_v37 = vld [vmem:[%s2336_s25 + $0x18] sm:$0xe] }
  0x29   : > { %2098 = vmatpush3.bf16.msra.mxu1 %v2322_v2  ;;  %v269_v18 = vrot.slane %v267_v62, 5  ;;  %v278_v21 = vshrl.u32 %v2437_v57, 16  ;;  %v256_v25 = vor.u32 %v255_v10, %v252_v60  ;;  %v281_v26 = vshll.u32 %v2437_v57, 16  ;;  %v1926_v59 = vld [vmem:[%s2336_s25 + $0x28] sm:$0xe] }
  0x2a   : > { %v866_v24 = vsel %vm2368_vm3, %v861_v8, %v865_v44  ;;  %v275_v2 = vrot.slane %v273_v12, 5  ;;  %2107 = vmatprep.subr.bf16.mxu1 %v2442_v58  ;;  %v287_v36 = vshll.u32 %v2452_v13, 16  ;;  %v292_v44 = vshrl.u32 %v2447_v0, 16  ;;  %v2490_v10 = vld [vmem:[%s2336_s25 + $0x2c] sm:$0x1] }
  0x2b   : > { %v1914_v30 = vcombine.low %v852_v14, %v866_v24  ;;  %v270_v32 = vor.u32 %v269_v18, %v266_v16  ;;  %v280_v34 = vrot.slane %v278_v21, 4  ;;  %v257_v41 = vrot.slane %v256_v25, 4  ;;  %v2500_v25 = vld [vmem:[%s2336_s25 + $0x34] sm:$0x1] }
  0x2c   : > { %v283_v42 = vrot.slane %v281_v26, 5  ;;  %v295_v47 = vshll.u32 %v2447_v0, 16  ;;  %v289_v54 = vrot.slane %v287_v36, 5  ;;  %v301_v55 = vshll.u32 %v2458_v20, 16  ;;  %v1927_v26 = vld [vmem:[%s2336_s25 + $0x30] sm:$0xe] }
  0x2d   : > { %2130 = vmatmul.mubr.msk.bf16.vlgmr.msra.gmra.mrb[0].mxu0 %vm326_vm2, %v1914_v30  ;;  %v271_v53 = vrot.slane %v270_v32, 4  ;;  %v1930_v56 = vrot.slane %v1922_v27, 9  ;;  %v262_v60 = vsel %vm2368_vm3, %v257_v41, %v261_v11  ;;  %v294_v62 = vrot.slane %v292_v44, 4  ;;  %v2508_v27 = vld [vmem:[%s2336_s25 + $0x3c] sm:$0x1] }
  0x2e   : > { %2138 = vmatpush3.bf16.msra.mxu0 %v2331_v3  ;;  %v284_v61 = vor.u32 %v283_v42, %v280_v34  ;;  %v297_v8 = vrot.slane %v295_v47, 5  ;;  %v303_v14 = vrot.slane %v301_v55, 5  ;;  %v1931_v3 = vrot.slane %v1923_v29, 9  ;;  %v2518_v34 = vld [vmem:[%s2336_s25 + $0x44] sm:$0x1] }
  0x2f   : > { %v276_v12 = vsel %vm2368_vm3, %v271_v53, %v275_v2  ;;  %v1056_v16 = vsel %vm2478_vm6, %v1930_v56, %v1055_v63  ;;  %2147 = vmatprep.subr.bf16.mxu0 %v2464_v22  ;;  %v1932_v24 = vrot.slane %v1924_v37, 9  ;;  %v1933_v2 = vrot.slane %v1925_v52, 9  ;;  %v1929_v44 = vld [vmem:[%s2336_s25 + $0x40] sm:$0xe]  ;;  %v508_v55 = vld [vmem:[%s2336_s25 + $0x8] sm:$0xe] }
  0x30   : > { %v1841_v11 = vcombine.low %v262_v60, %v276_v12  ;;  %v285_v18 = vrot.slane %v284_v61, 4  ;;  %v298_v21 = vor.u32 %v297_v8, %v294_v62  ;;  %v1060_v19 = vsel %vm2478_vm6, %v1931_v3, %v1059_v17  ;;  %v1928_v17 = vld [vmem:[%s2336_s25 + $0x38] sm:$0xe]  ;;  %v507_v47 = vld [vmem:[%s2336_s25] sm:$0xe] }
  0x31   : > { %v1934_v63 = vrot.slane %v1926_v59, 9  ;;  %v1940_v32 = vcombine.low %v1056_v16, %v1060_v19  ;;  %v1064_v23 = vsel %vm2478_vm6, %v1932_v24, %v1063_v45  ;;  %v1068_v36 = vsel %vm2478_vm6, %v1933_v2, %v1067_v49  ;;  %v2543_v60 = vld [vmem:[%s2811_s1 + $0x38] sm:$0xff]   ;;  %v511_v8 = vld [vmem:[%s2336_s25 + $0x20] sm:$0xe]  ;;  %v512_v3 = vld [vmem:[%s2336_s25 + $0x28] sm:$0xe] }
  0x32   : > { %2093 = vmatprep.mubr.msk.bf16.mxu1 %vm326_vm2, %v1841_v11  ;;  %v290_v29 = vsel %vm2368_vm3, %v285_v18, %v289_v54  ;;  %v299_v30 = vrot.slane %v298_v21, 4  ;;  %v1071_v37 = vrot.slane %v2490_v10, 5  ;;  %v1935_v41 = vrot.slane %v1927_v26, 9  ;;  %v510_v62 = vld [vmem:[%s2336_s25 + $0x18] sm:$0xe] }
  0x33   : > { %v1075_v42 = vrot.slane %v2500_v25, 5  ;;  %2139 = vmatprep.mubr.msk.bf16.mxu0 %vm326_vm2, %v1940_v32  ;;  %v1941_v45 = vcombine.low %v1064_v23, %v1068_v36  ;;  %v1848_v15 = vcombine.low %v2340_v4, %v2343_v5  ;;  %v1936_v54 = vrot.slane %v1928_v17, 9  ;;  %v509_v4 = vld [vmem:[%s2336_s25 + $0x10] sm:$0xe]  ;;  %v2593_v32 = vld [vmem:[%s2336_s25 + $0x38] sm:$0xe] }
  0x34   : > { %v304_v9 = vsel %vm2368_vm3, %v299_v30, %v303_v14  ;;  %v1072_v52 = vsel %vm2478_vm6, %v1934_v63, %v1071_v37  ;;  %v1079_v59 = vrot.slane %v2508_v27, 5  ;;  %v1937_v5 = vrot.slane %v1929_v44, 9  ;;  %v1970_v63 = vld [vmem:[%s2336_s25 + $0x18] sm:$0xf]  ;;  %v2596_v23 = vld [vmem:[%s2336_s25 + $0x14] sm:$0x1] }
  0x35   : > { %v1842_v49 = vcombine.low %v290_v29, %v304_v9  ;;  %v1076_v53 = vsel %vm2478_vm6, %v1935_v41, %v1075_v42  ;;  %v1083_v61 = vrot.slane %v2518_v34, 5  ;;  %v544_v12 = vrot.slane %v2382_v43, 5  ;;  %v2605_v36 = vld [vmem:[%s2336_s25 + $0x1c] sm:$0x1]  ;;  %v1972_v42 = vld [vmem:[%s2336_s25 + $0x20] sm:$0xf] }
  0x36   : > { %v1942_v56 = vcombine.low %v1072_v52, %v1076_v53  ;;  %v1857_v14 = vrot.slane %v507_v47, 9  ;;  %v1858_v16 = vrot.slane %v508_v55, 9  ;;  %v548_v11 = vrot.slane %v2389_v50, 5  ;;  %v1974_v47 = vld [vmem:[%s2336_s25 + $0x28] sm:$0xf] }
  0x37   : > { %2094 = vmatmul.mubr.msk.bf16.gmra.mrb[4].mxu1 %vm326_vm2, %v1842_v49  ;;  %v1080_v18 = vsel %vm2478_vm6, %v1936_v54, %v1079_v59  ;;  %v1084_v21 = vsel %vm2478_vm6, %v1937_v5, %v1083_v61  ;;  %v1859_v24 = vrot.slane %v509_v4, 9  ;;  %v1860_v26 = vrot.slane %v510_v62, 9  ;;  %v2626_v53 = vld [vmem:[%s2336_s25 + $0x24] sm:$0x1]  ;;  %v2637_v5 = vld [vmem:[%s2336_s25 + $0x2c] sm:$0x1] }
  0x38   : > { %2099 = vmatprep.mubr.msk.bf16.mxu1 %vm326_vm2, %v1848_v15  ;;  %v2565_v43 = vsel %vm2478_vm6, %v1857_v14, %v536_v35  ;;  %v2571_v50 = vsel %vm2478_vm6, %v1858_v16, %v540_v40  ;;  %v1861_v19 = vrot.slane %v511_v8, 9  ;;  %v1849_v6 = vcombine.low %v2374_v33, %v2378_v38  ;;  %v2580_v35 = vld [vmem:[%s2811_s1 + $0x18] sm:$0xff]   ;;  %v2584_v40 = vld [vmem:[%s2336_s25 + $0x30] sm:$0xe]  ;;  %v2264_v8 = vld [vmem:[%s2336_s25 + $0x20] ss:$8 sps:$4 sm:$0xff]  }
  0x39   : > { %2140 = vmatmul.mubr.msk.bf16.vlgmr.msra.gmra.mrb[0].mxu0 %vm326_vm2, %v1941_v45  ;;  %v552_v7 = vrot.slane %v2421_v39, 5  ;;  %v1862_v2 = vrot.slane %v512_v3, 9  ;;  %v1943_v29 = vcombine.low %v1080_v18, %v1084_v21  ;;  %v1850_v30 = vcombine.low %v2416_v31, %v2425_v46  ;;  %v2262_v38 = vld [vmem:[%s2336_s25 + $0x10] ss:$8 sps:$4 sm:$0xff]  }
  0x3a   : > { %2148 = vmatpush3.bf16.msra.mxu0 %v2464_v22  ;;  %2143 = vmatprep.mubr.msk.bf16.mxu0 %vm326_vm2, %v1942_v56  ;;  %v1968_v22 = vld [vmem:[%s2336_s25 + $0x10] sm:$0xf]  ;;  %v1851_v33 = vcombine.low %v2437_v57, %v2447_v0  ;;  %v1867_v39 = vcombine.low %v2565_v43, %v2571_v50  ;;  %v2602_v17 = vsel %vm2478_vm6, %v1859_v24, %v544_v12  ;;  %v556_v46 = vrot.slane %v2431_v51, 5 }
  0x3b   : > { %2157 = vmatprep.subr.bf16.mxu0 %v2543_v60  ;;  %v1331_v37 = vshrl.u32 %v1968_v22, 16  ;;  %v1334_v31 = vshll.u32 %v1968_v22, 16  ;;  %v1863_v57 = vrot.slane %v2584_v40, 9  ;;  %v560_v0 = vrot.slane %v2452_v13, 5  ;;  %v2648_v40 = vld [vmem:[%s2336_s25 + $0x34] sm:$0x1] }
  0x3c   : > { %v1345_v41 = vshrl.u32 %v1970_v63, 16  ;;  %v1864_v44 = vrot.slane %v2593_v32, 9  ;;  %v1340_v15 = vshll.u32 %v2596_v23, 16  ;;  %v2619_v51 = vsel %vm2478_vm6, %v1860_v26, %v548_v11  ;;  %v2266_v11 = vld [vmem:[%s2336_s25 + $0x30] ss:$8 sps:$4 sm:$0xff]  }
  0x3d   : > { %v1333_v9 = vrot.slane %v1331_v37, 4  ;;  %v1336_v45 = vrot.slane %v1334_v31, 5  ;;  %v2623_v13 = vsel %vm2478_vm6, %v1861_v19, %v552_v7  ;;  %v1348_v52 = vshll.u32 %v1970_v63, 16  ;;  %v1978_v63 = vld [vmem:[%s2336_s25 + $0x38] sm:$0xf] }
  0x3e   : > { %v1347_v49 = vrot.slane %v1345_v41, 4  ;;  %v1354_v54 = vshll.u32 %v2605_v36, 16  ;;  %v1359_v55 = vshrl.u32 %v1972_v42, 16  ;;  %v1362_v56 = vshll.u32 %v1972_v42, 16  ;;  %v2666_v37 = vld [vmem:[%s2336_s25 + $0x3c] sm:$0x1] }
  0x3f   : > { %2100 = vmatmul.mubr.msk.bf16.vlgmr.msra.gmra.mrb[0].mxu1 %vm326_vm2, %v1849_v6  ;;  %v2634_v59 = vsel %vm2478_vm6, %v1862_v2, %v556_v46  ;;  %v1350_v4 = vrot.slane %v1348_v52, 5  ;;  %v1373_v61 = vshrl.u32 %v1974_v47, 16  ;;  %v1376_v62 = vshll.u32 %v1974_v47, 16  ;;  %v1976_v6 = vld [vmem:[%s2336_s25 + $0x30] sm:$0xf] }
  0x40   : > { %2108 = vmatpush3.bf16.msra.mxu1 %v2442_v58  ;;  %2103 = vmatprep.mubr.msk.bf16.mxu1 %vm326_vm2, %v1850_v30  ;;  %v1337_v58 = vor.u32 %v1336_v45, %v1333_v9  ;;  %v1342_v12 = vrot.slane %v1340_v15, 5  ;;  %v1361_v14 = vrot.slane %v1359_v55, 4  ;;  %v1364_v16 = vrot.slane %v1362_v56, 5  ;;  %v1980_v41 = vld [vmem:[%s2336_s25 + $0x40] sm:$0xf] }
  0x41   : > { %2144 = vmatmul.mubr.msk.bf16.gmra.mrb[4].mxu0 %vm326_vm2, %v1943_v29  ;;  %2117 = vmatprep.subr.bf16.mxu1 %v2580_v35  ;;  %v1368_v3 = vshll.u32 %v2626_v53, 16  ;;  %v1351_v21 = vor.u32 %v1350_v4, %v1347_v49  ;;  %v1375_v24 = vrot.slane %v1373_v61, 4  ;;  %v1378_v43 = vrot.slane %v1376_v62, 5  ;;  %v1982_v47 = vld [vmem:[%s2336_s25 + $0x48] sm:$0xf] }
  0x42   : > { %2149 = vmatprep.mubr.msk.bf16.mxu0 %vm326_vm2, %v2262_v38  ;;  %v1338_v18 = vrot.slane %v1337_v58, 4  ;;  %v564_v50 = vrot.slane %v2458_v20, 5  ;;  %v1356_v26 = vrot.slane %v1354_v54, 5  ;;  %v1365_v19 = vor.u32 %v1364_v16, %v1361_v14  ;;  %v2661_v38 = vld [vmem:[%s2811_s1 + $0x40] sm:$0xff]   ;;  %v2690_v62 = vld [vmem:[%s2336_s25 + $0x4c] sm:$0x1] }
  0x43   : > { %v1382_v22 = vshll.u32 %v2637_v5, 16  ;;  %v1868_v7 = vcombine.low %v2602_v17, %v2619_v51  ;;  %v1352_v2 = vrot.slane %v1351_v21, 4  ;;  %v1387_v29 = vshrl.u32 %v1976_v6, 16  ;;  %v2681_v52 = vld [vmem:[%s2336_s25 + $0x44] sm:$0x1] }
  0x44   : > { %v1869_v30 = vcombine.low %v2623_v13, %v2634_v59  ;;  %v2656_v20 = vsel %vm2478_vm6, %v1863_v57, %v560_v0  ;;  %v2663_v17 = vrot.slane %v1368_v3, 5  ;;  %v1390_v31 = vshll.u32 %v1976_v6, 16  ;;  %v2267_v58 = vld [vmem:[%s2336_s25 + $0x40] ss:$8 sps:$4 sm:$0xff]  }
  0x45   : > { %v1379_v46 = vor.u32 %v1378_v43, %v1375_v24  ;;  %v1389_v57 = vrot.slane %v1387_v29, 4  ;;  %v1401_v0 = vshrl.u32 %v1978_v63, 16  ;;  %v1357_v42 = vsel %vm2368_vm3, %v1352_v2, %v1356_v26 }
  0x46   : > { %v1366_v9 = vrot.slane %v1365_v19, 4  ;;  %v1392_v45 = vrot.slane %v1390_v31, 5  ;;  %v1396_v15 = vshll.u32 %v2648_v40, 16  ;;  %v1404_v13 = vshll.u32 %v1978_v63, 16  ;;  %v1995_v19 = vld [vmem:[%s2336_s25 + $0x10] sm:$0xe] }
  0x47   : > { %2104 = vmatmul.mubr.msk.bf16.gmra.mrb[4].mxu1 %vm326_vm2, %v1851_v33  ;;  %v1343_v33 = vsel %vm2368_vm3, %v1338_v18, %v1342_v12  ;;  %v1403_v51 = vrot.slane %v1401_v0, 4  ;;  %v1410_v49 = vshll.u32 %v2666_v37, 16  ;;  %v565_v54 = vsel %vm2478_vm6, %v1864_v44, %v564_v50  ;;  %v1905_v31 = vld [vmem:[%s2336_s25 + $0x30] sm:$0xf] }
  0x48   : > { %2109 = vmatprep.mubr.msk.bf16.mxu1 %vm326_vm2, %v1867_v39  ;;  %v1384_v39 = vrot.slane %v1382_v22, 5  ;;  %v1393_v55 = vor.u32 %v1392_v45, %v1389_v57  ;;  %v1418_v56 = vshll.u32 %v1980_v41, 16  ;;  %v1986_v59 = vcombine.low %v1343_v33, %v1357_v42  ;;  %v2269_v0 = vld [vmem:[%s2336_s25 + $0x8] ss:$8 sps:$4 sm:$0xff]  }
  0x49   : > { %2150 = vmatmul.mubr.msk.bf16.vlgmr.msra.gmra.mrb[0].mxu0 %vm326_vm2, %v2264_v8  ;;  %v1380_v4 = vrot.slane %v1379_v46, 4  ;;  %v1406_v61 = vrot.slane %v1404_v13, 5  ;;  %v1429_v8 = vshrl.u32 %v1982_v47, 16  ;;  %v1398_v12 = vrot.slane %v1396_v15, 5 }
  0x4a   : > { %2158 = vmatpush3.bf16.msra.mxu0 %v2543_v60  ;;  %2153 = vmatprep.mubr.msk.bf16.mxu0 %vm326_vm2, %v2266_v11  ;;  %v1415_v60 = vshrl.u32 %v1980_v41, 16  ;;  %v1420_v16 = vrot.slane %v1418_v56, 5  ;;  %v1432_v3 = vshll.u32 %v1982_v47, 16  ;;  %v1394_v32 = vrot.slane %v1393_v55, 4 }
  0x4b   : > { %2167 = vmatprep.subr.bf16.mxu0 %v2661_v38  ;;  %v1407_v11 = vor.u32 %v1406_v61, %v1403_v51  ;;  %v1424_v44 = vshll.u32 %v2681_v52, 16  ;;  %v1431_v18 = vrot.slane %v1429_v8, 4  ;;  %v1412_v21 = vrot.slane %v1410_v49, 5 }
  0x4c   : > { %v1417_v14 = vrot.slane %v1415_v60, 4  ;;  %v1434_v24 = vrot.slane %v1432_v3, 5  ;;  %v1438_v43 = vshll.u32 %v2690_v62, 16  ;;  %v1870_v22 = vcombine.low %v2656_v20, %v565_v54  ;;  %v1903_v20 = vld [vmem:[%s2336_s25 + $0x28] sm:$0xf] }
  0x4d   : > { %v1408_v50 = vrot.slane %v1407_v11, 4  ;;  %v1574_v2 = vrot.slane %v2596_v23, 5  ;;  %v1385_v63 = vsel %vm2368_vm3, %v1380_v4, %v1384_v39  ;;  %v1399_v29 = vsel %vm2368_vm3, %v1394_v32, %v1398_v12  ;;  %v2270_v3 = vld [vmem:[%s2336_s25 + $0x18] ss:$8 sps:$4 sm:$0xff]  }
  0x4e   : > { %v1421_v26 = vor.u32 %v1420_v16, %v1417_v14  ;;  %v1435_v6 = vor.u32 %v1434_v24, %v1431_v18  ;;  %v1440_v46 = vrot.slane %v1438_v43, 5  ;;  %v2003_v23 = vrot.slane %v1995_v19, 9  ;;  %v1907_v14 = vld [vmem:[%s2336_s25 + $0x38] sm:$0xf]  ;;  %v1909_v16 = vld [vmem:[%s2336_s25 + $0x40] sm:$0xf] }
  0x4f   : > { %2110 = vmatmul.mubr.msk.bf16.vlgmr.msra.gmra.mrb[0].mxu1 %vm326_vm2, %v1868_v7  ;;  %v1996_v7 = vld [vmem:[%s2336_s25 + $0x18] sm:$0xe]  ;;  %v1413_v33 = vsel %vm2368_vm3, %v1408_v50, %v1412_v21  ;;  %v1578_v57 = vrot.slane %v2605_v36, 5  ;;  %v871_v15 = vshll.u32 %v1903_v20, 16  ;;  %v882_v47 = vshrl.u32 %v1905_v31, 16 }
  0x50   : > { %2118 = vmatpush3.bf16.msra.mxu1 %v2580_v35  ;;  %2113 = vmatprep.mubr.msk.bf16.mxu1 %vm326_vm2, %v1869_v30  ;;  %v1371_v35 = vsel %vm2368_vm3, %v1366_v9, %v2663_v17  ;;  %v1426_v30 = vrot.slane %v1424_v44, 5  ;;  %v1422_v41 = vrot.slane %v1421_v26, 4  ;;  %v1436_v17 = vrot.slane %v1435_v6, 4  ;;  %v1997_v36 = vld [vmem:[%s2336_s25 + $0x20] sm:$0xe] }
  0x51   : > { %2154 = vmatmul.mubr.msk.bf16.gmra.mrb[4].mxu0 %vm326_vm2, %v2267_v58  ;;  %2177 = vmatprep.subr.bf16.mxu1 %v2315_v1  ;;  %v2004_v42 = vrot.slane %v1996_v7, 9  ;;  %v868_v9 = vshrl.u32 %v1903_v20, 16  ;;  %v1987_v45 = vcombine.low %v1371_v35, %v1385_v63  ;;  %v1988_v39 = vcombine.low %v1399_v29, %v1413_v33  ;;  %v2000_v50 = vld [vmem:[%s2336_s25 + $0x38] sm:$0xe]  ;;  %v2271_v26 = vld [vmem:[%s2336_s25 + $0x28] ss:$8 sps:$4 sm:$0xff]  }
  0x52   : > { %2159 = vmatprep.mubr.msk.bf16.mxu0 %vm326_vm2, %v1986_v59  ;;  %v885_v13 = vshll.u32 %v1905_v31, 16  ;;  %v1575_v49 = vsel %vm2478_vm6, %v2003_v23, %v1574_v2  ;;  %v873_v58 = vrot.slane %v871_v15, 5  ;;  %v884_v54 = vrot.slane %v882_v47, 4  ;;  %v1998_v59 = vld [vmem:[%s2336_s25 + $0x28] sm:$0xe] }
  0x53   : > { %v870_v51 = vrot.slane %v868_v9, 4  ;;  %v1427_v55 = vsel %vm2368_vm3, %v1422_v41, %v1426_v30  ;;  %v1441_v60 = vsel %vm2368_vm3, %v1436_v17, %v1440_v46  ;;  %v1579_v56 = vsel %vm2478_vm6, %v2004_v42, %v1578_v57  ;;  %v2001_v41 = vld [vmem:[%s2336_s25 + $0x40] sm:$0xe]  ;;  %v2002_v17 = vld [vmem:[%s2336_s25 + $0x48] sm:$0xe] }
  0x54   : > { %v887_v4 = vrot.slane %v885_v13, 5  ;;  %v877_v8 = vshll.u32 %v2490_v10, 16  ;;  %v891_v12 = vshll.u32 %v2500_v25, 16  ;;  %v2005_v32 = vrot.slane %v1997_v36, 9  ;;  %v1999_v10 = vld [vmem:[%s2336_s25 + $0x30] sm:$0xe] }
  0x55   : > { %v874_v61 = vor.u32 %v873_v58, %v870_v51  ;;  %v1582_v11 = vrot.slane %v2626_v53, 5  ;;  %v1989_v18 = vcombine.low %v1427_v55, %v1441_v60  ;;  %v2013_v21 = vcombine.low %v1575_v49, %v1579_v56 }
  0x56   : > { %v888_v44 = vor.u32 %v887_v4, %v884_v54  ;;  %v2006_v24 = vrot.slane %v1998_v59, 9  ;;  %v1586_v43 = vrot.slane %v2637_v5, 5  ;;  %v896_v25 = vshrl.u32 %v1907_v14, 16 }
  0x57   : > { %2114 = vmatmul.mubr.msk.bf16.gmra.mrb[4].mxu1 %vm326_vm2, %v1870_v22  ;;  %v899_v19 = vshll.u32 %v1907_v14, 16  ;;  %v910_v22 = vshrl.u32 %v1909_v16, 16  ;;  %v913_v6 = vshll.u32 %v1909_v16, 16  ;;  %v879_v7 = vrot.slane %v877_v8, 5 }
  0x58   : > { %2119 = vmatprep.mubr.msk.bf16.mxu1 %vm326_vm2, %v2269_v0  ;;  %v889_v2 = vrot.slane %v888_v44, 4  ;;  %v893_v35 = vrot.slane %v891_v12, 5  ;;  %v2007_v63 = vrot.slane %v1999_v10, 9  ;;  %v1590_v53 = vrot.slane %v2648_v40, 5  ;;  %v2272_v0 = vld [vmem:[%s2336_s25 + $0x38] ss:$8 sps:$4 sm:$0xff]  }
  0x59   : > { %2160 = vmatmul.mubr.msk.bf16.vlgmr.msra.gmra.mrb[0].mxu0 %vm326_vm2, %v1987_v45  ;;  %v2008_v29 = vrot.slane %v2000_v50, 9  ;;  %v1594_v30 = vrot.slane %v2666_v37, 5  ;;  %v898_v5 = vrot.slane %v896_v25, 4  ;;  %v901_v20 = vrot.slane %v899_v19, 5 }
  0x5a   : > { %2168 = vmatpush3.bf16.msra.mxu0 %v2661_v38  ;;  %2163 = vmatprep.mubr.msk.bf16.mxu0 %vm326_vm2, %v1988_v39  ;;  %v875_v38 = vrot.slane %v874_v61, 4  ;;  %v912_v31 = vrot.slane %v910_v22, 4  ;;  %v915_v33 = vrot.slane %v913_v6, 5  ;;  %v905_v46 = vshll.u32 %v2508_v27, 16 }
  0x5b   : > { %v894_v37 = vsel %vm2368_vm3, %v889_v2, %v893_v35  ;;  %v1587_v23 = vsel %vm2478_vm6, %v2006_v24, %v1586_v43  ;;  %v1591_v57 = vsel %vm2478_vm6, %v2007_v63, %v1590_v53  ;;  %v1595_v27 = vsel %vm2478_vm6, %v2008_v29, %v1594_v30 }
  0x5c   : > { %v880_v40 = vsel %vm2368_vm3, %v875_v38, %v879_v7  ;;  %v919_v42 = vshll.u32 %v2518_v34, 16  ;;  %v902_v45 = vor.u32 %v901_v20, %v898_v5  ;;  %v916_v15 = vor.u32 %v915_v33, %v912_v31 }
  0x5d   : > { %v1915_v9 = vcombine.low %v880_v40, %v894_v37  ;;  %v2015_v39 = vcombine.low %v1591_v57, %v1595_v27  ;;  %v2009_v51 = vrot.slane %v2001_v41, 9  ;;  %v1598_v13 = vrot.slane %v2681_v52, 5 }
  0x5e   : > { %v2010_v49 = vrot.slane %v2002_v17, 9  ;;  %v1602_v36 = vrot.slane %v2690_v62, 5  ;;  %v907_v58 = vrot.slane %v905_v46, 5  ;;  %v921_v54 = vrot.slane %v919_v42, 5 }
  0x5f   : > { %2120 = vmatmul.mubr.msk.bf16.vlgmr.msra.gmra.mrb[0].mxu1 %vm326_vm2, %v2270_v3  ;;  %v903_v55 = vrot.slane %v902_v45, 4  ;;  %v917_v60 = vrot.slane %v916_v15, 4  ;;  %v1599_v34 = vsel %vm2478_vm6, %v2009_v51, %v1598_v13 }
  0x60   : > { %2178 = vmatpush3.bf16.msra.mxu1 %v2315_v1  ;;  %2123 = vmatprep.mubr.msk.bf16.mxu1 %vm326_vm2, %v2271_v26  ;;  %v1583_v1 = vsel %vm2478_vm6, %v2005_v32, %v1582_v11  ;;  %v1603_v52 = vsel %vm2478_vm6, %v2010_v49, %v1602_v36 }
  0x61   : > { %2164 = vmatmul.mubr.msk.bf16.gmra.mrb[4].mxu0 %vm326_vm2, %v1989_v18  ;;  %v2014_v47 = vcombine.low %v1583_v1, %v1587_v23  ;;  %v908_v62 = vsel %vm2368_vm3, %v903_v55, %v907_v58  ;;  %v922_v56 = vsel %vm2368_vm3, %v917_v60, %v921_v54  ;;  %v2016_v59 = vcombine.low %v1599_v34, %v1603_v52 }
  0x62   : > { %2169 = vmatprep.mubr.msk.bf16.mxu0 %vm326_vm2, %v2013_v21  ;;  %v1916_v4 = vcombine.low %v908_v62, %v922_v56 }
  0x67   : > { %2124 = vmatmul.mubr.msk.bf16.gmra.mrb[4].mxu1 %vm326_vm2, %v2272_v0 }
  0x68   : > { %2133 = vmatprep.mubr.msk.bf16.mxu1 %vm326_vm2, %v1915_v9 }
  0x69   : > { %2170 = vmatmul.mubr.msk.bf16.vlgmr.msra.gmra.mrb[0].mxu0 %vm326_vm2, %v2014_v47 }
  0x6a   : > { %2173 = vmatprep.mubr.msk.bf16.mxu0 %vm326_vm2, %v2015_v39 }
  0x71   : > { %2174 = vmatmul.mubr.msk.bf16.gmra.mrb[4].mxu0 %vm326_vm2, %v2016_v59 }
  0x73   : > { %2134 = vmatmul.mubr.msk.bf16.vlgmr.msra.gmra.mrb[4].mxu1 %vm326_vm2, %v1916_v4 }
 0x132   : > { %v2121_v61 = vpop.f32.mrb[0].mxu1 }
 0x133   : > { %v756_v8 = vpop.f32.mrb[1].mxu1 }
 0x134   : > { %v2122_v12 = vpop.f32.mrb[2].mxu1 }
 0x135   : > { %v759_v14 = vpop.f32.mrb[3].mxu1 }
 0x13c   : > { %v2171_v16 = vpop.f32.mrb[0].mxu0 }
 0x13d   : > { %v2179_v3 = vadd.f32 %v2171_v16, %v2121_v61  ;;  %v1671_v32 = vpop.f32.mrb[1].mxu0 }
 0x13e   : > { %v2180_v28 = vadd.f32 %v1671_v32, %v756_v8  ;;  %v2172_v11 = vpop.f32.mrb[2].mxu0 }
 0x13f   : > { %v1719_v44 = vadd.f32 %v2179_v3, %v2022_v48  ;;  %v2181_v18 = vadd.f32 %v2172_v11, %v2122_v12  ;;  %v1674_v21 = vpop.f32.mrb[3].mxu0 }
 0x140   : > { %v1717_v24 = vadd.f32 %v2180_v28, %v2022_v48  ;;  %v2182_v43 = vadd.f32 %v1674_v21, %v759_v14 }
 0x141   : > { %v1727_v10 = vmax.f32 %v1719_v44, 0.0  ;;  %v1720_v50 = vadd.f32 %v2181_v18, %v2022_v48 }
 0x142   : > { %v1725_v26 = vmax.f32 %v1717_v24, 0.0  ;;  %v1718_v25 = vadd.f32 %v2182_v43, %v2022_v48 }
 0x143   : > { %v2036_v19 = vpack.c.bf16 %v1727_v10, %v1727_v10  ;;  %v1728_v22 = vmax.f32 %v1720_v50, 0.0 }
 0x144   : > { %v2034_v6 = vpack.c.bf16 %v1725_v26, %v1725_v26  ;;  %v1726_v38 = vmax.f32 %v1718_v25, 0.0  ;;  %v2175_v7 = vpop.f32.mrb[4].mxu0 }
 0x145   : > { %1768 = vst.msk [vmem:[%s2789_s16 + $0x8] sm:$0xf] %vm1765_vm7, %v2036_v19  ;;  %v2037_v2 = vpack.c.bf16 %v1728_v22, %v1728_v22  ;;  %v1687_v35 = vpop.f32.mrb[5].mxu0 }
 0x146   : > { %1766 = vst.msk [vmem:[%s2789_s16] sm:$0xf] %vm1765_vm7, %v2034_v6  ;;  %v2035_v63 = vpack.c.bf16 %v1726_v38, %v1726_v38  ;;  %v2135_v53 = vpop.f32.mrb[4].mxu1  ;;  %v2176_v29 = vpop.f32.mrb[6].mxu0 }
 0x147   : > { %1769 = vst.msk [vmem:[%s2789_s16 + $0xc] sm:$0xf] %vm1765_vm7, %v2037_v2  ;;  %v2183_v30 = vadd.f32 %v2175_v7, %v2135_v53  ;;  %v1006_v5 = vpop.f32.mrb[5].mxu1  ;;  %v1690_v20 = vpop.f32.mrb[7].mxu0 }
 0x148   : > { %1767 = vst.msk [vmem:[%s2789_s16 + $0x4] sm:$0xf] %vm1765_vm7, %v2035_v63  ;;  %v2184_v31 = vadd.f32 %v1687_v35, %v1006_v5  ;;  %v2136_v33 = vpop.f32.mrb[6].mxu1 }
 0x149   : > { %v1723_v46 = vadd.f32 %v2183_v30, %v2022_v48  ;;  %v2185_v40 = vadd.f32 %v2176_v29, %v2136_v33  ;;  %v1009_v37 = vpop.f32.mrb[7].mxu1 }
 0x14a   : > { %v1721_v1 = vadd.f32 %v2184_v31, %v2022_v48  ;;  %v2186_v23 = vadd.f32 %v1690_v20, %v1009_v37 }
 0x14b   : > { %v1731_v57 = vmax.f32 %v1723_v46, 0.0  ;;  %v1724_v27 = vadd.f32 %v2185_v40, %v2022_v48 }
 0x14c   : > { %v1729_v0 = vmax.f32 %v1721_v1, 0.0  ;;  %v1722_v41 = vadd.f32 %v2186_v23, %v2022_v48 }
 0x14d   : > { %v2040_v17 = vpack.c.bf16 %v1731_v57, %v1731_v57  ;;  %v1732_v42 = vmax.f32 %v1724_v27, 0.0 }
 0x14e   : > { %v2038_v9 = vpack.c.bf16 %v1729_v0, %v1729_v0  ;;  %v1730_v45 = vmax.f32 %v1722_v41, 0.0 }
 0x14f   : > { %1772 = vst.msk [vmem:[%s2789_s16 + $0x18] sm:$0xf] %vm1765_vm7, %v2040_v17  ;;  %v2041_v15 = vpack.c.bf16 %v1732_v42, %v1732_v42 }
 0x150   : > { %1770 = vst.msk [vmem:[%s2789_s16 + $0x10] sm:$0xf] %vm1765_vm7, %v2038_v9  ;;  %v2039_v47 = vpack.c.bf16 %v1730_v45, %v1730_v45 }
 0x151   : > { %1773 = vst.msk [vmem:[%s2789_s16 + $0x1c] sm:$0xf] %vm1765_vm7, %v2041_v15 }
 0x152   : > { %1771 = vst.msk [vmem:[%s2789_s16 + $0x14] sm:$0xf] %vm1765_vm7, %v2039_v47 }
 0x153 PF: > { %s13_s12 = sadd.s32 1, %s2279_s12  }
 0x154   : > { %p10_p4 = scmp.ge.s32.totalorder %s13_s12, 4  }
 0x156   :  { %12 = sbr.rel (!%p10_p4) target bundleno = 1 (0x1), region = 72 }

// kernel: duat_forward.36
= control target key start
LH: loop header
LB: loop body
LE: loop exit
PB: predicated region body
PF: predicated region fallthrough
CT: control target
= control target key end

     0   :  { %s2436_s12 = smov 0   ;;  %s2963_s0 = inlined_call_operand.vmem [shape: bf16[2,10,10,32], index: 0, kind: input, shape index: {}]   ;;  %s2964_s1 = inlined_call_operand.vmem [shape: bf16[9,32,32], index: 1, kind: input, shape index: {}]   ;;  %s2965_s2 = inlined_call_operand.vmem [shape: f32[1,32], index: 2, kind: input, shape index: {}]   ;;  %s2966_s3 = inlined_call_operand.vmem [shape: bf16[2,64,32], index: 3, kind: output, shape index: {}]  }
   0x1 LB: > { %s1901_s13 = sadd.s32 4294967295, %s2414_s12   ;;  %p1905_p0 = scmp.ge.s32.totalorder %s2414_s12, 1  ;;  %s2414_s12 = sphi %s2436_s12, %s13_s12  }
   0x2   : > { %p137_p1 = scmp.lt.s32.totalorder %s2414_s12, 3 }
   0x4   : > { %p138_p2 = pnand %p1905_p0, %p137_p1 }
   0x5   : > { %v2378_v0 = vld [vmem:[%s2964_s1 + $0x10] sm:$0xff] (!%p138_p2)   ;;  %p161_p3 = scmp.lt.s32.totalorder (!%p138_p2), %s1901_s13, 1  ;;  %v2450_v1 = vld [vmem:[%s2964_s1 + $0x40] sm:$0xff] (!%p138_p2)   ;;  %v2380_v2 = vld [vmem:[%s2964_s1 + $0x18] sm:$0xff] (!%p138_p2)   ;;  %vm192_vm0 = vsmask.f32 (!%p138_p2), 3328 }
   0x6   : > { %141 = sbr.rel (%p138_p2) target bundleno = 338 (0x152), region = 32  ;;  %2193 = vmatprep.subr.bf16.mxu1 (!%p138_p2), %v2378_v0  ;;  %2241 = vmatprep.subr.bf16.mxu0 (!%p138_p2), %v2450_v1  ;;  %v2461_v3 = vld [vmem:[%s2964_s1 + $0x48] sm:$0xff] (!%p138_p2)   ;;  %v2468_v4 = vld [vmem:[%s2964_s1] sm:$0xff] (!%p138_p2)   ;;  %v2479_v5 = vld [vmem:[%s2964_s1 + $0x50] sm:$0xff] (!%p138_p2)   ;;  %vm193_vm1 = vsmask.f32 (!%p138_p2), 7440 }
   0x7   : > { %2194 = vmatpush3.bf16.msra.mxu1 (!%p138_p2), %v2378_v0  ;;  %2242 = vmatpush3.bf16.msra.mxu0 (!%p138_p2), %v2450_v1  ;;  %vm2513_vm2 = vmor (!%p138_p2), %vm192_vm0, %vm193_vm1  ;;  %vm336_vm3 = vcmask (!%p138_p2), 261120   ;;  %vm547_vm4 = vcmask (!%p138_p2), 1042432   ;;  %vm548_vm5 = vcmask (!%p138_p2), 1046532   ;;  %vm1837_vm7 = vcmask (!%p138_p2), 257024  }
   0x8   : > { %2195 = vmatprep.subr.bf16.mxu1 (!%p138_p2), %v2380_v2  ;;  %2243 = vmatprep.subr.bf16.mxu0 (!%p138_p2), %v2461_v3  ;;  %vm2620_vm6 = vmor (!%p138_p2), %vm547_vm4, %vm548_vm5 }
   0xb   : > { %2196 = vmatpush3.bf16.msra.mxu1 (!%p138_p2), %v2380_v2  ;;  %2244 = vmatpush3.bf16.msra.mxu0 (!%p138_p2), %v2461_v3 }
   0xc   : > { %2205 = vmatprep.subr.bf16.mxu1 (!%p138_p2), %v2468_v4  ;;  %2253 = vmatprep.subr.bf16.mxu0 (!%p138_p2), %v2479_v5 }
   0xd   : > { %s2972_s13 = smov (!%p161_p3, %s1901_s13), 1 }
   0xe   : > { %s2369_s22 = smul.u32 80, %s2972_s13  ;;  %s2130_s4 = sshll.u32 %s2972_s13, 5 }
   0xf   : > { %s2942_s7 = scalar_lea.vmem %s2966_s3, %s2130_s4 }
  0x10   : > { %s2474_s27 = scalar_lea.vmem %s2963_s0, %s2369_s22 }
  0x11   : > { %v2482_v6 = vld [vmem:[%s2474_s27] sm:$0xf]  ;;  %v2485_v7 = vld [vmem:[%s2474_s27 + $0x8] sm:$0xf]  ;;  %v2488_v8 = vld [vmem:[%s2474_s27 + $0x4] sm:$0x1] }
  0x12   : > { %v2492_v9 = vld [vmem:[%s2474_s27 + $0xc] sm:$0x1]  ;;  %v196_v10 = vshrl.u32 %v2482_v6, 16  ;;  %v199_v11 = vshll.u32 %v2482_v6, 16  ;;  %v205_v12 = vshll.u32 %v2488_v8, 16  ;;  %v210_v13 = vshrl.u32 %v2485_v7, 16 }
  0x13   : > { %v213_v14 = vshll.u32 %v2485_v7, 16  ;;  %v219_v15 = vshll.u32 %v2492_v9, 16  ;;  %v1977_v16 = vld [vmem:[%s2474_s27 + $0x8] sm:$0xf]  ;;  %v2504_v21 = vld [vmem:[%s2474_s27 + $0xc] sm:$0x1] }
  0x14   : > { %v198_v17 = vrot.slane %v196_v10, 4  ;;  %v201_v18 = vrot.slane %v199_v11, 5  ;;  %v207_v19 = vrot.slane %v205_v12, 5  ;;  %v212_v20 = vrot.slane %v210_v13, 4  ;;  %v1979_v24 = vld [vmem:[%s2474_s27 + $0x10] sm:$0xf] }
  0x15   : > { %v215_v22 = vrot.slane %v213_v14, 5  ;;  %v221_v23 = vrot.slane %v219_v15, 5  ;;  %v2508_v25 = vld [vmem:[%s2474_s27 + $0x14] sm:$0x1]  ;;  %v844_v27 = vshrl.u32 %v1977_v16, 16  ;;  %v847_v28 = vshll.u32 %v1977_v16, 16 }
  0x16   : > { %v202_v26 = vor.u32 %v201_v18, %v198_v17  ;;  %v853_v29 = vshll.u32 %v2504_v21, 16  ;;  %v858_v32 = vshrl.u32 %v1979_v24, 16  ;;  %v861_v33 = vshll.u32 %v1979_v24, 16  ;;  %v2519_v35 = vld [vmem:[%s2474_s27 + $0x10] sm:$0xf] }
  0x17   : > { %v216_v31 = vor.u32 %v215_v22, %v212_v20  ;;  %v867_v34 = vshll.u32 %v2508_v25, 16  ;;  %v846_v37 = vrot.slane %v844_v27, 4  ;;  %v849_v38 = vrot.slane %v847_v28, 5  ;;  %v2522_v39 = vld [vmem:[%s2474_s27 + $0x18] sm:$0xf] }
  0x18   : > { %v203_v36 = vrot.slane %v202_v26, 4  ;;  %v860_v41 = vrot.slane %v858_v32, 4  ;;  %v863_v42 = vrot.slane %v861_v33, 5  ;;  %v2525_v43 = vld [vmem:[%s2474_s27 + $0x14] sm:$0x1]  ;;  %v855_v46 = vrot.slane %v853_v29, 5 }
  0x19   : > { %v217_v40 = vrot.slane %v216_v31, 4  ;;  %v850_v45 = vor.u32 %v849_v38, %v846_v37  ;;  %v869_v47 = vrot.slane %v867_v34, 5  ;;  %v2532_v50 = vld [vmem:[%s2474_s27 + $0x1c] sm:$0x1]  ;;  %v224_v51 = vshrl.u32 %v2519_v35, 16 }
  0x1a   : > { %v208_v44 = vsel %vm2513_vm2, %v203_v36, %v207_v19  ;;  %v864_v49 = vor.u32 %v863_v42, %v860_v41  ;;  %v227_v52 = vshll.u32 %v2519_v35, 16  ;;  %v1981_v53 = vld [vmem:[%s2474_s27 + $0x18] sm:$0xf]  ;;  %v233_v56 = vshll.u32 %v2525_v43, 16  ;;  %v2546_v10 = vld [vmem:[%s2474_s27 + $0x1c] sm:$0x1] }
  0x1b   : > { %v222_v48 = vsel %vm2513_vm2, %v217_v40, %v221_v23  ;;  %v851_v55 = vrot.slane %v850_v45, 4  ;;  %v238_v57 = vshrl.u32 %v2522_v39, 16  ;;  %v226_v59 = vrot.slane %v224_v51, 4  ;;  %v1983_v15 = vld [vmem:[%s2474_s27 + $0x20] sm:$0xf] }
  0x1c   : > { %v1913_v54 = vcombine.low %v208_v44, %v222_v48  ;;  %v865_v58 = vrot.slane %v864_v49, 4  ;;  %v229_v60 = vrot.slane %v227_v52, 5  ;;  %v241_v61 = vshll.u32 %v2522_v39, 16  ;;  %v2552_v16 = vld [vmem:[%s2474_s27 + $0x24] sm:$0x1]  ;;  %v2385_v52 = vld [vmem:[%s2964_s1 + $0x8] sm:$0xff]  }
  0x1d   : > { %v856_v62 = vsel %vm2513_vm2, %v851_v55, %v855_v46  ;;  %v1095_v63 = vrot.slane %v2504_v21, 5  ;;  %v240_v0 = vrot.slane %v238_v57, 4  ;;  %v247_v2 = vshll.u32 %v2532_v50, 16  ;;  %v2556_v22 = vld [vmem:[%s2474_s27 + $0x20] sm:$0xf] }
  0x1e   : > { %2197 = vmatprep.mubr.msk.bf16.mxu1 %vm336_vm3, %v1913_v54  ;;  %v870_v11 = vsel %vm2513_vm2, %v865_v58, %v869_v47  ;;  %v230_v12 = vor.u32 %v229_v60, %v226_v59  ;;  %v235_v13 = vrot.slane %v233_v56, 5  ;;  %v243_v14 = vrot.slane %v241_v61, 5  ;;  %v2564_v38 = vld [vmem:[%s2474_s27 + $0x24] sm:$0x1]  ;;  %v2568_v45 = vld [vmem:[%s2474_s27 + $0x28] sm:$0xf] }
  0x1f   : > { %v1997_v17 = vcombine.low %v856_v62, %v870_v11  ;;  %v1099_v18 = vrot.slane %v2508_v25, 5  ;;  %v249_v19 = vrot.slane %v247_v2, 5  ;;  %v872_v20 = vshrl.u32 %v1981_v53, 16  ;;  %v2574_v49 = vld [vmem:[%s2474_s27 + $0x2c] sm:$0x1] }
  0x20   : > { %v231_v23 = vrot.slane %v230_v12, 4  ;;  %v244_v24 = vor.u32 %v243_v14, %v240_v0  ;;  %v875_v26 = vshll.u32 %v1981_v53, 16  ;;  %v881_v27 = vshll.u32 %v2546_v10, 16  ;;  %v2583_v57 = vld [vmem:[%s2474_s27 + $0x30] sm:$0xf] }
  0x21   : > { %2245 = vmatprep.mubr.msk.bf16.mxu0 %vm336_vm3, %v1997_v17  ;;  %v874_v28 = vrot.slane %v872_v20, 4  ;;  %v886_v29 = vshrl.u32 %v1983_v15, 16  ;;  %v889_v31 = vshll.u32 %v1983_v15, 16  ;;  %v895_v32 = vshll.u32 %v2552_v16, 16  ;;  %v2586_v58 = vld [vmem:[%s2474_s27 + $0x34] sm:$0x1] }
  0x22   : > { %v236_v33 = vsel %vm2513_vm2, %v231_v23, %v235_v13  ;;  %v245_v34 = vrot.slane %v244_v24, 4  ;;  %v877_v36 = vrot.slane %v875_v26, 5  ;;  %v883_v37 = vrot.slane %v881_v27, 5  ;;  %v2591_v0 = vld [vmem:[%s2474_s27 + $0x38] sm:$0xf]  ;;  %v2608_v24 = vld [vmem:[%s2964_s1 + $0x20] sm:$0xff]  }
  0x23   : > { %v888_v40 = vrot.slane %v886_v29, 4  ;;  %v891_v41 = vrot.slane %v889_v31, 5  ;;  %v897_v42 = vrot.slane %v895_v32, 5  ;;  %v1103_v44 = vrot.slane %v2546_v10, 5  ;;  %v2384_v15 = vld [vmem:[%s2964_s1 + $0x58] sm:$0xff]  }
  0x24   : > { %v250_v46 = vsel %vm2513_vm2, %v245_v34, %v249_v19  ;;  %v878_v47 = vor.u32 %v877_v36, %v874_v28  ;;  %v1107_v48 = vrot.slane %v2552_v16, 5  ;;  %v252_v51 = vshrl.u32 %v2556_v22, 16  ;;  %v2602_v20 = vld [vmem:[%s2474_s27 + $0x3c] sm:$0x1]  ;;  %v2007_v29 = vld [vmem:[%s2474_s27 + $0x8] sm:$0xe] }
  0x25   : > { %v1914_v53 = vcombine.low %v236_v33, %v250_v46  ;;  %v892_v54 = vor.u32 %v891_v41, %v888_v40  ;;  %v255_v55 = vshll.u32 %v2556_v22, 16  ;;  %v261_v56 = vshll.u32 %v2564_v38, 16  ;;  %v2008_v36 = vld [vmem:[%s2474_s27 + $0x10] sm:$0xe]  ;;  %v2014_v16 = vld [vmem:[%s2474_s27 + $0x40] sm:$0xe] }
  0x26   : > { %v879_v59 = vrot.slane %v878_v47, 4  ;;  %v254_v60 = vrot.slane %v252_v51, 4  ;;  %v266_v61 = vshrl.u32 %v2568_v45, 16  ;;  %v269_v62 = vshll.u32 %v2568_v45, 16  ;;  %v2009_v47 = vld [vmem:[%s2474_s27 + $0x18] sm:$0xe] }
  0x27   : > { %2198 = vmatmul.mubr.msk.bf16.vlgmr.msra.gmra.mrb[0].mxu1 %vm336_vm3, %v1914_v53  ;;  %v893_v2 = vrot.slane %v892_v54, 4  ;;  %v257_v11 = vrot.slane %v255_v55, 5  ;;  %v263_v12 = vrot.slane %v261_v56, 5  ;;  %v275_v13 = vshll.u32 %v2574_v49, 16  ;;  %v2386_v56 = vld [vmem:[%s2964_s1 + $0x60] sm:$0xff]  }
  0x28   : > { %2206 = vmatpush3.bf16.msra.mxu1 %v2468_v4  ;;  %v884_v14 = vsel %vm2513_vm2, %v879_v59, %v883_v37  ;;  %v268_v17 = vrot.slane %v266_v61, 4  ;;  %v271_v19 = vrot.slane %v269_v62, 5  ;;  %v280_v23 = vshrl.u32 %v2583_v57, 16  ;;  %v2010_v59 = vld [vmem:[%s2474_s27 + $0x20] sm:$0xe] }
  0x29   : > { %v898_v4 = vsel %vm2513_vm2, %v893_v2, %v897_v42  ;;  %v258_v26 = vor.u32 %v257_v11, %v254_v60  ;;  %v277_v27 = vrot.slane %v275_v13, 5  ;;  %2207 = vmatprep.subr.bf16.mxu1 %v2385_v52  ;;  %v283_v28 = vshll.u32 %v2583_v57, 16  ;;  %v2119_v46 = vld [vmem:[%s2965_s2] ss:$0 sm:$0xff] }
  0x2a   : > { %v1998_v31 = vcombine.low %v884_v14, %v898_v4  ;;  %v272_v32 = vor.u32 %v271_v19, %v268_v17  ;;  %v282_v33 = vrot.slane %v280_v23, 4  ;;  %v289_v34 = vshll.u32 %v2586_v58, 16  ;;  %v2643_v14 = vld [vmem:[%s2474_s27 + $0x2c] sm:$0x1] }
  0x2b   : > { %v259_v37 = vrot.slane %v258_v26, 4  ;;  %v285_v40 = vrot.slane %v283_v28, 5  ;;  %v294_v41 = vshrl.u32 %v2591_v0, 16  ;;  %v297_v42 = vshll.u32 %v2591_v0, 16  ;;  %v2646_v26 = vld [vmem:[%s2474_s27 + $0x34] sm:$0x1] }
  0x2c   : > { %2246 = vmatmul.mubr.msk.bf16.vlgmr.msra.gmra.mrb[0].mxu0 %vm336_vm3, %v1998_v31  ;;  %v273_v51 = vrot.slane %v272_v32, 4  ;;  %v291_v53 = vrot.slane %v289_v34, 5  ;;  %v303_v54 = vshll.u32 %v2602_v20, 16  ;;  %2208 = vmatpush3.bf16.msra.mxu1 %v2385_v52  ;;  %v2015_v55 = vrot.slane %v2007_v29, 9  ;;  %v2011_v52 = vld [vmem:[%s2474_s27 + $0x28] sm:$0xe] }
  0x2d   : > { %2254 = vmatpush3.bf16.msra.mxu0 %v2479_v5  ;;  %v264_v60 = vsel %vm2513_vm2, %v259_v37, %v263_v12  ;;  %v286_v61 = vor.u32 %v285_v40, %v282_v33  ;;  %v296_v62 = vrot.slane %v294_v41, 4  ;;  %v299_v2 = vrot.slane %v297_v42, 5  ;;  %2217 = vmatprep.subr.bf16.mxu1 %v2608_v24  ;;  %v2012_v28 = vld [vmem:[%s2474_s27 + $0x30] sm:$0xe]  ;;  %v2654_v31 = vld [vmem:[%s2474_s27 + $0x3c] sm:$0x1] }
  0x2e   : > { %2255 = vmatprep.subr.bf16.mxu0 %v2384_v15  ;;  %v278_v11 = vsel %vm2513_vm2, %v273_v51, %v277_v27  ;;  %v305_v13 = vrot.slane %v303_v54, 5  ;;  %v1096_v5 = vsel %vm2620_vm6, %v2015_v55, %v1095_v63  ;;  %v2016_v12 = vrot.slane %v2008_v36, 9  ;;  %v2013_v63 = vld [vmem:[%s2474_s27 + $0x38] sm:$0xe] }
  0x2f   : > { %v1915_v17 = vcombine.low %v264_v60, %v278_v11  ;;  %v287_v19 = vrot.slane %v286_v61, 4  ;;  %v300_v23 = vor.u32 %v299_v2, %v296_v62  ;;  %v2017_v4 = vrot.slane %v2009_v47, 9  ;;  %v524_v60 = vld [vmem:[%s2474_s27 + $0x8] sm:$0xe] }
  0x30   : > { %v1100_v27 = vsel %vm2620_vm6, %v2016_v12, %v1099_v18  ;;  %v2018_v29 = vrot.slane %v2010_v59, 9  ;;  %v2019_v21 = vrot.slane %v2011_v52, 9  ;;  %v2020_v36 = vrot.slane %v2012_v28, 9  ;;  %v523_v59 = vld [vmem:[%s2474_s27] sm:$0xe] }
  0x31   : > { %2256 = vmatpush3.bf16.msra.mxu0 %v2384_v15  ;;  %2201 = vmatprep.mubr.msk.bf16.mxu1 %vm336_vm3, %v1915_v17  ;;  %v292_v32 = vsel %vm2513_vm2, %v287_v19, %v291_v53  ;;  %v301_v33 = vrot.slane %v300_v23, 4  ;;  %v2027_v34 = vcombine.low %v1096_v5, %v1100_v27  ;;  %v1104_v25 = vsel %vm2620_vm6, %v2017_v4, %v1103_v44  ;;  %v2676_v44 = vld [vmem:[%s2474_s27 + $0x44] sm:$0x1]  ;;  %v525_v12 = vld [vmem:[%s2474_s27 + $0x10] sm:$0xe] }
  0x32   : > { %2265 = vmatprep.subr.bf16.mxu0 %v2386_v56  ;;  %v1108_v18 = vsel %vm2620_vm6, %v2018_v29, %v1107_v48  ;;  %v1111_v15 = vrot.slane %v2643_v14, 5  ;;  %v1115_v37 = vrot.slane %v2646_v26, 5  ;;  %v1923_v10 = vcombine.low %v2482_v6, %v2485_v7  ;;  %v2390_v6 = vld [vmem:[%s2964_s1 + $0x68] sm:$0xff]   ;;  %v526_v17 = vld [vmem:[%s2474_s27 + $0x18] sm:$0xe] }
  0x33   : > { %v306_v40 = vsel %vm2513_vm2, %v301_v33, %v305_v13  ;;  %2257 = vmatprep.mubr.msk.bf16.mxu0 %vm336_vm3, %v2027_v34  ;;  %v2028_v48 = vcombine.low %v1104_v25, %v1108_v18  ;;  %v2021_v53 = vrot.slane %v2013_v63, 9  ;;  %v1119_v54 = vrot.slane %v2654_v31, 5  ;;  %v2394_v28 = vld [vmem:[%s2474_s27 + $0x10] ss:$8 sps:$4 sm:$0xff]   ;;  %v527_v29 = vld [vmem:[%s2474_s27 + $0x20] sm:$0xe] }
  0x34   : > { %v1916_v41 = vcombine.low %v292_v32, %v306_v40  ;;  %v1112_v42 = vsel %vm2620_vm6, %v2019_v21, %v1111_v15  ;;  %v1116_v47 = vsel %vm2620_vm6, %v2020_v36, %v1115_v37  ;;  %v2022_v7 = vrot.slane %v2014_v16, 9  ;;  %v528_v33 = vld [vmem:[%s2474_s27 + $0x28] sm:$0xe]  ;;  %v2738_v34 = vld [vmem:[%s2474_s27 + $0x30] sm:$0xe] }
  0x35   : > { %v2029_v51 = vcombine.low %v1112_v42, %v1116_v47  ;;  %v1123_v55 = vrot.slane %v2676_v44, 5  ;;  %v552_v61 = vrot.slane %v2488_v8, 5  ;;  %v556_v62 = vrot.slane %v2492_v9, 5  ;;  %v2705_v8 = vld [vmem:[%s2964_s1 + $0x70] sm:$0xff]   ;;  %v2061_v37 = vld [vmem:[%s2474_s27 + $0x18] sm:$0xf] }
  0x36   : > { %2202 = vmatmul.mubr.msk.bf16.gmra.mrb[4].mxu1 %vm336_vm3, %v1916_v41  ;;  %v560_v2 = vrot.slane %v2525_v43, 5  ;;  %v564_v52 = vrot.slane %v2532_v50, 5  ;;  %v1120_v11 = vsel %vm2620_vm6, %v2021_v53, %v1119_v54  ;;  %v1933_v9 = vrot.slane %v523_v59, 9  ;;  %v2059_v25 = vld [vmem:[%s2474_s27 + $0x10] sm:$0xf]  ;;  %v2399_v50 = vld [vmem:[%s2964_s1 + $0x78] sm:$0xff]  }
  0x37   : > { %2209 = vmatprep.mubr.msk.bf16.mxu1 %vm336_vm3, %v1923_v10  ;;  %v1124_v13 = vsel %vm2620_vm6, %v2022_v7, %v1123_v55  ;;  %v1934_v43 = vrot.slane %v524_v60, 9  ;;  %v1924_v5 = vcombine.low %v2519_v35, %v2522_v39  ;;  %v1925_v19 = vcombine.low %v2556_v22, %v2568_v45  ;;  %v2745_v36 = vld [vmem:[%s2474_s27 + $0x14] sm:$0x1]  ;;  %v2754_v16 = vld [vmem:[%s2474_s27 + $0x1c] sm:$0x1] }
  0x38   : > { %2258 = vmatmul.mubr.msk.bf16.vlgmr.msra.gmra.mrb[0].mxu0 %vm336_vm3, %v2028_v48  ;;  %v937_v23 = vshll.u32 %v2654_v31, 16  ;;  %v2030_v4 = vcombine.low %v1120_v11, %v1124_v13  ;;  %v568_v27 = vrot.slane %v2564_v38, 5  ;;  %v553_v35 = vsel %vm2620_vm6, %v1933_v9, %v552_v61  ;;  %v2730_v38 = vld [vmem:[%s2964_s1 + $0x30] sm:$0xff]   ;;  %v2063_v59 = vld [vmem:[%s2474_s27 + $0x20] sm:$0xf] }
  0x39   : > { %2266 = vmatpush3.bf16.msra.mxu0 %v2386_v56  ;;  %2261 = vmatprep.mubr.msk.bf16.mxu0 %vm336_vm3, %v2029_v51  ;;  %v2392_v56 = vld [vmem:[%s2964_s1 + $0x28] sm:$0xff]   ;;  %v1935_v39 = vrot.slane %v525_v12, 9  ;;  %v572_v21 = vrot.slane %v2574_v49, 5  ;;  %v557_v22 = vsel %vm2620_vm6, %v1934_v43, %v556_v62  ;;  %v1936_v45 = vrot.slane %v526_v17, 9  ;;  %v2398_v53 = vld [vmem:[%s2474_s27 + $0x30] ss:$8 sps:$4 sm:$0xff]  }
  0x3a   : > { %2267 = vmatprep.subr.bf16.mxu0 %v2390_v6  ;;  %v576_v63 = vrot.slane %v2586_v58, 5  ;;  %v580_v32 = vrot.slane %v2602_v20, 5  ;;  %v1926_v18 = vcombine.low %v2583_v57, %v2591_v0  ;;  %v1937_v15 = vrot.slane %v527_v29, 9  ;;  %v2396_v57 = vld [vmem:[%s2474_s27 + $0x20] ss:$8 sps:$4 sm:$0xff]  }
  0x3b   : > { %v1387_v40 = vshrl.u32 %v2059_v25, 16  ;;  %v2751_v10 = vsel %vm2620_vm6, %v1935_v39, %v560_v2  ;;  %v1390_v41 = vshll.u32 %v2059_v25, 16  ;;  %v1396_v48 = vshll.u32 %v2745_v36, 16  ;;  %v530_v62 = vld [vmem:[%s2474_s27 + $0x38] sm:$0xe] }
  0x3c   : > { %v1938_v0 = vrot.slane %v528_v33, 9  ;;  %v1401_v47 = vshrl.u32 %v2061_v37, 16  ;;  %v1404_v51 = vshll.u32 %v2061_v37, 16  ;;  %v1939_v54 = vrot.slane %v2738_v34, 9  ;;  %v2773_v13 = vld [vmem:[%s2474_s27 + $0x24] sm:$0x1] }
  0x3d   : > { %2268 = vmatpush3.bf16.msra.mxu0 %v2390_v6  ;;  %v1389_v42 = vrot.slane %v1387_v40, 4  ;;  %v1392_v6 = vrot.slane %v1390_v41, 5  ;;  %v1398_v7 = vrot.slane %v1396_v48, 5  ;;  %v1410_v55 = vshll.u32 %v2754_v16, 16  ;;  %v2065_v9 = vld [vmem:[%s2474_s27 + $0x28] sm:$0xf] }
  0x3e   : > { %2210 = vmatmul.mubr.msk.bf16.vlgmr.msra.gmra.mrb[0].mxu1 %vm336_vm3, %v1924_v5  ;;  %2277 = vmatprep.subr.bf16.mxu0 %v2705_v8  ;;  %v565_v60 = vsel %vm2620_vm6, %v1936_v45, %v564_v52  ;;  %v2769_v61 = vsel %vm2620_vm6, %v1937_v15, %v568_v27  ;;  %v1403_v2 = vrot.slane %v1401_v47, 4  ;;  %v1406_v11 = vrot.slane %v1404_v51, 5  ;;  %v2400_v49 = vld [vmem:[%s2474_s27 + $0x40] ss:$8 sps:$4 sm:$0xff]   ;;  %v2067_v48 = vld [vmem:[%s2474_s27 + $0x30] sm:$0xf] }
  0x3f   : > { %2218 = vmatpush3.bf16.msra.mxu1 %v2608_v24  ;;  %2213 = vmatprep.mubr.msk.bf16.mxu1 %vm336_vm3, %v1925_v19  ;;  %v1945_v24 = vcombine.low %v553_v35, %v557_v22  ;;  %v1393_v43 = vor.u32 %v1392_v6, %v1389_v42  ;;  %v1412_v5 = vrot.slane %v1410_v55, 5  ;;  %v1415_v12 = vshrl.u32 %v2063_v59, 16  ;;  %v2069_v51 = vld [vmem:[%s2474_s27 + $0x38] sm:$0xf] }
  0x40   : > { %2262 = vmatmul.mubr.msk.bf16.gmra.mrb[4].mxu0 %vm336_vm3, %v2030_v4  ;;  %2219 = vmatprep.subr.bf16.mxu1 %v2392_v56  ;;  %v1418_v17 = vshll.u32 %v2063_v59, 16  ;;  %v1407_v52 = vor.u32 %v1406_v11, %v1403_v2  ;;  %v1424_v19 = vshll.u32 %v2773_v13, 16  ;;  %v1429_v4 = vshrl.u32 %v2065_v9, 16 }
  0x41   : > { %2269 = vmatprep.mubr.msk.bf16.mxu0 %vm336_vm3, %v2394_v28  ;;  %v1432_v28 = vshll.u32 %v2065_v9, 16  ;;  %v1394_v27 = vrot.slane %v1393_v43, 4  ;;  %v1417_v35 = vrot.slane %v1415_v12, 4  ;;  %v573_v22 = vsel %vm2620_vm6, %v1938_v0, %v572_v21  ;;  %v2401_v21 = vld [vmem:[%s2964_s1 + $0x38] sm:$0xff]   ;;  %v2071_v43 = vld [vmem:[%s2474_s27 + $0x40] sm:$0xf] }
  0x42   : > { %v1420_v39 = vrot.slane %v1418_v17, 5  ;;  %v1408_v45 = vrot.slane %v1407_v52, 4  ;;  %v1431_v33 = vrot.slane %v1429_v4, 4  ;;  %v1946_v25 = vcombine.low %v2751_v10, %v565_v60  ;;  %v2841_v17 = vld [vmem:[%s2474_s27 + $0x44] sm:$0x1] }
  0x43   : > { %2220 = vmatpush3.bf16.msra.mxu1 %v2392_v56  ;;  %v2777_v56 = vld [vmem:[%s2474_s27 + $0x2c] sm:$0x1]  ;;  %v1434_v34 = vrot.slane %v1432_v28, 5  ;;  %v2794_v37 = vrot.slane %v1424_v19, 5  ;;  %v1399_v40 = vsel %vm2513_vm2, %v1394_v27, %v1398_v7  ;;  %v1947_v0 = vcombine.low %v2769_v61, %v573_v22 }
  0x44   : > { %2229 = vmatprep.subr.bf16.mxu1 %v2730_v38  ;;  %v1438_v29 = vshll.u32 %v2777_v56, 16  ;;  %v1421_v15 = vor.u32 %v1420_v39, %v1417_v35  ;;  %v2818_v42 = vsel %vm2620_vm6, %v1939_v54, %v576_v63  ;;  %v1443_v6 = vshrl.u32 %v2067_v48, 16 }
  0x45   : > { %v1435_v10 = vor.u32 %v1434_v34, %v1431_v33  ;;  %v1446_v55 = vshll.u32 %v2067_v48, 16  ;;  %v1457_v60 = vshrl.u32 %v2069_v51, 16  ;;  %v1460_v58 = vshll.u32 %v2069_v51, 16 }
  0x46   : > { %2214 = vmatmul.mubr.msk.bf16.gmra.mrb[4].mxu1 %vm336_vm3, %v1926_v18  ;;  %v1940_v18 = vrot.slane %v530_v62, 9  ;;  %v1440_v41 = vrot.slane %v1438_v29, 5  ;;  %v1422_v47 = vrot.slane %v1421_v15, 4  ;;  %v1445_v61 = vrot.slane %v1443_v6, 4  ;;  %v2405_v6 = vld [vmem:[%s2964_s1 + $0x88] sm:$0xff]  }
  0x47   : > { %2221 = vmatprep.mubr.msk.bf16.mxu1 %vm336_vm3, %v1945_v24  ;;  %v2807_v24 = vld [vmem:[%s2964_s1 + $0x80] sm:$0xff]   ;;  %v1436_v7 = vrot.slane %v1435_v10, 4  ;;  %v1448_v2 = vrot.slane %v1446_v55, 5  ;;  %v1459_v9 = vrot.slane %v1457_v60, 4  ;;  %v1462_v12 = vrot.slane %v1460_v58, 5 }
  0x48   : > { %2270 = vmatmul.mubr.msk.bf16.vlgmr.msra.gmra.mrb[0].mxu0 %vm336_vm3, %v2396_v57  ;;  %v2811_v57 = vld [vmem:[%s2474_s27 + $0x34] sm:$0x1]  ;;  %v581_v54 = vsel %vm2620_vm6, %v1940_v18, %v580_v32  ;;  %v1471_v19 = vshrl.u32 %v2071_v43, 16  ;;  %v1474_v4 = vshll.u32 %v2071_v43, 16  ;;  %v1480_v28 = vshll.u32 %v2841_v17, 16 }
  0x49   : > { %2278 = vmatpush3.bf16.msra.mxu0 %v2705_v8  ;;  %2273 = vmatprep.mubr.msk.bf16.mxu0 %vm336_vm3, %v2398_v53  ;;  %v1413_v8 = vsel %vm2513_vm2, %v1408_v45, %v1412_v5  ;;  %v2822_v53 = vld [vmem:[%s2474_s27 + $0x3c] sm:$0x1]  ;;  %v1452_v59 = vshll.u32 %v2811_v57, 16  ;;  %v1427_v5 = vsel %vm2513_vm2, %v1422_v47, %v2794_v37  ;;  %v1441_v20 = vsel %vm2513_vm2, %v1436_v7, %v1440_v41  ;;  %v2090_v47 = vld [vmem:[%s2474_s27 + $0x18] sm:$0xe] }
  0x4a   : > { %2279 = vmatprep.subr.bf16.mxu0 %v2399_v50  ;;  %v2079_v62 = vcombine.low %v1399_v40, %v1413_v8  ;;  %v1466_v63 = vshll.u32 %v2822_v53, 16  ;;  %v1449_v52 = vor.u32 %v1448_v2, %v1445_v61  ;;  %v1463_v27 = vor.u32 %v1462_v12, %v1459_v9  ;;  %v2091_v60 = vld [vmem:[%s2474_s27 + $0x20] sm:$0xe]  ;;  %v2092_v61 = vld [vmem:[%s2474_s27 + $0x28] sm:$0xe] }
  0x4b   : > { %v1454_v11 = vrot.slane %v1452_v59, 5  ;;  %v1948_v22 = vcombine.low %v2818_v42, %v581_v54  ;;  %v1473_v33 = vrot.slane %v1471_v19, 4  ;;  %v1476_v34 = vrot.slane %v1474_v4, 5  ;;  %v2089_v42 = vld [vmem:[%s2474_s27 + $0x10] sm:$0xe] }
  0x4c   : > { %v1468_v32 = vrot.slane %v1466_v63, 5  ;;  %v1450_v45 = vrot.slane %v1449_v52, 4  ;;  %v1464_v18 = vrot.slane %v1463_v27, 4  ;;  %v2080_v40 = vcombine.low %v1427_v5, %v1441_v20  ;;  %v2404_v54 = vld [vmem:[%s2474_s27 + $0x18] ss:$8 sps:$4 sm:$0xff]  }
  0x4d   : > { %2280 = vmatpush3.bf16.msra.mxu0 %v2399_v50  ;;  %v2073_v50 = vld [vmem:[%s2474_s27 + $0x48] sm:$0xf]  ;;  %v1477_v10 = vor.u32 %v1476_v34, %v1473_v33  ;;  %v1482_v41 = vrot.slane %v1480_v28, 5  ;;  %v2097_v55 = vrot.slane %v2089_v42, 9  ;;  %v2098_v59 = vrot.slane %v2090_v47, 9 }
  0x4e   : > { %2222 = vmatmul.mubr.msk.bf16.vlgmr.msra.gmra.mrb[0].mxu1 %vm336_vm3, %v1946_v25  ;;  %2289 = vmatprep.subr.bf16.mxu0 %v2807_v24  ;;  %v1485_v35 = vshrl.u32 %v2073_v50, 16  ;;  %v1488_v39 = vshll.u32 %v2073_v50, 16  ;;  %v2403_v25 = vld [vmem:[%s2474_s27 + $0x8] ss:$8 sps:$4 sm:$0xff]   ;;  %v1455_v8 = vsel %vm2513_vm2, %v1450_v45, %v1454_v11  ;;  %v1469_v48 = vsel %vm2513_vm2, %v1464_v18, %v1468_v32  ;;  %v2094_v50 = vld [vmem:[%s2474_s27 + $0x38] sm:$0xe] }
  0x4f   : > { %2230 = vmatpush3.bf16.msra.mxu1 %v2730_v38  ;;  %2225 = vmatprep.mubr.msk.bf16.mxu1 %vm336_vm3, %v1947_v0  ;;  %v2846_v38 = vld [vmem:[%s2474_s27 + $0x4c] sm:$0x1]  ;;  %v2081_v51 = vcombine.low %v1455_v8, %v1469_v48  ;;  %v1478_v7 = vrot.slane %v1477_v10, 4  ;;  %v909_v58 = vshll.u32 %v2643_v14, 16  ;;  %v923_v63 = vshll.u32 %v2646_v26, 16 }
  0x50   : > { %2274 = vmatmul.mubr.msk.bf16.gmra.mrb[4].mxu0 %vm336_vm3, %v2400_v49  ;;  %2231 = vmatprep.subr.bf16.mxu1 %v2401_v21  ;;  %v1494_v29 = vshll.u32 %v2846_v38, 16  ;;  %v1487_v15 = vrot.slane %v1485_v35, 4  ;;  %v1490_v37 = vrot.slane %v1488_v39, 5  ;;  %v1638_v49 = vrot.slane %v2745_v36, 5  ;;  %v1987_v14 = vld [vmem:[%s2474_s27 + $0x30] sm:$0xf] }
  0x51   : > { %2281 = vmatprep.mubr.msk.bf16.mxu0 %vm336_vm3, %v2079_v62  ;;  %v1642_v36 = vrot.slane %v2754_v16, 5  ;;  %v1646_v16 = vrot.slane %v2773_v13, 5  ;;  %v1483_v2 = vsel %vm2513_vm2, %v1478_v7, %v1482_v41  ;;  %v2099_v43 = vrot.slane %v2091_v60, 9  ;;  %v1985_v13 = vld [vmem:[%s2474_s27 + $0x28] sm:$0xf] }
  0x52   : > { %v1496_v0 = vrot.slane %v1494_v29, 5  ;;  %v1639_v11 = vsel %vm2620_vm6, %v2097_v55, %v1638_v49  ;;  %v2406_v5 = vld [vmem:[%s2474_s27 + $0x28] ss:$8 sps:$4 sm:$0xff]   ;;  %v1650_v20 = vrot.slane %v2777_v56, 5  ;;  %v900_v12 = vshrl.u32 %v1985_v13, 16 }
  0x53   : > { %2232 = vmatpush3.bf16.msra.mxu1 %v2401_v21  ;;  %v1491_v21 = vor.u32 %v1490_v37, %v1487_v15  ;;  %v1643_v9 = vsel %vm2620_vm6, %v2098_v59, %v1642_v36  ;;  %v2093_v32 = vld [vmem:[%s2474_s27 + $0x30] sm:$0xe]  ;;  %v2100_v19 = vrot.slane %v2092_v61, 9  ;;  %v903_v4 = vshll.u32 %v1985_v13, 16  ;;  %v1989_v27 = vld [vmem:[%s2474_s27 + $0x38] sm:$0xf] }
  0x54   : > { %2301 = vmatprep.subr.bf16.mxu1 %v2450_v1  ;;  %v2109_v52 = vcombine.low %v1639_v11, %v1643_v9  ;;  %v914_v28 = vshrl.u32 %v1987_v14, 16  ;;  %v917_v39 = vshll.u32 %v1987_v14, 16  ;;  %v2101_v29 = vrot.slane %v2093_v32, 9  ;;  %v2407_v7 = vld [vmem:[%s2474_s27 + $0x38] ss:$8 sps:$4 sm:$0xff]  }
  0x55   : > { %v1492_v62 = vrot.slane %v1491_v21, 4  ;;  %v905_v45 = vrot.slane %v903_v4, 5  ;;  %v1654_v34 = vrot.slane %v2811_v57, 5  ;;  %v1658_v18 = vrot.slane %v2822_v53, 5  ;;  %v2095_v59 = vld [vmem:[%s2474_s27 + $0x40] sm:$0xe] }
  0x56   : > { %2226 = vmatmul.mubr.msk.bf16.gmra.mrb[4].mxu1 %vm336_vm3, %v1948_v22  ;;  %v1991_v22 = vld [vmem:[%s2474_s27 + $0x40] sm:$0xf]  ;;  %v916_v33 = vrot.slane %v914_v28, 4  ;;  %v919_v56 = vrot.slane %v917_v39, 5  ;;  %v928_v15 = vshrl.u32 %v1989_v27, 16  ;;  %v931_v37 = vshll.u32 %v1989_v27, 16 }
  0x57   : > { %2233 = vmatprep.mubr.msk.bf16.mxu1 %vm336_vm3, %v2403_v25  ;;  %v1497_v26 = vsel %vm2513_vm2, %v1492_v62, %v1496_v0  ;;  %v2102_v25 = vrot.slane %v2094_v50, 9  ;;  %v942_v8 = vshrl.u32 %v1991_v22, 16  ;;  %v945_v10 = vshll.u32 %v1991_v22, 16  ;;  %v2096_v60 = vld [vmem:[%s2474_s27 + $0x48] sm:$0xe] }
  0x58   : > { %2282 = vmatmul.mubr.msk.bf16.vlgmr.msra.gmra.mrb[0].mxu0 %vm336_vm3, %v2080_v40  ;;  %v2082_v35 = vcombine.low %v1483_v2, %v1497_v26  ;;  %v911_v40 = vrot.slane %v909_v58, 5  ;;  %v920_v41 = vor.u32 %v919_v56, %v916_v33  ;;  %v925_v57 = vrot.slane %v923_v63, 5 }
  0x59   : > { %2290 = vmatpush3.bf16.msra.mxu0 %v2807_v24  ;;  %2285 = vmatprep.mubr.msk.bf16.mxu0 %vm336_vm3, %v2081_v51  ;;  %v902_v24 = vrot.slane %v900_v12, 4  ;;  %v930_v48 = vrot.slane %v928_v15, 4  ;;  %v933_v21 = vrot.slane %v931_v37, 5  ;;  %v1647_v53 = vsel %vm2620_vm6, %v2099_v43, %v1646_v16 }
  0x5a   : > { %2291 = vmatprep.subr.bf16.mxu0 %v2405_v6  ;;  %v944_v42 = vrot.slane %v942_v8, 4  ;;  %v947_v47 = vrot.slane %v945_v10, 5  ;;  %v921_v36 = vrot.slane %v920_v41, 4  ;;  %v1655_v51 = vsel %vm2620_vm6, %v2101_v29, %v1654_v34 }
  0x5b   : > { %v906_v49 = vor.u32 %v905_v45, %v902_v24  ;;  %v951_v62 = vshll.u32 %v2676_v44, 16  ;;  %v934_v16 = vor.u32 %v933_v21, %v930_v48  ;;  %v2103_v11 = vrot.slane %v2095_v59, 9 }
  0x5c   : > { %v926_v61 = vsel %vm2513_vm2, %v921_v36, %v925_v57  ;;  %v948_v58 = vor.u32 %v947_v47, %v944_v42  ;;  %v1662_v9 = vrot.slane %v2841_v17, 5  ;;  %v2104_v43 = vrot.slane %v2096_v60, 9 }
  0x5d   : > { %2292 = vmatpush3.bf16.msra.mxu0 %v2405_v6  ;;  %v907_v0 = vrot.slane %v906_v49, 4  ;;  %v1659_v6 = vsel %vm2620_vm6, %v2102_v25, %v1658_v18  ;;  %v1666_v13 = vrot.slane %v2846_v38, 5  ;;  %v939_v44 = vrot.slane %v937_v23, 5 }
  0x5e   : > { %2234 = vmatmul.mubr.msk.bf16.vlgmr.msra.gmra.mrb[0].mxu1 %vm336_vm3, %v2404_v54  ;;  %v2111_v2 = vcombine.low %v1655_v51, %v1659_v6  ;;  %v935_v14 = vrot.slane %v934_v16, 4  ;;  %v949_v26 = vrot.slane %v948_v58, 4  ;;  %v1663_v17 = vsel %vm2620_vm6, %v2103_v11, %v1662_v9 }
  0x5f   : > { %2303 = vmatpush3.bf16.msra.mxu1 %v2450_v1  ;;  %2237 = vmatprep.mubr.msk.bf16.mxu1 %vm336_vm3, %v2406_v5  ;;  %v1651_v1 = vsel %vm2620_vm6, %v2100_v19, %v1650_v20  ;;  %v912_v55 = vsel %vm2513_vm2, %v907_v0, %v911_v40  ;;  %v1667_v38 = vsel %vm2620_vm6, %v2104_v43, %v1666_v13 }
  0x60   : > { %2286 = vmatmul.mubr.msk.bf16.gmra.mrb[4].mxu0 %vm336_vm3, %v2082_v35  ;;  %2302 = vmatprep.subr.bf16.mxu1 %v2461_v3  ;;  %v2110_v63 = vcombine.low %v1647_v53, %v1651_v1  ;;  %v1999_v54 = vcombine.low %v912_v55, %v926_v61  ;;  %v940_v5 = vsel %vm2513_vm2, %v935_v14, %v939_v44 }
  0x61   : > { %2293 = vmatprep.mubr.msk.bf16.mxu0 %vm336_vm3, %v2109_v52  ;;  %v2112_v23 = vcombine.low %v1663_v17, %v1667_v38 }
  0x63   : > { %2304 = vmatpush3.bf16.msra.mxu1 %v2461_v3  ;;  %v953_v3 = vrot.slane %v951_v62, 5 }
  0x65   : > { %v954_v31 = vsel %vm2513_vm2, %v949_v26, %v953_v3 }
  0x66   : > { %2238 = vmatmul.mubr.msk.bf16.gmra.mrb[4].mxu1 %vm336_vm3, %v2407_v7  ;;  %v2000_v20 = vcombine.low %v940_v5, %v954_v31 }
  0x67   : > { %2249 = vmatprep.mubr.msk.bf16.mxu1 %vm336_vm3, %v1999_v54 }
  0x68   : > { %2294 = vmatmul.mubr.msk.bf16.vlgmr.msra.gmra.mrb[0].mxu0 %vm336_vm3, %v2110_v63 }
  0x69   : > { %2297 = vmatprep.mubr.msk.bf16.mxu0 %vm336_vm3, %v2111_v2 }
  0x70   : > { %2298 = vmatmul.mubr.msk.bf16.gmra.mrb[4].mxu0 %vm336_vm3, %v2112_v23 }
  0x72   : > { %2250 = vmatmul.mubr.msk.bf16.vlgmr.msra.gmra.mrb[4].mxu1 %vm336_vm3, %v2000_v20 }
 0x131   : > { %v2235_v12 = vpop.f32.mrb[0].mxu1 }
 0x132   : > { %v788_v32 = vpop.f32.mrb[1].mxu1 }
 0x133   : > { %v2236_v50 = vpop.f32.mrb[2].mxu1 }
 0x134   : > { %v791_v52 = vpop.f32.mrb[3].mxu1 }
 0x13b   : > { %v2295_v19 = vpop.f32.mrb[0].mxu0 }
 0x13c   : > { %v2305_v4 = vadd.f32 %v2295_v19, %v2235_v12  ;;  %v1743_v28 = vpop.f32.mrb[1].mxu0 }
 0x13d   : > { %v2306_v30 = vadd.f32 %v1743_v28, %v788_v32  ;;  %v2296_v27 = vpop.f32.mrb[2].mxu0 }
 0x13e   : > { %v1791_v35 = vadd.f32 %v2305_v4, %v2119_v46  ;;  %v2307_v24 = vadd.f32 %v2296_v27, %v2236_v50  ;;  %v1746_v39 = vpop.f32.mrb[3].mxu0 }
 0x13f   : > { %v1789_v29 = vadd.f32 %v2306_v30, %v2119_v46  ;;  %v2308_v22 = vadd.f32 %v1746_v39, %v791_v52 }
 0x140   : > { %v1799_v45 = vmax.f32 %v1791_v35, 0.0  ;;  %v1792_v33 = vadd.f32 %v2307_v24, %v2119_v46 }
 0x141   : > { %v1797_v34 = vmax.f32 %v1789_v29, 0.0  ;;  %v1790_v25 = vadd.f32 %v2308_v22, %v2119_v46 }
 0x142   : > { %v2133_v56 = vpack.c.bf16 %v1799_v45, %v1799_v45  ;;  %v1800_v18 = vmax.f32 %v1792_v33, 0.0 }
 0x143   : > { %v2131_v15 = vpack.c.bf16 %v1797_v34, %v1797_v34  ;;  %v1798_v37 = vmax.f32 %v1790_v25, 0.0  ;;  %v2299_v49 = vpop.f32.mrb[4].mxu0 }
 0x144   : > { %1840 = vst.msk [vmem:[%s2942_s7 + $0x8] sm:$0xf] %vm1837_vm7, %v2133_v56  ;;  %v2134_v40 = vpack.c.bf16 %v1800_v18, %v1800_v18  ;;  %v1759_v8 = vpop.f32.mrb[5].mxu0 }
 0x145   : > { %1838 = vst.msk [vmem:[%s2942_s7] sm:$0xf] %vm1837_vm7, %v2131_v15  ;;  %v2132_v10 = vpack.c.bf16 %v1798_v37, %v1798_v37  ;;  %v2251_v41 = vpop.f32.mrb[4].mxu1  ;;  %v2300_v57 = vpop.f32.mrb[6].mxu0 }
 0x146   : > { %1841 = vst.msk [vmem:[%s2942_s7 + $0xc] sm:$0xf] %vm1837_vm7, %v2134_v40  ;;  %v2309_v48 = vadd.f32 %v2299_v49, %v2251_v41  ;;  %v1046_v21 = vpop.f32.mrb[5].mxu1  ;;  %v1762_v53 = vpop.f32.mrb[7].mxu0 }
 0x147   : > { %1839 = vst.msk [vmem:[%s2942_s7 + $0x4] sm:$0xf] %vm1837_vm7, %v2132_v10  ;;  %v2310_v0 = vadd.f32 %v1759_v8, %v1046_v21  ;;  %v2252_v42 = vpop.f32.mrb[6].mxu1 }
 0x148   : > { %v1795_v47 = vadd.f32 %v2309_v48, %v2119_v46  ;;  %v2311_v1 = vadd.f32 %v2300_v57, %v2252_v42  ;;  %v1049_v36 = vpop.f32.mrb[7].mxu1 }
 0x149   : > { %v1793_v51 = vadd.f32 %v2310_v0, %v2119_v46  ;;  %v2312_v6 = vadd.f32 %v1762_v53, %v1049_v36 }
 0x14a   : > { %v1803_v7 = vmax.f32 %v1795_v47, 0.0  ;;  %v1796_v55 = vadd.f32 %v2311_v1, %v2119_v46 }
 0x14b   : > { %v1801_v59 = vmax.f32 %v1793_v51, 0.0  ;;  %v1794_v60 = vadd.f32 %v2312_v6, %v2119_v46 }
 0x14c   : > { %v2137_v62 = vpack.c.bf16 %v1803_v7, %v1803_v7  ;;  %v1804_v61 = vmax.f32 %v1796_v55, 0.0 }
 0x14d   : > { %v2135_v16 = vpack.c.bf16 %v1801_v59, %v1801_v59  ;;  %v1802_v58 = vmax.f32 %v1794_v60, 0.0 }
 0x14e   : > { %1844 = vst.msk [vmem:[%s2942_s7 + $0x18] sm:$0xf] %vm1837_vm7, %v2137_v62  ;;  %v2138_v63 = vpack.c.bf16 %v1804_v61, %v1804_v61 }
 0x14f   : > { %1842 = vst.msk [vmem:[%s2942_s7 + $0x10] sm:$0xf] %vm1837_vm7, %v2135_v16  ;;  %v2136_v54 = vpack.c.bf16 %v1802_v58, %v1802_v58 }
 0x150   : > { %1845 = vst.msk [vmem:[%s2942_s7 + $0x1c] sm:$0xf] %vm1837_vm7, %v2138_v63 }
 0x151   : > { %1843 = vst.msk [vmem:[%s2942_s7 + $0x14] sm:$0xf] %vm1837_vm7, %v2136_v54 }
 0x152 PF: > { %s13_s12 = sadd.s32 1, %s2414_s12  }
 0x153   : > { %p10_p4 = scmp.ge.s32.totalorder %s13_s12, 4  }
 0x155   :  { %12 = sbr.rel (!%p10_p4) target bundleno = 1 (0x1), region = 72 }

// kernel: duat_forward.37
= control target key start
LH: loop header
LB: loop body
LE: loop exit
PB: predicated region body
PF: predicated region fallthrough
CT: control target
= control target key end

     0   :  { %v3815_v22 = vmov 1966171168   ;;  %v540_v24 = vlaneseq  ;;  %s4668_s1 = inlined_call_operand.vmem [shape: bf16[4096,128], index: 1, kind: input, shape index: {}]   ;;  %s4669_s0 = inlined_call_operand.vmem [shape: bf16[1,4096], index: 0, kind: input, shape index: {}]   ;;  %s4670_s2 = inlined_call_operand.vmem [shape: f32[1,128], index: 2, kind: input, shape index: {}]   ;;  %s4671_s3 = inlined_call_operand.vmem [shape: f32[1,128], index: 3, kind: output, shape index: {}]  }
   0x1   :  { %v3555_v0 = vld [vmem:[%s4668_s1 + $0x40] sm:$0xff]   ;;  %v3559_v4 = vld [vmem:[%s4668_s1 + $0x48] sm:$0xff]   ;;  %v3563_v8 = vld [vmem:[%s4668_s1 + $0x50] sm:$0xff]   ;;  %v538_v23 = vunpack.c.l.s4 %v3815_v22 }
   0x2   :  { %v3556_v1 = vld [vmem:[%s4668_s1 + $0xc0] sm:$0xff]   ;;  %3202 = vmatprep.subr.bf16.mxu0 %v3555_v0  ;;  %v3560_v5 = vld [vmem:[%s4668_s1 + $0xc8] sm:$0xff]   ;;  %v3564_v9 = vld [vmem:[%s4668_s1 + $0xd0] sm:$0xff]   ;;  %v541_v30 = vshrl.u32 %v540_v24, 7 }
   0x3   :  { %v3557_v2 = vld [vmem:[%s4668_s1] sm:$0xff]   ;;  %3224 = vmatprep.subr.bf16.mxu1 %v3556_v1  ;;  %v3561_v6 = vld [vmem:[%s4668_s1 + $0x8] sm:$0xff]   ;;  %v3565_v10 = vld [vmem:[%s4668_s1 + $0x10] sm:$0xff]   ;;  %v539_v29 = vunpack.c.0.s8 %v538_v23 }
   0x4   :  { %v3558_v3 = vld [vmem:[%s4668_s1 + $0x80] sm:$0xff]   ;;  %3203 = vmatpush3.bf16.msra.mxu0 %v3557_v2  ;;  %v3562_v7 = vld [vmem:[%s4668_s1 + $0x88] sm:$0xff]   ;;  %v3566_v11 = vld [vmem:[%s4668_s1 + $0x90] sm:$0xff]  }
   0x5   :  { %3225 = vmatpush3.bf16.msra.mxu1 %v3558_v3  ;;  %3204 = vmatprep.subr.bf16.mxu0 %v3559_v4  ;;  %v3567_v12 = vld [vmem:[%s4668_s1 + $0x58] sm:$0xff]   ;;  %v3571_v16 = vld [vmem:[%s4668_s1 + $0x60] sm:$0xff]   ;;  %v3575_v20 = vld [vmem:[%s4668_s1 + $0x68] sm:$0xff]   ;;  %v3926_v35 = vsub.s32 %v539_v29, %v541_v30 }
   0x6   :  { %3226 = vmatprep.subr.bf16.mxu1 %v3560_v5  ;;  %v3568_v13 = vld [vmem:[%s4668_s1 + $0xd8] sm:$0xff]   ;;  %v3572_v17 = vld [vmem:[%s4668_s1 + $0xe0] sm:$0xff]   ;;  %v3576_v21 = vld [vmem:[%s4668_s1 + $0xe8] sm:$0xff]  }
   0x7   :  { %v3569_v14 = vld [vmem:[%s4668_s1 + $0x18] sm:$0xff]   ;;  %v3573_v18 = vld [vmem:[%s4668_s1 + $0x20] sm:$0xff]   ;;  %v3577_v25 = vld [vmem:[%s4668_s1 + $0x28] sm:$0xff]  }
   0x8   :  { %3205 = vmatpush3.bf16.msra.mxu0 %v3561_v6  ;;  %v3570_v15 = vld [vmem:[%s4668_s1 + $0x98] sm:$0xff]   ;;  %v3574_v19 = vld [vmem:[%s4668_s1 + $0xa0] sm:$0xff]   ;;  %v3578_v26 = vld [vmem:[%s4668_s1 + $0xa8] sm:$0xff]  }
   0x9   :  { %3227 = vmatpush3.bf16.msra.mxu1 %v3562_v7  ;;  %3206 = vmatprep.subr.bf16.mxu0 %v3563_v8  ;;  %v3579_v27 = vld [vmem:[%s4668_s1 + $0x70] sm:$0xff]   ;;  %v3583_v33 = vld [vmem:[%s4668_s1 + $0x78] sm:$0xff]   ;;  %v15_v38 = vld [vmem:[%s4669_s0] sm:$0xff] }
   0xa   :  { %3228 = vmatprep.subr.bf16.mxu1 %v3564_v9  ;;  %v3580_v28 = vld [vmem:[%s4668_s1 + $0xf0] sm:$0xff]   ;;  %v3584_v34 = vld [vmem:[%s4668_s1 + $0xf8] sm:$0xff]   ;;  %v536_v39 = vcombine.high %v15_v38, %v15_v38  ;;  %v543_v40 = vrot.slane %v15_v38, %v3926_v35  ;;  %v3588_v41 = vld [vmem:[%s4668_s1 + $0x140] sm:$0xff]  }
   0xb   :  { %v3581_v31 = vld [vmem:[%s4668_s1 + $0x30] sm:$0xff]   ;;  %v3585_v36 = vld [vmem:[%s4668_s1 + $0x38] sm:$0xff]   ;;  %v3589_v42 = vld [vmem:[%s4668_s1 + $0x1c0] sm:$0xff]  }
   0xc   :  { %3207 = vmatpush3.bf16.msra.mxu0 %v3565_v10  ;;  %v3582_v32 = vld [vmem:[%s4668_s1 + $0xb0] sm:$0xff]   ;;  %v3586_v37 = vld [vmem:[%s4668_s1 + $0xb8] sm:$0xff]   ;;  %v551_v43 = vcombine.high %v543_v40, %v543_v40  ;;  %v559_v44 = vrot.slane %v543_v40, %v3926_v35  ;;  %v3946_v45 = vrot.slane %v536_v39, %v3926_v35  ;;  %v3590_v46 = vld [vmem:[%s4668_s1 + $0x100] sm:$0xff]  }
   0xd   :  { %3229 = vmatpush3.bf16.msra.mxu1 %v3566_v11  ;;  %3208 = vmatprep.subr.bf16.mxu0 %v3567_v12  ;;  %v3591_v48 = vld [vmem:[%s4668_s1 + $0x180] sm:$0xff]   ;;  %v3592_v51 = vld [vmem:[%s4668_s1 + $0x148] sm:$0xff]   ;;  %v3596_v58 = vld [vmem:[%s4668_s1 + $0x150] sm:$0xff]  }
   0xe   :  { %3230 = vmatprep.subr.bf16.mxu1 %v3568_v13  ;;  %v573_v47 = vrot.slane %v551_v43, %v3926_v35  ;;  %v552_v49 = vcombine.high %v3946_v45, %v3946_v45  ;;  %v581_v50 = vcombine.high %v559_v44, %v559_v44  ;;  %v3593_v53 = vld [vmem:[%s4668_s1 + $0x1c8] sm:$0xff]   ;;  %v3597_v59 = vld [vmem:[%s4668_s1 + $0x1d0] sm:$0xff]   ;;  %v3600_v62 = vld [vmem:[%s4668_s1 + $0x158] sm:$0xff]  }
   0xf   :  { %v3594_v55 = vld [vmem:[%s4668_s1 + $0x108] sm:$0xff]   ;;  %v3598_v60 = vld [vmem:[%s4668_s1 + $0x110] sm:$0xff]   ;;  %v3601_v63 = vld [vmem:[%s4668_s1 + $0x1d8] sm:$0xff]  }
  0x10   :  { %3209 = vmatpush3.bf16.msra.mxu0 %v3569_v14  ;;  %2332 = vmatprep.mubr.bf16.mxu0 %v573_v47  ;;  %v583_v52 = vcombine.high %v573_v47, %v573_v47  ;;  %v580_v54 = vrot.slane %v552_v49, %v3926_v35  ;;  %v3595_v56 = vld [vmem:[%s4668_s1 + $0x188] sm:$0xff]   ;;  %v3599_v61 = vld [vmem:[%s4668_s1 + $0x190] sm:$0xff]   ;;  %v3602_v0 = vld [vmem:[%s4668_s1 + $0x118] sm:$0xff]  }
  0x11   :  { %3231 = vmatpush3.bf16.msra.mxu1 %v3570_v15  ;;  %3210 = vmatprep.subr.bf16.mxu0 %v3571_v16  ;;  %v3603_v1 = vld [vmem:[%s4668_s1 + $0x198] sm:$0xff]   ;;  %v3604_v2 = vld [vmem:[%s4668_s1 + $0x160] sm:$0xff]   ;;  %v3608_v6 = vld [vmem:[%s4668_s1 + $0x168] sm:$0xff]  }
  0x12   :  { %3232 = vmatprep.subr.bf16.mxu1 %v3572_v17  ;;  %2372 = vmatprep.mubr.bf16.mxu1 %v583_v52  ;;  %v584_v57 = vcombine.high %v580_v54, %v580_v54  ;;  %v3605_v3 = vld [vmem:[%s4668_s1 + $0x1e0] sm:$0xff]   ;;  %v3609_v7 = vld [vmem:[%s4668_s1 + $0x1e8] sm:$0xff]   ;;  %v3612_v10 = vld [vmem:[%s4668_s1 + $0x170] sm:$0xff]  }
  0x13   :  { %v3606_v4 = vld [vmem:[%s4668_s1 + $0x120] sm:$0xff]   ;;  %v3610_v8 = vld [vmem:[%s4668_s1 + $0x128] sm:$0xff]   ;;  %v3613_v11 = vld [vmem:[%s4668_s1 + $0x1f0] sm:$0xff]  }
  0x14   :  { %3211 = vmatpush3.bf16.msra.mxu0 %v3573_v18  ;;  %v3607_v5 = vld [vmem:[%s4668_s1 + $0x1a0] sm:$0xff]   ;;  %v3611_v9 = vld [vmem:[%s4668_s1 + $0x1a8] sm:$0xff]   ;;  %v3614_v12 = vld [vmem:[%s4668_s1 + $0x130] sm:$0xff]   ;;  %v566_v18 = vrot.slane %v3946_v45, %v3926_v35 }
  0x15   :  { %3233 = vmatpush3.bf16.msra.mxu1 %v3574_v19  ;;  %3212 = vmatprep.subr.bf16.mxu0 %v3575_v20  ;;  %v3615_v13 = vld [vmem:[%s4668_s1 + $0x1b0] sm:$0xff]   ;;  %v3616_v14 = vld [vmem:[%s4668_s1 + $0x178] sm:$0xff]   ;;  %v3620_v19 = vld [vmem:[%s4668_s1 + $0x240] sm:$0xff]  }
  0x16   :  { %3234 = vmatprep.subr.bf16.mxu1 %v3576_v21  ;;  %v3617_v15 = vld [vmem:[%s4668_s1 + $0x1f8] sm:$0xff]   ;;  %v3621_v20 = vld [vmem:[%s4668_s1 + $0x2c0] sm:$0xff]   ;;  %v582_v23 = vcombine.high %v566_v18, %v566_v18  ;;  %v3624_v24 = vld [vmem:[%s4668_s1 + $0x248] sm:$0xff]  }
  0x17   :  { %v3618_v16 = vld [vmem:[%s4668_s1 + $0x138] sm:$0xff]   ;;  %v3622_v21 = vld [vmem:[%s4668_s1 + $0x200] sm:$0xff]   ;;  %v3629_v29 = vld [vmem:[%s4668_s1 + $0x2d0] sm:$0xff]  }
  0x18   :  { %3213 = vmatpush3.bf16.msra.mxu0 %v3577_v25  ;;  %v3619_v17 = vld [vmem:[%s4668_s1 + $0x1b8] sm:$0xff]   ;;  %v3623_v22 = vld [vmem:[%s4668_s1 + $0x280] sm:$0xff]   ;;  %v3625_v25 = vld [vmem:[%s4668_s1 + $0x2c8] sm:$0xff]  }
  0x19   :  { %3235 = vmatpush3.bf16.msra.mxu1 %v3578_v26  ;;  %3214 = vmatprep.subr.bf16.mxu0 %v3579_v27  ;;  %v3626_v26 = vld [vmem:[%s4668_s1 + $0x208] sm:$0xff]   ;;  %v3630_v30 = vld [vmem:[%s4668_s1 + $0x210] sm:$0xff]   ;;  %v3637_v38 = vld [vmem:[%s4668_s1 + $0x2e0] sm:$0xff]  }
  0x1a   :  { %3236 = vmatprep.subr.bf16.mxu1 %v3580_v28  ;;  %v3627_v27 = vld [vmem:[%s4668_s1 + $0x288] sm:$0xff]   ;;  %v3628_v28 = vld [vmem:[%s4668_s1 + $0x250] sm:$0xff]   ;;  %v3638_v39 = vld [vmem:[%s4668_s1 + $0x220] sm:$0xff]  }
  0x1b   :  { %v3639_v40 = vld [vmem:[%s4668_s1 + $0x2a0] sm:$0xff]   ;;  %v3642_v43 = vld [vmem:[%s4668_s1 + $0x228] sm:$0xff]   ;;  %v3644_v45 = vld [vmem:[%s4668_s1 + $0x270] sm:$0xff]  }
  0x1c   :  { %3215 = vmatpush3.bf16.msra.mxu0 %v3581_v31  ;;  %v3631_v31 = vld [vmem:[%s4668_s1 + $0x290] sm:$0xff]   ;;  %v3648_v49 = vld [vmem:[%s4668_s1 + $0x278] sm:$0xff]   ;;  %v16_v52 = vld [vmem:[%s4669_s0 + $0x8] sm:$0xff] }
  0x1d   :  { %3237 = vmatpush3.bf16.msra.mxu1 %v3582_v32  ;;  %3216 = vmatprep.subr.bf16.mxu0 %v3583_v33  ;;  %v3632_v32 = vld [vmem:[%s4668_s1 + $0x258] sm:$0xff]   ;;  %v3646_v47 = vld [vmem:[%s4668_s1 + $0x230] sm:$0xff]  }
  0x1e   :  { %3238 = vmatprep.subr.bf16.mxu1 %v3584_v34  ;;  %v3633_v33 = vld [vmem:[%s4668_s1 + $0x2d8] sm:$0xff]  }
  0x1f   :  { %v3634_v34 = vld [vmem:[%s4668_s1 + $0x218] sm:$0xff]  }
  0x20   :  { %3217 = vmatpush3.bf16.msra.mxu0 %v3585_v36  ;;  %v3635_v36 = vld [vmem:[%s4668_s1 + $0x298] sm:$0xff]  }
  0x21   :  { %3239 = vmatpush3.bf16.msra.mxu1 %v3586_v37  ;;  %3246 = vmatprep.subr.bf16.mxu0 %v3588_v41  ;;  %v3636_v37 = vld [vmem:[%s4668_s1 + $0x260] sm:$0xff]   ;;  %v3640_v41 = vld [vmem:[%s4668_s1 + $0x268] sm:$0xff]  }
  0x22   :  { %3268 = vmatprep.subr.bf16.mxu1 %v3589_v42  ;;  %v3641_v42 = vld [vmem:[%s4668_s1 + $0x2e8] sm:$0xff]  }
  0x23   :  { %2333 = vmatmul.mubr.bf16.vlgmr.msra.gmra.mrb[0].mxu0 %v559_v44  ;;  %v3643_v44 = vld [vmem:[%s4668_s1 + $0x2a8] sm:$0xff]  }
  0x24   :  { %3247 = vmatpush3.bf16.msra.mxu0 %v3590_v46  ;;  %2373 = vmatmul.mubr.bf16.vlgmr.msra.gmra.mrb[0].mxu1 %v581_v50  ;;  %v3645_v46 = vld [vmem:[%s4668_s1 + $0x2f0] sm:$0xff]   ;;  %v3649_v50 = vld [vmem:[%s4668_s1 + $0x2f8] sm:$0xff]  }
  0x25   :  { %3248 = vmatprep.subr.bf16.mxu0 %v3592_v51  ;;  %3269 = vmatpush3.bf16.msra.mxu1 %v3591_v48  ;;  %v3647_v48 = vld [vmem:[%s4668_s1 + $0x2b0] sm:$0xff]   ;;  %v3650_v51 = vld [vmem:[%s4668_s1 + $0x238] sm:$0xff]  }
  0x26   :  { %2412 = vmatprep.mubr.bf16.mxu0 %v580_v54  ;;  %3270 = vmatprep.subr.bf16.mxu1 %v3593_v53  ;;  %v3651_v53 = vld [vmem:[%s4668_s1 + $0x2b8] sm:$0xff]   ;;  %v592_v54 = vrot.slane %v16_v52, %v3926_v35 }
  0x27   :  { %2452 = vmatprep.mubr.bf16.mxu1 %v584_v57 }
  0x28   :  { %3249 = vmatpush3.bf16.msra.mxu0 %v3594_v55  ;;  %v585_v55 = vcombine.high %v16_v52, %v16_v52  ;;  %v600_v57 = vcombine.high %v592_v54, %v592_v54  ;;  %v3701_v52 = vld [vmem:[%s4668_s1 + $0x460] sm:$0xff]  }
  0x29   :  { %3250 = vmatprep.subr.bf16.mxu0 %v3596_v58  ;;  %3271 = vmatpush3.bf16.msra.mxu1 %v3595_v56  ;;  %v3652_v56 = vld [vmem:[%s4668_s1 + $0x340] sm:$0xff]   ;;  %v608_v58 = vrot.slane %v592_v54, %v3926_v35 }
  0x2a   :  { %3272 = vmatprep.subr.bf16.mxu1 %v3597_v59  ;;  %v3653_v59 = vld [vmem:[%s4668_s1 + $0x3c0] sm:$0xff]  }
  0x2b   :  { %v3703_v54 = vld [vmem:[%s4668_s1 + $0x420] sm:$0xff]  }
  0x2c   :  { %3251 = vmatpush3.bf16.msra.mxu0 %v3598_v60  ;;  %v4152_v60 = vrot.slane %v585_v55, %v3926_v35  ;;  %v3704_v55 = vld [vmem:[%s4668_s1 + $0x4a0] sm:$0xff]  }
  0x2d   :  { %3252 = vmatprep.subr.bf16.mxu0 %v3600_v62  ;;  %3273 = vmatpush3.bf16.msra.mxu1 %v3599_v61  ;;  %v3654_v61 = vld [vmem:[%s4668_s1 + $0x300] sm:$0xff]   ;;  %v622_v62 = vrot.slane %v600_v57, %v3926_v35  ;;  %v3706_v57 = vld [vmem:[%s4668_s1 + $0x4e8] sm:$0xff]  }
  0x2e   :  { %3274 = vmatprep.subr.bf16.mxu1 %v3601_v63  ;;  %v3655_v63 = vld [vmem:[%s4668_s1 + $0x380] sm:$0xff]  }
  0x30   :  { %3253 = vmatpush3.bf16.msra.mxu0 %v3602_v0  ;;  %v601_v0 = vcombine.high %v4152_v60, %v4152_v60 }
  0x31   :  { %3254 = vmatprep.subr.bf16.mxu0 %v3604_v2  ;;  %3275 = vmatpush3.bf16.msra.mxu1 %v3603_v1  ;;  %v630_v1 = vcombine.high %v608_v58, %v608_v58  ;;  %v3656_v2 = vld [vmem:[%s4668_s1 + $0x348] sm:$0xff]  }
  0x32   :  { %3276 = vmatprep.subr.bf16.mxu1 %v3605_v3  ;;  %v632_v3 = vcombine.high %v622_v62, %v622_v62 }
  0x34   :  { %3255 = vmatpush3.bf16.msra.mxu0 %v3606_v4  ;;  %v3657_v4 = vld [vmem:[%s4668_s1 + $0x3c8] sm:$0xff]  }
  0x35   :  { %3256 = vmatprep.subr.bf16.mxu0 %v3608_v6  ;;  %3277 = vmatpush3.bf16.msra.mxu1 %v3607_v5  ;;  %v629_v5 = vrot.slane %v601_v0, %v3926_v35  ;;  %v3658_v6 = vld [vmem:[%s4668_s1 + $0x308] sm:$0xff]   ;;  %v3713_v0 = vld [vmem:[%s4668_s1 + $0x478] sm:$0xff]  }
  0x36   :  { %3278 = vmatprep.subr.bf16.mxu1 %v3609_v7  ;;  %v3659_v7 = vld [vmem:[%s4668_s1 + $0x388] sm:$0xff]  }
  0x38   :  { %3257 = vmatpush3.bf16.msra.mxu0 %v3610_v8  ;;  %v633_v8 = vcombine.high %v629_v5, %v629_v5 }
  0x39   :  { %3258 = vmatprep.subr.bf16.mxu0 %v3612_v10  ;;  %3279 = vmatpush3.bf16.msra.mxu1 %v3611_v9  ;;  %v3660_v9 = vld [vmem:[%s4668_s1 + $0x350] sm:$0xff]  }
  0x3a   :  { %3280 = vmatprep.subr.bf16.mxu1 %v3613_v11  ;;  %v3661_v10 = vld [vmem:[%s4668_s1 + $0x3d0] sm:$0xff]  }
  0x3b   :  { %v3662_v11 = vld [vmem:[%s4668_s1 + $0x310] sm:$0xff]  }
  0x3c   :  { %3259 = vmatpush3.bf16.msra.mxu0 %v3614_v12  ;;  %v3663_v12 = vld [vmem:[%s4668_s1 + $0x390] sm:$0xff]  }
  0x3d   :  { %3260 = vmatprep.subr.bf16.mxu0 %v3616_v14  ;;  %3281 = vmatpush3.bf16.msra.mxu1 %v3615_v13  ;;  %v3664_v13 = vld [vmem:[%s4668_s1 + $0x358] sm:$0xff]  }
  0x3e   :  { %3282 = vmatprep.subr.bf16.mxu1 %v3617_v15  ;;  %v3665_v14 = vld [vmem:[%s4668_s1 + $0x3d8] sm:$0xff]  }
  0x3f   :  { %v3666_v15 = vld [vmem:[%s4668_s1 + $0x318] sm:$0xff]  }
  0x40   :  { %3261 = vmatpush3.bf16.msra.mxu0 %v3618_v16  ;;  %v3667_v16 = vld [vmem:[%s4668_s1 + $0x398] sm:$0xff]  }
  0x41   :  { %3290 = vmatprep.subr.bf16.mxu0 %v3620_v19  ;;  %3283 = vmatpush3.bf16.msra.mxu1 %v3619_v17  ;;  %v3668_v17 = vld [vmem:[%s4668_s1 + $0x360] sm:$0xff]  }
  0x42   :  { %3312 = vmatprep.subr.bf16.mxu1 %v3621_v20  ;;  %v3670_v19 = vld [vmem:[%s4668_s1 + $0x320] sm:$0xff]  }
  0x43   :  { %2413 = vmatmul.mubr.bf16.vlgmr.msra.gmra.mrb[4].mxu0 %v566_v18  ;;  %v3669_v18 = vld [vmem:[%s4668_s1 + $0x3e0] sm:$0xff]  }
  0x44   :  { %3291 = vmatpush3.bf16.msra.mxu0 %v3622_v21  ;;  %2453 = vmatmul.mubr.bf16.vlgmr.msra.gmra.mrb[4].mxu1 %v582_v23  ;;  %v3671_v20 = vld [vmem:[%s4668_s1 + $0x3a0] sm:$0xff]   ;;  %v3672_v21 = vld [vmem:[%s4668_s1 + $0x368] sm:$0xff]  }
  0x45   :  { %3292 = vmatprep.subr.bf16.mxu0 %v3624_v24  ;;  %3313 = vmatpush3.bf16.msra.mxu1 %v3623_v22  ;;  %v3673_v22 = vld [vmem:[%s4668_s1 + $0x3e8] sm:$0xff]  }
  0x46   :  { %3314 = vmatprep.subr.bf16.mxu1 %v3625_v25  ;;  %2492 = vmatprep.mubr.bf16.mxu0 %v622_v62  ;;  %v3674_v23 = vld [vmem:[%s4668_s1 + $0x328] sm:$0xff]   ;;  %v3676_v25 = vld [vmem:[%s4668_s1 + $0x370] sm:$0xff]  }
  0x47   :  { %2532 = vmatprep.mubr.bf16.mxu1 %v632_v3  ;;  %v3675_v24 = vld [vmem:[%s4668_s1 + $0x3a8] sm:$0xff]   ;;  %v3711_v62 = vld [vmem:[%s4668_s1 + $0x430] sm:$0xff]  }
  0x48   :  { %3293 = vmatpush3.bf16.msra.mxu0 %v3626_v26  ;;  %v3677_v26 = vld [vmem:[%s4668_s1 + $0x3f0] sm:$0xff]  }
  0x49   :  { %3294 = vmatprep.subr.bf16.mxu0 %v3628_v28  ;;  %3315 = vmatpush3.bf16.msra.mxu1 %v3627_v27  ;;  %v3678_v27 = vld [vmem:[%s4668_s1 + $0x330] sm:$0xff]  }
  0x4a   :  { %3316 = vmatprep.subr.bf16.mxu1 %v3629_v29  ;;  %v3679_v28 = vld [vmem:[%s4668_s1 + $0x3b0] sm:$0xff]   ;;  %v3680_v29 = vld [vmem:[%s4668_s1 + $0x378] sm:$0xff]  }
  0x4b   :  { %v17_v3 = vld [vmem:[%s4669_s0 + $0x10] sm:$0xff] }
  0x4c   :  { %3295 = vmatpush3.bf16.msra.mxu0 %v3630_v30  ;;  %v3681_v30 = vld [vmem:[%s4668_s1 + $0x3f8] sm:$0xff]  }
  0x4d   :  { %3296 = vmatprep.subr.bf16.mxu0 %v3632_v32  ;;  %3317 = vmatpush3.bf16.msra.mxu1 %v3631_v31  ;;  %v3682_v31 = vld [vmem:[%s4668_s1 + $0x338] sm:$0xff]  }
  0x4e   :  { %3318 = vmatprep.subr.bf16.mxu1 %v3633_v33  ;;  %v3683_v32 = vld [vmem:[%s4668_s1 + $0x3b8] sm:$0xff]   ;;  %v615_v33 = vrot.slane %v4152_v60, %v3926_v35  ;;  %v3709_v60 = vld [vmem:[%s4668_s1 + $0x470] sm:$0xff]  }
  0x50   :  { %3297 = vmatpush3.bf16.msra.mxu0 %v3634_v34  ;;  %v3685_v34 = vld [vmem:[%s4668_s1 + $0x440] sm:$0xff]  }
  0x51   :  { %3298 = vmatprep.subr.bf16.mxu0 %v3636_v37  ;;  %3319 = vmatpush3.bf16.msra.mxu1 %v3635_v36  ;;  %v3686_v36 = vld [vmem:[%s4668_s1 + $0x4c0] sm:$0xff]  }
  0x52   :  { %3320 = vmatprep.subr.bf16.mxu1 %v3637_v38  ;;  %v3687_v37 = vld [vmem:[%s4668_s1 + $0x400] sm:$0xff]  }
  0x53   :  { %v3688_v38 = vld [vmem:[%s4668_s1 + $0x480] sm:$0xff]  }
  0x54   :  { %3299 = vmatpush3.bf16.msra.mxu0 %v3638_v39  ;;  %v631_v39 = vcombine.high %v615_v33, %v615_v33 }
  0x55   :  { %3300 = vmatprep.subr.bf16.mxu0 %v3640_v41  ;;  %3321 = vmatpush3.bf16.msra.mxu1 %v3639_v40  ;;  %v3689_v40 = vld [vmem:[%s4668_s1 + $0x448] sm:$0xff]  }
  0x56   :  { %3322 = vmatprep.subr.bf16.mxu1 %v3641_v42  ;;  %v3690_v41 = vld [vmem:[%s4668_s1 + $0x4c8] sm:$0xff]  }
  0x57   :  { %v3691_v42 = vld [vmem:[%s4668_s1 + $0x408] sm:$0xff]  }
  0x58   :  { %3301 = vmatpush3.bf16.msra.mxu0 %v3642_v43  ;;  %v3692_v43 = vld [vmem:[%s4668_s1 + $0x488] sm:$0xff]  }
  0x59   :  { %3302 = vmatprep.subr.bf16.mxu0 %v3644_v45  ;;  %3323 = vmatpush3.bf16.msra.mxu1 %v3643_v44  ;;  %v3693_v44 = vld [vmem:[%s4668_s1 + $0x450] sm:$0xff]  }
  0x5a   :  { %3324 = vmatprep.subr.bf16.mxu1 %v3645_v46  ;;  %v3694_v45 = vld [vmem:[%s4668_s1 + $0x4d0] sm:$0xff]  }
  0x5b   :  { %v3695_v46 = vld [vmem:[%s4668_s1 + $0x410] sm:$0xff]  }
  0x5c   :  { %3303 = vmatpush3.bf16.msra.mxu0 %v3646_v47  ;;  %v3696_v47 = vld [vmem:[%s4668_s1 + $0x490] sm:$0xff]  }
  0x5d   :  { %3304 = vmatprep.subr.bf16.mxu0 %v3648_v49  ;;  %3325 = vmatpush3.bf16.msra.mxu1 %v3647_v48  ;;  %v3697_v48 = vld [vmem:[%s4668_s1 + $0x458] sm:$0xff]  }
  0x5e   :  { %3326 = vmatprep.subr.bf16.mxu1 %v3649_v50  ;;  %v3698_v49 = vld [vmem:[%s4668_s1 + $0x4d8] sm:$0xff]  }
  0x5f   :  { %v3699_v50 = vld [vmem:[%s4668_s1 + $0x418] sm:$0xff]  }
  0x60   :  { %3305 = vmatpush3.bf16.msra.mxu0 %v3650_v51  ;;  %v3700_v51 = vld [vmem:[%s4668_s1 + $0x498] sm:$0xff]  }
  0x61   :  { %3334 = vmatprep.subr.bf16.mxu0 %v3652_v56  ;;  %3327 = vmatpush3.bf16.msra.mxu1 %v3651_v53  ;;  %v3702_v53 = vld [vmem:[%s4668_s1 + $0x4e0] sm:$0xff]   ;;  %v3705_v56 = vld [vmem:[%s4668_s1 + $0x468] sm:$0xff]  }
  0x62   :  { %3356 = vmatprep.subr.bf16.mxu1 %v3653_v59  ;;  %v3708_v59 = vld [vmem:[%s4668_s1 + $0x4a8] sm:$0xff]  }
  0x63   :  { %2493 = vmatmul.mubr.bf16.vlgmr.msra.gmra.mrb[8].mxu0 %v608_v58  ;;  %v3707_v58 = vld [vmem:[%s4668_s1 + $0x428] sm:$0xff]  }
  0x64   :  { %3335 = vmatpush3.bf16.msra.mxu0 %v3654_v61  ;;  %2533 = vmatmul.mubr.bf16.vlgmr.msra.gmra.mrb[8].mxu1 %v630_v1  ;;  %v3710_v61 = vld [vmem:[%s4668_s1 + $0x4f0] sm:$0xff]   ;;  %v3714_v1 = vld [vmem:[%s4668_s1 + $0x4f8] sm:$0xff]  }
  0x65   :  { %3336 = vmatprep.subr.bf16.mxu0 %v3656_v2  ;;  %3357 = vmatpush3.bf16.msra.mxu1 %v3655_v63  ;;  %v3712_v63 = vld [vmem:[%s4668_s1 + $0x4b0] sm:$0xff]   ;;  %v3715_v2 = vld [vmem:[%s4668_s1 + $0x438] sm:$0xff]  }
  0x66   :  { %2572 = vmatprep.mubr.bf16.mxu0 %v629_v5  ;;  %3358 = vmatprep.subr.bf16.mxu1 %v3657_v4  ;;  %v3716_v4 = vld [vmem:[%s4668_s1 + $0x4b8] sm:$0xff]   ;;  %v641_v5 = vrot.slane %v17_v3, %v3926_v35 }
  0x67   :  { %2612 = vmatprep.mubr.bf16.mxu1 %v633_v8 }
  0x68   :  { %3337 = vmatpush3.bf16.msra.mxu0 %v3658_v6  ;;  %v634_v6 = vcombine.high %v17_v3, %v17_v3  ;;  %v649_v8 = vcombine.high %v641_v5, %v641_v5  ;;  %v3766_v3 = vld [vmem:[%s4668_s1 + $0x660] sm:$0xff]  }
  0x69   :  { %3338 = vmatprep.subr.bf16.mxu0 %v3660_v9  ;;  %3359 = vmatpush3.bf16.msra.mxu1 %v3659_v7  ;;  %v3717_v7 = vld [vmem:[%s4668_s1 + $0x540] sm:$0xff]   ;;  %v657_v9 = vrot.slane %v641_v5, %v3926_v35 }
  0x6a   :  { %3360 = vmatprep.subr.bf16.mxu1 %v3661_v10  ;;  %v3718_v10 = vld [vmem:[%s4668_s1 + $0x5c0] sm:$0xff]  }
  0x6b   :  { %v3768_v5 = vld [vmem:[%s4668_s1 + $0x620] sm:$0xff]  }
  0x6c   :  { %3339 = vmatpush3.bf16.msra.mxu0 %v3662_v11  ;;  %v4358_v11 = vrot.slane %v634_v6, %v3926_v35  ;;  %v3769_v6 = vld [vmem:[%s4668_s1 + $0x6a0] sm:$0xff]  }
  0x6d   :  { %3340 = vmatprep.subr.bf16.mxu0 %v3664_v13  ;;  %3361 = vmatpush3.bf16.msra.mxu1 %v3663_v12  ;;  %v3719_v12 = vld [vmem:[%s4668_s1 + $0x500] sm:$0xff]   ;;  %v671_v13 = vrot.slane %v649_v8, %v3926_v35  ;;  %v3771_v8 = vld [vmem:[%s4668_s1 + $0x6e8] sm:$0xff]  }
  0x6e   :  { %3362 = vmatprep.subr.bf16.mxu1 %v3665_v14  ;;  %v3720_v14 = vld [vmem:[%s4668_s1 + $0x580] sm:$0xff]  }
  0x70   :  { %3341 = vmatpush3.bf16.msra.mxu0 %v3666_v15  ;;  %v650_v15 = vcombine.high %v4358_v11, %v4358_v11 }
  0x71   :  { %3342 = vmatprep.subr.bf16.mxu0 %v3668_v17  ;;  %3363 = vmatpush3.bf16.msra.mxu1 %v3667_v16  ;;  %v679_v16 = vcombine.high %v657_v9, %v657_v9  ;;  %v3721_v17 = vld [vmem:[%s4668_s1 + $0x548] sm:$0xff]  }
  0x72   :  { %3364 = vmatprep.subr.bf16.mxu1 %v3669_v18  ;;  %v681_v18 = vcombine.high %v671_v13, %v671_v13 }
  0x74   :  { %3343 = vmatpush3.bf16.msra.mxu0 %v3670_v19  ;;  %v3722_v19 = vld [vmem:[%s4668_s1 + $0x5c8] sm:$0xff]  }
  0x75   :  { %3344 = vmatprep.subr.bf16.mxu0 %v3672_v21  ;;  %3365 = vmatpush3.bf16.msra.mxu1 %v3671_v20  ;;  %v678_v20 = vrot.slane %v650_v15, %v3926_v35  ;;  %v3723_v21 = vld [vmem:[%s4668_s1 + $0x508] sm:$0xff]   ;;  %v3778_v15 = vld [vmem:[%s4668_s1 + $0x678] sm:$0xff]  }
  0x76   :  { %3366 = vmatprep.subr.bf16.mxu1 %v3673_v22  ;;  %v3724_v22 = vld [vmem:[%s4668_s1 + $0x588] sm:$0xff]  }
  0x78   :  { %3345 = vmatpush3.bf16.msra.mxu0 %v3674_v23  ;;  %v682_v23 = vcombine.high %v678_v20, %v678_v20 }
  0x79   :  { %3346 = vmatprep.subr.bf16.mxu0 %v3676_v25  ;;  %3367 = vmatpush3.bf16.msra.mxu1 %v3675_v24  ;;  %v3725_v24 = vld [vmem:[%s4668_s1 + $0x550] sm:$0xff]  }
  0x7a   :  { %3368 = vmatprep.subr.bf16.mxu1 %v3677_v26  ;;  %v3726_v25 = vld [vmem:[%s4668_s1 + $0x5d0] sm:$0xff]  }
  0x7b   :  { %v3727_v26 = vld [vmem:[%s4668_s1 + $0x510] sm:$0xff]  }
  0x7c   :  { %3347 = vmatpush3.bf16.msra.mxu0 %v3678_v27  ;;  %v3728_v27 = vld [vmem:[%s4668_s1 + $0x590] sm:$0xff]  }
  0x7d   :  { %3348 = vmatprep.subr.bf16.mxu0 %v3680_v29  ;;  %3369 = vmatpush3.bf16.msra.mxu1 %v3679_v28  ;;  %v3729_v28 = vld [vmem:[%s4668_s1 + $0x558] sm:$0xff]  }
  0x7e   :  { %3370 = vmatprep.subr.bf16.mxu1 %v3681_v30  ;;  %v3730_v29 = vld [vmem:[%s4668_s1 + $0x5d8] sm:$0xff]  }
  0x7f   :  { %v3731_v30 = vld [vmem:[%s4668_s1 + $0x518] sm:$0xff]  }
  0x80   :  { %3349 = vmatpush3.bf16.msra.mxu0 %v3682_v31  ;;  %v3732_v31 = vld [vmem:[%s4668_s1 + $0x598] sm:$0xff]  }
  0x81   :  { %3378 = vmatprep.subr.bf16.mxu0 %v3685_v34  ;;  %3371 = vmatpush3.bf16.msra.mxu1 %v3683_v32  ;;  %v3733_v32 = vld [vmem:[%s4668_s1 + $0x560] sm:$0xff]  }
  0x82   :  { %3400 = vmatprep.subr.bf16.mxu1 %v3686_v36  ;;  %v3735_v34 = vld [vmem:[%s4668_s1 + $0x520] sm:$0xff]  }
  0x83   :  { %2573 = vmatmul.mubr.bf16.vlgmr.msra.gmra.mrb[12].mxu0 %v615_v33  ;;  %v3734_v33 = vld [vmem:[%s4668_s1 + $0x5e0] sm:$0xff]  }
  0x84   :  { %3379 = vmatpush3.bf16.msra.mxu0 %v3687_v37  ;;  %2613 = vmatmul.mubr.bf16.vlgmr.msra.gmra.mrb[12].mxu1 %v631_v39  ;;  %v3736_v36 = vld [vmem:[%s4668_s1 + $0x5a0] sm:$0xff]   ;;  %v3737_v37 = vld [vmem:[%s4668_s1 + $0x568] sm:$0xff]  }
  0x85   :  { %3380 = vmatprep.subr.bf16.mxu0 %v3689_v40  ;;  %3401 = vmatpush3.bf16.msra.mxu1 %v3688_v38  ;;  %v3738_v38 = vld [vmem:[%s4668_s1 + $0x5e8] sm:$0xff]  }
  0x86   :  { %3402 = vmatprep.subr.bf16.mxu1 %v3690_v41  ;;  %2652 = vmatprep.mubr.bf16.mxu0 %v671_v13  ;;  %v3739_v39 = vld [vmem:[%s4668_s1 + $0x528] sm:$0xff]   ;;  %v3741_v41 = vld [vmem:[%s4668_s1 + $0x570] sm:$0xff]  }
  0x87   :  { %2692 = vmatprep.mubr.bf16.mxu1 %v681_v18  ;;  %v3740_v40 = vld [vmem:[%s4668_s1 + $0x5a8] sm:$0xff]   ;;  %v3776_v13 = vld [vmem:[%s4668_s1 + $0x630] sm:$0xff]   ;;  %v18_v18 = vld [vmem:[%s4669_s0 + $0x18] sm:$0xff] }
  0x88   :  { %3381 = vmatpush3.bf16.msra.mxu0 %v3691_v42  ;;  %v3742_v42 = vld [vmem:[%s4668_s1 + $0x5f0] sm:$0xff]  }
  0x89   :  { %3382 = vmatprep.subr.bf16.mxu0 %v3693_v44  ;;  %3403 = vmatpush3.bf16.msra.mxu1 %v3692_v43  ;;  %v3743_v43 = vld [vmem:[%s4668_s1 + $0x530] sm:$0xff]  }
  0x8a   :  { %3404 = vmatprep.subr.bf16.mxu1 %v3694_v45  ;;  %v3744_v44 = vld [vmem:[%s4668_s1 + $0x5b0] sm:$0xff]   ;;  %v3745_v45 = vld [vmem:[%s4668_s1 + $0x578] sm:$0xff]  }
  0x8c   :  { %3383 = vmatpush3.bf16.msra.mxu0 %v3695_v46  ;;  %v3746_v46 = vld [vmem:[%s4668_s1 + $0x5f8] sm:$0xff]  }
  0x8d   :  { %3384 = vmatprep.subr.bf16.mxu0 %v3697_v48  ;;  %3405 = vmatpush3.bf16.msra.mxu1 %v3696_v47  ;;  %v3747_v47 = vld [vmem:[%s4668_s1 + $0x538] sm:$0xff]  }
  0x8e   :  { %3406 = vmatprep.subr.bf16.mxu1 %v3698_v49  ;;  %v3748_v48 = vld [vmem:[%s4668_s1 + $0x5b8] sm:$0xff]   ;;  %v664_v49 = vrot.slane %v4358_v11, %v3926_v35  ;;  %v3774_v11 = vld [vmem:[%s4668_s1 + $0x670] sm:$0xff]  }
  0x90   :  { %3385 = vmatpush3.bf16.msra.mxu0 %v3699_v50  ;;  %v3750_v50 = vld [vmem:[%s4668_s1 + $0x640] sm:$0xff]  }
  0x91   :  { %3386 = vmatprep.subr.bf16.mxu0 %v3701_v52  ;;  %3407 = vmatpush3.bf16.msra.mxu1 %v3700_v51  ;;  %v3751_v51 = vld [vmem:[%s4668_s1 + $0x6c0] sm:$0xff]  }
  0x92   :  { %3408 = vmatprep.subr.bf16.mxu1 %v3702_v53  ;;  %v3752_v52 = vld [vmem:[%s4668_s1 + $0x600] sm:$0xff]  }
  0x93   :  { %v3753_v53 = vld [vmem:[%s4668_s1 + $0x680] sm:$0xff]  }
  0x94   :  { %3387 = vmatpush3.bf16.msra.mxu0 %v3703_v54  ;;  %v680_v54 = vcombine.high %v664_v49, %v664_v49 }
  0x95   :  { %3388 = vmatprep.subr.bf16.mxu0 %v3705_v56  ;;  %3409 = vmatpush3.bf16.msra.mxu1 %v3704_v55  ;;  %v3754_v55 = vld [vmem:[%s4668_s1 + $0x648] sm:$0xff]  }
  0x96   :  { %3410 = vmatprep.subr.bf16.mxu1 %v3706_v57  ;;  %v3755_v56 = vld [vmem:[%s4668_s1 + $0x6c8] sm:$0xff]  }
  0x97   :  { %v3756_v57 = vld [vmem:[%s4668_s1 + $0x608] sm:$0xff]  }
  0x98   :  { %3389 = vmatpush3.bf16.msra.mxu0 %v3707_v58  ;;  %v3757_v58 = vld [vmem:[%s4668_s1 + $0x688] sm:$0xff]  }
  0x99   :  { %3390 = vmatprep.subr.bf16.mxu0 %v3709_v60  ;;  %3411 = vmatpush3.bf16.msra.mxu1 %v3708_v59  ;;  %v3758_v59 = vld [vmem:[%s4668_s1 + $0x650] sm:$0xff]  }
  0x9a   :  { %3412 = vmatprep.subr.bf16.mxu1 %v3710_v61  ;;  %v3759_v60 = vld [vmem:[%s4668_s1 + $0x6d0] sm:$0xff]  }
  0x9b   :  { %v3760_v61 = vld [vmem:[%s4668_s1 + $0x610] sm:$0xff]  }
  0x9c   :  { %3391 = vmatpush3.bf16.msra.mxu0 %v3711_v62  ;;  %v3761_v62 = vld [vmem:[%s4668_s1 + $0x690] sm:$0xff]  }
  0x9d   :  { %3392 = vmatprep.subr.bf16.mxu0 %v3713_v0  ;;  %3413 = vmatpush3.bf16.msra.mxu1 %v3712_v63  ;;  %v3762_v63 = vld [vmem:[%s4668_s1 + $0x658] sm:$0xff]  }
  0x9e   :  { %3414 = vmatprep.subr.bf16.mxu1 %v3714_v1  ;;  %v3763_v0 = vld [vmem:[%s4668_s1 + $0x6d8] sm:$0xff]  }
  0x9f   :  { %v3764_v1 = vld [vmem:[%s4668_s1 + $0x618] sm:$0xff]  }
  0xa0   :  { %3393 = vmatpush3.bf16.msra.mxu0 %v3715_v2  ;;  %v3765_v2 = vld [vmem:[%s4668_s1 + $0x698] sm:$0xff]  }
  0xa1   :  { %3422 = vmatprep.subr.bf16.mxu0 %v3717_v7  ;;  %3415 = vmatpush3.bf16.msra.mxu1 %v3716_v4  ;;  %v3767_v4 = vld [vmem:[%s4668_s1 + $0x6e0] sm:$0xff]   ;;  %v3770_v7 = vld [vmem:[%s4668_s1 + $0x668] sm:$0xff]  }
  0xa2   :  { %3444 = vmatprep.subr.bf16.mxu1 %v3718_v10  ;;  %v3773_v10 = vld [vmem:[%s4668_s1 + $0x6a8] sm:$0xff]  }
  0xa3   :  { %2653 = vmatmul.mubr.bf16.vlgmr.msra.gmra.mrb[16].mxu0 %v657_v9  ;;  %v3772_v9 = vld [vmem:[%s4668_s1 + $0x628] sm:$0xff]  }
  0xa4   :  { %3423 = vmatpush3.bf16.msra.mxu0 %v3719_v12  ;;  %2693 = vmatmul.mubr.bf16.vlgmr.msra.gmra.mrb[16].mxu1 %v679_v16  ;;  %v3775_v12 = vld [vmem:[%s4668_s1 + $0x6f0] sm:$0xff]   ;;  %v3779_v16 = vld [vmem:[%s4668_s1 + $0x6f8] sm:$0xff]  }
  0xa5   :  { %3424 = vmatprep.subr.bf16.mxu0 %v3721_v17  ;;  %3445 = vmatpush3.bf16.msra.mxu1 %v3720_v14  ;;  %v3777_v14 = vld [vmem:[%s4668_s1 + $0x6b0] sm:$0xff]   ;;  %v3780_v17 = vld [vmem:[%s4668_s1 + $0x638] sm:$0xff]  }
  0xa6   :  { %2732 = vmatprep.mubr.bf16.mxu0 %v678_v20  ;;  %3446 = vmatprep.subr.bf16.mxu1 %v3722_v19  ;;  %v690_v19 = vrot.slane %v18_v18, %v3926_v35  ;;  %v3782_v20 = vld [vmem:[%s4668_s1 + $0x740] sm:$0xff]  }
  0xa7   :  { %2772 = vmatprep.mubr.bf16.mxu1 %v682_v23 }
  0xa8   :  { %3425 = vmatpush3.bf16.msra.mxu0 %v3723_v21  ;;  %v683_v21 = vcombine.high %v18_v18, %v18_v18  ;;  %v698_v23 = vcombine.high %v690_v19, %v690_v19 }
  0xa9   :  { %3426 = vmatprep.subr.bf16.mxu0 %v3725_v24  ;;  %3447 = vmatpush3.bf16.msra.mxu1 %v3724_v22  ;;  %v3781_v22 = vld [vmem:[%s4668_s1 + $0x6b8] sm:$0xff]   ;;  %v706_v24 = vrot.slane %v690_v19, %v3926_v35 }
  0xaa   :  { %3448 = vmatprep.subr.bf16.mxu1 %v3726_v25  ;;  %v3783_v25 = vld [vmem:[%s4668_s1 + $0x7c0] sm:$0xff]  }
  0xac   :  { %3427 = vmatpush3.bf16.msra.mxu0 %v3727_v26  ;;  %v4564_v26 = vrot.slane %v683_v21, %v3926_v35 }
  0xad   :  { %3428 = vmatprep.subr.bf16.mxu0 %v3729_v28  ;;  %3449 = vmatpush3.bf16.msra.mxu1 %v3728_v27  ;;  %v720_v27 = vrot.slane %v698_v23, %v3926_v35  ;;  %v3784_v28 = vld [vmem:[%s4668_s1 + $0x700] sm:$0xff]  }
  0xae   :  { %3450 = vmatprep.subr.bf16.mxu1 %v3730_v29  ;;  %v699_v29 = vcombine.high %v4564_v26, %v4564_v26 }
  0xb0   :  { %3429 = vmatpush3.bf16.msra.mxu0 %v3731_v30  ;;  %v728_v30 = vcombine.high %v706_v24, %v706_v24 }
  0xb1   :  { %3430 = vmatprep.subr.bf16.mxu0 %v3733_v32  ;;  %3451 = vmatpush3.bf16.msra.mxu1 %v3732_v31  ;;  %v3786_v31 = vld [vmem:[%s4668_s1 + $0x748] sm:$0xff]   ;;  %v730_v32 = vcombine.high %v720_v27, %v720_v27 }
  0xb2   :  { %3452 = vmatprep.subr.bf16.mxu1 %v3734_v33  ;;  %v3785_v33 = vld [vmem:[%s4668_s1 + $0x780] sm:$0xff]  }
  0xb4   :  { %3431 = vmatpush3.bf16.msra.mxu0 %v3735_v34  ;;  %v727_v34 = vrot.slane %v699_v29, %v3926_v35 }
  0xb5   :  { %3432 = vmatprep.subr.bf16.mxu0 %v3737_v37  ;;  %3453 = vmatpush3.bf16.msra.mxu1 %v3736_v36  ;;  %v3787_v36 = vld [vmem:[%s4668_s1 + $0x7c8] sm:$0xff]  }
  0xb6   :  { %3454 = vmatprep.subr.bf16.mxu1 %v3738_v38  ;;  %v3788_v37 = vld [vmem:[%s4668_s1 + $0x708] sm:$0xff]   ;;  %v731_v38 = vcombine.high %v727_v34, %v727_v34 }
  0xb8   :  { %3433 = vmatpush3.bf16.msra.mxu0 %v3739_v39  ;;  %v3790_v39 = vld [vmem:[%s4668_s1 + $0x750] sm:$0xff]  }
  0xb9   :  { %3434 = vmatprep.subr.bf16.mxu0 %v3741_v41  ;;  %3455 = vmatpush3.bf16.msra.mxu1 %v3740_v40  ;;  %v3789_v40 = vld [vmem:[%s4668_s1 + $0x788] sm:$0xff]   ;;  %v3791_v41 = vld [vmem:[%s4668_s1 + $0x7d0] sm:$0xff]  }
  0xba   :  { %3456 = vmatprep.subr.bf16.mxu1 %v3742_v42  ;;  %v3792_v42 = vld [vmem:[%s4668_s1 + $0x710] sm:$0xff]  }
  0xbc   :  { %3435 = vmatpush3.bf16.msra.mxu0 %v3743_v43  ;;  %v3794_v43 = vld [vmem:[%s4668_s1 + $0x758] sm:$0xff]  }
  0xbd   :  { %3436 = vmatprep.subr.bf16.mxu0 %v3745_v45  ;;  %3457 = vmatpush3.bf16.msra.mxu1 %v3744_v44  ;;  %v3793_v44 = vld [vmem:[%s4668_s1 + $0x790] sm:$0xff]   ;;  %v3795_v45 = vld [vmem:[%s4668_s1 + $0x7d8] sm:$0xff]  }
  0xbe   :  { %3458 = vmatprep.subr.bf16.mxu1 %v3746_v46  ;;  %v3796_v46 = vld [vmem:[%s4668_s1 + $0x718] sm:$0xff]  }
  0xc0   :  { %3437 = vmatpush3.bf16.msra.mxu0 %v3747_v47  ;;  %v3798_v47 = vld [vmem:[%s4668_s1 + $0x760] sm:$0xff]  }
  0xc1   :  { %3466 = vmatprep.subr.bf16.mxu0 %v3750_v50  ;;  %3459 = vmatpush3.bf16.msra.mxu1 %v3748_v48  ;;  %v3797_v48 = vld [vmem:[%s4668_s1 + $0x798] sm:$0xff]   ;;  %v3800_v50 = vld [vmem:[%s4668_s1 + $0x720] sm:$0xff]  }
  0xc2   :  { %3488 = vmatprep.subr.bf16.mxu1 %v3751_v51  ;;  %v3802_v51 = vld [vmem:[%s4668_s1 + $0x768] sm:$0xff]  }
  0xc3   :  { %2733 = vmatmul.mubr.bf16.vlgmr.msra.gmra.mrb[20].mxu0 %v664_v49  ;;  %v3799_v49 = vld [vmem:[%s4668_s1 + $0x7e0] sm:$0xff]  }
  0xc4   :  { %3467 = vmatpush3.bf16.msra.mxu0 %v3752_v52  ;;  %2773 = vmatmul.mubr.bf16.vlgmr.msra.gmra.mrb[20].mxu1 %v680_v54  ;;  %v3801_v52 = vld [vmem:[%s4668_s1 + $0x7a0] sm:$0xff]  }
  0xc5   :  { %3468 = vmatprep.subr.bf16.mxu0 %v3754_v55  ;;  %3489 = vmatpush3.bf16.msra.mxu1 %v3753_v53  ;;  %v3803_v53 = vld [vmem:[%s4668_s1 + $0x7e8] sm:$0xff]   ;;  %v531_v54 = vld [vmem:[%s4670_s2] sm:$0x1] }
  0xc6   :  { %3490 = vmatprep.subr.bf16.mxu1 %v3755_v56  ;;  %2812 = vmatprep.mubr.bf16.mxu0 %v720_v27  ;;  %v3804_v55 = vld [vmem:[%s4668_s1 + $0x728] sm:$0xff]  }
  0xc7   :  { %2852 = vmatprep.mubr.bf16.mxu1 %v730_v32 }
  0xc8   :  { %3469 = vmatpush3.bf16.msra.mxu0 %v3756_v57  ;;  %v3806_v57 = vld [vmem:[%s4668_s1 + $0x770] sm:$0xff]  }
  0xc9   :  { %3470 = vmatprep.subr.bf16.mxu0 %v3758_v59  ;;  %3491 = vmatpush3.bf16.msra.mxu1 %v3757_v58  ;;  %v3805_v59 = vld [vmem:[%s4668_s1 + $0x7a8] sm:$0xff]  }
  0xca   :  { %3492 = vmatprep.subr.bf16.mxu1 %v3759_v60 }
  0xcc   :  { %3471 = vmatpush3.bf16.msra.mxu0 %v3760_v61 }
  0xcd   :  { %3472 = vmatprep.subr.bf16.mxu0 %v3762_v63  ;;  %3493 = vmatpush3.bf16.msra.mxu1 %v3761_v62  ;;  %v3807_v63 = vld [vmem:[%s4668_s1 + $0x7f0] sm:$0xff]  }
  0xce   :  { %3494 = vmatprep.subr.bf16.mxu1 %v3763_v0  ;;  %v3808_v0 = vld [vmem:[%s4668_s1 + $0x730] sm:$0xff]  }
  0xd0   :  { %3473 = vmatpush3.bf16.msra.mxu0 %v3764_v1 }
  0xd1   :  { %3474 = vmatprep.subr.bf16.mxu0 %v3766_v3  ;;  %3495 = vmatpush3.bf16.msra.mxu1 %v3765_v2 }
  0xd2   :  { %3496 = vmatprep.subr.bf16.mxu1 %v3767_v4 }
  0xd4   :  { %3475 = vmatpush3.bf16.msra.mxu0 %v3768_v5 }
  0xd5   :  { %3476 = vmatprep.subr.bf16.mxu0 %v3770_v7  ;;  %3497 = vmatpush3.bf16.msra.mxu1 %v3769_v6  ;;  %v3810_v6 = vld [vmem:[%s4668_s1 + $0x778] sm:$0xff]  }
  0xd6   :  { %3498 = vmatprep.subr.bf16.mxu1 %v3771_v8  ;;  %v3809_v8 = vld [vmem:[%s4668_s1 + $0x7b0] sm:$0xff]  }
  0xd8   :  { %3477 = vmatpush3.bf16.msra.mxu0 %v3772_v9 }
  0xd9   :  { %3478 = vmatprep.subr.bf16.mxu0 %v3774_v11  ;;  %3499 = vmatpush3.bf16.msra.mxu1 %v3773_v10  ;;  %v3811_v10 = vld [vmem:[%s4668_s1 + $0x7f8] sm:$0xff]  }
  0xda   :  { %3500 = vmatprep.subr.bf16.mxu1 %v3775_v12  ;;  %v3812_v11 = vld [vmem:[%s4668_s1 + $0x738] sm:$0xff]   ;;  %v713_v12 = vrot.slane %v4564_v26, %v3926_v35 }
  0xdc   :  { %3479 = vmatpush3.bf16.msra.mxu0 %v3776_v13  ;;  %v3813_v13 = vld [vmem:[%s4668_s1 + $0x7b8] sm:$0xff]  }
  0xdd   :  { %3480 = vmatprep.subr.bf16.mxu0 %v3778_v15  ;;  %3501 = vmatpush3.bf16.msra.mxu1 %v3777_v14  ;;  %v729_v14 = vcombine.high %v713_v12, %v713_v12 }
  0xde   :  { %3502 = vmatprep.subr.bf16.mxu1 %v3779_v16 }
  0xe0   :  { %3481 = vmatpush3.bf16.msra.mxu0 %v3780_v17 }
  0xe1   :  { %3510 = vmatprep.subr.bf16.mxu0 %v3782_v20  ;;  %3503 = vmatpush3.bf16.msra.mxu1 %v3781_v22 }
  0xe2   :  { %3532 = vmatprep.subr.bf16.mxu1 %v3783_v25 }
  0xe3   :  { %2813 = vmatmul.mubr.bf16.vlgmr.msra.gmra.mrb[24].mxu0 %v706_v24 }
  0xe4   :  { %3511 = vmatpush3.bf16.msra.mxu0 %v3784_v28  ;;  %2853 = vmatmul.mubr.bf16.vlgmr.msra.gmra.mrb[24].mxu1 %v728_v30 }
  0xe5   :  { %3512 = vmatprep.subr.bf16.mxu0 %v3786_v31  ;;  %3533 = vmatpush3.bf16.msra.mxu1 %v3785_v33 }
  0xe6   :  { %2892 = vmatprep.mubr.bf16.mxu0 %v727_v34  ;;  %3534 = vmatprep.subr.bf16.mxu1 %v3787_v36 }
  0xe7   :  { %2932 = vmatprep.mubr.bf16.mxu1 %v731_v38 }
  0xe8   :  { %3513 = vmatpush3.bf16.msra.mxu0 %v3788_v37 }
  0xe9   :  { %3514 = vmatprep.subr.bf16.mxu0 %v3790_v39  ;;  %3535 = vmatpush3.bf16.msra.mxu1 %v3789_v40 }
  0xea   :  { %3536 = vmatprep.subr.bf16.mxu1 %v3791_v41 }
  0xec   :  { %3515 = vmatpush3.bf16.msra.mxu0 %v3792_v42 }
  0xed   :  { %3516 = vmatprep.subr.bf16.mxu0 %v3794_v43  ;;  %3537 = vmatpush3.bf16.msra.mxu1 %v3793_v44 }
  0xee   :  { %3538 = vmatprep.subr.bf16.mxu1 %v3795_v45 }
  0xf0   :  { %3517 = vmatpush3.bf16.msra.mxu0 %v3796_v46 }
  0xf1   :  { %3518 = vmatprep.subr.bf16.mxu0 %v3798_v47  ;;  %3539 = vmatpush3.bf16.msra.mxu1 %v3797_v48 }
  0xf2   :  { %3540 = vmatprep.subr.bf16.mxu1 %v3799_v49 }
  0xf4   :  { %3519 = vmatpush3.bf16.msra.mxu0 %v3800_v50 }
  0xf5   :  { %3520 = vmatprep.subr.bf16.mxu0 %v3802_v51  ;;  %3541 = vmatpush3.bf16.msra.mxu1 %v3801_v52 }
  0xf6   :  { %v3218_v56 = vpop.f32.mrb[0].mxu0  ;;  %3542 = vmatprep.subr.bf16.mxu1 %v3803_v53 }
  0xf7   :  { %v3219_v58 = vpop.f32.mrb[1].mxu0  ;;  %v3240_v60 = vpop.f32.mrb[0].mxu1 }
  0xf8   :  { %v3220_v61 = vadd.f32 %v3219_v58, %v3218_v56  ;;  %v3221_v62 = vpop.f32.mrb[2].mxu0  ;;  %v3241_v1 = vpop.f32.mrb[1].mxu1  ;;  %3521 = vmatpush3.bf16.msra.mxu0 %v3804_v55 }
  0xf9   :  { %v3222_v2 = vpop.f32.mrb[3].mxu0  ;;  %v3242_v4 = vadd.f32 %v3241_v1, %v3240_v60  ;;  %v3243_v5 = vpop.f32.mrb[2].mxu1  ;;  %3522 = vmatprep.subr.bf16.mxu0 %v3806_v57  ;;  %3543 = vmatpush3.bf16.msra.mxu1 %v3805_v59 }
  0xfa   :  { %v2335_v3 = vadd.f32 %v3220_v61, %v531_v54  ;;  %v3244_v7 = vpop.f32.mrb[3].mxu1  ;;  %3544 = vmatprep.subr.bf16.mxu1 %v3807_v63 }
  0xfc   :  { %v2375_v9 = vadd.f32 %v3242_v4, %v2335_v3  ;;  %3523 = vmatpush3.bf16.msra.mxu0 %v3808_v0 }
  0xfd   :  { %3524 = vmatprep.subr.bf16.mxu0 %v3810_v6  ;;  %3545 = vmatpush3.bf16.msra.mxu1 %v3809_v8 }
  0xfe   :  { %3546 = vmatprep.subr.bf16.mxu1 %v3811_v10 }
 0x100   :  { %3525 = vmatpush3.bf16.msra.mxu0 %v3812_v11 }
 0x101   :  { %3547 = vmatpush3.bf16.msra.mxu1 %v3813_v13 }
 0x103   :  { %2893 = vmatmul.mubr.bf16.vlgmr.msra.gmra.mrb[28].mxu0 %v713_v12 }
 0x104   :  { %2933 = vmatmul.mubr.bf16.vlgmr.msra.gmra.mrb[28].mxu1 %v729_v14 }
 0x116   :  { %v3262_v15 = vpop.f32.mrb[4].mxu0 }
 0x117   :  { %v3263_v16 = vpop.f32.mrb[5].mxu0  ;;  %v3284_v17 = vpop.f32.mrb[4].mxu1 }
 0x118   :  { %v3264_v18 = vadd.f32 %v3263_v16, %v3262_v15  ;;  %v3265_v19 = vpop.f32.mrb[6].mxu0  ;;  %v3285_v20 = vpop.f32.mrb[5].mxu1 }
 0x119   :  { %v3266_v21 = vpop.f32.mrb[7].mxu0  ;;  %v3286_v35 = vadd.f32 %v3285_v20, %v3284_v17  ;;  %v3287_v23 = vpop.f32.mrb[6].mxu1 }
 0x11a   :  { %v2415_v22 = vadd.f32 %v3264_v18, %v2375_v9  ;;  %v3288_v24 = vpop.f32.mrb[7].mxu1 }
 0x11c   :  { %v2455_v25 = vadd.f32 %v3286_v35, %v2415_v22 }
 0x136   :  { %v3306_v26 = vpop.f32.mrb[8].mxu0 }
 0x137   :  { %v3307_v27 = vpop.f32.mrb[9].mxu0  ;;  %v3328_v28 = vpop.f32.mrb[8].mxu1 }
 0x138   :  { %v3308_v29 = vadd.f32 %v3307_v27, %v3306_v26  ;;  %v3309_v30 = vpop.f32.mrb[10].mxu0  ;;  %v3329_v31 = vpop.f32.mrb[9].mxu1 }
 0x139   :  { %v3310_v32 = vpop.f32.mrb[11].mxu0  ;;  %v3330_v34 = vadd.f32 %v3329_v31, %v3328_v28  ;;  %v3331_v36 = vpop.f32.mrb[10].mxu1 }
 0x13a   :  { %v2495_v33 = vadd.f32 %v3308_v29, %v2455_v25  ;;  %v3332_v37 = vpop.f32.mrb[11].mxu1 }
 0x13c   :  { %v2535_v38 = vadd.f32 %v3330_v34, %v2495_v33 }
 0x156   :  { %v3350_v39 = vpop.f32.mrb[12].mxu0 }
 0x157   :  { %v3351_v40 = vpop.f32.mrb[13].mxu0  ;;  %v3372_v41 = vpop.f32.mrb[12].mxu1 }
 0x158   :  { %v3352_v42 = vadd.f32 %v3351_v40, %v3350_v39  ;;  %v3353_v43 = vpop.f32.mrb[14].mxu0  ;;  %v3373_v44 = vpop.f32.mrb[13].mxu1 }
 0x159   :  { %v3354_v45 = vpop.f32.mrb[15].mxu0  ;;  %v3374_v47 = vadd.f32 %v3373_v44, %v3372_v41  ;;  %v3375_v48 = vpop.f32.mrb[14].mxu1 }
 0x15a   :  { %v2575_v46 = vadd.f32 %v3352_v42, %v2535_v38  ;;  %v3376_v49 = vpop.f32.mrb[15].mxu1 }
 0x15c   :  { %v2615_v50 = vadd.f32 %v3374_v47, %v2575_v46 }
 0x176   :  { %v3394_v51 = vpop.f32.mrb[16].mxu0 }
 0x177   :  { %v3395_v52 = vpop.f32.mrb[17].mxu0  ;;  %v3416_v53 = vpop.f32.mrb[16].mxu1 }
 0x178   :  { %v3396_v54 = vadd.f32 %v3395_v52, %v3394_v51  ;;  %v3397_v55 = vpop.f32.mrb[18].mxu0  ;;  %v3417_v56 = vpop.f32.mrb[17].mxu1 }
 0x179   :  { %v3398_v57 = vpop.f32.mrb[19].mxu0  ;;  %v3418_v59 = vadd.f32 %v3417_v56, %v3416_v53  ;;  %v3419_v60 = vpop.f32.mrb[18].mxu1 }
 0x17a   :  { %v2655_v58 = vadd.f32 %v3396_v54, %v2615_v50  ;;  %v3420_v61 = vpop.f32.mrb[19].mxu1 }
 0x17c   :  { %v2695_v62 = vadd.f32 %v3418_v59, %v2655_v58 }
 0x196   :  { %v3438_v63 = vpop.f32.mrb[20].mxu0 }
 0x197   :  { %v3439_v0 = vpop.f32.mrb[21].mxu0  ;;  %v3460_v1 = vpop.f32.mrb[20].mxu1 }
 0x198   :  { %v3440_v2 = vadd.f32 %v3439_v0, %v3438_v63  ;;  %v3441_v3 = vpop.f32.mrb[22].mxu0  ;;  %v3461_v4 = vpop.f32.mrb[21].mxu1 }
 0x199   :  { %v3442_v5 = vpop.f32.mrb[23].mxu0  ;;  %v3462_v7 = vadd.f32 %v3461_v4, %v3460_v1  ;;  %v3463_v8 = vpop.f32.mrb[22].mxu1 }
 0x19a   :  { %v2735_v6 = vadd.f32 %v3440_v2, %v2695_v62  ;;  %v3464_v9 = vpop.f32.mrb[23].mxu1 }
 0x19c   :  { %v2775_v10 = vadd.f32 %v3462_v7, %v2735_v6 }
 0x1b6   :  { %v3482_v11 = vpop.f32.mrb[24].mxu0 }
 0x1b7   :  { %v3483_v12 = vpop.f32.mrb[25].mxu0  ;;  %v3504_v13 = vpop.f32.mrb[24].mxu1 }
 0x1b8   :  { %v3484_v14 = vadd.f32 %v3483_v12, %v3482_v11  ;;  %v3485_v15 = vpop.f32.mrb[26].mxu0  ;;  %v3505_v16 = vpop.f32.mrb[25].mxu1 }
 0x1b9   :  { %v3486_v17 = vpop.f32.mrb[27].mxu0  ;;  %v3506_v19 = vadd.f32 %v3505_v16, %v3504_v13  ;;  %v3507_v20 = vpop.f32.mrb[26].mxu1 }
 0x1ba   :  { %v2815_v18 = vadd.f32 %v3484_v14, %v2775_v10  ;;  %v3508_v21 = vpop.f32.mrb[27].mxu1 }
 0x1bc   :  { %v2855_v22 = vadd.f32 %v3506_v19, %v2815_v18 }
 0x1d6   :  { %v3526_v35 = vpop.f32.mrb[28].mxu0 }
 0x1d7   :  { %v3527_v23 = vpop.f32.mrb[29].mxu0  ;;  %v3548_v24 = vpop.f32.mrb[28].mxu1 }
 0x1d8   :  { %v3528_v25 = vadd.f32 %v3527_v23, %v3526_v35  ;;  %v3529_v26 = vpop.f32.mrb[30].mxu0  ;;  %v3549_v27 = vpop.f32.mrb[29].mxu1 }
 0x1d9   :  { %v3530_v28 = vpop.f32.mrb[31].mxu0  ;;  %v3550_v30 = vadd.f32 %v3549_v27, %v3548_v24  ;;  %v3551_v31 = vpop.f32.mrb[30].mxu1 }
 0x1da   :  { %v2895_v29 = vadd.f32 %v3528_v25, %v2855_v22  ;;  %v3552_v32 = vpop.f32.mrb[31].mxu1 }
 0x1dc   :  { %v2935_v33 = vadd.f32 %v3550_v30, %v2895_v29 }
 0x1de   :  { %v2940_v34 = vmax.f32 %v2935_v33, 0.0 }
 0x1e0   :  { %2941 = vst [vmem:[%s4671_s3] sm:$0x1] %v2940_v34 }

// kernel: duat_forward.24
= control target key start
LH: loop header
LB: loop body
LE: loop exit
PB: predicated region body
PF: predicated region fallthrough
CT: control target
= control target key end

     0   :  { %v199_v0 = vmov 0.0   ;;  %vm200_vm0 = vmmov 0   ;;  %vm46_vm1 = vcmask 261120   ;;  %vm107_vm2 = vcmask 130048   ;;  %s252_s1 = inlined_call_operand.vmem [shape: bf16[32,16], index: 1, kind: input, shape index: {}]   ;;  %s253_s0 = inlined_call_operand.vmem [shape: f32[2,32], index: 0, kind: input, shape index: {}]   ;;  %s254_s3 = inlined_call_operand.vmem [shape: bf16[16,16], index: 3, kind: input, shape index: {}]   ;;  %s255_s2 = inlined_call_operand.vmem [shape: f32[1,16], index: 2, kind: input, shape index: {}]   ;;  %s256_s4 = inlined_call_operand.vmem [shape: f32[1,16], index: 4, kind: input, shape index: {}]   ;;  %s257_s5 = inlined_call_operand.vmem [shape: f32[2,16], index: 5, kind: output, shape index: {}]  }
   0x1   :  { %176 = vmatprep.subr.bf16.mxu0 %v199_v0  ;;  %v192_v1 = vld [vmem:[%s252_s1] sm:$0xff]   ;;  %180 = vmatprep.mubr.msk.bf16.mxu0 %vm200_vm0, %v199_v0  ;;  %v193_v2 = vld [vmem:[%s252_s1 + $0x8] sm:$0xff]   ;;  %vm157_vm3 = vcmask 123904  }
   0x2   :  { %184 = vmatprep.subr.bf16.mxu1 %v199_v0  ;;  %186 = vmatprep.mubr.msk.bf16.mxu1 %vm200_vm0, %v199_v0  ;;  %v21_v3 = vld [vmem:[%s253_s0] sm:$0x3] }
   0x3   :  { %177 = vmatpush3.bf16.msra.mxu0 %v192_v1  ;;  %v22_v4 = vpack.c.bf16 %v21_v3, %v21_v3  ;;  %v194_v5 = vld [vmem:[%s254_s3] sm:$0xff]  }
   0x4   :  { %178 = vmatprep.subr.bf16.mxu0 %v199_v0  ;;  %185 = vmatpush3.bf16.msra.mxu1 %v194_v5  ;;  %v163_v6 = vld [vmem:[%s255_s2] ss:$0 sm:$0xff] }
   0x5   :  { %v167_v14 = vld [vmem:[%s256_s4] ss:$0 sm:$0xff] }
   0x7   :  { %179 = vmatpush3.bf16.msra.mxu0 %v193_v2 }
   0xa   :  { %181 = vmatmul.mubr.msk.bf16.vlgmr.msra.gmra.mrb[0].mxu0 %vm46_vm1, %v22_v4 }
  0xdd   :  { %v84_v7 = vpop.f32.mrb[0].mxu0 }
  0xde   :  { %v85_v8 = vadd.f32 %v163_v6, %v84_v7  ;;  %v182_v9 = vpop.f32.mrb[1].mxu0 }
  0xdf   :  { %v87_v10 = vpop.f32.mrb[2].mxu0 }
  0xe0   :  { %v90_v11 = vmax.f32 %v85_v8, 0.0  ;;  %v183_v12 = vpop.f32.mrb[3].mxu0 }
  0xe2   :  { %v91_v13 = vpack.c.bf16 %v90_v11, %v90_v11 }
  0xe4   :  { %187 = vmatmul.mubr.msk.bf16.vlgmr.msra.gmra.mrb[0].mxu1 %vm107_vm2, %v91_v13 }
 0x1b7   :  { %v145_v15 = vpop.f32.mrb[0].mxu1 }
 0x1b8   :  { %v146_v16 = vadd.f32 %v167_v14, %v145_v15  ;;  %v188_v17 = vpop.f32.mrb[1].mxu1 }
 0x1b9   :  { %v148_v18 = vpop.f32.mrb[2].mxu1 }
 0x1ba   :  { %v170_v19 = vmul.f32 -1.442695, %v146_v16  ;;  %v189_v20 = vpop.f32.mrb[3].mxu1 }
 0x1bc   :  { %195 = vpow2.f32 %v170_v19 }
 0x1c6   :  { %v196_v21 = vpop.eup %195 }
 0x1c7   :  { %v154_v22 = vadd.f32 1.0, %v196_v21 }
 0x1c9   :  { %197 = vrcp.f32 %v154_v22 }
 0x1d3   :  { %v198_v23 = vpop.eup %197 }
 0x1d4   :  { %158 = vst.msk [vmem:[%s257_s5] sm:$0x3] %vm157_vm3, %v198_v23 }

// kernel: duat_forward.23
= control target key start
LH: loop header
LB: loop body
LE: loop exit
PB: predicated region body
PF: predicated region fallthrough
CT: control target
= control target key end

     0   :  { %s1894_s15 = smov 0   ;;  %s2161_s0 = inlined_call_operand.vmem [shape: bf16[2,6,6,32], index: 0, kind: input, shape index: {}]   ;;  %s2162_s1 = inlined_call_operand.vmem [shape: bf16[9,32,16], index: 1, kind: input, shape index: {}]   ;;  %s2163_s2 = inlined_call_operand.vmem [shape: f32[1,16], index: 2, kind: input, shape index: {}]   ;;  %s2164_s3 = inlined_call_operand.vmem [shape: bf16[2,16,16], index: 3, kind: output, shape index: {0}]   ;;  %s2165_s4 = inlined_call_operand.vmem [shape: f32[2,1,32], index: 4, kind: output, shape index: {1}]  }
   0x1 LB: > { %s1574_s16 = sadd.s32 4294967295, %s1864_s15   ;;  %p1578_p0 = scmp.ge.s32.totalorder %s1864_s15, 1  ;;  %s1864_s15 = sphi %s1894_s15, %s15_s15  }
   0x2   : > { %p165_p1 = scmp.lt.s32.totalorder %s1864_s15, 3 }
   0x4   : > { %p166_p2 = pnand %p1578_p0, %p165_p1 }
   0x5   : > { %v1828_v0 = vld [vmem:[%s2162_s1 + $0x10] sm:$0xff] (!%p166_p2)   ;;  %v1866_v1 = vmov (!%p166_p2), 0.0   ;;  %v1829_v2 = vld [vmem:[%s2162_s1] sm:$0xff] (!%p166_p2)   ;;  %v1830_v3 = vld [vmem:[%s2162_s1 + $0x18] sm:$0xff] (!%p166_p2)   ;;  %vm1867_vm0 = vmmov (!%p166_p2), 0   ;;  %p194_p3 = scmp.lt.s32.totalorder (!%p166_p2), %s1574_s16, 1  ;;  %v329_v4 = vlaneseq (!%p166_p2) }
   0x6   : > { %169 = sbr.rel (%p166_p2) target bundleno = 295 (0x127), region = 32  ;;  %1744 = vmatprep.subr.bf16.mxu0 (!%p166_p2), %v1866_v1  ;;  %1752 = vmatprep.subr.bf16.mxu1 (!%p166_p2), %v1866_v1  ;;  %v1831_v5 = vld [vmem:[%s2162_s1 + $0x8] sm:$0xff] (!%p166_p2)   ;;  %vm256_vm1 = vsmask.f32 (!%p166_p2), 1280  ;;  %vm257_vm2 = vsmask.f32 (!%p166_p2), 3336 }
   0x7   : > { %1745 = vmatpush3.bf16.msra.mxu0 (!%p166_p2), %v1828_v0  ;;  %1748 = vmatprep.mubr.msk.bf16.mxu0 (!%p166_p2), %vm1867_vm0, %v1866_v1  ;;  %v1868_v6 = vmov (!%p166_p2), 1983009808   ;;  %v330_v8 = vshrl.u32 (!%p166_p2), %v329_v4, 7  ;;  %vm259_vm3 = vsmask.f32 (!%p166_p2), 5392  ;;  %vm1458_vm5 = vcmask (!%p166_p2), 1042432   ;;  %vm1934_vm7 = vmor (!%p166_p2), %vm256_vm1, %vm257_vm2 }
   0x8   : > { %1753 = vmatpush3.bf16.msra.mxu1 (!%p166_p2), %v1829_v2  ;;  %1746 = vmatprep.subr.bf16.mxu0 (!%p166_p2), %v1866_v1  ;;  %v327_v7 = vunpack.c.l.s4 (!%p166_p2), %v1868_v6  ;;  %vm261_vm4 = vsmask.f32 (!%p166_p2), 7448  ;;  %vm1459_vm6 = vcmask (!%p166_p2), 1046532   ;;  %vm515_vm8 = vcmask (!%p166_p2), 1040384   ;;  %vm1947_vm10 = vmor (!%p166_p2), %vm1934_vm7, %vm259_vm3 }
   0x9   : > { %1754 = vmatprep.subr.bf16.mxu1 (!%p166_p2), %v1866_v1  ;;  %1756 = vmatprep.mubr.msk.bf16.mxu1 (!%p166_p2), %vm1867_vm0, %v1866_v1  ;;  %vm516_vm9 = vcmask (!%p166_p2), 1042434   ;;  %vm518_vm11 = vcmask (!%p166_p2), 1044484   ;;  %vm1956_vm12 = vmor (!%p166_p2), %vm1947_vm10, %vm261_vm4  ;;  %vm520_vm13 = vcmask (!%p166_p2), 1046534   ;;  %vm353_vm14 = vcmask (!%p166_p2), 261120  }
   0xa   : > { %v328_v9 = vunpack.c.0.s8 (!%p166_p2), %v327_v7  ;;  %vm1969_vm15 = vmor (!%p166_p2), %vm1458_vm5, %vm1459_vm6  ;;  %vm1492_vm4 = vcmask (!%p166_p2), 253952  }
   0xb   : > { %1747 = vmatpush3.bf16.msra.mxu0 (!%p166_p2), %v1830_v3  ;;  %vm1978_vm1 = vmor (!%p166_p2), %vm515_vm8, %vm516_vm9 }
   0xc   : > { %1755 = vmatpush3.bf16.msra.mxu1 (!%p166_p2), %v1831_v5  ;;  %1760 = vmatprep.subr.bf16.mxu0 (!%p166_p2), %v1866_v1  ;;  %v1941_v21 = vsub.s32 (!%p166_p2), %v328_v9, %v330_v8  ;;  %vm1996_vm2 = vmor (!%p166_p2), %vm1978_vm1, %vm518_vm11 }
   0xd   : > { %s2181_s16 = smov (!%p194_p3, %s1574_s16), 1  ;;  %1768 = vmatprep.subr.bf16.mxu1 %v1866_v1  ;;  %vm2021_vm3 = vmor %vm1996_vm2, %vm520_vm13 }
   0xe   : > { %s1816_s25 = smul.u32 24, %s2181_s16  ;;  %s1714_s12 = sshll.u32 %s2181_s16, 3 }
   0xf   : > { %s203_s17 = scalar_lea.vmem %s2164_s3, %s1714_s12 }
  0x10   : > { %s1929_s28 = scalar_lea.vmem %s2161_s0, %s1816_s25  ;;  %s206_s25 = scalar_lea.vmem %s2165_s4, %s2181_s16 }
  0x11   : > { %v1582_v10 = vld.sshfl [vmem:[%s1929_s28] sm:$0x13 pattern:$0x76325410]  ;;  %v1704_v12 = vld [vmem:[%s1929_s28 + $0x4] sm:$0x7] }
  0x12   : > { %v1583_v13 = vld.sshfl [vmem:[%s1929_s28 + $0x4] sm:$0x13 pattern:$0x76325410]  ;;  %v231_v14 = vcombine.high %v1582_v10, %v1582_v10  ;;  %v264_v15 = vshrl.u32 %v1582_v10, 16  ;;  %v267_v16 = vshll.u32 %v1582_v10, 16  ;;  %v1446_v27 = vunpack.c.l.bf16 %v1704_v12 }
  0x13   : > { %v1584_v17 = vld.sshfl [vmem:[%s1929_s28 + $0x8] sm:$0x13 pattern:$0x76325410]  ;;  %v239_v18 = vcombine.high %v1583_v13, %v1583_v13  ;;  %v278_v19 = vshrl.u32 %v1583_v13, 16  ;;  %v281_v20 = vshll.u32 %v1583_v13, 16 }
  0x14   : > { %v1585_v22 = vld.sshfl [vmem:[%s1929_s28 + $0xc] sm:$0x13 pattern:$0x76325410]  ;;  %v247_v23 = vcombine.high %v1584_v17, %v1584_v17  ;;  %v266_v25 = vrot.slane %v264_v15, 6  ;;  %v269_v26 = vrot.slane %v267_v16, 7  ;;  %v1454_v3 = vcombine.high %v1446_v27, %v1446_v27 }
  0x15   : > { %v255_v28 = vcombine.high %v1585_v22, %v1585_v22  ;;  %v273_v29 = vshll.u32 %v231_v14, 16  ;;  %v280_v30 = vrot.slane %v278_v19, 6  ;;  %v283_v31 = vrot.slane %v281_v20, 7  ;;  %v1705_v32 = vld [vmem:[%s1929_s28 + $0x8] sm:$0x7] }
  0x16   : > { %v270_v33 = vor.u32 %v269_v26, %v266_v25  ;;  %v287_v34 = vshll.u32 %v239_v18, 16  ;;  %v292_v35 = vshrl.u32 %v1584_v17, 16  ;;  %v295_v36 = vshll.u32 %v1584_v17, 16  ;;  %v1706_v37 = vld [vmem:[%s1929_s28 + $0xc] sm:$0x7] }
  0x17   : > { %v275_v39 = vrot.slane %v273_v29, 7  ;;  %v284_v40 = vor.u32 %v283_v31, %v280_v30  ;;  %v301_v41 = vshll.u32 %v247_v23, 16  ;;  %v306_v42 = vshrl.u32 %v1585_v22, 16  ;;  %v1707_v43 = vld [vmem:[%s1929_s28 + $0x10] sm:$0x7] }
  0x18   : > { %v271_v44 = vrot.slane %v270_v33, 2  ;;  %v289_v45 = vrot.slane %v287_v34, 7  ;;  %v294_v46 = vrot.slane %v292_v35, 6  ;;  %v297_v47 = vrot.slane %v295_v36, 7  ;;  %v1835_v23 = vld [vmem:[%s2162_s1 + $0x30] sm:$0xff]   ;;  %v1834_v35 = vld [vmem:[%s2162_s1 + $0x20] sm:$0xff]  }
  0x19   : > { %v285_v48 = vrot.slane %v284_v40, 2  ;;  %v303_v49 = vrot.slane %v301_v41, 7  ;;  %v308_v50 = vrot.slane %v306_v42, 6  ;;  %v309_v51 = vshll.u32 %v1585_v22, 16 }
  0x1a   : > { %v276_v52 = vsel %vm1956_vm12, %v271_v44, %v275_v39  ;;  %v298_v53 = vor.u32 %v297_v47, %v294_v46  ;;  %v315_v54 = vshll.u32 %v255_v28, 16  ;;  %v1447_v55 = vunpack.c.l.bf16 %v1705_v32  ;;  %v1852_v61 = vld.sshfl [vmem:[%s1929_s28] sm:$0xf pattern:$0x76325410] }
  0x1b   : > { %v1965_v56 = vsel %vm1956_vm12, %v285_v48, %v289_v45  ;;  %v311_v57 = vrot.slane %v309_v51, 7  ;;  %v1448_v58 = vunpack.c.l.bf16 %v1706_v37  ;;  %v1449_v59 = vunpack.c.l.bf16 %v1707_v43  ;;  %v1853_v62 = vld.sshfl [vmem:[%s1929_s28 + $0x8] sm:$0xf pattern:$0x76325410]  ;;  %v1837_v43 = vld [vmem:[%s2162_s1 + $0x38] sm:$0xff]  }
  0x1c   : > { %v299_v63 = vrot.slane %v298_v53, 2  ;;  %v317_v0 = vrot.slane %v315_v54, 7  ;;  %v324_v2 = vcombine.low %v276_v52, %v1965_v56  ;;  %v1455_v6 = vcombine.high %v1447_v55, %v1447_v55  ;;  %v1596_v13 = vld.sshfl [vmem:[%s1929_s28] sm:$0x12 pattern:$0x76325410] }
  0x1d   : > { %v312_v5 = vor.u32 %v311_v57, %v308_v50  ;;  %v1456_v7 = vcombine.high %v1448_v58, %v1448_v58  ;;  %v1457_v8 = vcombine.high %v1449_v59, %v1449_v59  ;;  %v1708_v11 = vrot.slane %v1446_v27, 9  ;;  %v1597_v27 = vld.sshfl [vmem:[%s1929_s28 + $0x4] sm:$0x12 pattern:$0x76325410] }
  0x1e   : > { %v1984_v9 = vsel %vm1956_vm12, %v299_v63, %v303_v49  ;;  %v332_v10 = vrot.slane %v324_v2, %v1941_v21  ;;  %v1463_v12 = vrot.slane %v1454_v3, 5  ;;  %v1709_v15 = vrot.slane %v1447_v55, 9  ;;  %v1598_v32 = vld.sshfl [vmem:[%s1929_s28 + $0x8] sm:$0x12 pattern:$0x76325410] }
  0x1f   : > { %v313_v14 = vrot.slane %v312_v5, 2  ;;  %v1467_v16 = vrot.slane %v1455_v6, 5  ;;  %v1710_v17 = vrot.slane %v1448_v58, 9  ;;  %v1471_v19 = vrot.slane %v1456_v7, 5 }
  0x20   : > { %v1464_v18 = vsel %vm1969_vm15, %v1708_v11, %v1463_v12  ;;  %v1711_v20 = vrot.slane %v1449_v59, 9  ;;  %v1475_v22 = vrot.slane %v1457_v8, 5  ;;  %v418_v34 = vcombine.low %v1852_v61, %v1853_v62  ;;  %v1599_v36 = vld.sshfl [vmem:[%s1929_s28 + $0xc] sm:$0x12 pattern:$0x76325410] }
  0x21   : > { %v2002_v25 = vsel %vm1956_vm12, %v313_v14, %v317_v0  ;;  %v1468_v26 = vsel %vm1969_vm15, %v1709_v15, %v1467_v16  ;;  %v1472_v29 = vsel %vm1969_vm15, %v1710_v17, %v1471_v19  ;;  %v490_v37 = vcombine.high %v1596_v13, %v1596_v13  ;;  %v1854_v46 = vld.sshfl [vmem:[%s1929_s28 + $0x4] sm:$0xf pattern:$0x76325410]  ;;  %v1841_v8 = vld [vmem:[%s2162_s1 + $0x50] sm:$0xff]  }
  0x22   : > { %v325_v28 = vcombine.low %v1984_v9, %v2002_v25  ;;  %v1476_v30 = vsel %vm1969_vm15, %v1711_v20, %v1475_v22  ;;  %v1477_v31 = vcombine.low %v1464_v18, %v1468_v26  ;;  %v498_v39 = vcombine.high %v1597_v27, %v1597_v27  ;;  %v1855_v47 = vld.sshfl [vmem:[%s1929_s28 + $0xc] sm:$0xf pattern:$0x76325410]  ;;  %1757 = vmatmul.mubr.msk.bf16.vlgmr.msra.gmra.mrb[0].mxu1 %vm353_vm14, %v418_v34  ;;  %v1838_v19 = vld [vmem:[%s2162_s1 + $0x40] sm:$0xff]  }
  0x23   : > { %v1478_v33 = vcombine.low %v1472_v29, %v1476_v30  ;;  %v506_v44 = vcombine.high %v1598_v32, %v1598_v32  ;;  %v514_v45 = vcombine.high %v1599_v36, %v1599_v36  ;;  %v1600_v49 = vrot.slane %v1596_v13, 9  ;;  %1769 = vmatpush3.bf16.msra.mxu1 %v1835_v23  ;;  %1772 = vmatprep.mubr.msk.bf16.mxu1 %vm1867_vm0, %v1866_v1  ;;  %v1836_v62 = vld [vmem:[%s2162_s1 + $0x28] sm:$0xff]   ;;  %v1629_v4 = vld.sshfl [vmem:[%s1929_s28 + $0x10] sm:$0x13 pattern:$0x76325410] }
  0x24   : > { %v2026_v41 = vrot.slane %v325_v28, %v1941_v21  ;;  %v1481_v42 = vsel %vm353_vm14, %v1477_v31, 0.0  ;;  %v524_v50 = vrot.slane %v490_v37, 7  ;;  %v1601_v51 = vrot.slane %v1597_v27, 9  ;;  %1770 = vmatprep.subr.bf16.mxu1 %v1866_v1  ;;  %v1843_v27 = vld [vmem:[%s2162_s1 + $0x58] sm:$0xff]  }
  0x25   : > { %v1482_v48 = vsel %vm353_vm14, %v1478_v33, 0.0  ;;  %v528_v54 = vrot.slane %v498_v39, 7  ;;  %v1602_v55 = vrot.slane %v1598_v32, 9  ;;  %v532_v58 = vrot.slane %v506_v44, 7  ;;  %v1845_v39 = vld [vmem:[%s2162_s1 + $0x70] sm:$0xff]  }
  0x26   : > { %v340_v52 = vcombine.low %v332_v10, %v2026_v41  ;;  %v1483_v53 = vadd.f32 %v1482_v48, %v1481_v42  ;;  %v525_v57 = vsel %vm2021_vm3, %v1600_v49, %v524_v50  ;;  %v1603_v59 = vrot.slane %v1599_v36, 9  ;;  %v1644_v14 = vld.sshfl [vmem:[%s1929_s28 + $0x10] sm:$0x12 pattern:$0x76325410] }
  0x27   : > { %v536_v60 = vrot.slane %v514_v45, 7  ;;  %v529_v63 = vsel %vm2021_vm3, %v1601_v51, %v528_v54  ;;  %v533_v0 = vsel %vm2021_vm3, %v1602_v55, %v532_v58  ;;  %1771 = vmatpush3.bf16.msra.mxu1 %v1837_v43  ;;  %v648_v7 = vcombine.low %v1854_v46, %v1855_v47  ;;  %v1674_v45 = vld.sshfl [vmem:[%s1929_s28 + $0x14] sm:$0x13 pattern:$0x76325410] }
  0x28   : > { %1749 = vmatmul.mubr.msk.bf16.vlgmr.msra.gmra.mrb[0].mxu0 %vm353_vm14, %v340_v52  ;;  %v1484_v61 = vrot.slane %v1483_v53, 4  ;;  %v543_v3 = vcombine.low %v525_v57, %v529_v63  ;;  %v790_v10 = vshrl.u32 %v1629_v4, 16  ;;  %1784 = vmatprep.subr.bf16.mxu1 %v1866_v1  ;;  %v746_v12 = vcombine.high %v1629_v4, %v1629_v4  ;;  %v1689_v50 = vld.sshfl [vmem:[%s1929_s28 + $0x14] sm:$0x12 pattern:$0x76325410] }
  0x29   : > { %1761 = vmatpush3.bf16.msra.mxu0 %v1834_v35  ;;  %1764 = vmatprep.mubr.msk.bf16.mxu0 %vm1867_vm0, %v1866_v1  ;;  %v537_v2 = vsel %vm2021_vm3, %v1603_v59, %v536_v60  ;;  %v793_v13 = vshll.u32 %v1629_v4, 16  ;;  %v922_v18 = vcombine.high %v1644_v14, %v1644_v14  ;;  %v1648_v23 = vrot.slane %v1644_v14, 9  ;;  %v1842_v35 = vld [vmem:[%s2162_s1 + $0x48] sm:$0xff]  }
  0x2a   : > { %v1485_v5 = vadd.f32 %v1484_v61, %v1483_v53  ;;  %1762 = vmatprep.subr.bf16.mxu0 %v1866_v1  ;;  %v544_v6 = vcombine.low %v533_v0, %v537_v2  ;;  %v551_v11 = vrot.slane %v543_v3, %v1941_v21  ;;  %v792_v17 = vrot.slane %v790_v10, 6  ;;  %1773 = vmatmul.mubr.msk.bf16.vlgmr.msra.gmra.mrb[4].mxu1 %vm353_vm14, %v648_v7  ;;  %v1856_v55 = vld.sshfl [vmem:[%s1929_s28 + $0x8] sm:$0xf pattern:$0x76325410] }
  0x2b   : > { %v795_v20 = vrot.slane %v793_v13, 7  ;;  %v799_v22 = vshll.u32 %v746_v12, 16  ;;  %1785 = vmatpush3.bf16.msra.mxu1 %v1841_v8  ;;  %v937_v28 = vrot.slane %v922_v18, 7  ;;  %v944_v29 = vcombine.low %v529_v63, %v533_v0  ;;  %1788 = vmatprep.mubr.msk.bf16.mxu1 %vm1867_vm0, %v1866_v1  ;;  %v1847_v0 = vld [vmem:[%s2162_s1 + $0x78] sm:$0xff]   ;;  %v1846_v4 = vld [vmem:[%s2162_s1 + $0x68] sm:$0xff]   ;;  %v1850_v12 = vld [vmem:[%s2162_s1 + $0x80] sm:$0xff]  }
  0x2c   : > { %v1486_v15 = vrot.slane %v1485_v5, 2  ;;  %v2063_v16 = vrot.slane %v544_v6, %v1941_v21  ;;  %1786 = vmatprep.subr.bf16.mxu1 %v1866_v1  ;;  %v808_v32 = vcombine.low %v1965_v56, %v1984_v9  ;;  %v1147_v48 = vcombine.high %v1674_v45, %v1674_v45  ;;  %v1857_v57 = vld.sshfl [vmem:[%s1929_s28 + $0x10] sm:$0xf pattern:$0x76325410]  ;;  %v1851_v14 = vld [vmem:[%s2162_s1 + $0x88] sm:$0xff]  }
  0x2d   : > { %1763 = vmatpush3.bf16.msra.mxu0 %v1836_v62  ;;  %v796_v30 = vor.u32 %v795_v20, %v792_v17  ;;  %v801_v31 = vrot.slane %v799_v22, 7  ;;  %v2082_v34 = vsel %vm2021_vm3, %v1648_v23, %v937_v28  ;;  %v952_v36 = vrot.slane %v944_v29, %v1941_v21 }
  0x2e   : > { %v1487_v24 = vadd.f32 %v1486_v15, %v1485_v5  ;;  %1776 = vmatprep.subr.bf16.mxu0 %v1866_v1  ;;  %v559_v26 = vcombine.low %v551_v11, %v2063_v16  ;;  %v945_v9 = vcombine.low %v537_v2, %v2082_v34  ;;  %v816_v43 = vrot.slane %v808_v32, %v1941_v21 }
  0x2f   : > { %v797_v56 = vrot.slane %v796_v30, 2  ;;  %1787 = vmatpush3.bf16.msra.mxu1 %v1843_v27  ;;  %v1191_v49 = vshrl.u32 %v1674_v45, 16  ;;  %v1194_v52 = vshll.u32 %v1674_v45, 16  ;;  %v1323_v53 = vcombine.high %v1689_v50, %v1689_v50 }
  0x30   : > { %v1488_v33 = vrot.slane %v1487_v24, 1  ;;  %1765 = vmatmul.mubr.msk.bf16.vlgmr.msra.gmra.mrb[4].mxu0 %vm353_vm14, %v559_v26  ;;  %v959_v44 = vrot.slane %v945_v9, %v1941_v21  ;;  %1800 = vmatprep.subr.bf16.mxu1 %v1866_v1  ;;  %v1200_v59 = vshll.u32 %v1147_v48, 16  ;;  %v1693_v61 = vrot.slane %v1689_v50, 9 }
  0x31   : > { %1777 = vmatpush3.bf16.msra.mxu0 %v1838_v19  ;;  %1780 = vmatprep.mubr.msk.bf16.mxu0 %vm1867_vm0, %v1866_v1  ;;  %v802_v42 = vsel %vm1956_vm12, %v797_v56, %v801_v31  ;;  %v1193_v58 = vrot.slane %v1191_v49, 6  ;;  %v1196_v60 = vrot.slane %v1194_v52, 7  ;;  %v1338_v62 = vrot.slane %v1323_v53, 7 }
  0x32   : > { %v1489_v37 = vadd.f32 %v1488_v33, %v1487_v24  ;;  %1778 = vmatprep.subr.bf16.mxu0 %v1866_v1  ;;  %v809_v47 = vcombine.low %v2002_v25, %v802_v42  ;;  %v960_v51 = vcombine.low %v952_v36, %v959_v44  ;;  %v1844_v25 = vld [vmem:[%s2162_s1 + $0x60] sm:$0xff]   ;;  %v1202_v3 = vrot.slane %v1200_v59, 7 }
  0x33   : > { %v1197_v2 = vor.u32 %v1196_v60, %v1193_v58  ;;  %v1339_v6 = vsel %vm2021_vm3, %v1693_v61, %v1338_v62  ;;  %v1049_v8 = vcombine.low %v1856_v55, %v1857_v57 }
  0x34   : > { %v1491_v46 = vmul.f32 0.0625, %v1489_v37  ;;  %v823_v54 = vrot.slane %v809_v47, %v1941_v21  ;;  %1789 = vmatmul.mubr.msk.bf16.vlgmr.msra.gmra.mrb[8].mxu1 %vm353_vm14, %v960_v51  ;;  %v1346_v11 = vcombine.low %v2082_v34, %v1339_v6 }
  0x35   : > { %1779 = vmatpush3.bf16.msra.mxu0 %v1842_v35  ;;  %1801 = vmatpush3.bf16.msra.mxu1 %v1845_v39  ;;  %v1198_v5 = vrot.slane %v1197_v2, 2 }
  0x36   : > { %1493 = vst.msk [vmem:[%s206_s25] sm:$0x1] %vm1492_vm4, %v1491_v46  ;;  %1792 = vmatprep.subr.bf16.mxu0 %v1866_v1  ;;  %v824_v63 = vcombine.low %v816_v43, %v823_v54  ;;  %1804 = vmatprep.mubr.msk.bf16.mxu1 %vm1867_vm0, %v1866_v1  ;;  %v1360_v38 = vrot.slane %v1346_v11, %v1941_v21 }
  0x37   : > { %1802 = vmatprep.subr.bf16.mxu1 %v1866_v1  ;;  %v1203_v7 = vsel %vm1956_vm12, %v1198_v5, %v1202_v3 }
  0x38   : > { %1781 = vmatmul.mubr.msk.bf16.vlgmr.msra.gmra.mrb[8].mxu0 %vm353_vm14, %v824_v63  ;;  %v1210_v10 = vcombine.low %v802_v42, %v1203_v7  ;;  %v1361_v15 = vcombine.low %v2063_v16, %v1360_v38  ;;  %v1701_v63 = vld [vmem:[%s2163_s2] ss:$0 sm:$0xff] }
  0x39   : > { %1793 = vmatpush3.bf16.msra.mxu0 %v1844_v25  ;;  %1796 = vmatprep.mubr.msk.bf16.mxu0 %vm1867_vm0, %v1866_v1 }
  0x3a   : > { %1794 = vmatprep.subr.bf16.mxu0 %v1866_v1  ;;  %1803 = vmatpush3.bf16.msra.mxu1 %v1847_v0  ;;  %v1224_v40 = vrot.slane %v1210_v10, %v1941_v21 }
  0x3c   : > { %v1225_v13 = vcombine.low %v2026_v41, %v1224_v40 }
  0x3d   : > { %1795 = vmatpush3.bf16.msra.mxu0 %v1846_v4 }
  0x3e   : > { %1808 = vmatprep.subr.bf16.mxu0 %v1866_v1  ;;  %1805 = vmatmul.mubr.msk.bf16.vlgmr.msra.gmra.mrb[12].mxu1 %vm353_vm14, %v1225_v13 }
  0x40   : > { %1797 = vmatmul.mubr.msk.bf16.vlgmr.msra.gmra.mrb[12].mxu0 %vm353_vm14, %v1049_v8 }
  0x41   : > { %1809 = vmatpush3.bf16.msra.mxu0 %v1850_v12  ;;  %1812 = vmatprep.mubr.msk.bf16.mxu0 %vm1867_vm0, %v1866_v1  ;;  %vm1439_vm0 = vcmask 125952  }
  0x42   : > { %1810 = vmatprep.subr.bf16.mxu0 %v1866_v1 }
  0x45   : > { %1811 = vmatpush3.bf16.msra.mxu0 %v1851_v14 }
  0x48   : > { %1813 = vmatmul.mubr.msk.bf16.vlgmr.msra.gmra.mrb[16].mxu0 %vm353_vm14, %v1361_v15 }
  0xf5   : > { %v468_v41 = vpop.f32.mrb[0].mxu1 }
  0xf6   : > { %v1758_v17 = vpop.f32.mrb[1].mxu1 }
  0xf7   : > { %v471_v21 = vpop.f32.mrb[2].mxu1 }
  0xf8   : > { %v1759_v19 = vpop.f32.mrb[3].mxu1 }
  0xfb   : > { %v391_v18 = vpop.f32.mrb[0].mxu0 }
  0xfc   : > { %v469_v20 = vadd.f32 %v468_v41, %v391_v18  ;;  %v1750_v22 = vpop.f32.mrb[1].mxu0 }
  0xfd   : > { %v394_v23 = vpop.f32.mrb[2].mxu0  ;;  %v698_v27 = vpop.f32.mrb[4].mxu1 }
  0xfe   : > { %v472_v24 = vadd.f32 %v471_v21, %v394_v23  ;;  %v1751_v26 = vpop.f32.mrb[3].mxu0  ;;  %v1774_v28 = vpop.f32.mrb[5].mxu1 }
  0xff   : > { %v701_v29 = vpop.f32.mrb[6].mxu1 }
 0x100   : > { %v1775_v1 = vpop.f32.mrb[7].mxu1 }
 0x103   : > { %v609_v30 = vpop.f32.mrb[4].mxu0 }
 0x104   : > { %v616_v31 = vadd.f32 %v609_v30, %v469_v20  ;;  %v1766_v16 = vpop.f32.mrb[5].mxu0 }
 0x105   : > { %v612_v32 = vpop.f32.mrb[6].mxu0 }
 0x106   : > { %v617_v33 = vadd.f32 %v612_v32, %v472_v24  ;;  %v705_v34 = vadd.f32 %v698_v27, %v616_v31  ;;  %v1767_v35 = vpop.f32.mrb[7].mxu0 }
 0x107   : > { %v1010_v9 = vpop.f32.mrb[8].mxu1 }
 0x108   : > { %v706_v56 = vadd.f32 %v701_v29, %v617_v33  ;;  %v1790_v36 = vpop.f32.mrb[9].mxu1 }
 0x109   : > { %v1013_v37 = vpop.f32.mrb[10].mxu1 }
 0x10a   : > { %v1791_v42 = vpop.f32.mrb[11].mxu1 }
 0x10b   : > { %v874_v39 = vpop.f32.mrb[8].mxu0 }
 0x10c   : > { %v881_v43 = vadd.f32 %v874_v39, %v705_v34  ;;  %v1782_v44 = vpop.f32.mrb[9].mxu0 }
 0x10d   : > { %v877_v45 = vpop.f32.mrb[10].mxu0 }
 0x10e   : > { %v882_v46 = vadd.f32 %v877_v45, %v706_v56  ;;  %v1017_v47 = vadd.f32 %v1010_v9, %v881_v43  ;;  %v1783_v48 = vpop.f32.mrb[11].mxu0 }
 0x110   : > { %v1018_v49 = vadd.f32 %v1013_v37, %v882_v46 }
 0x111   : > { %v1275_v54 = vpop.f32.mrb[12].mxu1 }
 0x112   : > { %v1806_v59 = vpop.f32.mrb[13].mxu1 }
 0x113   : > { %v1099_v50 = vpop.f32.mrb[12].mxu0  ;;  %v1278_v25 = vpop.f32.mrb[14].mxu1 }
 0x114   : > { %v1106_v51 = vadd.f32 %v1099_v50, %v1017_v47  ;;  %v1798_v52 = vpop.f32.mrb[13].mxu0  ;;  %v1807_v61 = vpop.f32.mrb[15].mxu1 }
 0x115   : > { %v1102_v53 = vpop.f32.mrb[14].mxu0 }
 0x116   : > { %v1107_v55 = vadd.f32 %v1102_v53, %v1018_v49  ;;  %v1282_v57 = vadd.f32 %v1275_v54, %v1106_v51  ;;  %v1799_v58 = vpop.f32.mrb[15].mxu0 }
 0x118   : > { %v1283_v60 = vadd.f32 %v1278_v25, %v1107_v55 }
 0x11b   : > { %v1411_v62 = vpop.f32.mrb[16].mxu0 }
 0x11c   : > { %v1418_v0 = vadd.f32 %v1411_v62, %v1282_v57  ;;  %v1814_v2 = vpop.f32.mrb[17].mxu0 }
 0x11d   : > { %v1414_v3 = vpop.f32.mrb[18].mxu0 }
 0x11e   : > { %v1427_v4 = vadd.f32 %v1701_v63, %v1418_v0  ;;  %v1419_v5 = vadd.f32 %v1414_v3, %v1283_v60  ;;  %v1815_v6 = vpop.f32.mrb[19].mxu0 }
 0x120   : > { %v1429_v7 = vmax.f32 %v1427_v4, 0.0  ;;  %v1428_v8 = vadd.f32 %v1701_v63, %v1419_v5 }
 0x122   : > { %v1715_v10 = vpack.c.bf16 %v1429_v7, %v1429_v7  ;;  %v1430_v11 = vmax.f32 %v1428_v8, 0.0 }
 0x124   : > { %1440 = vst.msk [vmem:[%s203_s17] sm:$0xf] %vm1439_vm0, %v1715_v10  ;;  %v1716_v12 = vpack.c.bf16 %v1430_v11, %v1430_v11 }
 0x126   : > { %1441 = vst.msk [vmem:[%s203_s17 + $0x4] sm:$0xf] %vm1439_vm0, %v1716_v12 }
 0x127 PF: > { %s15_s15 = sadd.s32 1, %s1864_s15  }
 0x128   : > { %p12_p4 = scmp.ge.s32.totalorder %s15_s15, 4  }
 0x12a   :  { %14 = sbr.rel (!%p12_p4) target bundleno = 1 (0x1), region = 84 }

// kernel: duat_forward.25
= control target key start
LH: loop header
LB: loop body
LE: loop exit
PB: predicated region body
PF: predicated region fallthrough
CT: control target
= control target key end

     0   :  { %s533_s15 = smov 0   ;;  %s535_s16 = smov 0   ;;  %s584_s0 = inlined_call_operand.vmem [shape: bf16[2,4,64], index: 0, kind: input, shape index: {}]   ;;  %s585_s1 = inlined_call_operand.vmem [shape: f32[2,1,64], index: 1, kind: input, shape index: {}]   ;;  %s586_s2 = inlined_call_operand.vmem [shape: bf16[64,128], index: 2, kind: input, shape index: {}]   ;;  %s587_s3 = inlined_call_operand.vmem [shape: f32[1,128], index: 3, kind: input, shape index: {}]   ;;  %s588_s4 = inlined_call_operand.vmem [shape: bf16[2,4,128], index: 4, kind: output, shape index: {}]  }
   0x1   :  { %s537_s17 = smov 0  }
   0x2 LB: > { %s26_s18 = sadd.s32 1, %s500_s16  ;;  %p423_p0 = scmp.ge.s32.totalorder %s504_s17, 1  ;;  %s504_s17 = sphi %s537_s17, %s14_s17   ;;  %s500_s16 = sphi %s535_s16, %s590_s16   ;;  %s496_s15 = sphi %s533_s15, %s589_s15  }
   0x3   : > { %p28_p1 = scmp.ge.s32.totalorder %s26_s18, 2  ;;  %p188_p2 = scmp.lt.s32.totalorder %s504_s17, 3 }
   0x5   : > { %s592_s18 = smov (%p28_p1, %s26_s18), 0  ;;  %p189_p3 = pnand %p423_p0, %p188_p2 }
   0x6   : > { %v478_v0 = vld [vmem:[%s586_s2] sm:$0xff] (!%p189_p3)   ;;  %v506_v1 = vmov (!%p189_p3), 0.0   ;;  %v479_v2 = vld [vmem:[%s586_s2 + $0x8] sm:$0xff] (!%p189_p3)   ;;  %vm507_vm0 = vmmov (!%p189_p3), 0   ;;  %p221_p4 = scmp.lt.s32.totalorder (!%p189_p3), %s496_s15, 1  ;;  %v480_v3 = vld [vmem:[%s586_s2 + $0x10] sm:$0xff] (!%p189_p3)  }
   0x7   : > { %192 = sbr.rel (%p189_p3) target bundleno = 243 (0xf3), region = 36  ;;  %440 = vmatprep.subr.bf16.mxu0 (!%p189_p3), %v506_v1  ;;  %448 = vmatprep.mubr.msk.bf16.mxu0 (!%p189_p3), %vm507_vm0, %v506_v1  ;;  %v481_v7 = vld [vmem:[%s586_s2 + $0x18] sm:$0xff] (!%p189_p3)   ;;  %vm289_vm1 = vcmask (!%p189_p3), 523264   ;;  %v427_v10 = vld [vmem:[%s587_s3] ss:$0 sm:$0xff] (!%p189_p3) }
   0x8   : > { %441 = vmatpush3.bf16.msra.mxu0 (!%p189_p3), %v478_v0 }
   0x9   : > { %442 = vmatprep.subr.bf16.mxu0 (!%p189_p3), %v506_v1 }
   0xc   : > { %443 = vmatpush3.bf16.msra.mxu0 (!%p189_p3), %v479_v2 }
   0xd   : > { %444 = vmatprep.subr.bf16.mxu0 (!%p189_p3), %v506_v1 }
   0xe   : > { %s594_s15 = smov (!%p221_p4, %s496_s15), 1 }
   0xf   : > { %s424_s25 = sshll.u32 %s594_s15, 1  ;;  %s230_s28 = scalar_lea.vmem %s585_s1, %s594_s15 }
  0x10   : > { %s227_s5 = scalar_lea.vmem %s584_s0, %s424_s25  ;;  %v426_v5 = vld [vmem:[%s230_s28] ss:$0 sm:$0xff]  ;;  %445 = vmatpush3.bf16.msra.mxu0 %v480_v3  ;;  %s237_s12 = scalar_lea.vmem %s588_s4, %s424_s25 }
  0x11   : > { %v239_v4 = vld [vmem:[%s227_s5] sm:$0x3]  ;;  %446 = vmatprep.subr.bf16.mxu0 %v506_v1 }
  0x12   : > { %v240_v6 = vunpack.c.l.bf16 %v239_v4 }
  0x14   : > { %v248_v8 = vmul.f32 %v426_v5, %v240_v6  ;;  %447 = vmatpush3.bf16.msra.mxu0 %v481_v7 }
  0x16   : > { %v249_v9 = vpack.c.bf16 %v248_v8, %v248_v8 }
  0x18   : > { %449 = vmatmul.mubr.msk.bf16.vlgmr.msra.gmra.mrb[0].mxu0 %vm289_vm1, %v249_v9 }
  0xeb   : > { %v327_v11 = vpop.f32.mrb[0].mxu0 }
  0xec   : > { %v328_v12 = vadd.f32 %v427_v10, %v327_v11  ;;  %v450_v13 = vpop.f32.mrb[1].mxu0 }
  0xed   : > { %v330_v14 = vpop.f32.mrb[2].mxu0 }
  0xee   : > { %v333_v15 = vmax.f32 %v328_v12, 0.0  ;;  %v451_v16 = vpop.f32.mrb[3].mxu0 }
  0xf0   : > { %v334_v17 = vpack.c.bf16 %v333_v15, %v333_v15 }
  0xf2   : > { %335 = vst [vmem:[%s237_s12] sm:$0x3] %v334_v17 }
  0xf3 PF: > { %s14_s17 = sadd.s32 1, %s504_s17   ;;  %s589_s15 = smov %s500_s16 }
  0xf4   : > { %p11_p5 = scmp.ge.s32.totalorder %s14_s17, 4   ;;  %s590_s16 = smov %s592_s18 }
  0xf6   :  { %13 = sbr.rel (!%p11_p5) target bundleno = 2 (0x2), region = 69 }

// kernel: duat_forward.32
= control target key start
LH: loop header
LB: loop body
LE: loop exit
PB: predicated region body
PF: predicated region fallthrough
CT: control target
= control target key end

     0   :  { %v2868_v22 = vmov 1966171168   ;;  %v410_v24 = vlaneseq  ;;  %vm2210_vm0 = vcmask 253952   ;;  %s3515_s1 = inlined_call_operand.vmem [shape: bf16[3072,32], index: 1, kind: input, shape index: {}]   ;;  %s3516_s0 = inlined_call_operand.vmem [shape: bf16[1,3072], index: 0, kind: input, shape index: {}]   ;;  %s3517_s2 = inlined_call_operand.vmem [shape: f32[1,32], index: 2, kind: input, shape index: {}]   ;;  %s3518_s3 = inlined_call_operand.vmem [shape: f32[1,32], index: 3, kind: output, shape index: {}]  }
   0x1   :  { %v2673_v0 = vld [vmem:[%s3515_s1 + $0x40] sm:$0xff]   ;;  %v2677_v4 = vld [vmem:[%s3515_s1 + $0x48] sm:$0xff]   ;;  %v2681_v8 = vld [vmem:[%s3515_s1 + $0x50] sm:$0xff]   ;;  %v408_v23 = vunpack.c.l.s4 %v2868_v22 }
   0x2   :  { %v2674_v1 = vld [vmem:[%s3515_s1 + $0xc0] sm:$0xff]   ;;  %2408 = vmatprep.subr.bf16.mxu0 %v2673_v0  ;;  %v2678_v5 = vld [vmem:[%s3515_s1 + $0xc8] sm:$0xff]   ;;  %v2682_v9 = vld [vmem:[%s3515_s1 + $0xd0] sm:$0xff]   ;;  %v411_v30 = vshrl.u32 %v410_v24, 7 }
   0x3   :  { %v2675_v2 = vld [vmem:[%s3515_s1] sm:$0xff]   ;;  %2430 = vmatprep.subr.bf16.mxu1 %v2674_v1  ;;  %v2679_v6 = vld [vmem:[%s3515_s1 + $0x8] sm:$0xff]   ;;  %v2683_v10 = vld [vmem:[%s3515_s1 + $0x10] sm:$0xff]   ;;  %v409_v29 = vunpack.c.0.s8 %v408_v23 }
   0x4   :  { %v2676_v3 = vld [vmem:[%s3515_s1 + $0x80] sm:$0xff]   ;;  %2409 = vmatpush3.bf16.msra.mxu0 %v2675_v2  ;;  %v2680_v7 = vld [vmem:[%s3515_s1 + $0x88] sm:$0xff]   ;;  %v2684_v11 = vld [vmem:[%s3515_s1 + $0x90] sm:$0xff]  }
   0x5   :  { %2431 = vmatpush3.bf16.msra.mxu1 %v2676_v3  ;;  %2410 = vmatprep.subr.bf16.mxu0 %v2677_v4  ;;  %v2685_v12 = vld [vmem:[%s3515_s1 + $0x58] sm:$0xff]   ;;  %v2689_v16 = vld [vmem:[%s3515_s1 + $0x60] sm:$0xff]   ;;  %v2693_v20 = vld [vmem:[%s3515_s1 + $0x68] sm:$0xff]   ;;  %v2979_v35 = vsub.s32 %v409_v29, %v411_v30 }
   0x6   :  { %2432 = vmatprep.subr.bf16.mxu1 %v2678_v5  ;;  %v2686_v13 = vld [vmem:[%s3515_s1 + $0xd8] sm:$0xff]   ;;  %v2690_v17 = vld [vmem:[%s3515_s1 + $0xe0] sm:$0xff]   ;;  %v2694_v21 = vld [vmem:[%s3515_s1 + $0xe8] sm:$0xff]  }
   0x7   :  { %v2687_v14 = vld [vmem:[%s3515_s1 + $0x18] sm:$0xff]   ;;  %v2691_v18 = vld [vmem:[%s3515_s1 + $0x20] sm:$0xff]   ;;  %v2695_v25 = vld [vmem:[%s3515_s1 + $0x28] sm:$0xff]  }
   0x8   :  { %2411 = vmatpush3.bf16.msra.mxu0 %v2679_v6  ;;  %v2688_v15 = vld [vmem:[%s3515_s1 + $0x98] sm:$0xff]   ;;  %v2692_v19 = vld [vmem:[%s3515_s1 + $0xa0] sm:$0xff]   ;;  %v2696_v26 = vld [vmem:[%s3515_s1 + $0xa8] sm:$0xff]  }
   0x9   :  { %2433 = vmatpush3.bf16.msra.mxu1 %v2680_v7  ;;  %2412 = vmatprep.subr.bf16.mxu0 %v2681_v8  ;;  %v2697_v27 = vld [vmem:[%s3515_s1 + $0x70] sm:$0xff]   ;;  %v2701_v33 = vld [vmem:[%s3515_s1 + $0x78] sm:$0xff]   ;;  %v15_v38 = vld [vmem:[%s3516_s0] sm:$0xff] }
   0xa   :  { %2434 = vmatprep.subr.bf16.mxu1 %v2682_v9  ;;  %v2698_v28 = vld [vmem:[%s3515_s1 + $0xf0] sm:$0xff]   ;;  %v2702_v34 = vld [vmem:[%s3515_s1 + $0xf8] sm:$0xff]   ;;  %v406_v39 = vcombine.high %v15_v38, %v15_v38  ;;  %v413_v40 = vrot.slane %v15_v38, %v2979_v35  ;;  %v2706_v41 = vld [vmem:[%s3515_s1 + $0x140] sm:$0xff]  }
   0xb   :  { %v2699_v31 = vld [vmem:[%s3515_s1 + $0x30] sm:$0xff]   ;;  %v2703_v36 = vld [vmem:[%s3515_s1 + $0x38] sm:$0xff]   ;;  %v2707_v42 = vld [vmem:[%s3515_s1 + $0x1c0] sm:$0xff]  }
   0xc   :  { %2413 = vmatpush3.bf16.msra.mxu0 %v2683_v10  ;;  %v2700_v32 = vld [vmem:[%s3515_s1 + $0xb0] sm:$0xff]   ;;  %v2704_v37 = vld [vmem:[%s3515_s1 + $0xb8] sm:$0xff]   ;;  %v421_v43 = vcombine.high %v413_v40, %v413_v40  ;;  %v429_v44 = vrot.slane %v413_v40, %v2979_v35  ;;  %v2999_v45 = vrot.slane %v406_v39, %v2979_v35  ;;  %v2708_v47 = vld [vmem:[%s3515_s1 + $0x100] sm:$0xff]  }
   0xd   :  { %2435 = vmatpush3.bf16.msra.mxu1 %v2684_v11  ;;  %2414 = vmatprep.subr.bf16.mxu0 %v2685_v12  ;;  %v2710_v50 = vld [vmem:[%s3515_s1 + $0x148] sm:$0xff]   ;;  %v2709_v52 = vld [vmem:[%s3515_s1 + $0x180] sm:$0xff]   ;;  %v2714_v57 = vld [vmem:[%s3515_s1 + $0x150] sm:$0xff]  }
   0xe   :  { %2436 = vmatprep.subr.bf16.mxu1 %v2686_v13  ;;  %v443_v46 = vrot.slane %v421_v43, %v2979_v35  ;;  %v422_v48 = vcombine.high %v2999_v45, %v2999_v45  ;;  %v451_v49 = vcombine.high %v429_v44, %v429_v44  ;;  %v2711_v54 = vld [vmem:[%s3515_s1 + $0x1c8] sm:$0xff]   ;;  %v2715_v59 = vld [vmem:[%s3515_s1 + $0x1d0] sm:$0xff]   ;;  %v2718_v61 = vld [vmem:[%s3515_s1 + $0x158] sm:$0xff]  }
   0xf   :  { %v2712_v55 = vld [vmem:[%s3515_s1 + $0x108] sm:$0xff]   ;;  %v2716_v60 = vld [vmem:[%s3515_s1 + $0x110] sm:$0xff]   ;;  %v2719_v63 = vld [vmem:[%s3515_s1 + $0x1d8] sm:$0xff]  }
  0x10   :  { %2415 = vmatpush3.bf16.msra.mxu0 %v2687_v14  ;;  %1761 = vmatprep.mubr.bf16.mxu0 %v443_v46  ;;  %v453_v51 = vcombine.high %v443_v46, %v443_v46  ;;  %v450_v53 = vrot.slane %v422_v48, %v2979_v35  ;;  %v2713_v58 = vld [vmem:[%s3515_s1 + $0x188] sm:$0xff]   ;;  %v2717_v62 = vld [vmem:[%s3515_s1 + $0x190] sm:$0xff]   ;;  %v2720_v0 = vld [vmem:[%s3515_s1 + $0x118] sm:$0xff]  }
  0x11   :  { %2437 = vmatpush3.bf16.msra.mxu1 %v2688_v15  ;;  %2416 = vmatprep.subr.bf16.mxu0 %v2689_v16  ;;  %v2722_v1 = vld [vmem:[%s3515_s1 + $0x160] sm:$0xff]   ;;  %v2721_v2 = vld [vmem:[%s3515_s1 + $0x198] sm:$0xff]   ;;  %v2726_v5 = vld [vmem:[%s3515_s1 + $0x168] sm:$0xff]  }
  0x12   :  { %2438 = vmatprep.subr.bf16.mxu1 %v2690_v17  ;;  %1801 = vmatprep.mubr.bf16.mxu1 %v453_v51  ;;  %v454_v56 = vcombine.high %v450_v53, %v450_v53  ;;  %v2723_v3 = vld [vmem:[%s3515_s1 + $0x1e0] sm:$0xff]   ;;  %v2727_v7 = vld [vmem:[%s3515_s1 + $0x1e8] sm:$0xff]   ;;  %v2730_v9 = vld [vmem:[%s3515_s1 + $0x170] sm:$0xff]   ;;  %v436_v17 = vrot.slane %v2999_v45, %v2979_v35 }
  0x13   :  { %v2724_v4 = vld [vmem:[%s3515_s1 + $0x120] sm:$0xff]   ;;  %v2728_v8 = vld [vmem:[%s3515_s1 + $0x128] sm:$0xff]   ;;  %v2731_v11 = vld [vmem:[%s3515_s1 + $0x1f0] sm:$0xff]  }
  0x14   :  { %2417 = vmatpush3.bf16.msra.mxu0 %v2691_v18  ;;  %v2725_v6 = vld [vmem:[%s3515_s1 + $0x1a0] sm:$0xff]   ;;  %v2729_v10 = vld [vmem:[%s3515_s1 + $0x1a8] sm:$0xff]   ;;  %v2732_v12 = vld [vmem:[%s3515_s1 + $0x130] sm:$0xff]   ;;  %v452_v22 = vcombine.high %v436_v17, %v436_v17 }
  0x15   :  { %2439 = vmatpush3.bf16.msra.mxu1 %v2692_v19  ;;  %2418 = vmatprep.subr.bf16.mxu0 %v2693_v20  ;;  %v2734_v13 = vld [vmem:[%s3515_s1 + $0x178] sm:$0xff]   ;;  %v2733_v14 = vld [vmem:[%s3515_s1 + $0x1b0] sm:$0xff]   ;;  %v2738_v18 = vld [vmem:[%s3515_s1 + $0x240] sm:$0xff]  }
  0x16   :  { %2440 = vmatprep.subr.bf16.mxu1 %v2694_v21  ;;  %v2735_v15 = vld [vmem:[%s3515_s1 + $0x1f8] sm:$0xff]   ;;  %v2739_v20 = vld [vmem:[%s3515_s1 + $0x2c0] sm:$0xff]   ;;  %v2742_v23 = vld [vmem:[%s3515_s1 + $0x248] sm:$0xff]  }
  0x17   :  { %v2736_v16 = vld [vmem:[%s3515_s1 + $0x138] sm:$0xff]   ;;  %v2740_v21 = vld [vmem:[%s3515_s1 + $0x200] sm:$0xff]   ;;  %v2747_v29 = vld [vmem:[%s3515_s1 + $0x2d0] sm:$0xff]  }
  0x18   :  { %2419 = vmatpush3.bf16.msra.mxu0 %v2695_v25  ;;  %v2737_v19 = vld [vmem:[%s3515_s1 + $0x1b8] sm:$0xff]   ;;  %v2741_v24 = vld [vmem:[%s3515_s1 + $0x280] sm:$0xff]   ;;  %v2743_v25 = vld [vmem:[%s3515_s1 + $0x2c8] sm:$0xff]  }
  0x19   :  { %2441 = vmatpush3.bf16.msra.mxu1 %v2696_v26  ;;  %2420 = vmatprep.subr.bf16.mxu0 %v2697_v27  ;;  %v2744_v26 = vld [vmem:[%s3515_s1 + $0x208] sm:$0xff]   ;;  %v2746_v27 = vld [vmem:[%s3515_s1 + $0x250] sm:$0xff]   ;;  %v2755_v38 = vld [vmem:[%s3515_s1 + $0x2e0] sm:$0xff]  }
  0x1a   :  { %2442 = vmatprep.subr.bf16.mxu1 %v2698_v28  ;;  %v2745_v28 = vld [vmem:[%s3515_s1 + $0x288] sm:$0xff]   ;;  %v2748_v30 = vld [vmem:[%s3515_s1 + $0x210] sm:$0xff]   ;;  %v2756_v39 = vld [vmem:[%s3515_s1 + $0x220] sm:$0xff]  }
  0x1b   :  { %v2758_v40 = vld [vmem:[%s3515_s1 + $0x268] sm:$0xff]   ;;  %v2763_v46 = vld [vmem:[%s3515_s1 + $0x2f0] sm:$0xff]   ;;  %v2766_v48 = vld [vmem:[%s3515_s1 + $0x278] sm:$0xff]  }
  0x1c   :  { %2421 = vmatpush3.bf16.msra.mxu0 %v2699_v31  ;;  %v2750_v31 = vld [vmem:[%s3515_s1 + $0x258] sm:$0xff]   ;;  %v2760_v43 = vld [vmem:[%s3515_s1 + $0x228] sm:$0xff]  }
  0x1d   :  { %2443 = vmatpush3.bf16.msra.mxu1 %v2700_v32  ;;  %2422 = vmatprep.subr.bf16.mxu0 %v2701_v33  ;;  %v2749_v32 = vld [vmem:[%s3515_s1 + $0x290] sm:$0xff]   ;;  %v2751_v33 = vld [vmem:[%s3515_s1 + $0x2d8] sm:$0xff]   ;;  %v2761_v45 = vld [vmem:[%s3515_s1 + $0x2a8] sm:$0xff]  }
  0x1e   :  { %2444 = vmatprep.subr.bf16.mxu1 %v2702_v34  ;;  %v2752_v34 = vld [vmem:[%s3515_s1 + $0x218] sm:$0xff]   ;;  %v16_v51 = vld [vmem:[%s3516_s0 + $0x8] sm:$0xff] }
  0x20   :  { %2423 = vmatpush3.bf16.msra.mxu0 %v2703_v36  ;;  %v2754_v36 = vld [vmem:[%s3515_s1 + $0x260] sm:$0xff]  }
  0x21   :  { %2445 = vmatpush3.bf16.msra.mxu1 %v2704_v37  ;;  %2452 = vmatprep.subr.bf16.mxu0 %v2706_v41  ;;  %v2753_v37 = vld [vmem:[%s3515_s1 + $0x298] sm:$0xff]   ;;  %v2757_v41 = vld [vmem:[%s3515_s1 + $0x2a0] sm:$0xff]  }
  0x22   :  { %2474 = vmatprep.subr.bf16.mxu1 %v2707_v42  ;;  %v2759_v42 = vld [vmem:[%s3515_s1 + $0x2e8] sm:$0xff]  }
  0x23   :  { %1762 = vmatmul.mubr.bf16.vlgmr.msra.gmra.mrb[0].mxu0 %v429_v44  ;;  %v2762_v44 = vld [vmem:[%s3515_s1 + $0x270] sm:$0xff]  }
  0x24   :  { %2453 = vmatpush3.bf16.msra.mxu0 %v2708_v47  ;;  %1802 = vmatmul.mubr.bf16.vlgmr.msra.gmra.mrb[0].mxu1 %v451_v49  ;;  %v2764_v47 = vld [vmem:[%s3515_s1 + $0x230] sm:$0xff]  }
  0x25   :  { %2454 = vmatprep.subr.bf16.mxu0 %v2710_v50  ;;  %2475 = vmatpush3.bf16.msra.mxu1 %v2709_v52  ;;  %v2765_v49 = vld [vmem:[%s3515_s1 + $0x2b0] sm:$0xff]   ;;  %v2767_v50 = vld [vmem:[%s3515_s1 + $0x2f8] sm:$0xff]  }
  0x26   :  { %1841 = vmatprep.mubr.bf16.mxu0 %v450_v53  ;;  %2476 = vmatprep.subr.bf16.mxu1 %v2711_v54  ;;  %v2768_v52 = vld [vmem:[%s3515_s1 + $0x238] sm:$0xff]   ;;  %v462_v53 = vrot.slane %v16_v51, %v2979_v35  ;;  %v455_v54 = vcombine.high %v16_v51, %v16_v51  ;;  %v2819_v51 = vld [vmem:[%s3515_s1 + $0x460] sm:$0xff]  }
  0x27   :  { %1881 = vmatprep.mubr.bf16.mxu1 %v454_v56  ;;  %v2769_v56 = vld [vmem:[%s3515_s1 + $0x2b8] sm:$0xff]  }
  0x28   :  { %2455 = vmatpush3.bf16.msra.mxu0 %v2712_v55  ;;  %v2770_v55 = vld [vmem:[%s3515_s1 + $0x340] sm:$0xff]  }
  0x29   :  { %2456 = vmatprep.subr.bf16.mxu0 %v2714_v57  ;;  %2477 = vmatpush3.bf16.msra.mxu1 %v2713_v58  ;;  %v470_v57 = vcombine.high %v462_v53, %v462_v53  ;;  %v478_v58 = vrot.slane %v462_v53, %v2979_v35  ;;  %v2820_v53 = vld [vmem:[%s3515_s1 + $0x4e0] sm:$0xff]  }
  0x2a   :  { %2478 = vmatprep.subr.bf16.mxu1 %v2715_v59  ;;  %v3202_v59 = vrot.slane %v455_v54, %v2979_v35  ;;  %v2821_v54 = vld [vmem:[%s3515_s1 + $0x420] sm:$0xff]  }
  0x2c   :  { %2457 = vmatpush3.bf16.msra.mxu0 %v2716_v60  ;;  %v2771_v60 = vld [vmem:[%s3515_s1 + $0x3c0] sm:$0xff]  }
  0x2d   :  { %2458 = vmatprep.subr.bf16.mxu0 %v2718_v61  ;;  %2479 = vmatpush3.bf16.msra.mxu1 %v2717_v62  ;;  %v492_v61 = vrot.slane %v470_v57, %v2979_v35  ;;  %v2772_v62 = vld [vmem:[%s3515_s1 + $0x300] sm:$0xff]   ;;  %v2824_v57 = vld [vmem:[%s3515_s1 + $0x4e8] sm:$0xff]  }
  0x2e   :  { %2480 = vmatprep.subr.bf16.mxu1 %v2719_v63  ;;  %v471_v63 = vcombine.high %v3202_v59, %v3202_v59 }
  0x30   :  { %2459 = vmatpush3.bf16.msra.mxu0 %v2720_v0  ;;  %v500_v0 = vcombine.high %v478_v58, %v478_v58 }
  0x31   :  { %2460 = vmatprep.subr.bf16.mxu0 %v2722_v1  ;;  %2481 = vmatpush3.bf16.msra.mxu1 %v2721_v2  ;;  %v2774_v1 = vld [vmem:[%s3515_s1 + $0x348] sm:$0xff]   ;;  %v502_v2 = vcombine.high %v492_v61, %v492_v61 }
  0x32   :  { %2482 = vmatprep.subr.bf16.mxu1 %v2723_v3  ;;  %v2773_v3 = vld [vmem:[%s3515_s1 + $0x380] sm:$0xff]  }
  0x34   :  { %2461 = vmatpush3.bf16.msra.mxu0 %v2724_v4  ;;  %v499_v4 = vrot.slane %v471_v63, %v2979_v35  ;;  %v2831_v63 = vld [vmem:[%s3515_s1 + $0x478] sm:$0xff]  }
  0x35   :  { %2462 = vmatprep.subr.bf16.mxu0 %v2726_v5  ;;  %2483 = vmatpush3.bf16.msra.mxu1 %v2725_v6  ;;  %v2775_v5 = vld [vmem:[%s3515_s1 + $0x3c8] sm:$0xff]  }
  0x36   :  { %2484 = vmatprep.subr.bf16.mxu1 %v2727_v7  ;;  %v2776_v6 = vld [vmem:[%s3515_s1 + $0x308] sm:$0xff]   ;;  %v503_v7 = vcombine.high %v499_v4, %v499_v4 }
  0x38   :  { %2463 = vmatpush3.bf16.msra.mxu0 %v2728_v8  ;;  %v2778_v8 = vld [vmem:[%s3515_s1 + $0x350] sm:$0xff]  }
  0x39   :  { %2464 = vmatprep.subr.bf16.mxu0 %v2730_v9  ;;  %2485 = vmatpush3.bf16.msra.mxu1 %v2729_v10  ;;  %v2777_v9 = vld [vmem:[%s3515_s1 + $0x388] sm:$0xff]   ;;  %v2779_v10 = vld [vmem:[%s3515_s1 + $0x3d0] sm:$0xff]  }
  0x3a   :  { %2486 = vmatprep.subr.bf16.mxu1 %v2731_v11  ;;  %v2780_v11 = vld [vmem:[%s3515_s1 + $0x310] sm:$0xff]  }
  0x3c   :  { %2465 = vmatpush3.bf16.msra.mxu0 %v2732_v12  ;;  %v2782_v12 = vld [vmem:[%s3515_s1 + $0x358] sm:$0xff]  }
  0x3d   :  { %2466 = vmatprep.subr.bf16.mxu0 %v2734_v13  ;;  %2487 = vmatpush3.bf16.msra.mxu1 %v2733_v14  ;;  %v2781_v13 = vld [vmem:[%s3515_s1 + $0x390] sm:$0xff]   ;;  %v2783_v14 = vld [vmem:[%s3515_s1 + $0x3d8] sm:$0xff]  }
  0x3e   :  { %2488 = vmatprep.subr.bf16.mxu1 %v2735_v15  ;;  %v2784_v15 = vld [vmem:[%s3515_s1 + $0x318] sm:$0xff]  }
  0x40   :  { %2467 = vmatpush3.bf16.msra.mxu0 %v2736_v16  ;;  %v2786_v16 = vld [vmem:[%s3515_s1 + $0x360] sm:$0xff]  }
  0x41   :  { %2496 = vmatprep.subr.bf16.mxu0 %v2738_v18  ;;  %2489 = vmatpush3.bf16.msra.mxu1 %v2737_v19  ;;  %v2787_v18 = vld [vmem:[%s3515_s1 + $0x3e0] sm:$0xff]  }
  0x42   :  { %2518 = vmatprep.subr.bf16.mxu1 %v2739_v20  ;;  %v2788_v19 = vld [vmem:[%s3515_s1 + $0x320] sm:$0xff]   ;;  %v2790_v20 = vld [vmem:[%s3515_s1 + $0x368] sm:$0xff]  }
  0x43   :  { %1842 = vmatmul.mubr.bf16.vlgmr.msra.gmra.mrb[4].mxu0 %v436_v17  ;;  %v2785_v17 = vld [vmem:[%s3515_s1 + $0x398] sm:$0xff]  }
  0x44   :  { %2497 = vmatpush3.bf16.msra.mxu0 %v2740_v21  ;;  %1882 = vmatmul.mubr.bf16.vlgmr.msra.gmra.mrb[4].mxu1 %v452_v22  ;;  %v2789_v21 = vld [vmem:[%s3515_s1 + $0x3a0] sm:$0xff]   ;;  %v2791_v22 = vld [vmem:[%s3515_s1 + $0x3e8] sm:$0xff]  }
  0x45   :  { %2498 = vmatprep.subr.bf16.mxu0 %v2742_v23  ;;  %2519 = vmatpush3.bf16.msra.mxu1 %v2741_v24  ;;  %v2792_v23 = vld [vmem:[%s3515_s1 + $0x328] sm:$0xff]   ;;  %v2794_v24 = vld [vmem:[%s3515_s1 + $0x370] sm:$0xff]  }
  0x46   :  { %2520 = vmatprep.subr.bf16.mxu1 %v2743_v25  ;;  %1921 = vmatprep.mubr.bf16.mxu0 %v492_v61  ;;  %v2793_v25 = vld [vmem:[%s3515_s1 + $0x3a8] sm:$0xff]   ;;  %v2828_v61 = vld [vmem:[%s3515_s1 + $0x4f0] sm:$0xff]  }
  0x47   :  { %1961 = vmatprep.mubr.bf16.mxu1 %v502_v2  ;;  %v17_v2 = vld [vmem:[%s3516_s0 + $0x10] sm:$0xff] }
  0x48   :  { %2499 = vmatpush3.bf16.msra.mxu0 %v2744_v26  ;;  %v2795_v26 = vld [vmem:[%s3515_s1 + $0x3f0] sm:$0xff]  }
  0x49   :  { %2500 = vmatprep.subr.bf16.mxu0 %v2746_v27  ;;  %2521 = vmatpush3.bf16.msra.mxu1 %v2745_v28  ;;  %v2796_v27 = vld [vmem:[%s3515_s1 + $0x330] sm:$0xff]   ;;  %v2798_v28 = vld [vmem:[%s3515_s1 + $0x378] sm:$0xff]  }
  0x4a   :  { %2522 = vmatprep.subr.bf16.mxu1 %v2747_v29  ;;  %v2797_v29 = vld [vmem:[%s3515_s1 + $0x3b0] sm:$0xff]  }
  0x4c   :  { %2501 = vmatpush3.bf16.msra.mxu0 %v2748_v30  ;;  %v2799_v30 = vld [vmem:[%s3515_s1 + $0x3f8] sm:$0xff]  }
  0x4d   :  { %2502 = vmatprep.subr.bf16.mxu0 %v2750_v31  ;;  %2523 = vmatpush3.bf16.msra.mxu1 %v2749_v32  ;;  %v2800_v31 = vld [vmem:[%s3515_s1 + $0x338] sm:$0xff]   ;;  %v485_v32 = vrot.slane %v3202_v59, %v2979_v35  ;;  %v2827_v59 = vld [vmem:[%s3515_s1 + $0x470] sm:$0xff]  }
  0x4e   :  { %2524 = vmatprep.subr.bf16.mxu1 %v2751_v33  ;;  %v2803_v33 = vld [vmem:[%s3515_s1 + $0x440] sm:$0xff]  }
  0x50   :  { %2503 = vmatpush3.bf16.msra.mxu0 %v2752_v34  ;;  %v2801_v34 = vld [vmem:[%s3515_s1 + $0x3b8] sm:$0xff]  }
  0x51   :  { %2504 = vmatprep.subr.bf16.mxu0 %v2754_v36  ;;  %2525 = vmatpush3.bf16.msra.mxu1 %v2753_v37  ;;  %v2804_v36 = vld [vmem:[%s3515_s1 + $0x4c0] sm:$0xff]  }
  0x52   :  { %2526 = vmatprep.subr.bf16.mxu1 %v2755_v38  ;;  %v2805_v37 = vld [vmem:[%s3515_s1 + $0x400] sm:$0xff]   ;;  %v501_v38 = vcombine.high %v485_v32, %v485_v32 }
  0x54   :  { %2505 = vmatpush3.bf16.msra.mxu0 %v2756_v39  ;;  %v2807_v39 = vld [vmem:[%s3515_s1 + $0x448] sm:$0xff]  }
  0x55   :  { %2506 = vmatprep.subr.bf16.mxu0 %v2758_v40  ;;  %2527 = vmatpush3.bf16.msra.mxu1 %v2757_v41  ;;  %v2806_v40 = vld [vmem:[%s3515_s1 + $0x480] sm:$0xff]   ;;  %v2808_v41 = vld [vmem:[%s3515_s1 + $0x4c8] sm:$0xff]  }
  0x56   :  { %2528 = vmatprep.subr.bf16.mxu1 %v2759_v42  ;;  %v2809_v42 = vld [vmem:[%s3515_s1 + $0x408] sm:$0xff]  }
  0x58   :  { %2507 = vmatpush3.bf16.msra.mxu0 %v2760_v43  ;;  %v2811_v43 = vld [vmem:[%s3515_s1 + $0x450] sm:$0xff]  }
  0x59   :  { %2508 = vmatprep.subr.bf16.mxu0 %v2762_v44  ;;  %2529 = vmatpush3.bf16.msra.mxu1 %v2761_v45  ;;  %v2810_v44 = vld [vmem:[%s3515_s1 + $0x488] sm:$0xff]   ;;  %v2812_v45 = vld [vmem:[%s3515_s1 + $0x4d0] sm:$0xff]  }
  0x5a   :  { %2530 = vmatprep.subr.bf16.mxu1 %v2763_v46  ;;  %v2813_v46 = vld [vmem:[%s3515_s1 + $0x410] sm:$0xff]  }
  0x5c   :  { %2509 = vmatpush3.bf16.msra.mxu0 %v2764_v47  ;;  %v2815_v47 = vld [vmem:[%s3515_s1 + $0x458] sm:$0xff]  }
  0x5d   :  { %2510 = vmatprep.subr.bf16.mxu0 %v2766_v48  ;;  %2531 = vmatpush3.bf16.msra.mxu1 %v2765_v49  ;;  %v2814_v48 = vld [vmem:[%s3515_s1 + $0x490] sm:$0xff]   ;;  %v2816_v49 = vld [vmem:[%s3515_s1 + $0x4d8] sm:$0xff]  }
  0x5e   :  { %2532 = vmatprep.subr.bf16.mxu1 %v2767_v50  ;;  %v2817_v50 = vld [vmem:[%s3515_s1 + $0x418] sm:$0xff]  }
  0x60   :  { %2511 = vmatpush3.bf16.msra.mxu0 %v2768_v52  ;;  %v2818_v52 = vld [vmem:[%s3515_s1 + $0x498] sm:$0xff]  }
  0x61   :  { %2540 = vmatprep.subr.bf16.mxu0 %v2770_v55  ;;  %2533 = vmatpush3.bf16.msra.mxu1 %v2769_v56  ;;  %v2823_v55 = vld [vmem:[%s3515_s1 + $0x468] sm:$0xff]   ;;  %v2822_v56 = vld [vmem:[%s3515_s1 + $0x4a0] sm:$0xff]  }
  0x62   :  { %2562 = vmatprep.subr.bf16.mxu1 %v2771_v60  ;;  %v2826_v60 = vld [vmem:[%s3515_s1 + $0x4a8] sm:$0xff]  }
  0x63   :  { %1922 = vmatmul.mubr.bf16.vlgmr.msra.gmra.mrb[8].mxu0 %v478_v58  ;;  %v2825_v58 = vld [vmem:[%s3515_s1 + $0x428] sm:$0xff]  }
  0x64   :  { %2541 = vmatpush3.bf16.msra.mxu0 %v2772_v62  ;;  %1962 = vmatmul.mubr.bf16.vlgmr.msra.gmra.mrb[8].mxu1 %v500_v0  ;;  %v2829_v62 = vld [vmem:[%s3515_s1 + $0x430] sm:$0xff]  }
  0x65   :  { %2542 = vmatprep.subr.bf16.mxu0 %v2774_v1  ;;  %2563 = vmatpush3.bf16.msra.mxu1 %v2773_v3  ;;  %v2830_v0 = vld [vmem:[%s3515_s1 + $0x4b0] sm:$0xff]   ;;  %v2832_v1 = vld [vmem:[%s3515_s1 + $0x4f8] sm:$0xff]  }
  0x66   :  { %2001 = vmatprep.mubr.bf16.mxu0 %v499_v4  ;;  %2564 = vmatprep.subr.bf16.mxu1 %v2775_v5  ;;  %v2833_v3 = vld [vmem:[%s3515_s1 + $0x438] sm:$0xff]   ;;  %v511_v4 = vrot.slane %v17_v2, %v2979_v35  ;;  %v504_v5 = vcombine.high %v17_v2, %v17_v2 }
  0x67   :  { %2041 = vmatprep.mubr.bf16.mxu1 %v503_v7  ;;  %v2834_v7 = vld [vmem:[%s3515_s1 + $0x4b8] sm:$0xff]  }
  0x68   :  { %2543 = vmatpush3.bf16.msra.mxu0 %v2776_v6  ;;  %v2835_v6 = vld [vmem:[%s3515_s1 + $0x540] sm:$0xff]  }
  0x69   :  { %2544 = vmatprep.subr.bf16.mxu0 %v2778_v8  ;;  %2565 = vmatpush3.bf16.msra.mxu1 %v2777_v9  ;;  %v519_v8 = vcombine.high %v511_v4, %v511_v4  ;;  %v527_v9 = vrot.slane %v511_v4, %v2979_v35 }
  0x6a   :  { %2566 = vmatprep.subr.bf16.mxu1 %v2779_v10  ;;  %v3408_v10 = vrot.slane %v504_v5, %v2979_v35 }
  0x6c   :  { %2545 = vmatpush3.bf16.msra.mxu0 %v2780_v11  ;;  %v2836_v11 = vld [vmem:[%s3515_s1 + $0x5c0] sm:$0xff]  }
  0x6d   :  { %2546 = vmatprep.subr.bf16.mxu0 %v2782_v12  ;;  %2567 = vmatpush3.bf16.msra.mxu1 %v2781_v13  ;;  %v541_v12 = vrot.slane %v519_v8, %v2979_v35  ;;  %v2837_v13 = vld [vmem:[%s3515_s1 + $0x500] sm:$0xff]  }
  0x6e   :  { %2568 = vmatprep.subr.bf16.mxu1 %v2783_v14  ;;  %v520_v14 = vcombine.high %v3408_v10, %v3408_v10 }
  0x70   :  { %2547 = vmatpush3.bf16.msra.mxu0 %v2784_v15  ;;  %v549_v15 = vcombine.high %v527_v9, %v527_v9 }
  0x71   :  { %2548 = vmatprep.subr.bf16.mxu0 %v2786_v16  ;;  %2569 = vmatpush3.bf16.msra.mxu1 %v2785_v17  ;;  %v2839_v16 = vld [vmem:[%s3515_s1 + $0x548] sm:$0xff]   ;;  %v551_v17 = vcombine.high %v541_v12, %v541_v12 }
  0x72   :  { %2570 = vmatprep.subr.bf16.mxu1 %v2787_v18  ;;  %v2838_v18 = vld [vmem:[%s3515_s1 + $0x580] sm:$0xff]  }
  0x74   :  { %2549 = vmatpush3.bf16.msra.mxu0 %v2788_v19  ;;  %v548_v19 = vrot.slane %v520_v14, %v2979_v35 }
  0x75   :  { %2550 = vmatprep.subr.bf16.mxu0 %v2790_v20  ;;  %2571 = vmatpush3.bf16.msra.mxu1 %v2789_v21  ;;  %v2840_v20 = vld [vmem:[%s3515_s1 + $0x5c8] sm:$0xff]  }
  0x76   :  { %2572 = vmatprep.subr.bf16.mxu1 %v2791_v22  ;;  %v2841_v21 = vld [vmem:[%s3515_s1 + $0x508] sm:$0xff]   ;;  %v552_v22 = vcombine.high %v548_v19, %v548_v19 }
  0x78   :  { %2551 = vmatpush3.bf16.msra.mxu0 %v2792_v23  ;;  %v2843_v23 = vld [vmem:[%s3515_s1 + $0x550] sm:$0xff]  }
  0x79   :  { %2552 = vmatprep.subr.bf16.mxu0 %v2794_v24  ;;  %2573 = vmatpush3.bf16.msra.mxu1 %v2793_v25  ;;  %v2842_v24 = vld [vmem:[%s3515_s1 + $0x588] sm:$0xff]   ;;  %v2844_v25 = vld [vmem:[%s3515_s1 + $0x5d0] sm:$0xff]  }
  0x7a   :  { %2574 = vmatprep.subr.bf16.mxu1 %v2795_v26  ;;  %v2845_v26 = vld [vmem:[%s3515_s1 + $0x510] sm:$0xff]  }
  0x7c   :  { %2553 = vmatpush3.bf16.msra.mxu0 %v2796_v27  ;;  %v2847_v27 = vld [vmem:[%s3515_s1 + $0x558] sm:$0xff]  }
  0x7d   :  { %2554 = vmatprep.subr.bf16.mxu0 %v2798_v28  ;;  %2575 = vmatpush3.bf16.msra.mxu1 %v2797_v29  ;;  %v2846_v28 = vld [vmem:[%s3515_s1 + $0x590] sm:$0xff]   ;;  %v2848_v29 = vld [vmem:[%s3515_s1 + $0x5d8] sm:$0xff]  }
  0x7e   :  { %2576 = vmatprep.subr.bf16.mxu1 %v2799_v30  ;;  %v2849_v30 = vld [vmem:[%s3515_s1 + $0x518] sm:$0xff]  }
  0x80   :  { %2555 = vmatpush3.bf16.msra.mxu0 %v2800_v31  ;;  %v2851_v31 = vld [vmem:[%s3515_s1 + $0x560] sm:$0xff]  }
  0x81   :  { %2584 = vmatprep.subr.bf16.mxu0 %v2803_v33  ;;  %2577 = vmatpush3.bf16.msra.mxu1 %v2801_v34  ;;  %v2852_v33 = vld [vmem:[%s3515_s1 + $0x5e0] sm:$0xff]  }
  0x82   :  { %2606 = vmatprep.subr.bf16.mxu1 %v2804_v36  ;;  %v2853_v34 = vld [vmem:[%s3515_s1 + $0x520] sm:$0xff]   ;;  %v2855_v36 = vld [vmem:[%s3515_s1 + $0x568] sm:$0xff]  }
  0x83   :  { %2002 = vmatmul.mubr.bf16.vlgmr.msra.gmra.mrb[12].mxu0 %v485_v32  ;;  %v2850_v32 = vld [vmem:[%s3515_s1 + $0x598] sm:$0xff]  }
  0x84   :  { %2585 = vmatpush3.bf16.msra.mxu0 %v2805_v37  ;;  %2042 = vmatmul.mubr.bf16.vlgmr.msra.gmra.mrb[12].mxu1 %v501_v38  ;;  %v2854_v37 = vld [vmem:[%s3515_s1 + $0x5a0] sm:$0xff]   ;;  %v2856_v38 = vld [vmem:[%s3515_s1 + $0x5e8] sm:$0xff]  }
  0x85   :  { %2586 = vmatprep.subr.bf16.mxu0 %v2807_v39  ;;  %2607 = vmatpush3.bf16.msra.mxu1 %v2806_v40  ;;  %v2857_v39 = vld [vmem:[%s3515_s1 + $0x528] sm:$0xff]   ;;  %v2859_v40 = vld [vmem:[%s3515_s1 + $0x570] sm:$0xff]  }
  0x86   :  { %2608 = vmatprep.subr.bf16.mxu1 %v2808_v41  ;;  %2081 = vmatprep.mubr.bf16.mxu0 %v541_v12  ;;  %v2858_v41 = vld [vmem:[%s3515_s1 + $0x5a8] sm:$0xff]  }
  0x87   :  { %2121 = vmatprep.mubr.bf16.mxu1 %v551_v17 }
  0x88   :  { %2587 = vmatpush3.bf16.msra.mxu0 %v2809_v42  ;;  %v2860_v42 = vld [vmem:[%s3515_s1 + $0x5f0] sm:$0xff]  }
  0x89   :  { %2588 = vmatprep.subr.bf16.mxu0 %v2811_v43  ;;  %2609 = vmatpush3.bf16.msra.mxu1 %v2810_v44  ;;  %v2861_v43 = vld [vmem:[%s3515_s1 + $0x530] sm:$0xff]   ;;  %v2863_v44 = vld [vmem:[%s3515_s1 + $0x578] sm:$0xff]  }
  0x8a   :  { %2610 = vmatprep.subr.bf16.mxu1 %v2812_v45  ;;  %v2862_v45 = vld [vmem:[%s3515_s1 + $0x5b0] sm:$0xff]  }
  0x8c   :  { %2589 = vmatpush3.bf16.msra.mxu0 %v2813_v46  ;;  %v2864_v46 = vld [vmem:[%s3515_s1 + $0x5f8] sm:$0xff]  }
  0x8d   :  { %2590 = vmatprep.subr.bf16.mxu0 %v2815_v47  ;;  %2611 = vmatpush3.bf16.msra.mxu1 %v2814_v48  ;;  %v2865_v47 = vld [vmem:[%s3515_s1 + $0x538] sm:$0xff]   ;;  %v534_v48 = vrot.slane %v3408_v10, %v2979_v35 }
  0x8e   :  { %2612 = vmatprep.subr.bf16.mxu1 %v2816_v49  ;;  %v2866_v49 = vld [vmem:[%s3515_s1 + $0x5b8] sm:$0xff]  }
  0x90   :  { %2591 = vmatpush3.bf16.msra.mxu0 %v2817_v50  ;;  %v550_v50 = vcombine.high %v534_v48, %v534_v48 }
  0x91   :  { %2592 = vmatprep.subr.bf16.mxu0 %v2819_v51  ;;  %2613 = vmatpush3.bf16.msra.mxu1 %v2818_v52  ;;  %v402_v52 = vld [vmem:[%s3517_s2] sm:$0x1] }
  0x92   :  { %2614 = vmatprep.subr.bf16.mxu1 %v2820_v53 }
  0x94   :  { %2593 = vmatpush3.bf16.msra.mxu0 %v2821_v54 }
  0x95   :  { %2594 = vmatprep.subr.bf16.mxu0 %v2823_v55  ;;  %2615 = vmatpush3.bf16.msra.mxu1 %v2822_v56 }
  0x96   :  { %2616 = vmatprep.subr.bf16.mxu1 %v2824_v57 }
  0x98   :  { %2595 = vmatpush3.bf16.msra.mxu0 %v2825_v58 }
  0x99   :  { %2596 = vmatprep.subr.bf16.mxu0 %v2827_v59  ;;  %2617 = vmatpush3.bf16.msra.mxu1 %v2826_v60 }
  0x9a   :  { %2618 = vmatprep.subr.bf16.mxu1 %v2828_v61 }
  0x9c   :  { %2597 = vmatpush3.bf16.msra.mxu0 %v2829_v62 }
  0x9d   :  { %2598 = vmatprep.subr.bf16.mxu0 %v2831_v63  ;;  %2619 = vmatpush3.bf16.msra.mxu1 %v2830_v0 }
  0x9e   :  { %2620 = vmatprep.subr.bf16.mxu1 %v2832_v1 }
  0xa0   :  { %2599 = vmatpush3.bf16.msra.mxu0 %v2833_v3 }
  0xa1   :  { %2628 = vmatprep.subr.bf16.mxu0 %v2835_v6  ;;  %2621 = vmatpush3.bf16.msra.mxu1 %v2834_v7 }
  0xa2   :  { %2650 = vmatprep.subr.bf16.mxu1 %v2836_v11 }
  0xa3   :  { %2082 = vmatmul.mubr.bf16.vlgmr.msra.gmra.mrb[16].mxu0 %v527_v9 }
  0xa4   :  { %2629 = vmatpush3.bf16.msra.mxu0 %v2837_v13  ;;  %2122 = vmatmul.mubr.bf16.vlgmr.msra.gmra.mrb[16].mxu1 %v549_v15 }
  0xa5   :  { %2630 = vmatprep.subr.bf16.mxu0 %v2839_v16  ;;  %2651 = vmatpush3.bf16.msra.mxu1 %v2838_v18 }
  0xa6   :  { %2161 = vmatprep.mubr.bf16.mxu0 %v548_v19  ;;  %2652 = vmatprep.subr.bf16.mxu1 %v2840_v20 }
  0xa7   :  { %2201 = vmatprep.mubr.bf16.mxu1 %v552_v22 }
  0xa8   :  { %2631 = vmatpush3.bf16.msra.mxu0 %v2841_v21 }
  0xa9   :  { %2632 = vmatprep.subr.bf16.mxu0 %v2843_v23  ;;  %2653 = vmatpush3.bf16.msra.mxu1 %v2842_v24 }
  0xaa   :  { %2654 = vmatprep.subr.bf16.mxu1 %v2844_v25 }
  0xac   :  { %2633 = vmatpush3.bf16.msra.mxu0 %v2845_v26 }
  0xad   :  { %2634 = vmatprep.subr.bf16.mxu0 %v2847_v27  ;;  %2655 = vmatpush3.bf16.msra.mxu1 %v2846_v28 }
  0xae   :  { %2656 = vmatprep.subr.bf16.mxu1 %v2848_v29 }
  0xb0   :  { %2635 = vmatpush3.bf16.msra.mxu0 %v2849_v30 }
  0xb1   :  { %2636 = vmatprep.subr.bf16.mxu0 %v2851_v31  ;;  %2657 = vmatpush3.bf16.msra.mxu1 %v2850_v32 }
  0xb2   :  { %2658 = vmatprep.subr.bf16.mxu1 %v2852_v33 }
  0xb4   :  { %2637 = vmatpush3.bf16.msra.mxu0 %v2853_v34 }
  0xb5   :  { %2638 = vmatprep.subr.bf16.mxu0 %v2855_v36  ;;  %2659 = vmatpush3.bf16.msra.mxu1 %v2854_v37 }
  0xb6   :  { %2660 = vmatprep.subr.bf16.mxu1 %v2856_v38 }
  0xb8   :  { %2639 = vmatpush3.bf16.msra.mxu0 %v2857_v39 }
  0xb9   :  { %2640 = vmatprep.subr.bf16.mxu0 %v2859_v40  ;;  %2661 = vmatpush3.bf16.msra.mxu1 %v2858_v41 }
  0xba   :  { %2662 = vmatprep.subr.bf16.mxu1 %v2860_v42 }
  0xbc   :  { %2641 = vmatpush3.bf16.msra.mxu0 %v2861_v43 }
  0xbd   :  { %2642 = vmatprep.subr.bf16.mxu0 %v2863_v44  ;;  %2663 = vmatpush3.bf16.msra.mxu1 %v2862_v45 }
  0xbe   :  { %2664 = vmatprep.subr.bf16.mxu1 %v2864_v46 }
  0xc0   :  { %2643 = vmatpush3.bf16.msra.mxu0 %v2865_v47 }
  0xc1   :  { %2665 = vmatpush3.bf16.msra.mxu1 %v2866_v49 }
  0xc3   :  { %2162 = vmatmul.mubr.bf16.vlgmr.msra.gmra.mrb[20].mxu0 %v534_v48 }
  0xc4   :  { %2202 = vmatmul.mubr.bf16.vlgmr.msra.gmra.mrb[20].mxu1 %v550_v50 }
  0xf6   :  { %v2424_v51 = vpop.f32.mrb[0].mxu0 }
  0xf7   :  { %v2425_v53 = vpop.f32.mrb[1].mxu0  ;;  %v2446_v54 = vpop.f32.mrb[0].mxu1 }
  0xf8   :  { %v2426_v55 = vadd.f32 %v2425_v53, %v2424_v51  ;;  %v2427_v35 = vpop.f32.mrb[2].mxu0  ;;  %v2447_v56 = vpop.f32.mrb[1].mxu1 }
  0xf9   :  { %v2428_v57 = vpop.f32.mrb[3].mxu0  ;;  %v2448_v59 = vadd.f32 %v2447_v56, %v2446_v54  ;;  %v2449_v60 = vpop.f32.mrb[2].mxu1 }
  0xfa   :  { %v1764_v58 = vadd.f32 %v2426_v55, %v402_v52  ;;  %v2450_v61 = vpop.f32.mrb[3].mxu1 }
  0xfc   :  { %v1804_v62 = vadd.f32 %v2448_v59, %v1764_v58 }
 0x116   :  { %v2468_v63 = vpop.f32.mrb[4].mxu0 }
 0x117   :  { %v2469_v0 = vpop.f32.mrb[5].mxu0  ;;  %v2490_v1 = vpop.f32.mrb[4].mxu1 }
 0x118   :  { %v2470_v2 = vadd.f32 %v2469_v0, %v2468_v63  ;;  %v2471_v3 = vpop.f32.mrb[6].mxu0  ;;  %v2491_v4 = vpop.f32.mrb[5].mxu1 }
 0x119   :  { %v2472_v5 = vpop.f32.mrb[7].mxu0  ;;  %v2492_v7 = vadd.f32 %v2491_v4, %v2490_v1  ;;  %v2493_v8 = vpop.f32.mrb[6].mxu1 }
 0x11a   :  { %v1844_v6 = vadd.f32 %v2470_v2, %v1804_v62  ;;  %v2494_v9 = vpop.f32.mrb[7].mxu1 }
 0x11c   :  { %v1884_v10 = vadd.f32 %v2492_v7, %v1844_v6 }
 0x136   :  { %v2512_v11 = vpop.f32.mrb[8].mxu0 }
 0x137   :  { %v2513_v12 = vpop.f32.mrb[9].mxu0  ;;  %v2534_v13 = vpop.f32.mrb[8].mxu1 }
 0x138   :  { %v2514_v14 = vadd.f32 %v2513_v12, %v2512_v11  ;;  %v2515_v15 = vpop.f32.mrb[10].mxu0  ;;  %v2535_v16 = vpop.f32.mrb[9].mxu1 }
 0x139   :  { %v2516_v17 = vpop.f32.mrb[11].mxu0  ;;  %v2536_v19 = vadd.f32 %v2535_v16, %v2534_v13  ;;  %v2537_v20 = vpop.f32.mrb[10].mxu1 }
 0x13a   :  { %v1924_v18 = vadd.f32 %v2514_v14, %v1884_v10  ;;  %v2538_v21 = vpop.f32.mrb[11].mxu1 }
 0x13c   :  { %v1964_v22 = vadd.f32 %v2536_v19, %v1924_v18 }
 0x156   :  { %v2556_v23 = vpop.f32.mrb[12].mxu0 }
 0x157   :  { %v2557_v24 = vpop.f32.mrb[13].mxu0  ;;  %v2578_v25 = vpop.f32.mrb[12].mxu1 }
 0x158   :  { %v2558_v26 = vadd.f32 %v2557_v24, %v2556_v23  ;;  %v2559_v27 = vpop.f32.mrb[14].mxu0  ;;  %v2579_v28 = vpop.f32.mrb[13].mxu1 }
 0x159   :  { %v2560_v29 = vpop.f32.mrb[15].mxu0  ;;  %v2580_v31 = vadd.f32 %v2579_v28, %v2578_v25  ;;  %v2581_v32 = vpop.f32.mrb[14].mxu1 }
 0x15a   :  { %v2004_v30 = vadd.f32 %v2558_v26, %v1964_v22  ;;  %v2582_v33 = vpop.f32.mrb[15].mxu1 }
 0x15c   :  { %v2044_v34 = vadd.f32 %v2580_v31, %v2004_v30 }
 0x176   :  { %v2600_v36 = vpop.f32.mrb[16].mxu0 }
 0x177   :  { %v2601_v37 = vpop.f32.mrb[17].mxu0  ;;  %v2622_v38 = vpop.f32.mrb[16].mxu1 }
 0x178   :  { %v2602_v39 = vadd.f32 %v2601_v37, %v2600_v36  ;;  %v2603_v40 = vpop.f32.mrb[18].mxu0  ;;  %v2623_v41 = vpop.f32.mrb[17].mxu1 }
 0x179   :  { %v2604_v42 = vpop.f32.mrb[19].mxu0  ;;  %v2624_v44 = vadd.f32 %v2623_v41, %v2622_v38  ;;  %v2625_v45 = vpop.f32.mrb[18].mxu1 }
 0x17a   :  { %v2084_v43 = vadd.f32 %v2602_v39, %v2044_v34  ;;  %v2626_v46 = vpop.f32.mrb[19].mxu1 }
 0x17c   :  { %v2124_v47 = vadd.f32 %v2624_v44, %v2084_v43 }
 0x196   :  { %v2644_v48 = vpop.f32.mrb[20].mxu0 }
 0x197   :  { %v2645_v49 = vpop.f32.mrb[21].mxu0  ;;  %v2666_v50 = vpop.f32.mrb[20].mxu1 }
 0x198   :  { %v2646_v51 = vadd.f32 %v2645_v49, %v2644_v48  ;;  %v2647_v52 = vpop.f32.mrb[22].mxu0  ;;  %v2667_v53 = vpop.f32.mrb[21].mxu1 }
 0x199   :  { %v2648_v54 = vpop.f32.mrb[23].mxu0  ;;  %v2668_v35 = vadd.f32 %v2667_v53, %v2666_v50  ;;  %v2669_v56 = vpop.f32.mrb[22].mxu1 }
 0x19a   :  { %v2164_v55 = vadd.f32 %v2646_v51, %v2124_v47  ;;  %v2670_v57 = vpop.f32.mrb[23].mxu1 }
 0x19c   :  { %v2204_v58 = vadd.f32 %v2668_v35, %v2164_v55 }
 0x19e   :  { %v2209_v59 = vmax.f32 %v2204_v58, 0.0 }
 0x1a0   :  { %2211 = vst.msk [vmem:[%s3518_s3] sm:$0x1] %vm2210_vm0, %v2209_v59 }

</bundles_post_ra>
